<compile_context>
chip_gen: v5e
topology: v5e:2x2
jax: 0.10.0
libtpu: 0.0.40
codegen_flags: <defaults>
</compile_context>

<pallas_src>
import functools
import numpy as np
import jax
import jax.numpy as jnp
from jax.experimental import pallas as pl
from jax.experimental.pallas import tpu as pltpu

# ----------------------------- config -----------------------------------
HIDDEN = 32
CHAR_EMBED = 16
WORD_FROM_CHAR = 16
WORD_DIM = 32
VOCAB_W = 50
VOCAB_C = 30
MAX_WORD_LEN = 8
CHAR_KERNEL = 3

EMB_ENC_NUM_CONVS = 2
EMB_ENC_KERNEL = 5
EMB_ENC_HEADS = 4
EMB_ENC_BLOCKS = 1
MOD_ENC_NUM_CONVS = 2
MOD_ENC_KERNEL = 5
MOD_ENC_HEADS = 4
MOD_ENC_BLOCKS = 1

B = 2
LC = 16   # context length
LQ = 8    # question length

_PAR = pltpu.CompilerParams(dimension_semantics=("parallel",))
_ARB = pltpu.CompilerParams(dimension_semantics=("arbitrary",))


def _full_spec(a):
    nd = a.ndim
    return pl.BlockSpec(a.shape, lambda *_: (0,) * nd)


# ----------------------------- kernels -----------------------------------
def _embedding_kernel(ccol_ref, cw_ref, cb_ref, wv_ref, proj_w_ref, proj_b_ref,
                      hw_w_ref, hw_b_ref, out_ref, *, n_words, wpos, n_highway):
    # char conv as one tall matmul over the im2col'd chars (pos-major rows)
    conv = (jnp.dot(ccol_ref[...], cw_ref[...],
                    preferred_element_type=jnp.float32) + cb_ref[...])
    conv = jnp.maximum(conv, 0.0)                       # (wpos*n_words, Cout)
    # max-pool over char positions (rows are grouped pos-major, word-minor)
    feat = conv[0:n_words, :]
    for p_ in range(1, wpos):
        feat = jnp.maximum(feat, conv[p_ * n_words:(p_ + 1) * n_words, :])
    emb = jnp.concatenate([wv_ref[...], feat], axis=-1)  # (n_words, Dw+Cout)
    emb = (jnp.dot(emb, proj_w_ref[...],
                   preferred_element_type=jnp.float32) + proj_b_ref[...])
    H = proj_w_ref.shape[1]
    for i in range(n_highway):
        w = hw_w_ref[i * H:(i + 1) * H, :]               # (H, 2H) gate|transform
        b = hw_b_ref[i:i + 1, :]
        gt = jnp.dot(emb, w, preferred_element_type=jnp.float32) + b
        g = 1.0 / (1.0 + jnp.exp(-gt[:, :H]))
        t = jnp.maximum(gt[:, H:], 0.0)
        emb = g * t + (1.0 - g) * emb
    out_ref[...] = emb


def _encoder_block_kernel(x_ref, pe_ref, amask_ref, lmask_ref,
                          ln_g_ref, ln_b_ref, dw_w_ref, dw_b_ref,
                          pw_w_ref, pw_b_ref, qkv_w_ref, qkv_b_ref,
                          o_w_ref, o_b_ref, f1_w_ref, f1_b_ref,
                          f2_w_ref, f2_b_ref, out_ref,
                          *, num_blocks, num_convs, ksize, num_heads):
    L = x_ref.shape[1]
    H = x_ref.shape[2]
    dh = H // num_heads
    scale = 1.0 / float(np.sqrt(dh))
    pad = (ksize - 1) // 2

    x = x_ref[0]                              # (L, H)
    pe = pe_ref[...]                          # (L, H)
    amask = amask_ref[0]                      # (1, L) attention keep mask
    lmask = lmask_ref[0]                      # (L, 1) true-length mask
    neg_inf = (amask - 1.0) * 1e30            # (1, L)

    # shift matrices for the depthwise-conv taps (MXU, no slice copies)
    rows = jax.lax.broadcasted_iota(jnp.int32, (L, L), 0)
    cols = jax.lax.broadcasted_iota(jnp.int32, (L, L), 1)
    shift_mats = [(cols == rows + (k - pad)).astype(jnp.float32)
                  for k in range(ksize)]

    def layer_norm(v, idx):
        g = ln_g_ref[idx:idx + 1, :]
        b = ln_b_ref[idx:idx + 1, :]
        mu = jnp.mean(v, axis=-1, keepdims=True)
        var = jnp.mean(jnp.square(v - mu), axis=-1, keepdims=True)
        return (v - mu) * jax.lax.rsqrt(var + 1e-5) * g + b

    for blk in range(num_blocks):
        x = x + pe
        # --- depthwise-separable conv sublayers -------------------------
        for ci in range(num_convs):
            li = blk * num_convs + ci
            ln_i = blk * (num_convs + 2) + ci
            # lmask zeroes positions past the true sequence length so the
            # stacked (question padded to LC) run sees exactly the same
            # zero-padding as the separate-length run would.
            y = layer_norm(x, ln_i) * lmask
            w = dw_w_ref[li]                             # (K, H)
            acc = jnp.zeros((L, H), jnp.float32)
            for k in range(ksize):
                tap = jnp.dot(shift_mats[k], y,
                              preferred_element_type=jnp.float32)
                acc = acc + tap * w[k:k + 1, :]
            y = acc + dw_b_ref[li:li + 1, :]
            y = (jnp.dot(y, pw_w_ref[li], preferred_element_type=jnp.float32)
                 + pw_b_ref[li:li + 1, :])
            y = jnp.maximum(y, 0.0)
            x = x + y
        # --- multi-head self attention (fused QKV, all heads in-kernel) -
        y = layer_norm(x, blk * (num_convs + 2) + num_convs)
        qkv = (jnp.dot(y, qkv_w_ref[blk], preferred_element_type=jnp.float32)
               + qkv_b_ref[blk:blk + 1, :])              # (L, 3H)
        o_w = o_w_ref[blk]                               # (H, H)
        att = jnp.zeros((L, H), jnp.float32)
        for h in range(num_heads):
            q = qkv[:, h * dh:(h + 1) * dh]
            k = qkv[:, H + h * dh:H + (h + 1) * dh]
            v = qkv[:, 2 * H + h * dh:2 * H + (h + 1) * dh]
            s = jax.lax.dot_general(q, k, (((1,), (1,)), ((), ())),
                                    preferred_element_type=jnp.float32) * scale
            s = s + neg_inf
            s = s - jnp.max(s, axis=-1, keepdims=True)
            p = jnp.exp(s)
            p = p * pl.reciprocal(jnp.sum(p, axis=-1, keepdims=True),
                                  approx=True)
            head = jnp.dot(p, v, preferred_element_type=jnp.float32)
            # concat(heads) @ o_w  ==  sum_h head_h @ o_w[h*dh:(h+1)*dh]
            att = att + jnp.dot(head, o_w[h * dh:(h + 1) * dh, :],
                                preferred_element_type=jnp.float32)
        x = x + att + o_b_ref[blk:blk + 1, :]
        # --- feed forward ------------------------------------------------
        y = layer_norm(x, blk * (num_convs + 2) + num_convs + 1)
        y = (jnp.dot(y, f1_w_ref[blk], preferred_element_type=jnp.float32)
             + f1_b_ref[blk:blk + 1, :])
        y = jnp.maximum(y, 0.0)
        y = (jnp.dot(y, f2_w_ref[blk], preferred_element_type=jnp.float32)
             + f2_b_ref[blk:blk + 1, :])
        x = x + y

    out_ref[0] = x


def _bidaf_kernel(c_ref, q_ref, cmask_ref, qmask_ref,
                  wc_ref, wq_ref, wcq_ref, bias_ref,
                  pre_w_ref, pre_b_ref, out_ref):
    c = c_ref[0]                 # (Lc, H)
    q = q_ref[0]                 # (Lq, H)
    cmask = cmask_ref[0]         # (Lc, 1) keep
    qmask = qmask_ref[0]         # (1, Lq) keep
    s0 = jnp.dot(c, wc_ref[...], preferred_element_type=jnp.float32)   # (Lc,1)
    s1t = jax.lax.dot_general(wq_ref[...], q, (((0,), (1,)), ((), ())),
                              preferred_element_type=jnp.float32)      # (1,Lq)
    s2 = jax.lax.dot_general(c * wcq_ref[...], q, (((1,), (1,)), ((), ())),
                             preferred_element_type=jnp.float32)       # (Lc,Lq)
    s = s0 + s1t + s2 + bias_ref[...]
    # softmax over question dim (keys), masked by q mask
    sa = s + (qmask - 1.0) * 1e30
    sa = sa - jnp.max(sa, axis=-1, keepdims=True)
    ea = jnp.exp(sa)
    s1_soft = ea * pl.reciprocal(jnp.sum(ea, axis=-1, keepdims=True),
                                 approx=True)
    # softmax over context dim, masked by c mask
    sb = s + (cmask - 1.0) * 1e30
    sb = sb - jnp.max(sb, axis=0, keepdims=True)
    eb = jnp.exp(sb)
    s2_soft = eb * pl.reciprocal(jnp.sum(eb, axis=0, keepdims=True),
                                 approx=True)
    a = jnp.dot(s1_soft, q, preferred_element_type=jnp.float32)        # (Lc,H)
    ss = jax.lax.dot_general(s1_soft, s2_soft, (((1,), (1,)), ((), ())),
                             preferred_element_type=jnp.float32)       # (Lc,Lc)
    b = jnp.dot(ss, c, preferred_element_type=jnp.float32)             # (Lc,H)
    g = jnp.concatenate([c, a, c * a, c * b], axis=-1)                 # (Lc,4H)
    out_ref[0] = (jnp.dot(g, pre_w_ref[...],
                          preferred_element_type=jnp.float32) + pre_b_ref[...])


def _output_kernel(m0_ref, m1_ref, m2_ref, mask_ref, w1_ref, w2_ref, b_ref,
                   p1_ref, p2_ref):
    m0 = m0_ref[...]
    m1 = m1_ref[...]
    m2 = m2_ref[...]
    keep = mask_ref[...]                       # (B, Lc)
    w1 = w1_ref[...]                           # (2, H)
    w2 = w2_ref[...]
    # Linear(cat[m0,m1]) with N=1 done as a weighted-sum reduce (no 1-lane store)
    l1 = jnp.sum(m0 * w1[0:1, :][None] + m1 * w1[1:2, :][None],
                 axis=-1) + b_ref[0:1, 0:1]
    l2 = jnp.sum(m0 * w2[0:1, :][None] + m2 * w2[1:2, :][None],
                 axis=-1) + b_ref[0:1, 1:2]

    def log_softmax(l):
        z = l + (keep - 1.0) * 1e30
        z = z - jnp.max(z, axis=-1, keepdims=True)
        return z - jnp.log(jnp.sum(jnp.exp(z), axis=-1, keepdims=True))

    p1_ref[...] = log_softmax(l1)
    p2_ref[...] = log_softmax(l2)


# ----------------------------- wrappers -----------------------------------
def embedding_forward(p, w_idx, c_idx):
    NB, L = w_idx.shape
    Wc = c_idx.shape[-1]
    Dw = p["word_vectors"].shape[-1]
    Dc = p["char_vectors"].shape[-1]
    K = CHAR_KERNEL
    H = p["proj_w"].shape[1]
    n_words = NB * L
    n_highway = p["hw_b"].shape[0]

    # embedding gathers + im2col stay in XLA (data-dependent gather)
    wv = p["word_vectors"][w_idx].reshape(n_words, Dw)
    cv = p["char_vectors"][c_idx]                               # (NB, L, Wc, Dc)
    pad_l = (K - 1) // 2
    cvp = jnp.pad(cv, ((0, 0), (0, 0), (pad_l, K - 1 - pad_l), (0, 0)))
    cols = jnp.stack(
        [cvp[:, :, pos:pos + K, :].reshape(n_words, K * Dc) for pos in range(Wc)],
        axis=0).reshape(Wc * n_words, K * Dc)

    kernel = functools.partial(_embedding_kernel, n_words=n_words, wpos=Wc,
                               n_highway=n_highway)
    args = (cols, p["char_w"], p["char_b"], wv,
            p["proj_w"], p["proj_b"], p["hw_w"], p["hw_b"])
    out = pl.pallas_call(
        kernel,
        out_shape=jax.ShapeDtypeStruct((n_words, H), jnp.float32),
        grid=(1,),
        in_specs=[_full_spec(a) for a in args],
        out_specs=pl.BlockSpec((n_words, H), lambda i: (0, 0)),
        compiler_params=_ARB,
    )(*args)
    return out.reshape(NB, L, H)


def encoder_forward(p, x, pe, attn_keep, len_keep, *, num_blocks, num_convs,
                    ksize, num_heads):
    Bn, L, H = x.shape
    amask = attn_keep.astype(jnp.float32).reshape(Bn, 1, L)
    lmask = len_keep.astype(jnp.float32).reshape(Bn, L, 1)
    weights = (p["ln_g"], p["ln_b"], p["dw_w"], p["dw_b"], p["pw_w"], p["pw_b"],
               p["qkv_w"], p["qkv_b"], p["o_w"], p["o_b"],
               p["f1_w"], p["f1_b"], p["f2_w"], p["f2_b"])
    kernel = functools.partial(_encoder_block_kernel, num_blocks=num_blocks,
                               num_convs=num_convs, ksize=ksize,
                               num_heads=num_heads)
    return pl.pallas_call(
        kernel,
        out_shape=jax.ShapeDtypeStruct((Bn, L, H), jnp.float32),
        grid=(Bn,),
        in_specs=[pl.BlockSpec((1, L, H), lambda i: (i, 0, 0)),
                  pl.BlockSpec((L, H), lambda i: (0, 0)),
                  pl.BlockSpec((1, 1, L), lambda i: (i, 0, 0)),
                  pl.BlockSpec((1, L, 1), lambda i: (i, 0, 0))]
                 + [_full_spec(w) for w in weights],
        out_specs=pl.BlockSpec((1, L, H), lambda i: (i, 0, 0)),
        compiler_params=_PAR,
    )(x, pe, amask, lmask, *weights)


def bidaf_forward(p, pre_w, pre_b, c, q, c_keep, q_keep):
    Bn, Lc, H = c.shape
    Lq = q.shape[1]
    cmask = c_keep.astype(jnp.float32).reshape(Bn, Lc, 1)
    qmask = q_keep.astype(jnp.float32).reshape(Bn, 1, Lq)
    return pl.pallas_call(
        _bidaf_kernel,
        out_shape=jax.ShapeDtypeStruct((Bn, Lc, H), jnp.float32),
        grid=(Bn,),
        in_specs=[pl.BlockSpec((1, Lc, H), lambda i: (i, 0, 0)),
                  pl.BlockSpec((1, Lq, H), lambda i: (i, 0, 0)),
                  pl.BlockSpec((1, Lc, 1), lambda i: (i, 0, 0)),
                  pl.BlockSpec((1, 1, Lq), lambda i: (i, 0, 0)),
                  _full_spec(p["w_c"]), _full_spec(p["w_q"]),
                  _full_spec(p["w_cq"]), _full_spec(p["bias"]),
                  _full_spec(pre_w), _full_spec(pre_b)],
        out_specs=pl.BlockSpec((1, Lc, H), lambda i: (i, 0, 0)),
        compiler_params=_PAR,
    )(c, q, cmask, qmask, p["w_c"], p["w_q"], p["w_cq"], p["bias"],
      pre_w, pre_b)


def output_forward(p, m0, m1, m2, c_keep):
    Bn, Lc, _ = m0.shape
    mask = c_keep.astype(jnp.float32)
    return pl.pallas_call(
        _output_kernel,
        out_shape=(jax.ShapeDtypeStruct((Bn, Lc), jnp.float32),
                   jax.ShapeDtypeStruct((Bn, Lc), jnp.float32)),
        grid=(1,),
        in_specs=[_full_spec(m0), _full_spec(m1), _full_spec(m2),
                  _full_spec(mask), _full_spec(p["w1"]), _full_spec(p["w2"]),
                  _full_spec(p["b"])],
        out_specs=(pl.BlockSpec((Bn, Lc), lambda i: (0, 0)),
                   pl.BlockSpec((Bn, Lc), lambda i: (0, 0))),
        compiler_params=_ARB,
    )(m0, m1, m2, mask, p["w1"], p["w2"], p["b"])


# ----------------------------- model pieces -------------------------------
def position_encoder(L, H):
    pos = np.arange(L)[:, None].astype(np.float32)
    i = np.arange(H)[None, :]
    angle = pos / np.power(10000.0, (2 * (i // 2)) / float(H))
    pe = np.where(i % 2 == 0, np.sin(angle), np.cos(angle)).astype(np.float32)
    return jnp.asarray(pe)


def qanet_forward(params, cw_idxs, cc_idxs, qw_idxs, qc_idxs):
    Bn, Lc = cw_idxs.shape
    Lq = qw_idxs.shape[1]
    assert Lq <= Lc
    c_is_pad = (cw_idxs == 0)
    q_is_pad = (qw_idxs == 0)
    c_keep = 1.0 - c_is_pad.astype(jnp.float32)
    q_keep = 1.0 - q_is_pad.astype(jnp.float32)

    # --- stack context + question along batch (question padded to Lc) ----
    qw_pad = jnp.pad(qw_idxs, ((0, 0), (0, Lc - Lq)))
    qc_pad = jnp.pad(qc_idxs, ((0, 0), (0, Lc - Lq), (0, 0)))
    w_idx = jnp.concatenate([cw_idxs, qw_pad], axis=0)          # (2B, Lc)
    c_idx = jnp.concatenate([cc_idxs, qc_pad], axis=0)

    emb = embedding_forward(params["emb"], w_idx, c_idx)        # (2B, Lc, H)
    pe = position_encoder(Lc, HIDDEN)

    attn_keep = (w_idx != 0).astype(jnp.float32)                # (2B, Lc)
    pos = jnp.arange(Lc)
    q_len_keep = jnp.broadcast_to((pos[None, :] < Lq).astype(jnp.float32),
                                  (Bn, Lc))
    len_keep = jnp.concatenate([jnp.ones((Bn, Lc), jnp.float32), q_len_keep],
                               axis=0)                          # (2B, Lc)

    enc = encoder_forward(params["embed_encoder"], emb, pe, attn_keep, len_keep,
                          num_blocks=EMB_ENC_BLOCKS,
                          num_convs=EMB_ENC_NUM_CONVS,
                          ksize=EMB_ENC_KERNEL, num_heads=EMB_ENC_HEADS)
    x = enc[:Bn]                     # context  (B, Lc, H)
    y = enc[Bn:, :Lq]                # question (B, Lq, H)

    m_in = bidaf_forward(params["cq_att"], params["pre_w"], params["pre_b"],
                         x, y, c_keep, q_keep)                  # (B, Lc, H)

    ones_mask = jnp.ones((Bn, Lc), jnp.float32)
    menc = params["model_encoder"]
    m0 = encoder_forward(menc, m_in, pe, c_keep, ones_mask,
                         num_blocks=MOD_ENC_BLOCKS, num_convs=MOD_ENC_NUM_CONVS,
                         ksize=MOD_ENC_KERNEL, num_heads=MOD_ENC_HEADS)
    m1 = encoder_forward(menc, m0, pe, c_keep, ones_mask,
                         num_blocks=MOD_ENC_BLOCKS, num_convs=MOD_ENC_NUM_CONVS,
                         ksize=MOD_ENC_KERNEL, num_heads=MOD_ENC_HEADS)
    m2 = encoder_forward(menc, m1, pe, c_keep, ones_mask,
                         num_blocks=MOD_ENC_BLOCKS, num_convs=MOD_ENC_NUM_CONVS,
                         ksize=MOD_ENC_KERNEL, num_heads=MOD_ENC_HEADS)
    return output_forward(params["output"], m0, m1, m2, c_keep)


# ----------------------------- params -------------------------------------
def init_params(key):
    keys = iter(jax.random.split(key, 256))

    def nk():
        return next(keys)

    def w_init(shape, fan_in):
        return jax.random.normal(nk(), shape, jnp.float32) * (1.0 / np.sqrt(fan_in))

    H = HIDDEN
    word_vectors = jax.random.normal(nk(), (VOCAB_W, WORD_DIM), jnp.float32) * 0.1
    word_vectors = word_vectors.at[0].set(0.0)
    char_vectors = jax.random.normal(nk(), (VOCAB_C, CHAR_EMBED), jnp.float32) * 0.1
    char_vectors = char_vectors.at[0].set(0.0)

    emb = {
        "word_vectors": word_vectors,
        "char_vectors": char_vectors,
        "char_w": w_init((CHAR_KERNEL * CHAR_EMBED, WORD_FROM_CHAR),
                         CHAR_KERNEL * CHAR_EMBED),
        "char_b": jnp.zeros((1, WORD_FROM_CHAR), jnp.float32),
        "proj_w": w_init((WORD_DIM + WORD_FROM_CHAR, H), WORD_DIM + WORD_FROM_CHAR),
        "proj_b": jnp.zeros((1, H), jnp.float32),
        # two highway layers, each (H, 2H) = [gate | transform], stacked on rows
        "hw_w": w_init((2 * H, 2 * H), H),
        "hw_b": jnp.zeros((2, 2 * H), jnp.float32),
    }

    def init_encoder(nb, nc, ksize):
        return {
            "ln_g": jnp.ones((nb * (nc + 2), H), jnp.float32),
            "ln_b": jnp.zeros((nb * (nc + 2), H), jnp.float32),
            "dw_w": w_init((nb * nc, ksize, H), ksize),
            "dw_b": jnp.zeros((nb * nc, H), jnp.float32),
            "pw_w": w_init((nb * nc, H, H), H),
            "pw_b": jnp.zeros((nb * nc, H), jnp.float32),
            "qkv_w": w_init((nb, H, 3 * H), H),          # fused Q|K|V
            "qkv_b": jnp.zeros((nb, 3 * H), jnp.float32),
            "o_w": w_init((nb, H, H), H),
            "o_b": jnp.zeros((nb, H), jnp.float32),
            "f1_w": w_init((nb, H, H), H),
            "f1_b": jnp.zeros((nb, H), jnp.float32),
            "f2_w": w_init((nb, H, H), H),
            "f2_b": jnp.zeros((nb, H), jnp.float32),
        }

    params = {
        "emb": emb,
        "embed_encoder": init_encoder(EMB_ENC_BLOCKS, EMB_ENC_NUM_CONVS,
                                      EMB_ENC_KERNEL),
        "cq_att": {"w_c": w_init((H, 1), H), "w_q": w_init((H, 1), H),
                   "w_cq": w_init((1, H), H),
                   "bias": jnp.zeros((1, 1), jnp.float32)},
        "pre_w": w_init((4 * H, H), 4 * H),
        "pre_b": jnp.zeros((1, H), jnp.float32),
        "model_encoder": init_encoder(MOD_ENC_BLOCKS, MOD_ENC_NUM_CONVS,
                                      MOD_ENC_KERNEL),
        "output": {"w1": w_init((2, H), 2 * H), "w2": w_init((2, H), 2 * H),
                   "b": jnp.zeros((1, 2), jnp.float32)},
    }
    return params


# ----------------------------- main ----------------------------------------
if __name__ == "__main__":
    key = jax.random.PRNGKey(0)
    pkey, dkey = jax.random.split(key)
    params = init_params(pkey)

    k1, k2, k3, k4 = jax.random.split(dkey, 4)
    cw_idxs = jax.random.randint(k1, (B, LC), 1, VOCAB_W, dtype=jnp.int32)
    qw_idxs = jax.random.randint(k2, (B, LQ), 1, VOCAB_W, dtype=jnp.int32)
    cw_idxs = cw_idxs.at[:, -3:].set(0)   # padding tokens (idx 0)
    qw_idxs = qw_idxs.at[:, -2:].set(0)
    cc_idxs = jax.random.randint(k3, (B, LC, MAX_WORD_LEN), 1, VOCAB_C,
                                 dtype=jnp.int32)
    qc_idxs = jax.random.randint(k4, (B, LQ, MAX_WORD_LEN), 1, VOCAB_C,
                                 dtype=jnp.int32)

    fwd = jax.jit(qanet_forward)
    log_p1, log_p2 = fwd(params, cw_idxs, cc_idxs, qw_idxs, qc_idxs)
    jax.block_until_ready((log_p1, log_p2))
    assert log_p1.shape == (B, LC) and log_p2.shape == (B, LC)
    assert bool(jnp.all(jnp.isfinite(log_p1))) and bool(jnp.all(jnp.isfinite(log_p2)))
    print("KERNEL_OK")
</pallas_src>

<mosaic_0001>
module attributes {stable_mosaic.version = 11 : i64} {
  func.func @_embedding_kernel(%arg0: i32, %arg1: memref<512x48xf32, #tpu.memory_space<vmem>>, %arg2: memref<48x16xf32, #tpu.memory_space<vmem>>, %arg3: memref<1x16xf32, #tpu.memory_space<vmem>>, %arg4: memref<64x32xf32, #tpu.memory_space<vmem>>, %arg5: memref<48x32xf32, #tpu.memory_space<vmem>>, %arg6: memref<1x32xf32, #tpu.memory_space<vmem>>, %arg7: memref<64x64xf32, #tpu.memory_space<vmem>>, %arg8: memref<2x64xf32, #tpu.memory_space<vmem>>, %arg9: memref<64x32xf32, #tpu.memory_space<vmem>>) attributes {dimension_semantics = [#tpu.dimension_semantics<arbitrary>], iteration_bounds = array<i64: 1>, scalar_prefetch = 0 : i64, scratch_operands = 0 : i64, tpu.core_type = #tpu.core_type<tc>, window_params = [{pipeline_mode = #tpu.pipeline_mode<synchronous>, transform_indices = @transform_0, window_bounds = array<i64: 512, 48>}, {pipeline_mode = #tpu.pipeline_mode<synchronous>, transform_indices = @transform_1, window_bounds = array<i64: 48, 16>}, {pipeline_mode = #tpu.pipeline_mode<synchronous>, transform_indices = @transform_2, window_bounds = array<i64: 1, 16>}, {pipeline_mode = #tpu.pipeline_mode<synchronous>, transform_indices = @transform_3, window_bounds = array<i64: 64, 32>}, {pipeline_mode = #tpu.pipeline_mode<synchronous>, transform_indices = @transform_4, window_bounds = array<i64: 48, 32>}, {pipeline_mode = #tpu.pipeline_mode<synchronous>, transform_indices = @transform_5, window_bounds = array<i64: 1, 32>}, {pipeline_mode = #tpu.pipeline_mode<synchronous>, transform_indices = @transform_6, window_bounds = array<i64: 64, 64>}, {pipeline_mode = #tpu.pipeline_mode<synchronous>, transform_indices = @transform_7, window_bounds = array<i64: 2, 64>}, {pipeline_mode = #tpu.pipeline_mode<synchronous>, transform_indices = @transform_8, window_bounds = array<i64: 64, 32>}]} {
    %c0 = arith.constant 0 : index
    %c0_0 = arith.constant 0 : index
    %0 = vector.load %arg1[%c0, %c0_0] : memref<512x48xf32, #tpu.memory_space<vmem>>, vector<512x48xf32>
    %c0_1 = arith.constant 0 : index
    %c0_2 = arith.constant 0 : index
    %1 = vector.load %arg2[%c0_1, %c0_2] : memref<48x16xf32, #tpu.memory_space<vmem>>, vector<48x16xf32>
    %cst = arith.constant dense<0.000000e+00> : vector<512x16xf32>
    %2 = tpu.matmul %0, %1, %cst {dimension_numbers = #tpu.dot_dimension_numbers<[1], [0], [0], [1], [0, 0, 1, 1], [], []>} : vector<512x48xf32>, vector<48x16xf32>, vector<512x16xf32> -> vector<512x16xf32>
    %c0_3 = arith.constant 0 : index
    %c0_4 = arith.constant 0 : index
    %3 = vector.load %arg3[%c0_3, %c0_4] : memref<1x16xf32, #tpu.memory_space<vmem>>, vector<1x16xf32>
    %4 = vector.broadcast %3 : vector<1x16xf32> to vector<512x16xf32>
    %5 = arith.addf %2, %4 : vector<512x16xf32>
    %cst_5 = arith.constant 0.000000e+00 : f32
    %6 = vector.broadcast %cst_5 : f32 to vector<512x16xf32>
    %7 = arith.maximumf %5, %6 : vector<512x16xf32>
    %8 = vector.extract_strided_slice %7 {offsets = [0, 0], sizes = [64, 16], strides = [1, 1]} : vector<512x16xf32> to vector<64x16xf32>
    %9 = vector.extract_strided_slice %7 {offsets = [64, 0], sizes = [64, 16], strides = [1, 1]} : vector<512x16xf32> to vector<64x16xf32>
    %10 = arith.maximumf %8, %9 : vector<64x16xf32>
    %11 = vector.extract_strided_slice %7 {offsets = [128, 0], sizes = [64, 16], strides = [1, 1]} : vector<512x16xf32> to vector<64x16xf32>
    %12 = arith.maximumf %10, %11 : vector<64x16xf32>
    %13 = vector.extract_strided_slice %7 {offsets = [192, 0], sizes = [64, 16], strides = [1, 1]} : vector<512x16xf32> to vector<64x16xf32>
    %14 = arith.maximumf %12, %13 : vector<64x16xf32>
    %15 = vector.extract_strided_slice %7 {offsets = [256, 0], sizes = [64, 16], strides = [1, 1]} : vector<512x16xf32> to vector<64x16xf32>
    %16 = arith.maximumf %14, %15 : vector<64x16xf32>
    %17 = vector.extract_strided_slice %7 {offsets = [320, 0], sizes = [64, 16], strides = [1, 1]} : vector<512x16xf32> to vector<64x16xf32>
    %18 = arith.maximumf %16, %17 : vector<64x16xf32>
    %19 = vector.extract_strided_slice %7 {offsets = [384, 0], sizes = [64, 16], strides = [1, 1]} : vector<512x16xf32> to vector<64x16xf32>
    %20 = arith.maximumf %18, %19 : vector<64x16xf32>
    %21 = vector.extract_strided_slice %7 {offsets = [448, 0], sizes = [64, 16], strides = [1, 1]} : vector<512x16xf32> to vector<64x16xf32>
    %22 = arith.maximumf %20, %21 : vector<64x16xf32>
    %c0_6 = arith.constant 0 : index
    %c0_7 = arith.constant 0 : index
    %23 = vector.load %arg4[%c0_6, %c0_7] : memref<64x32xf32, #tpu.memory_space<vmem>>, vector<64x32xf32>
    %24 = tpu.concatenate %23, %22 in 1 : vector<64x32xf32>, vector<64x16xf32> -> vector<64x48xf32>
    %c0_8 = arith.constant 0 : index
    %c0_9 = arith.constant 0 : index
    %25 = vector.load %arg5[%c0_8, %c0_9] : memref<48x32xf32, #tpu.memory_space<vmem>>, vector<48x32xf32>
    %cst_10 = arith.constant dense<0.000000e+00> : vector<64x32xf32>
    %26 = tpu.matmul %24, %25, %cst_10 {dimension_numbers = #tpu.dot_dimension_numbers<[1], [0], [0], [1], [0, 0, 1, 1], [], []>} : vector<64x48xf32>, vector<48x32xf32>, vector<64x32xf32> -> vector<64x32xf32>
    %c0_11 = arith.constant 0 : index
    %c0_12 = arith.constant 0 : index
    %27 = vector.load %arg6[%c0_11, %c0_12] : memref<1x32xf32, #tpu.memory_space<vmem>>, vector<1x32xf32>
    %28 = vector.broadcast %27 : vector<1x32xf32> to vector<64x32xf32>
    %29 = arith.addf %26, %28 : vector<64x32xf32>
    %c0_13 = arith.constant 0 : index
    %c0_14 = arith.constant 0 : index
    %30 = vector.load %arg7[%c0_13, %c0_14] : memref<64x64xf32, #tpu.memory_space<vmem>>, vector<32x64xf32>
    %c0_15 = arith.constant 0 : index
    %c0_16 = arith.constant 0 : index
    %31 = vector.load %arg8[%c0_15, %c0_16] : memref<2x64xf32, #tpu.memory_space<vmem>>, vector<1x64xf32>
    %cst_17 = arith.constant dense<0.000000e+00> : vector<64x64xf32>
    %32 = tpu.matmul %29, %30, %cst_17 {dimension_numbers = #tpu.dot_dimension_numbers<[1], [0], [0], [1], [0, 0, 1, 1], [], []>} : vector<64x32xf32>, vector<32x64xf32>, vector<64x64xf32> -> vector<64x64xf32>
    %33 = vector.broadcast %31 : vector<1x64xf32> to vector<64x64xf32>
    %34 = arith.addf %32, %33 : vector<64x64xf32>
    %35 = vector.extract_strided_slice %34 {offsets = [0, 0], sizes = [64, 32], strides = [1, 1]} : vector<64x64xf32> to vector<64x32xf32>
    %cst_18 = arith.constant 0.000000e+00 : f32
    %36 = vector.broadcast %cst_18 : f32 to vector<64x32xf32>
    %37 = arith.subf %36, %35 : vector<64x32xf32>
    %38 = math.exp %37 : vector<64x32xf32>
    %cst_19 = arith.constant 1.000000e+00 : f32
    %39 = vector.broadcast %cst_19 : f32 to vector<64x32xf32>
    %40 = arith.addf %39, %38 : vector<64x32xf32>
    %cst_20 = arith.constant 1.000000e+00 : f32
    %41 = vector.broadcast %cst_20 : f32 to vector<64x32xf32>
    %42 = arith.divf %41, %40 : vector<64x32xf32>
    %43 = vector.extract_strided_slice %34 {offsets = [0, 32], sizes = [64, 32], strides = [1, 1]} : vector<64x64xf32> to vector<64x32xf32>
    %cst_21 = arith.constant 0.000000e+00 : f32
    %44 = vector.broadcast %cst_21 : f32 to vector<64x32xf32>
    %45 = arith.maximumf %43, %44 : vector<64x32xf32>
    %46 = arith.mulf %42, %45 : vector<64x32xf32>
    %cst_22 = arith.constant 1.000000e+00 : f32
    %47 = vector.broadcast %cst_22 : f32 to vector<64x32xf32>
    %48 = arith.subf %47, %42 : vector<64x32xf32>
    %49 = arith.mulf %48, %29 : vector<64x32xf32>
    %50 = arith.addf %46, %49 : vector<64x32xf32>
    %c32 = arith.constant 32 : index
    %c0_23 = arith.constant 0 : index
    %51 = vector.load %arg7[%c32, %c0_23] : memref<64x64xf32, #tpu.memory_space<vmem>>, vector<32x64xf32>
    %c1 = arith.constant 1 : index
    %c0_24 = arith.constant 0 : index
    %52 = vector.load %arg8[%c1, %c0_24] : memref<2x64xf32, #tpu.memory_space<vmem>>, vector<1x64xf32>
    %cst_25 = arith.constant dense<0.000000e+00> : vector<64x64xf32>
    %53 = tpu.matmul %50, %51, %cst_25 {dimension_numbers = #tpu.dot_dimension_numbers<[1], [0], [0], [1], [0, 0, 1, 1], [], []>} : vector<64x32xf32>, vector<32x64xf32>, vector<64x64xf32> -> vector<64x64xf32>
    %54 = vector.broadcast %52 : vector<1x64xf32> to vector<64x64xf32>
    %55 = arith.addf %53, %54 : vector<64x64xf32>
    %56 = vector.extract_strided_slice %55 {offsets = [0, 0], sizes = [64, 32], strides = [1, 1]} : vector<64x64xf32> to vector<64x32xf32>
    %cst_26 = arith.constant 0.000000e+00 : f32
    %57 = vector.broadcast %cst_26 : f32 to vector<64x32xf32>
    %58 = arith.subf %57, %56 : vector<64x32xf32>
    %59 = math.exp %58 : vector<64x32xf32>
    %cst_27 = arith.constant 1.000000e+00 : f32
    %60 = vector.broadcast %cst_27 : f32 to vector<64x32xf32>
    %61 = arith.addf %60, %59 : vector<64x32xf32>
    %cst_28 = arith.constant 1.000000e+00 : f32
    %62 = vector.broadcast %cst_28 : f32 to vector<64x32xf32>
    %63 = arith.divf %62, %61 : vector<64x32xf32>
    %64 = vector.extract_strided_slice %55 {offsets = [0, 32], sizes = [64, 32], strides = [1, 1]} : vector<64x64xf32> to vector<64x32xf32>
    %cst_29 = arith.constant 0.000000e+00 : f32
    %65 = vector.broadcast %cst_29 : f32 to vector<64x32xf32>
    %66 = arith.maximumf %64, %65 : vector<64x32xf32>
    %67 = arith.mulf %63, %66 : vector<64x32xf32>
    %cst_30 = arith.constant 1.000000e+00 : f32
    %68 = vector.broadcast %cst_30 : f32 to vector<64x32xf32>
    %69 = arith.subf %68, %63 : vector<64x32xf32>
    %70 = arith.mulf %69, %50 : vector<64x32xf32>
    %71 = arith.addf %67, %70 : vector<64x32xf32>
    %c0_31 = arith.constant 0 : index
    %c0_32 = arith.constant 0 : index
    %72 = vector.load %arg9[%c0_31, %c0_32] : memref<64x32xf32, #tpu.memory_space<vmem>>, vector<64x32xf32>
    tpu.vector_store %arg9[%c0_31, %c0_32], %71 {strides = array<i32>} : memref<64x32xf32, #tpu.memory_space<vmem>>, vector<64x32xf32>,
    return
  }
  func.func @transform_0(%arg0: i32) -> (i32, i32) {
    %c0_i32 = arith.constant 0 : i32
    %c0_i32_0 = arith.constant 0 : i32
    %c0_i32_1 = arith.constant 0 : i32
    return %c0_i32, %c0_i32_0 : i32, i32
  }
  func.func @transform_1(%arg0: i32) -> (i32, i32) {
    %c0_i32 = arith.constant 0 : i32
    %c0_i32_0 = arith.constant 0 : i32
    %c0_i32_1 = arith.constant 0 : i32
    return %c0_i32, %c0_i32_0 : i32, i32
  }
  func.func @transform_2(%arg0: i32) -> (i32, i32) {
    %c0_i32 = arith.constant 0 : i32
    %c0_i32_0 = arith.constant 0 : i32
    %c0_i32_1 = arith.constant 0 : i32
    return %c0_i32, %c0_i32_0 : i32, i32
  }
  func.func @transform_3(%arg0: i32) -> (i32, i32) {
    %c0_i32 = arith.constant 0 : i32
    %c0_i32_0 = arith.constant 0 : i32
    %c0_i32_1 = arith.constant 0 : i32
    return %c0_i32, %c0_i32_0 : i32, i32
  }
  func.func @transform_4(%arg0: i32) -> (i32, i32) {
    %c0_i32 = arith.constant 0 : i32
    %c0_i32_0 = arith.constant 0 : i32
    %c0_i32_1 = arith.constant 0 : i32
    return %c0_i32, %c0_i32_0 : i32, i32
  }
  func.func @transform_5(%arg0: i32) -> (i32, i32) {
    %c0_i32 = arith.constant 0 : i32
    %c0_i32_0 = arith.constant 0 : i32
    %c0_i32_1 = arith.constant 0 : i32
    return %c0_i32, %c0_i32_0 : i32, i32
  }
  func.func @transform_6(%arg0: i32) -> (i32, i32) {
    %c0_i32 = arith.constant 0 : i32
    %c0_i32_0 = arith.constant 0 : i32
    %c0_i32_1 = arith.constant 0 : i32
    return %c0_i32, %c0_i32_0 : i32, i32
  }
  func.func @transform_7(%arg0: i32) -> (i32, i32) {
    %c0_i32 = arith.constant 0 : i32
    %c0_i32_0 = arith.constant 0 : i32
    %c0_i32_1 = arith.constant 0 : i32
    return %c0_i32, %c0_i32_0 : i32, i32
  }
  func.func @transform_8(%arg0: i32) -> (i32, i32) {
    %c0_i32 = arith.constant 0 : i32
    %c0_i32_0 = arith.constant 0 : i32
    %c0_i32_1 = arith.constant 0 : i32
    return %c0_i32, %c0_i32_0 : i32, i32
  }
}

module attributes {stable_mosaic.version = 11 : i64} {
  func.func @_encoder_block_kernel(%arg0: i32, %arg1: memref<1x16x32xf32, #tpu.memory_space<vmem>>, %arg2: memref<16x32xf32, #tpu.memory_space<vmem>>, %arg3: memref<1x1x16xf32, #tpu.memory_space<vmem>>, %arg4: memref<1x16x1xf32, #tpu.memory_space<vmem>>, %arg5: memref<4x32xf32, #tpu.memory_space<vmem>>, %arg6: memref<4x32xf32, #tpu.memory_space<vmem>>, %arg7: memref<2x5x32xf32, #tpu.memory_space<vmem>>, %arg8: memref<2x32xf32, #tpu.memory_space<vmem>>, %arg9: memref<2x32x32xf32, #tpu.memory_space<vmem>>, %arg10: memref<2x32xf32, #tpu.memory_space<vmem>>, %arg11: memref<1x32x96xf32, #tpu.memory_space<vmem>>, %arg12: memref<1x96xf32, #tpu.memory_space<vmem>>, %arg13: memref<1x32x32xf32, #tpu.memory_space<vmem>>, %arg14: memref<1x32xf32, #tpu.memory_space<vmem>>, %arg15: memref<1x32x32xf32, #tpu.memory_space<vmem>>, %arg16: memref<1x32xf32, #tpu.memory_space<vmem>>, %arg17: memref<1x32x32xf32, #tpu.memory_space<vmem>>, %arg18: memref<1x32xf32, #tpu.memory_space<vmem>>, %arg19: memref<1x16x32xf32, #tpu.memory_space<vmem>>) attributes {dimension_semantics = [#tpu.dimension_semantics<parallel>], iteration_bounds = array<i64: 2>, scalar_prefetch = 0 : i64, scratch_operands = 0 : i64, tpu.core_type = #tpu.core_type<tc>, window_params = [{transform_indices = @transform_0, window_bounds = array<i64: 1, 16, 32>}, {pipeline_mode = #tpu.pipeline_mode<synchronous>, transform_indices = @transform_1, window_bounds = array<i64: 16, 32>}, {transform_indices = @transform_2, window_bounds = array<i64: 1, 1, 16>}, {transform_indices = @transform_3, window_bounds = array<i64: 1, 16, 1>}, {pipeline_mode = #tpu.pipeline_mode<synchronous>, transform_indices = @transform_4, window_bounds = array<i64: 4, 32>}, {pipeline_mode = #tpu.pipeline_mode<synchronous>, transform_indices = @transform_5, window_bounds = array<i64: 4, 32>}, {pipeline_mode = #tpu.pipeline_mode<synchronous>, transform_indices = @transform_6, window_bounds = array<i64: 2, 5, 32>}, {pipeline_mode = #tpu.pipeline_mode<synchronous>, transform_indices = @transform_7, window_bounds = array<i64: 2, 32>}, {pipeline_mode = #tpu.pipeline_mode<synchronous>, transform_indices = @transform_8, window_bounds = array<i64: 2, 32, 32>}, {pipeline_mode = #tpu.pipeline_mode<synchronous>, transform_indices = @transform_9, window_bounds = array<i64: 2, 32>}, {pipeline_mode = #tpu.pipeline_mode<synchronous>, transform_indices = @transform_10, window_bounds = array<i64: 1, 32, 96>}, {pipeline_mode = #tpu.pipeline_mode<synchronous>, transform_indices = @transform_11, window_bounds = array<i64: 1, 96>}, {pipeline_mode = #tpu.pipeline_mode<synchronous>, transform_indices = @transform_12, window_bounds = array<i64: 1, 32, 32>}, {pipeline_mode = #tpu.pipeline_mode<synchronous>, transform_indices = @transform_13, window_bounds = array<i64: 1, 32>}, {pipeline_mode = #tpu.pipeline_mode<synchronous>, transform_indices = @transform_14, window_bounds = array<i64: 1, 32, 32>}, {pipeline_mode = #tpu.pipeline_mode<synchronous>, transform_indices = @transform_15, window_bounds = array<i64: 1, 32>}, {pipeline_mode = #tpu.pipeline_mode<synchronous>, transform_indices = @transform_16, window_bounds = array<i64: 1, 32, 32>}, {pipeline_mode = #tpu.pipeline_mode<synchronous>, transform_indices = @transform_17, window_bounds = array<i64: 1, 32>}, {transform_indices = @transform_18, window_bounds = array<i64: 1, 16, 32>}]} {
    %c0 = arith.constant 0 : index
    %c0_0 = arith.constant 0 : index
    %c0_1 = arith.constant 0 : index
    %0 = vector.load %arg1[%c0, %c0_0, %c0_1] : memref<1x16x32xf32, #tpu.memory_space<vmem>>, vector<1x16x32xf32>
    %1 = vector.shape_cast %0 : vector<1x16x32xf32> to vector<16x32xf32>
    %c0_2 = arith.constant 0 : index
    %c0_3 = arith.constant 0 : index
    %2 = vector.load %arg2[%c0_2, %c0_3] : memref<16x32xf32, #tpu.memory_space<vmem>>, vector<16x32xf32>
    %c0_4 = arith.constant 0 : index
    %c0_5 = arith.constant 0 : index
    %c0_6 = arith.constant 0 : index
    %3 = vector.load %arg3[%c0_4, %c0_5, %c0_6] : memref<1x1x16xf32, #tpu.memory_space<vmem>>, vector<1x1x16xf32>
    %4 = vector.shape_cast %3 : vector<1x1x16xf32> to vector<1x16xf32>
    %c0_7 = arith.constant 0 : index
    %c0_8 = arith.constant 0 : index
    %c0_9 = arith.constant 0 : index
    %5 = vector.load %arg4[%c0_7, %c0_8, %c0_9] : memref<1x16x1xf32, #tpu.memory_space<vmem>>, vector<1x16x1xf32>
    %6 = vector.shape_cast %5 : vector<1x16x1xf32> to vector<16x1xf32>
    %cst = arith.constant 1.000000e+00 : f32
    %7 = vector.broadcast %cst : f32 to vector<1x16xf32>
    %8 = arith.subf %4, %7 : vector<1x16xf32>
    %cst_10 = arith.constant 1.000000e+30 : f32
    %9 = vector.broadcast %cst_10 : f32 to vector<1x16xf32>
    %10 = arith.mulf %8, %9 : vector<1x16xf32>
    %11 = tpu.iota {dimensions = array<i32: 0>} : vector<16x16xi32>
    %12 = tpu.iota {dimensions = array<i32: 1>} : vector<16x16xi32>
    %c-2_i32 = arith.constant -2 : i32
    %13 = vector.broadcast %c-2_i32 : i32 to vector<16x16xi32>
    %14 = arith.addi %11, %13 : vector<16x16xi32>
    %15 = arith.cmpi eq, %12, %14 : vector<16x16xi32>
    %16 = arith.extui %15 : vector<16x16xi1> to vector<16x16xi32>
    %17 = arith.sitofp %16 : vector<16x16xi32> to vector<16x16xf32>
    %c-1_i32 = arith.constant -1 : i32
    %18 = vector.broadcast %c-1_i32 : i32 to vector<16x16xi32>
    %19 = arith.addi %11, %18 : vector<16x16xi32>
    %20 = arith.cmpi eq, %12, %19 : vector<16x16xi32>
    %21 = arith.extui %20 : vector<16x16xi1> to vector<16x16xi32>
    %22 = arith.sitofp %21 : vector<16x16xi32> to vector<16x16xf32>
    %c0_i32 = arith.constant 0 : i32
    %23 = vector.broadcast %c0_i32 : i32 to vector<16x16xi32>
    %24 = arith.addi %11, %23 : vector<16x16xi32>
    %25 = arith.cmpi eq, %12, %24 : vector<16x16xi32>
    %26 = arith.extui %25 : vector<16x16xi1> to vector<16x16xi32>
    %27 = arith.sitofp %26 : vector<16x16xi32> to vector<16x16xf32>
    %c1_i32 = arith.constant 1 : i32
    %28 = vector.broadcast %c1_i32 : i32 to vector<16x16xi32>
    %29 = arith.addi %11, %28 : vector<16x16xi32>
    %30 = arith.cmpi eq, %12, %29 : vector<16x16xi32>
    %31 = arith.extui %30 : vector<16x16xi1> to vector<16x16xi32>
    %32 = arith.sitofp %31 : vector<16x16xi32> to vector<16x16xf32>
    %c2_i32 = arith.constant 2 : i32
    %33 = vector.broadcast %c2_i32 : i32 to vector<16x16xi32>
    %34 = arith.addi %11, %33 : vector<16x16xi32>
    %35 = arith.cmpi eq, %12, %34 : vector<16x16xi32>
    %36 = arith.extui %35 : vector<16x16xi1> to vector<16x16xi32>
    %37 = arith.sitofp %36 : vector<16x16xi32> to vector<16x16xf32>
    %38 = arith.addf %1, %2 : vector<16x32xf32>
    %c0_11 = arith.constant 0 : index
    %c0_12 = arith.constant 0 : index
    %39 = vector.load %arg5[%c0_11, %c0_12] : memref<4x32xf32, #tpu.memory_space<vmem>>, vector<1x32xf32>
    %c0_13 = arith.constant 0 : index
    %c0_14 = arith.constant 0 : index
    %40 = vector.load %arg6[%c0_13, %c0_14] : memref<4x32xf32, #tpu.memory_space<vmem>>, vector<1x32xf32>
    %cst_15 = arith.constant dense<0.000000e+00> : vector<16xf32>
    %41 = vector.multi_reduction <add>, %38, %cst_15 [1] : vector<16x32xf32> to vector<16xf32>
    %42 = vector.shape_cast %41 : vector<16xf32> to vector<16x1xf32>
    %cst_16 = arith.constant 3.200000e+01 : f32
    %43 = vector.broadcast %cst_16 : f32 to vector<16x1xf32>
    %44 = arith.divf %42, %43 : vector<16x1xf32>
    %45 = vector.broadcast %44 : vector<16x1xf32> to vector<16x32xf32>
    %46 = arith.subf %38, %45 : vector<16x32xf32>
    %47 = arith.mulf %46, %46 : vector<16x32xf32>
    %cst_17 = arith.constant dense<0.000000e+00> : vector<16xf32>
    %48 = vector.multi_reduction <add>, %47, %cst_17 [1] : vector<16x32xf32> to vector<16xf32>
    %49 = vector.shape_cast %48 : vector<16xf32> to vector<16x1xf32>
    %cst_18 = arith.constant 3.200000e+01 : f32
    %50 = vector.broadcast %cst_18 : f32 to vector<16x1xf32>
    %51 = arith.divf %49, %50 : vector<16x1xf32>
    %52 = vector.broadcast %44 : vector<16x1xf32> to vector<16x32xf32>
    %53 = arith.subf %38, %52 : vector<16x32xf32>
    %cst_19 = arith.constant 9.99999974E-6 : f32
    %54 = vector.broadcast %cst_19 : f32 to vector<16x1xf32>
    %55 = arith.addf %51, %54 : vector<16x1xf32>
    %56 = math.rsqrt %55 : vector<16x1xf32>
    %57 = vector.broadcast %56 : vector<16x1xf32> to vector<16x32xf32>
    %58 = arith.mulf %53, %57 : vector<16x32xf32>
    %59 = vector.broadcast %39 : vector<1x32xf32> to vector<16x32xf32>
    %60 = arith.mulf %58, %59 : vector<16x32xf32>
    %61 = vector.broadcast %40 : vector<1x32xf32> to vector<16x32xf32>
    %62 = arith.addf %60, %61 : vector<16x32xf32>
    %63 = vector.broadcast %6 : vector<16x1xf32> to vector<16x32xf32>
    %64 = arith.mulf %62, %63 : vector<16x32xf32>
    %c0_20 = arith.constant 0 : index
    %c0_21 = arith.constant 0 : index
    %c0_22 = arith.constant 0 : index
    %65 = vector.load %arg7[%c0_20, %c0_21, %c0_22] : memref<2x5x32xf32, #tpu.memory_space<vmem>>, vector<1x5x32xf32>
    %66 = vector.shape_cast %65 : vector<1x5x32xf32> to vector<5x32xf32>
    %cst_23 = arith.constant 0.000000e+00 : f32
    %67 = vector.broadcast %cst_23 : f32 to vector<16x32xf32>
    %cst_24 = arith.constant dense<0.000000e+00> : vector<16x32xf32>
    %68 = tpu.matmul %17, %64, %cst_24 {dimension_numbers = #tpu.dot_dimension_numbers<[1], [0], [0], [1], [0, 0, 1, 1], [], []>} : vector<16x16xf32>, vector<16x32xf32>, vector<16x32xf32> -> vector<16x32xf32>
    %69 = vector.extract_strided_slice %66 {offsets = [0, 0], sizes = [1, 32], strides = [1, 1]} : vector<5x32xf32> to vector<1x32xf32>
    %70 = vector.broadcast %69 : vector<1x32xf32> to vector<16x32xf32>
    %71 = arith.mulf %68, %70 : vector<16x32xf32>
    %72 = arith.addf %67, %71 : vector<16x32xf32>
    %cst_25 = arith.constant dense<0.000000e+00> : vector<16x32xf32>
    %73 = tpu.matmul %22, %64, %cst_25 {dimension_numbers = #tpu.dot_dimension_numbers<[1], [0], [0], [1], [0, 0, 1, 1], [], []>} : vector<16x16xf32>, vector<16x32xf32>, vector<16x32xf32> -> vector<16x32xf32>
    %74 = vector.extract_strided_slice %66 {offsets = [1, 0], sizes = [1, 32], strides = [1, 1]} : vector<5x32xf32> to vector<1x32xf32>
    %75 = vector.broadcast %74 : vector<1x32xf32> to vector<16x32xf32>
    %76 = arith.mulf %73, %75 : vector<16x32xf32>
    %77 = arith.addf %72, %76 : vector<16x32xf32>
    %cst_26 = arith.constant dense<0.000000e+00> : vector<16x32xf32>
    %78 = tpu.matmul %27, %64, %cst_26 {dimension_numbers = #tpu.dot_dimension_numbers<[1], [0], [0], [1], [0, 0, 1, 1], [], []>} : vector<16x16xf32>, vector<16x32xf32>, vector<16x32xf32> -> vector<16x32xf32>
    %79 = vector.extract_strided_slice %66 {offsets = [2, 0], sizes = [1, 32], strides = [1, 1]} : vector<5x32xf32> to vector<1x32xf32>
    %80 = vector.broadcast %79 : vector<1x32xf32> to vector<16x32xf32>
    %81 = arith.mulf %78, %80 : vector<16x32xf32>
    %82 = arith.addf %77, %81 : vector<16x32xf32>
    %cst_27 = arith.constant dense<0.000000e+00> : vector<16x32xf32>
    %83 = tpu.matmul %32, %64, %cst_27 {dimension_numbers = #tpu.dot_dimension_numbers<[1], [0], [0], [1], [0, 0, 1, 1], [], []>} : vector<16x16xf32>, vector<16x32xf32>, vector<16x32xf32> -> vector<16x32xf32>
    %84 = vector.extract_strided_slice %66 {offsets = [3, 0], sizes = [1, 32], strides = [1, 1]} : vector<5x32xf32> to vector<1x32xf32>
    %85 = vector.broadcast %84 : vector<1x32xf32> to vector<16x32xf32>
    %86 = arith.mulf %83, %85 : vector<16x32xf32>
    %87 = arith.addf %82, %86 : vector<16x32xf32>
    %cst_28 = arith.constant dense<0.000000e+00> : vector<16x32xf32>
    %88 = tpu.matmul %37, %64, %cst_28 {dimension_numbers = #tpu.dot_dimension_numbers<[1], [0], [0], [1], [0, 0, 1, 1], [], []>} : vector<16x16xf32>, vector<16x32xf32>, vector<16x32xf32> -> vector<16x32xf32>
    %89 = vector.extract_strided_slice %66 {offsets = [4, 0], sizes = [1, 32], strides = [1, 1]} : vector<5x32xf32> to vector<1x32xf32>
    %90 = vector.broadcast %89 : vector<1x32xf32> to vector<16x32xf32>
    %91 = arith.mulf %88, %90 : vector<16x32xf32>
    %92 = arith.addf %87, %91 : vector<16x32xf32>
    %c0_29 = arith.constant 0 : index
    %c0_30 = arith.constant 0 : index
    %93 = vector.load %arg8[%c0_29, %c0_30] : memref<2x32xf32, #tpu.memory_space<vmem>>, vector<1x32xf32>
    %94 = vector.broadcast %93 : vector<1x32xf32> to vector<16x32xf32>
    %95 = arith.addf %92, %94 : vector<16x32xf32>
    %c0_31 = arith.constant 0 : index
    %c0_32 = arith.constant 0 : index
    %c0_33 = arith.constant 0 : index
    %96 = vector.load %arg9[%c0_31, %c0_32, %c0_33] : memref<2x32x32xf32, #tpu.memory_space<vmem>>, vector<1x32x32xf32>
    %97 = vector.shape_cast %96 : vector<1x32x32xf32> to vector<32x32xf32>
    %cst_34 = arith.constant dense<0.000000e+00> : vector<16x32xf32>
    %98 = tpu.matmul %95, %97, %cst_34 {dimension_numbers = #tpu.dot_dimension_numbers<[1], [0], [0], [1], [0, 0, 1, 1], [], []>} : vector<16x32xf32>, vector<32x32xf32>, vector<16x32xf32> -> vector<16x32xf32>
    %c0_35 = arith.constant 0 : index
    %c0_36 = arith.constant 0 : index
    %99 = vector.load %arg10[%c0_35, %c0_36] : memref<2x32xf32, #tpu.memory_space<vmem>>, vector<1x32xf32>
    %100 = vector.broadcast %99 : vector<1x32xf32> to vector<16x32xf32>
    %101 = arith.addf %98, %100 : vector<16x32xf32>
    %cst_37 = arith.constant 0.000000e+00 : f32
    %102 = vector.broadcast %cst_37 : f32 to vector<16x32xf32>
    %103 = arith.maximumf %101, %102 : vector<16x32xf32>
    %104 = arith.addf %38, %103 : vector<16x32xf32>
    %c1 = arith.constant 1 : index
    %c0_38 = arith.constant 0 : index
    %105 = vector.load %arg5[%c1, %c0_38] : memref<4x32xf32, #tpu.memory_space<vmem>>, vector<1x32xf32>
    %c1_39 = arith.constant 1 : index
    %c0_40 = arith.constant 0 : index
    %106 = vector.load %arg6[%c1_39, %c0_40] : memref<4x32xf32, #tpu.memory_space<vmem>>, vector<1x32xf32>
    %cst_41 = arith.constant dense<0.000000e+00> : vector<16xf32>
    %107 = vector.multi_reduction <add>, %104, %cst_41 [1] : vector<16x32xf32> to vector<16xf32>
    %108 = vector.shape_cast %107 : vector<16xf32> to vector<16x1xf32>
    %cst_42 = arith.constant 3.200000e+01 : f32
    %109 = vector.broadcast %cst_42 : f32 to vector<16x1xf32>
    %110 = arith.divf %108, %109 : vector<16x1xf32>
    %111 = vector.broadcast %110 : vector<16x1xf32> to vector<16x32xf32>
    %112 = arith.subf %104, %111 : vector<16x32xf32>
    %113 = arith.mulf %112, %112 : vector<16x32xf32>
    %cst_43 = arith.constant dense<0.000000e+00> : vector<16xf32>
    %114 = vector.multi_reduction <add>, %113, %cst_43 [1] : vector<16x32xf32> to vector<16xf32>
    %115 = vector.shape_cast %114 : vector<16xf32> to vector<16x1xf32>
    %cst_44 = arith.constant 3.200000e+01 : f32
    %116 = vector.broadcast %cst_44 : f32 to vector<16x1xf32>
    %117 = arith.divf %115, %116 : vector<16x1xf32>
    %118 = vector.broadcast %110 : vector<16x1xf32> to vector<16x32xf32>
    %119 = arith.subf %104, %118 : vector<16x32xf32>
    %cst_45 = arith.constant 9.99999974E-6 : f32
    %120 = vector.broadcast %cst_45 : f32 to vector<16x1xf32>
    %121 = arith.addf %117, %120 : vector<16x1xf32>
    %122 = math.rsqrt %121 : vector<16x1xf32>
    %123 = vector.broadcast %122 : vector<16x1xf32> to vector<16x32xf32>
    %124 = arith.mulf %119, %123 : vector<16x32xf32>
    %125 = vector.broadcast %105 : vector<1x32xf32> to vector<16x32xf32>
    %126 = arith.mulf %124, %125 : vector<16x32xf32>
    %127 = vector.broadcast %106 : vector<1x32xf32> to vector<16x32xf32>
    %128 = arith.addf %126, %127 : vector<16x32xf32>
    %129 = vector.broadcast %6 : vector<16x1xf32> to vector<16x32xf32>
    %130 = arith.mulf %128, %129 : vector<16x32xf32>
    %c1_46 = arith.constant 1 : index
    %c0_47 = arith.constant 0 : index
    %c0_48 = arith.constant 0 : index
    %131 = vector.load %arg7[%c1_46, %c0_47, %c0_48] : memref<2x5x32xf32, #tpu.memory_space<vmem>>, vector<1x5x32xf32>
    %132 = vector.shape_cast %131 : vector<1x5x32xf32> to vector<5x32xf32>
    %cst_49 = arith.constant 0.000000e+00 : f32
    %133 = vector.broadcast %cst_49 : f32 to vector<16x32xf32>
    %cst_50 = arith.constant dense<0.000000e+00> : vector<16x32xf32>
    %134 = tpu.matmul %17, %130, %cst_50 {dimension_numbers = #tpu.dot_dimension_numbers<[1], [0], [0], [1], [0, 0, 1, 1], [], []>} : vector<16x16xf32>, vector<16x32xf32>, vector<16x32xf32> -> vector<16x32xf32>
    %135 = vector.extract_strided_slice %132 {offsets = [0, 0], sizes = [1, 32], strides = [1, 1]} : vector<5x32xf32> to vector<1x32xf32>
    %136 = vector.broadcast %135 : vector<1x32xf32> to vector<16x32xf32>
    %137 = arith.mulf %134, %136 : vector<16x32xf32>
    %138 = arith.addf %133, %137 : vector<16x32xf32>
    %cst_51 = arith.constant dense<0.000000e+00> : vector<16x32xf32>
    %139 = tpu.matmul %22, %130, %cst_51 {dimension_numbers = #tpu.dot_dimension_numbers<[1], [0], [0], [1], [0, 0, 1, 1], [], []>} : vector<16x16xf32>, vector<16x32xf32>, vector<16x32xf32> -> vector<16x32xf32>
    %140 = vector.extract_strided_slice %132 {offsets = [1, 0], sizes = [1, 32], strides = [1, 1]} : vector<5x32xf32> to vector<1x32xf32>
    %141 = vector.broadcast %140 : vector<1x32xf32> to vector<16x32xf32>
    %142 = arith.mulf %139, %141 : vector<16x32xf32>
    %143 = arith.addf %138, %142 : vector<16x32xf32>
    %cst_52 = arith.constant dense<0.000000e+00> : vector<16x32xf32>
    %144 = tpu.matmul %27, %130, %cst_52 {dimension_numbers = #tpu.dot_dimension_numbers<[1], [0], [0], [1], [0, 0, 1, 1], [], []>} : vector<16x16xf32>, vector<16x32xf32>, vector<16x32xf32> -> vector<16x32xf32>
    %145 = vector.extract_strided_slice %132 {offsets = [2, 0], sizes = [1, 32], strides = [1, 1]} : vector<5x32xf32> to vector<1x32xf32>
    %146 = vector.broadcast %145 : vector<1x32xf32> to vector<16x32xf32>
    %147 = arith.mulf %144, %146 : vector<16x32xf32>
    %148 = arith.addf %143, %147 : vector<16x32xf32>
    %cst_53 = arith.constant dense<0.000000e+00> : vector<16x32xf32>
    %149 = tpu.matmul %32, %130, %cst_53 {dimension_numbers = #tpu.dot_dimension_numbers<[1], [0], [0], [1], [0, 0, 1, 1], [], []>} : vector<16x16xf32>, vector<16x32xf32>, vector<16x32xf32> -> vector<16x32xf32>
    %150 = vector.extract_strided_slice %132 {offsets = [3, 0], sizes = [1, 32], strides = [1, 1]} : vector<5x32xf32> to vector<1x32xf32>
    %151 = vector.broadcast %150 : vector<1x32xf32> to vector<16x32xf32>
    %152 = arith.mulf %149, %151 : vector<16x32xf32>
    %153 = arith.addf %148, %152 : vector<16x32xf32>
    %cst_54 = arith.constant dense<0.000000e+00> : vector<16x32xf32>
    %154 = tpu.matmul %37, %130, %cst_54 {dimension_numbers = #tpu.dot_dimension_numbers<[1], [0], [0], [1], [0, 0, 1, 1], [], []>} : vector<16x16xf32>, vector<16x32xf32>, vector<16x32xf32> -> vector<16x32xf32>
    %155 = vector.extract_strided_slice %132 {offsets = [4, 0], sizes = [1, 32], strides = [1, 1]} : vector<5x32xf32> to vector<1x32xf32>
    %156 = vector.broadcast %155 : vector<1x32xf32> to vector<16x32xf32>
    %157 = arith.mulf %154, %156 : vector<16x32xf32>
    %158 = arith.addf %153, %157 : vector<16x32xf32>
    %c1_55 = arith.constant 1 : index
    %c0_56 = arith.constant 0 : index
    %159 = vector.load %arg8[%c1_55, %c0_56] : memref<2x32xf32, #tpu.memory_space<vmem>>, vector<1x32xf32>
    %160 = vector.broadcast %159 : vector<1x32xf32> to vector<16x32xf32>
    %161 = arith.addf %158, %160 : vector<16x32xf32>
    %c1_57 = arith.constant 1 : index
    %c0_58 = arith.constant 0 : index
    %c0_59 = arith.constant 0 : index
    %162 = vector.load %arg9[%c1_57, %c0_58, %c0_59] : memref<2x32x32xf32, #tpu.memory_space<vmem>>, vector<1x32x32xf32>
    %163 = vector.shape_cast %162 : vector<1x32x32xf32> to vector<32x32xf32>
    %cst_60 = arith.constant dense<0.000000e+00> : vector<16x32xf32>
    %164 = tpu.matmul %161, %163, %cst_60 {dimension_numbers = #tpu.dot_dimension_numbers<[1], [0], [0], [1], [0, 0, 1, 1], [], []>} : vector<16x32xf32>, vector<32x32xf32>, vector<16x32xf32> -> vector<16x32xf32>
    %c1_61 = arith.constant 1 : index
    %c0_62 = arith.constant 0 : index
    %165 = vector.load %arg10[%c1_61, %c0_62] : memref<2x32xf32, #tpu.memory_space<vmem>>, vector<1x32xf32>
    %166 = vector.broadcast %165 : vector<1x32xf32> to vector<16x32xf32>
    %167 = arith.addf %164, %166 : vector<16x32xf32>
    %cst_63 = arith.constant 0.000000e+00 : f32
    %168 = vector.broadcast %cst_63 : f32 to vector<16x32xf32>
    %169 = arith.maximumf %167, %168 : vector<16x32xf32>
    %170 = arith.addf %104, %169 : vector<16x32xf32>
    %c2 = arith.constant 2 : index
    %c0_64 = arith.constant 0 : index
    %171 = vector.load %arg5[%c2, %c0_64] : memref<4x32xf32, #tpu.memory_space<vmem>>, vector<1x32xf32>
    %c2_65 = arith.constant 2 : index
    %c0_66 = arith.constant 0 : index
    %172 = vector.load %arg6[%c2_65, %c0_66] : memref<4x32xf32, #tpu.memory_space<vmem>>, vector<1x32xf32>
    %cst_67 = arith.constant dense<0.000000e+00> : vector<16xf32>
    %173 = vector.multi_reduction <add>, %170, %cst_67 [1] : vector<16x32xf32> to vector<16xf32>
    %174 = vector.shape_cast %173 : vector<16xf32> to vector<16x1xf32>
    %cst_68 = arith.constant 3.200000e+01 : f32
    %175 = vector.broadcast %cst_68 : f32 to vector<16x1xf32>
    %176 = arith.divf %174, %175 : vector<16x1xf32>
    %177 = vector.broadcast %176 : vector<16x1xf32> to vector<16x32xf32>
    %178 = arith.subf %170, %177 : vector<16x32xf32>
    %179 = arith.mulf %178, %178 : vector<16x32xf32>
    %cst_69 = arith.constant dense<0.000000e+00> : vector<16xf32>
    %180 = vector.multi_reduction <add>, %179, %cst_69 [1] : vector<16x32xf32> to vector<16xf32>
    %181 = vector.shape_cast %180 : vector<16xf32> to vector<16x1xf32>
    %cst_70 = arith.constant 3.200000e+01 : f32
    %182 = vector.broadcast %cst_70 : f32 to vector<16x1xf32>
    %183 = arith.divf %181, %182 : vector<16x1xf32>
    %184 = vector.broadcast %176 : vector<16x1xf32> to vector<16x32xf32>
    %185 = arith.subf %170, %184 : vector<16x32xf32>
    %cst_71 = arith.constant 9.99999974E-6 : f32
    %186 = vector.broadcast %cst_71 : f32 to vector<16x1xf32>
    %187 = arith.addf %183, %186 : vector<16x1xf32>
    %188 = math.rsqrt %187 : vector<16x1xf32>
    %189 = vector.broadcast %188 : vector<16x1xf32> to vector<16x32xf32>
    %190 = arith.mulf %185, %189 : vector<16x32xf32>
    %191 = vector.broadcast %171 : vector<1x32xf32> to vector<16x32xf32>
    %192 = arith.mulf %190, %191 : vector<16x32xf32>
    %193 = vector.broadcast %172 : vector<1x32xf32> to vector<16x32xf32>
    %194 = arith.addf %192, %193 : vector<16x32xf32>
    %c0_72 = arith.constant 0 : index
    %c0_73 = arith.constant 0 : index
    %c0_74 = arith.constant 0 : index
    %195 = vector.load %arg11[%c0_72, %c0_73, %c0_74] : memref<1x32x96xf32, #tpu.memory_space<vmem>>, vector<1x32x96xf32>
    %196 = vector.shape_cast %195 : vector<1x32x96xf32> to vector<32x96xf32>
    %cst_75 = arith.constant dense<0.000000e+00> : vector<16x96xf32>
    %197 = tpu.matmul %194, %196, %cst_75 {dimension_numbers = #tpu.dot_dimension_numbers<[1], [0], [0], [1], [0, 0, 1, 1], [], []>} : vector<16x32xf32>, vector<32x96xf32>, vector<16x96xf32> -> vector<16x96xf32>
    %c0_76 = arith.constant 0 : index
    %c0_77 = arith.constant 0 : index
    %198 = vector.load %arg12[%c0_76, %c0_77] : memref<1x96xf32, #tpu.memory_space<vmem>>, vector<1x96xf32>
    %199 = vector.broadcast %198 : vector<1x96xf32> to vector<16x96xf32>
    %200 = arith.addf %197, %199 : vector<16x96xf32>
    %c0_78 = arith.constant 0 : index
    %c0_79 = arith.constant 0 : index
    %c0_80 = arith.constant 0 : index
    %201 = vector.load %arg13[%c0_78, %c0_79, %c0_80] : memref<1x32x32xf32, #tpu.memory_space<vmem>>, vector<1x32x32xf32>
    %202 = vector.shape_cast %201 : vector<1x32x32xf32> to vector<32x32xf32>
    %cst_81 = arith.constant 0.000000e+00 : f32
    %203 = vector.broadcast %cst_81 : f32 to vector<16x32xf32>
    %204 = vector.extract_strided_slice %200 {offsets = [0, 0], sizes = [16, 8], strides = [1, 1]} : vector<16x96xf32> to vector<16x8xf32>
    %205 = vector.extract_strided_slice %200 {offsets = [0, 32], sizes = [16, 8], strides = [1, 1]} : vector<16x96xf32> to vector<16x8xf32>
    %206 = vector.extract_strided_slice %200 {offsets = [0, 64], sizes = [16, 8], strides = [1, 1]} : vector<16x96xf32> to vector<16x8xf32>
    %cst_82 = arith.constant dense<0.000000e+00> : vector<16x16xf32>
    %207 = tpu.matmul %204, %205, %cst_82 {dimension_numbers = #tpu.dot_dimension_numbers<[1], [1], [0], [0], [0, 0, 1, 0], [], []>} : vector<16x8xf32>, vector<16x8xf32>, vector<16x16xf32> -> vector<16x16xf32>
    %cst_83 = arith.constant 0.353553385 : f32
    %208 = vector.broadcast %cst_83 : f32 to vector<16x16xf32>
    %209 = arith.mulf %207, %208 : vector<16x16xf32>
    %210 = vector.broadcast %10 : vector<1x16xf32> to vector<16x16xf32>
    %211 = arith.addf %209, %210 : vector<16x16xf32>
    %cst_84 = arith.constant dense<0xFF800000> : vector<16xf32>
    %212 = vector.multi_reduction <maximumf>, %211, %cst_84 [1] : vector<16x16xf32> to vector<16xf32>
    %213 = vector.shape_cast %212 : vector<16xf32> to vector<16x1xf32>
    %214 = vector.broadcast %213 : vector<16x1xf32> to vector<16x16xf32>
    %215 = arith.subf %211, %214 : vector<16x16xf32>
    %216 = math.exp %215 : vector<16x16xf32>
    %cst_85 = arith.constant dense<0.000000e+00> : vector<16xf32>
    %217 = vector.multi_reduction <add>, %216, %cst_85 [1] : vector<16x16xf32> to vector<16xf32>
    %218 = vector.shape_cast %217 : vector<16xf32> to vector<16x1xf32>
    %219 = tpu.reciprocal %218 {approx = true} : vector<16x1xf32> -> vector<16x1xf32>
    %220 = vector.broadcast %219 : vector<16x1xf32> to vector<16x16xf32>
    %221 = arith.mulf %216, %220 : vector<16x16xf32>
    %cst_86 = arith.constant dense<0.000000e+00> : vector<16x8xf32>
    %222 = tpu.matmul %221, %206, %cst_86 {dimension_numbers = #tpu.dot_dimension_numbers<[1], [0], [0], [1], [0, 0, 1, 1], [], []>} : vector<16x16xf32>, vector<16x8xf32>, vector<16x8xf32> -> vector<16x8xf32>
    %223 = vector.extract_strided_slice %202 {offsets = [0, 0], sizes = [8, 32], strides = [1, 1]} : vector<32x32xf32> to vector<8x32xf32>
    %cst_87 = arith.constant dense<0.000000e+00> : vector<16x32xf32>
    %224 = tpu.matmul %222, %223, %cst_87 {dimension_numbers = #tpu.dot_dimension_numbers<[1], [0], [0], [1], [0, 0, 1, 1], [], []>} : vector<16x8xf32>, vector<8x32xf32>, vector<16x32xf32> -> vector<16x32xf32>
    %225 = arith.addf %203, %224 : vector<16x32xf32>
    %226 = vector.extract_strided_slice %200 {offsets = [0, 8], sizes = [16, 8], strides = [1, 1]} : vector<16x96xf32> to vector<16x8xf32>
    %227 = vector.extract_strided_slice %200 {offsets = [0, 40], sizes = [16, 8], strides = [1, 1]} : vector<16x96xf32> to vector<16x8xf32>
    %228 = vector.extract_strided_slice %200 {offsets = [0, 72], sizes = [16, 8], strides = [1, 1]} : vector<16x96xf32> to vector<16x8xf32>
    %cst_88 = arith.constant dense<0.000000e+00> : vector<16x16xf32>
    %229 = tpu.matmul %226, %227, %cst_88 {dimension_numbers = #tpu.dot_dimension_numbers<[1], [1], [0], [0], [0, 0, 1, 0], [], []>} : vector<16x8xf32>, vector<16x8xf32>, vector<16x16xf32> -> vector<16x16xf32>
    %cst_89 = arith.constant 0.353553385 : f32
    %230 = vector.broadcast %cst_89 : f32 to vector<16x16xf32>
    %231 = arith.mulf %229, %230 : vector<16x16xf32>
    %232 = vector.broadcast %10 : vector<1x16xf32> to vector<16x16xf32>
    %233 = arith.addf %231, %232 : vector<16x16xf32>
    %cst_90 = arith.constant dense<0xFF800000> : vector<16xf32>
    %234 = vector.multi_reduction <maximumf>, %233, %cst_90 [1] : vector<16x16xf32> to vector<16xf32>
    %235 = vector.shape_cast %234 : vector<16xf32> to vector<16x1xf32>
    %236 = vector.broadcast %235 : vector<16x1xf32> to vector<16x16xf32>
    %237 = arith.subf %233, %236 : vector<16x16xf32>
    %238 = math.exp %237 : vector<16x16xf32>
    %cst_91 = arith.constant dense<0.000000e+00> : vector<16xf32>
    %239 = vector.multi_reduction <add>, %238, %cst_91 [1] : vector<16x16xf32> to vector<16xf32>
    %240 = vector.shape_cast %239 : vector<16xf32> to vector<16x1xf32>
    %241 = tpu.reciprocal %240 {approx = true} : vector<16x1xf32> -> vector<16x1xf32>
    %242 = vector.broadcast %241 : vector<16x1xf32> to vector<16x16xf32>
    %243 = arith.mulf %238, %242 : vector<16x16xf32>
    %cst_92 = arith.constant dense<0.000000e+00> : vector<16x8xf32>
    %244 = tpu.matmul %243, %228, %cst_92 {dimension_numbers = #tpu.dot_dimension_numbers<[1], [0], [0], [1], [0, 0, 1, 1], [], []>} : vector<16x16xf32>, vector<16x8xf32>, vector<16x8xf32> -> vector<16x8xf32>
    %245 = vector.extract_strided_slice %202 {offsets = [8, 0], sizes = [8, 32], strides = [1, 1]} : vector<32x32xf32> to vector<8x32xf32>
    %cst_93 = arith.constant dense<0.000000e+00> : vector<16x32xf32>
    %246 = tpu.matmul %244, %245, %cst_93 {dimension_numbers = #tpu.dot_dimension_numbers<[1], [0], [0], [1], [0, 0, 1, 1], [], []>} : vector<16x8xf32>, vector<8x32xf32>, vector<16x32xf32> -> vector<16x32xf32>
    %247 = arith.addf %225, %246 : vector<16x32xf32>
    %248 = vector.extract_strided_slice %200 {offsets = [0, 16], sizes = [16, 8], strides = [1, 1]} : vector<16x96xf32> to vector<16x8xf32>
    %249 = vector.extract_strided_slice %200 {offsets = [0, 48], sizes = [16, 8], strides = [1, 1]} : vector<16x96xf32> to vector<16x8xf32>
    %250 = vector.extract_strided_slice %200 {offsets = [0, 80], sizes = [16, 8], strides = [1, 1]} : vector<16x96xf32> to vector<16x8xf32>
    %cst_94 = arith.constant dense<0.000000e+00> : vector<16x16xf32>
    %251 = tpu.matmul %248, %249, %cst_94 {dimension_numbers = #tpu.dot_dimension_numbers<[1], [1], [0], [0], [0, 0, 1, 0], [], []>} : vector<16x8xf32>, vector<16x8xf32>, vector<16x16xf32> -> vector<16x16xf32>
    %cst_95 = arith.constant 0.353553385 : f32
    %252 = vector.broadcast %cst_95 : f32 to vector<16x16xf32>
    %253 = arith.mulf %251, %252 : vector<16x16xf32>
    %254 = vector.broadcast %10 : vector<1x16xf32> to vector<16x16xf32>
    %255 = arith.addf %253, %254 : vector<16x16xf32>
    %cst_96 = arith.constant dense<0xFF800000> : vector<16xf32>
    %256 = vector.multi_reduction <maximumf>, %255, %cst_96 [1] : vector<16x16xf32> to vector<16xf32>
    %257 = vector.shape_cast %256 : vector<16xf32> to vector<16x1xf32>
    %258 = vector.broadcast %257 : vector<16x1xf32> to vector<16x16xf32>
    %259 = arith.subf %255, %258 : vector<16x16xf32>
    %260 = math.exp %259 : vector<16x16xf32>
    %cst_97 = arith.constant dense<0.000000e+00> : vector<16xf32>
    %261 = vector.multi_reduction <add>, %260, %cst_97 [1] : vector<16x16xf32> to vector<16xf32>
    %262 = vector.shape_cast %261 : vector<16xf32> to vector<16x1xf32>
    %263 = tpu.reciprocal %262 {approx = true} : vector<16x1xf32> -> vector<16x1xf32>
    %264 = vector.broadcast %263 : vector<16x1xf32> to vector<16x16xf32>
    %265 = arith.mulf %260, %264 : vector<16x16xf32>
    %cst_98 = arith.constant dense<0.000000e+00> : vector<16x8xf32>
    %266 = tpu.matmul %265, %250, %cst_98 {dimension_numbers = #tpu.dot_dimension_numbers<[1], [0], [0], [1], [0, 0, 1, 1], [], []>} : vector<16x16xf32>, vector<16x8xf32>, vector<16x8xf32> -> vector<16x8xf32>
    %267 = vector.extract_strided_slice %202 {offsets = [16, 0], sizes = [8, 32], strides = [1, 1]} : vector<32x32xf32> to vector<8x32xf32>
    %cst_99 = arith.constant dense<0.000000e+00> : vector<16x32xf32>
    %268 = tpu.matmul %266, %267, %cst_99 {dimension_numbers = #tpu.dot_dimension_numbers<[1], [0], [0], [1], [0, 0, 1, 1], [], []>} : vector<16x8xf32>, vector<8x32xf32>, vector<16x32xf32> -> vector<16x32xf32>
    %269 = arith.addf %247, %268 : vector<16x32xf32>
    %270 = vector.extract_strided_slice %200 {offsets = [0, 24], sizes = [16, 8], strides = [1, 1]} : vector<16x96xf32> to vector<16x8xf32>
    %271 = vector.extract_strided_slice %200 {offsets = [0, 56], sizes = [16, 8], strides = [1, 1]} : vector<16x96xf32> to vector<16x8xf32>
    %272 = vector.extract_strided_slice %200 {offsets = [0, 88], sizes = [16, 8], strides = [1, 1]} : vector<16x96xf32> to vector<16x8xf32>
    %cst_100 = arith.constant dense<0.000000e+00> : vector<16x16xf32>
    %273 = tpu.matmul %270, %271, %cst_100 {dimension_numbers = #tpu.dot_dimension_numbers<[1], [1], [0], [0], [0, 0, 1, 0], [], []>} : vector<16x8xf32>, vector<16x8xf32>, vector<16x16xf32> -> vector<16x16xf32>
    %cst_101 = arith.constant 0.353553385 : f32
    %274 = vector.broadcast %cst_101 : f32 to vector<16x16xf32>
    %275 = arith.mulf %273, %274 : vector<16x16xf32>
    %276 = vector.broadcast %10 : vector<1x16xf32> to vector<16x16xf32>
    %277 = arith.addf %275, %276 : vector<16x16xf32>
    %cst_102 = arith.constant dense<0xFF800000> : vector<16xf32>
    %278 = vector.multi_reduction <maximumf>, %277, %cst_102 [1] : vector<16x16xf32> to vector<16xf32>
    %279 = vector.shape_cast %278 : vector<16xf32> to vector<16x1xf32>
    %280 = vector.broadcast %279 : vector<16x1xf32> to vector<16x16xf32>
    %281 = arith.subf %277, %280 : vector<16x16xf32>
    %282 = math.exp %281 : vector<16x16xf32>
    %cst_103 = arith.constant dense<0.000000e+00> : vector<16xf32>
    %283 = vector.multi_reduction <add>, %282, %cst_103 [1] : vector<16x16xf32> to vector<16xf32>
    %284 = vector.shape_cast %283 : vector<16xf32> to vector<16x1xf32>
    %285 = tpu.reciprocal %284 {approx = true} : vector<16x1xf32> -> vector<16x1xf32>
    %286 = vector.broadcast %285 : vector<16x1xf32> to vector<16x16xf32>
    %287 = arith.mulf %282, %286 : vector<16x16xf32>
    %cst_104 = arith.constant dense<0.000000e+00> : vector<16x8xf32>
    %288 = tpu.matmul %287, %272, %cst_104 {dimension_numbers = #tpu.dot_dimension_numbers<[1], [0], [0], [1], [0, 0, 1, 1], [], []>} : vector<16x16xf32>, vector<16x8xf32>, vector<16x8xf32> -> vector<16x8xf32>
    %289 = vector.extract_strided_slice %202 {offsets = [24, 0], sizes = [8, 32], strides = [1, 1]} : vector<32x32xf32> to vector<8x32xf32>
    %cst_105 = arith.constant dense<0.000000e+00> : vector<16x32xf32>
    %290 = tpu.matmul %288, %289, %cst_105 {dimension_numbers = #tpu.dot_dimension_numbers<[1], [0], [0], [1], [0, 0, 1, 1], [], []>} : vector<16x8xf32>, vector<8x32xf32>, vector<16x32xf32> -> vector<16x32xf32>
    %291 = arith.addf %269, %290 : vector<16x32xf32>
    %292 = arith.addf %170, %291 : vector<16x32xf32>
    %c0_106 = arith.constant 0 : index
    %c0_107 = arith.constant 0 : index
    %293 = vector.load %arg14[%c0_106, %c0_107] : memref<1x32xf32, #tpu.memory_space<vmem>>, vector<1x32xf32>
    %294 = vector.broadcast %293 : vector<1x32xf32> to vector<16x32xf32>
    %295 = arith.addf %292, %294 : vector<16x32xf32>
    %c3 = arith.constant 3 : index
    %c0_108 = arith.constant 0 : index
    %296 = vector.load %arg5[%c3, %c0_108] : memref<4x32xf32, #tpu.memory_space<vmem>>, vector<1x32xf32>
    %c3_109 = arith.constant 3 : index
    %c0_110 = arith.constant 0 : index
    %297 = vector.load %arg6[%c3_109, %c0_110] : memref<4x32xf32, #tpu.memory_space<vmem>>, vector<1x32xf32>
    %cst_111 = arith.constant dense<0.000000e+00> : vector<16xf32>
    %298 = vector.multi_reduction <add>, %295, %cst_111 [1] : vector<16x32xf32> to vector<16xf32>
    %299 = vector.shape_cast %298 : vector<16xf32> to vector<16x1xf32>
    %cst_112 = arith.constant 3.200000e+01 : f32
    %300 = vector.broadcast %cst_112 : f32 to vector<16x1xf32>
    %301 = arith.divf %299, %300 : vector<16x1xf32>
    %302 = vector.broadcast %301 : vector<16x1xf32> to vector<16x32xf32>
    %303 = arith.subf %295, %302 : vector<16x32xf32>
    %304 = arith.mulf %303, %303 : vector<16x32xf32>
    %cst_113 = arith.constant dense<0.000000e+00> : vector<16xf32>
    %305 = vector.multi_reduction <add>, %304, %cst_113 [1] : vector<16x32xf32> to vector<16xf32>
    %306 = vector.shape_cast %305 : vector<16xf32> to vector<16x1xf32>
    %cst_114 = arith.constant 3.200000e+01 : f32
    %307 = vector.broadcast %cst_114 : f32 to vector<16x1xf32>
    %308 = arith.divf %306, %307 : vector<16x1xf32>
    %309 = vector.broadcast %301 : vector<16x1xf32> to vector<16x32xf32>
    %310 = arith.subf %295, %309 : vector<16x32xf32>
    %cst_115 = arith.constant 9.99999974E-6 : f32
    %311 = vector.broadcast %cst_115 : f32 to vector<16x1xf32>
    %312 = arith.addf %308, %311 : vector<16x1xf32>
    %313 = math.rsqrt %312 : vector<16x1xf32>
    %314 = vector.broadcast %313 : vector<16x1xf32> to vector<16x32xf32>
    %315 = arith.mulf %310, %314 : vector<16x32xf32>
    %316 = vector.broadcast %296 : vector<1x32xf32> to vector<16x32xf32>
    %317 = arith.mulf %315, %316 : vector<16x32xf32>
    %318 = vector.broadcast %297 : vector<1x32xf32> to vector<16x32xf32>
    %319 = arith.addf %317, %318 : vector<16x32xf32>
    %c0_116 = arith.constant 0 : index
    %c0_117 = arith.constant 0 : index
    %c0_118 = arith.constant 0 : index
    %320 = vector.load %arg15[%c0_116, %c0_117, %c0_118] : memref<1x32x32xf32, #tpu.memory_space<vmem>>, vector<1x32x32xf32>
    %321 = vector.shape_cast %320 : vector<1x32x32xf32> to vector<32x32xf32>
    %cst_119 = arith.constant dense<0.000000e+00> : vector<16x32xf32>
    %322 = tpu.matmul %319, %321, %cst_119 {dimension_numbers = #tpu.dot_dimension_numbers<[1], [0], [0], [1], [0, 0, 1, 1], [], []>} : vector<16x32xf32>, vector<32x32xf32>, vector<16x32xf32> -> vector<16x32xf32>
    %c0_120 = arith.constant 0 : index
    %c0_121 = arith.constant 0 : index
    %323 = vector.load %arg16[%c0_120, %c0_121] : memref<1x32xf32, #tpu.memory_space<vmem>>, vector<1x32xf32>
    %324 = vector.broadcast %323 : vector<1x32xf32> to vector<16x32xf32>
    %325 = arith.addf %322, %324 : vector<16x32xf32>
    %cst_122 = arith.constant 0.000000e+00 : f32
    %326 = vector.broadcast %cst_122 : f32 to vector<16x32xf32>
    %327 = arith.maximumf %325, %326 : vector<16x32xf32>
    %c0_123 = arith.constant 0 : index
    %c0_124 = arith.constant 0 : index
    %c0_125 = arith.constant 0 : index
    %328 = vector.load %arg17[%c0_123, %c0_124, %c0_125] : memref<1x32x32xf32, #tpu.memory_space<vmem>>, vector<1x32x32xf32>
    %329 = vector.shape_cast %328 : vector<1x32x32xf32> to vector<32x32xf32>
    %cst_126 = arith.constant dense<0.000000e+00> : vector<16x32xf32>
    %330 = tpu.matmul %327, %329, %cst_126 {dimension_numbers = #tpu.dot_dimension_numbers<[1], [0], [0], [1], [0, 0, 1, 1], [], []>} : vector<16x32xf32>, vector<32x32xf32>, vector<16x32xf32> -> vector<16x32xf32>
    %c0_127 = arith.constant 0 : index
    %c0_128 = arith.constant 0 : index
    %331 = vector.load %arg18[%c0_127, %c0_128] : memref<1x32xf32, #tpu.memory_space<vmem>>, vector<1x32xf32>
    %332 = vector.broadcast %331 : vector<1x32xf32> to vector<16x32xf32>
    %333 = arith.addf %330, %332 : vector<16x32xf32>
    %334 = arith.addf %295, %333 : vector<16x32xf32>
    %c0_129 = arith.constant 0 : index
    %c0_130 = arith.constant 0 : index
    %c0_131 = arith.constant 0 : index
    %335 = vector.load %arg19[%c0_129, %c0_130, %c0_131] : memref<1x16x32xf32, #tpu.memory_space<vmem>>, vector<1x16x32xf32>
    %336 = vector.shape_cast %335 : vector<1x16x32xf32> to vector<16x32xf32>
    %337 = vector.shape_cast %334 : vector<16x32xf32> to vector<1x16x32xf32>
    tpu.vector_store %arg19[%c0_129, %c0_130, %c0_131], %337 {strides = array<i32>} : memref<1x16x32xf32, #tpu.memory_space<vmem>>, vector<1x16x32xf32>,
    return
  }
  func.func @transform_0(%arg0: i32) -> (i32, i32, i32) {
    %c0_i32 = arith.constant 0 : i32
    %c0_i32_0 = arith.constant 0 : i32
    %c0_i32_1 = arith.constant 0 : i32
    return %arg0, %c0_i32, %c0_i32_0 : i32, i32, i32
  }
  func.func @transform_1(%arg0: i32) -> (i32, i32) {
    %c0_i32 = arith.constant 0 : i32
    %c0_i32_0 = arith.constant 0 : i32
    %c0_i32_1 = arith.constant 0 : i32
    return %c0_i32, %c0_i32_0 : i32, i32
  }
  func.func @transform_2(%arg0: i32) -> (i32, i32, i32) {
    %c0_i32 = arith.constant 0 : i32
    %c0_i32_0 = arith.constant 0 : i32
    %c0_i32_1 = arith.constant 0 : i32
    return %arg0, %c0_i32, %c0_i32_0 : i32, i32, i32
  }
  func.func @transform_3(%arg0: i32) -> (i32, i32, i32) {
    %c0_i32 = arith.constant 0 : i32
    %c0_i32_0 = arith.constant 0 : i32
    %c0_i32_1 = arith.constant 0 : i32
    return %arg0, %c0_i32, %c0_i32_0 : i32, i32, i32
  }
  func.func @transform_4(%arg0: i32) -> (i32, i32) {
    %c0_i32 = arith.constant 0 : i32
    %c0_i32_0 = arith.constant 0 : i32
    %c0_i32_1 = arith.constant 0 : i32
    return %c0_i32, %c0_i32_0 : i32, i32
  }
  func.func @transform_5(%arg0: i32) -> (i32, i32) {
    %c0_i32 = arith.constant 0 : i32
    %c0_i32_0 = arith.constant 0 : i32
    %c0_i32_1 = arith.constant 0 : i32
    return %c0_i32, %c0_i32_0 : i32, i32
  }
  func.func @transform_6(%arg0: i32) -> (i32, i32, i32) {
    %c0_i32 = arith.constant 0 : i32
    %c0_i32_0 = arith.constant 0 : i32
    %c0_i32_1 = arith.constant 0 : i32
    %c0_i32_2 = arith.constant 0 : i32
    return %c0_i32, %c0_i32_0, %c0_i32_1 : i32, i32, i32
  }
  func.func @transform_7(%arg0: i32) -> (i32, i32) {
    %c0_i32 = arith.constant 0 : i32
    %c0_i32_0 = arith.constant 0 : i32
    %c0_i32_1 = arith.constant 0 : i32
    return %c0_i32, %c0_i32_0 : i32, i32
  }
  func.func @transform_8(%arg0: i32) -> (i32, i32, i32) {
    %c0_i32 = arith.constant 0 : i32
    %c0_i32_0 = arith.constant 0 : i32
    %c0_i32_1 = arith.constant 0 : i32
    %c0_i32_2 = arith.constant 0 : i32
    return %c0_i32, %c0_i32_0, %c0_i32_1 : i32, i32, i32
  }
  func.func @transform_9(%arg0: i32) -> (i32, i32) {
    %c0_i32 = arith.constant 0 : i32
    %c0_i32_0 = arith.constant 0 : i32
    %c0_i32_1 = arith.constant 0 : i32
    return %c0_i32, %c0_i32_0 : i32, i32
  }
  func.func @transform_10(%arg0: i32) -> (i32, i32, i32) {
    %c0_i32 = arith.constant 0 : i32
    %c0_i32_0 = arith.constant 0 : i32
    %c0_i32_1 = arith.constant 0 : i32
    %c0_i32_2 = arith.constant 0 : i32
    return %c0_i32, %c0_i32_0, %c0_i32_1 : i32, i32, i32
  }
  func.func @transform_11(%arg0: i32) -> (i32, i32) {
    %c0_i32 = arith.constant 0 : i32
    %c0_i32_0 = arith.constant 0 : i32
    %c0_i32_1 = arith.constant 0 : i32
    return %c0_i32, %c0_i32_0 : i32, i32
  }
  func.func @transform_12(%arg0: i32) -> (i32, i32, i32) {
    %c0_i32 = arith.constant 0 : i32
    %c0_i32_0 = arith.constant 0 : i32
    %c0_i32_1 = arith.constant 0 : i32
    %c0_i32_2 = arith.constant 0 : i32
    return %c0_i32, %c0_i32_0, %c0_i32_1 : i32, i32, i32
  }
  func.func @transform_13(%arg0: i32) -> (i32, i32) {
    %c0_i32 = arith.constant 0 : i32
    %c0_i32_0 = arith.constant 0 : i32
    %c0_i32_1 = arith.constant 0 : i32
    return %c0_i32, %c0_i32_0 : i32, i32
  }
  func.func @transform_14(%arg0: i32) -> (i32, i32, i32) {
    %c0_i32 = arith.constant 0 : i32
    %c0_i32_0 = arith.constant 0 : i32
    %c0_i32_1 = arith.constant 0 : i32
    %c0_i32_2 = arith.constant 0 : i32
    return %c0_i32, %c0_i32_0, %c0_i32_1 : i32, i32, i32
  }
  func.func @transform_15(%arg0: i32) -> (i32, i32) {
    %c0_i32 = arith.constant 0 : i32
    %c0_i32_0 = arith.constant 0 : i32
    %c0_i32_1 = arith.constant 0 : i32
    return %c0_i32, %c0_i32_0 : i32, i32
  }
  func.func @transform_16(%arg0: i32) -> (i32, i32, i32) {
    %c0_i32 = arith.constant 0 : i32
    %c0_i32_0 = arith.constant 0 : i32
    %c0_i32_1 = arith.constant 0 : i32
    %c0_i32_2 = arith.constant 0 : i32
    return %c0_i32, %c0_i32_0, %c0_i32_1 : i32, i32, i32
  }
  func.func @transform_17(%arg0: i32) -> (i32, i32) {
    %c0_i32 = arith.constant 0 : i32
    %c0_i32_0 = arith.constant 0 : i32
    %c0_i32_1 = arith.constant 0 : i32
    return %c0_i32, %c0_i32_0 : i32, i32
  }
  func.func @transform_18(%arg0: i32) -> (i32, i32, i32) {
    %c0_i32 = arith.constant 0 : i32
    %c0_i32_0 = arith.constant 0 : i32
    %c0_i32_1 = arith.constant 0 : i32
    return %arg0, %c0_i32, %c0_i32_0 : i32, i32, i32
  }
}

module attributes {stable_mosaic.version = 11 : i64} {
  func.func @_encoder_block_kernel(%arg0: i32, %arg1: memref<1x16x32xf32, #tpu.memory_space<vmem>>, %arg2: memref<16x32xf32, #tpu.memory_space<vmem>>, %arg3: memref<1x1x16xf32, #tpu.memory_space<vmem>>, %arg4: memref<1x16x1xf32, #tpu.memory_space<vmem>>, %arg5: memref<4x32xf32, #tpu.memory_space<vmem>>, %arg6: memref<4x32xf32, #tpu.memory_space<vmem>>, %arg7: memref<2x5x32xf32, #tpu.memory_space<vmem>>, %arg8: memref<2x32xf32, #tpu.memory_space<vmem>>, %arg9: memref<2x32x32xf32, #tpu.memory_space<vmem>>, %arg10: memref<2x32xf32, #tpu.memory_space<vmem>>, %arg11: memref<1x32x96xf32, #tpu.memory_space<vmem>>, %arg12: memref<1x96xf32, #tpu.memory_space<vmem>>, %arg13: memref<1x32x32xf32, #tpu.memory_space<vmem>>, %arg14: memref<1x32xf32, #tpu.memory_space<vmem>>, %arg15: memref<1x32x32xf32, #tpu.memory_space<vmem>>, %arg16: memref<1x32xf32, #tpu.memory_space<vmem>>, %arg17: memref<1x32x32xf32, #tpu.memory_space<vmem>>, %arg18: memref<1x32xf32, #tpu.memory_space<vmem>>, %arg19: memref<1x16x32xf32, #tpu.memory_space<vmem>>) attributes {dimension_semantics = [#tpu.dimension_semantics<parallel>], iteration_bounds = array<i64: 4>, scalar_prefetch = 0 : i64, scratch_operands = 0 : i64, tpu.core_type = #tpu.core_type<tc>, window_params = [{transform_indices = @transform_0, window_bounds = array<i64: 1, 16, 32>}, {pipeline_mode = #tpu.pipeline_mode<synchronous>, transform_indices = @transform_1, window_bounds = array<i64: 16, 32>}, {transform_indices = @transform_2, window_bounds = array<i64: 1, 1, 16>}, {transform_indices = @transform_3, window_bounds = array<i64: 1, 16, 1>}, {pipeline_mode = #tpu.pipeline_mode<synchronous>, transform_indices = @transform_4, window_bounds = array<i64: 4, 32>}, {pipeline_mode = #tpu.pipeline_mode<synchronous>, transform_indices = @transform_5, window_bounds = array<i64: 4, 32>}, {pipeline_mode = #tpu.pipeline_mode<synchronous>, transform_indices = @transform_6, window_bounds = array<i64: 2, 5, 32>}, {pipeline_mode = #tpu.pipeline_mode<synchronous>, transform_indices = @transform_7, window_bounds = array<i64: 2, 32>}, {pipeline_mode = #tpu.pipeline_mode<synchronous>, transform_indices = @transform_8, window_bounds = array<i64: 2, 32, 32>}, {pipeline_mode = #tpu.pipeline_mode<synchronous>, transform_indices = @transform_9, window_bounds = array<i64: 2, 32>}, {pipeline_mode = #tpu.pipeline_mode<synchronous>, transform_indices = @transform_10, window_bounds = array<i64: 1, 32, 96>}, {pipeline_mode = #tpu.pipeline_mode<synchronous>, transform_indices = @transform_11, window_bounds = array<i64: 1, 96>}, {pipeline_mode = #tpu.pipeline_mode<synchronous>, transform_indices = @transform_12, window_bounds = array<i64: 1, 32, 32>}, {pipeline_mode = #tpu.pipeline_mode<synchronous>, transform_indices = @transform_13, window_bounds = array<i64: 1, 32>}, {pipeline_mode = #tpu.pipeline_mode<synchronous>, transform_indices = @transform_14, window_bounds = array<i64: 1, 32, 32>}, {pipeline_mode = #tpu.pipeline_mode<synchronous>, transform_indices = @transform_15, window_bounds = array<i64: 1, 32>}, {pipeline_mode = #tpu.pipeline_mode<synchronous>, transform_indices = @transform_16, window_bounds = array<i64: 1, 32, 32>}, {pipeline_mode = #tpu.pipeline_mode<synchronous>, transform_indices = @transform_17, window_bounds = array<i64: 1, 32>}, {transform_indices = @transform_18, window_bounds = array<i64: 1, 16, 32>}]} {
    %c0 = arith.constant 0 : index
    %c0_0 = arith.constant 0 : index
    %c0_1 = arith.constant 0 : index
    %0 = vector.load %arg1[%c0, %c0_0, %c0_1] : memref<1x16x32xf32, #tpu.memory_space<vmem>>, vector<1x16x32xf32>
    %1 = vector.shape_cast %0 : vector<1x16x32xf32> to vector<16x32xf32>
    %c0_2 = arith.constant 0 : index
    %c0_3 = arith.constant 0 : index
    %2 = vector.load %arg2[%c0_2, %c0_3] : memref<16x32xf32, #tpu.memory_space<vmem>>, vector<16x32xf32>
    %c0_4 = arith.constant 0 : index
    %c0_5 = arith.constant 0 : index
    %c0_6 = arith.constant 0 : index
    %3 = vector.load %arg3[%c0_4, %c0_5, %c0_6] : memref<1x1x16xf32, #tpu.memory_space<vmem>>, vector<1x1x16xf32>
    %4 = vector.shape_cast %3 : vector<1x1x16xf32> to vector<1x16xf32>
    %c0_7 = arith.constant 0 : index
    %c0_8 = arith.constant 0 : index
    %c0_9 = arith.constant 0 : index
    %5 = vector.load %arg4[%c0_7, %c0_8, %c0_9] : memref<1x16x1xf32, #tpu.memory_space<vmem>>, vector<1x16x1xf32>
    %6 = vector.shape_cast %5 : vector<1x16x1xf32> to vector<16x1xf32>
    %cst = arith.constant 1.000000e+00 : f32
    %7 = vector.broadcast %cst : f32 to vector<1x16xf32>
    %8 = arith.subf %4, %7 : vector<1x16xf32>
    %cst_10 = arith.constant 1.000000e+30 : f32
    %9 = vector.broadcast %cst_10 : f32 to vector<1x16xf32>
    %10 = arith.mulf %8, %9 : vector<1x16xf32>
    %11 = tpu.iota {dimensions = array<i32: 0>} : vector<16x16xi32>
    %12 = tpu.iota {dimensions = array<i32: 1>} : vector<16x16xi32>
    %c-2_i32 = arith.constant -2 : i32
    %13 = vector.broadcast %c-2_i32 : i32 to vector<16x16xi32>
    %14 = arith.addi %11, %13 : vector<16x16xi32>
    %15 = arith.cmpi eq, %12, %14 : vector<16x16xi32>
    %16 = arith.extui %15 : vector<16x16xi1> to vector<16x16xi32>
    %17 = arith.sitofp %16 : vector<16x16xi32> to vector<16x16xf32>
    %c-1_i32 = arith.constant -1 : i32
    %18 = vector.broadcast %c-1_i32 : i32 to vector<16x16xi32>
    %19 = arith.addi %11, %18 : vector<16x16xi32>
    %20 = arith.cmpi eq, %12, %19 : vector<16x16xi32>
    %21 = arith.extui %20 : vector<16x16xi1> to vector<16x16xi32>
    %22 = arith.sitofp %21 : vector<16x16xi32> to vector<16x16xf32>
    %c0_i32 = arith.constant 0 : i32
    %23 = vector.broadcast %c0_i32 : i32 to vector<16x16xi32>
    %24 = arith.addi %11, %23 : vector<16x16xi32>
    %25 = arith.cmpi eq, %12, %24 : vector<16x16xi32>
    %26 = arith.extui %25 : vector<16x16xi1> to vector<16x16xi32>
    %27 = arith.sitofp %26 : vector<16x16xi32> to vector<16x16xf32>
    %c1_i32 = arith.constant 1 : i32
    %28 = vector.broadcast %c1_i32 : i32 to vector<16x16xi32>
    %29 = arith.addi %11, %28 : vector<16x16xi32>
    %30 = arith.cmpi eq, %12, %29 : vector<16x16xi32>
    %31 = arith.extui %30 : vector<16x16xi1> to vector<16x16xi32>
    %32 = arith.sitofp %31 : vector<16x16xi32> to vector<16x16xf32>
    %c2_i32 = arith.constant 2 : i32
    %33 = vector.broadcast %c2_i32 : i32 to vector<16x16xi32>
    %34 = arith.addi %11, %33 : vector<16x16xi32>
    %35 = arith.cmpi eq, %12, %34 : vector<16x16xi32>
    %36 = arith.extui %35 : vector<16x16xi1> to vector<16x16xi32>
    %37 = arith.sitofp %36 : vector<16x16xi32> to vector<16x16xf32>
    %38 = arith.addf %1, %2 : vector<16x32xf32>
    %c0_11 = arith.constant 0 : index
    %c0_12 = arith.constant 0 : index
    %39 = vector.load %arg5[%c0_11, %c0_12] : memref<4x32xf32, #tpu.memory_space<vmem>>, vector<1x32xf32>
    %c0_13 = arith.constant 0 : index
    %c0_14 = arith.constant 0 : index
    %40 = vector.load %arg6[%c0_13, %c0_14] : memref<4x32xf32, #tpu.memory_space<vmem>>, vector<1x32xf32>
    %cst_15 = arith.constant dense<0.000000e+00> : vector<16xf32>
    %41 = vector.multi_reduction <add>, %38, %cst_15 [1] : vector<16x32xf32> to vector<16xf32>
    %42 = vector.shape_cast %41 : vector<16xf32> to vector<16x1xf32>
    %cst_16 = arith.constant 3.200000e+01 : f32
    %43 = vector.broadcast %cst_16 : f32 to vector<16x1xf32>
    %44 = arith.divf %42, %43 : vector<16x1xf32>
    %45 = vector.broadcast %44 : vector<16x1xf32> to vector<16x32xf32>
    %46 = arith.subf %38, %45 : vector<16x32xf32>
    %47 = arith.mulf %46, %46 : vector<16x32xf32>
    %cst_17 = arith.constant dense<0.000000e+00> : vector<16xf32>
    %48 = vector.multi_reduction <add>, %47, %cst_17 [1] : vector<16x32xf32> to vector<16xf32>
    %49 = vector.shape_cast %48 : vector<16xf32> to vector<16x1xf32>
    %cst_18 = arith.constant 3.200000e+01 : f32
    %50 = vector.broadcast %cst_18 : f32 to vector<16x1xf32>
    %51 = arith.divf %49, %50 : vector<16x1xf32>
    %52 = vector.broadcast %44 : vector<16x1xf32> to vector<16x32xf32>
    %53 = arith.subf %38, %52 : vector<16x32xf32>
    %cst_19 = arith.constant 9.99999974E-6 : f32
    %54 = vector.broadcast %cst_19 : f32 to vector<16x1xf32>
    %55 = arith.addf %51, %54 : vector<16x1xf32>
    %56 = math.rsqrt %55 : vector<16x1xf32>
    %57 = vector.broadcast %56 : vector<16x1xf32> to vector<16x32xf32>
    %58 = arith.mulf %53, %57 : vector<16x32xf32>
    %59 = vector.broadcast %39 : vector<1x32xf32> to vector<16x32xf32>
    %60 = arith.mulf %58, %59 : vector<16x32xf32>
    %61 = vector.broadcast %40 : vector<1x32xf32> to vector<16x32xf32>
    %62 = arith.addf %60, %61 : vector<16x32xf32>
    %63 = vector.broadcast %6 : vector<16x1xf32> to vector<16x32xf32>
    %64 = arith.mulf %62, %63 : vector<16x32xf32>
    %c0_20 = arith.constant 0 : index
    %c0_21 = arith.constant 0 : index
    %c0_22 = arith.constant 0 : index
    %65 = vector.load %arg7[%c0_20, %c0_21, %c0_22] : memref<2x5x32xf32, #tpu.memory_space<vmem>>, vector<1x5x32xf32>
    %66 = vector.shape_cast %65 : vector<1x5x32xf32> to vector<5x32xf32>
    %cst_23 = arith.constant 0.000000e+00 : f32
    %67 = vector.broadcast %cst_23 : f32 to vector<16x32xf32>
    %cst_24 = arith.constant dense<0.000000e+00> : vector<16x32xf32>
    %68 = tpu.matmul %17, %64, %cst_24 {dimension_numbers = #tpu.dot_dimension_numbers<[1], [0], [0], [1], [0, 0, 1, 1], [], []>} : vector<16x16xf32>, vector<16x32xf32>, vector<16x32xf32> -> vector<16x32xf32>
    %69 = vector.extract_strided_slice %66 {offsets = [0, 0], sizes = [1, 32], strides = [1, 1]} : vector<5x32xf32> to vector<1x32xf32>
    %70 = vector.broadcast %69 : vector<1x32xf32> to vector<16x32xf32>
    %71 = arith.mulf %68, %70 : vector<16x32xf32>
    %72 = arith.addf %67, %71 : vector<16x32xf32>
    %cst_25 = arith.constant dense<0.000000e+00> : vector<16x32xf32>
    %73 = tpu.matmul %22, %64, %cst_25 {dimension_numbers = #tpu.dot_dimension_numbers<[1], [0], [0], [1], [0, 0, 1, 1], [], []>} : vector<16x16xf32>, vector<16x32xf32>, vector<16x32xf32> -> vector<16x32xf32>
    %74 = vector.extract_strided_slice %66 {offsets = [1, 0], sizes = [1, 32], strides = [1, 1]} : vector<5x32xf32> to vector<1x32xf32>
    %75 = vector.broadcast %74 : vector<1x32xf32> to vector<16x32xf32>
    %76 = arith.mulf %73, %75 : vector<16x32xf32>
    %77 = arith.addf %72, %76 : vector<16x32xf32>
    %cst_26 = arith.constant dense<0.000000e+00> : vector<16x32xf32>
    %78 = tpu.matmul %27, %64, %cst_26 {dimension_numbers = #tpu.dot_dimension_numbers<[1], [0], [0], [1], [0, 0, 1, 1], [], []>} : vector<16x16xf32>, vector<16x32xf32>, vector<16x32xf32> -> vector<16x32xf32>
    %79 = vector.extract_strided_slice %66 {offsets = [2, 0], sizes = [1, 32], strides = [1, 1]} : vector<5x32xf32> to vector<1x32xf32>
    %80 = vector.broadcast %79 : vector<1x32xf32> to vector<16x32xf32>
    %81 = arith.mulf %78, %80 : vector<16x32xf32>
    %82 = arith.addf %77, %81 : vector<16x32xf32>
    %cst_27 = arith.constant dense<0.000000e+00> : vector<16x32xf32>
    %83 = tpu.matmul %32, %64, %cst_27 {dimension_numbers = #tpu.dot_dimension_numbers<[1], [0], [0], [1], [0, 0, 1, 1], [], []>} : vector<16x16xf32>, vector<16x32xf32>, vector<16x32xf32> -> vector<16x32xf32>
    %84 = vector.extract_strided_slice %66 {offsets = [3, 0], sizes = [1, 32], strides = [1, 1]} : vector<5x32xf32> to vector<1x32xf32>
    %85 = vector.broadcast %84 : vector<1x32xf32> to vector<16x32xf32>
    %86 = arith.mulf %83, %85 : vector<16x32xf32>
    %87 = arith.addf %82, %86 : vector<16x32xf32>
    %cst_28 = arith.constant dense<0.000000e+00> : vector<16x32xf32>
    %88 = tpu.matmul %37, %64, %cst_28 {dimension_numbers = #tpu.dot_dimension_numbers<[1], [0], [0], [1], [0, 0, 1, 1], [], []>} : vector<16x16xf32>, vector<16x32xf32>, vector<16x32xf32> -> vector<16x32xf32>
    %89 = vector.extract_strided_slice %66 {offsets = [4, 0], sizes = [1, 32], strides = [1, 1]} : vector<5x32xf32> to vector<1x32xf32>
    %90 = vector.broadcast %89 : vector<1x32xf32> to vector<16x32xf32>
    %91 = arith.mulf %88, %90 : vector<16x32xf32>
    %92 = arith.addf %87, %91 : vector<16x32xf32>
    %c0_29 = arith.constant 0 : index
    %c0_30 = arith.constant 0 : index
    %93 = vector.load %arg8[%c0_29, %c0_30] : memref<2x32xf32, #tpu.memory_space<vmem>>, vector<1x32xf32>
    %94 = vector.broadcast %93 : vector<1x32xf32> to vector<16x32xf32>
    %95 = arith.addf %92, %94 : vector<16x32xf32>
    %c0_31 = arith.constant 0 : index
    %c0_32 = arith.constant 0 : index
    %c0_33 = arith.constant 0 : index
    %96 = vector.load %arg9[%c0_31, %c0_32, %c0_33] : memref<2x32x32xf32, #tpu.memory_space<vmem>>, vector<1x32x32xf32>
    %97 = vector.shape_cast %96 : vector<1x32x32xf32> to vector<32x32xf32>
    %cst_34 = arith.constant dense<0.000000e+00> : vector<16x32xf32>
    %98 = tpu.matmul %95, %97, %cst_34 {dimension_numbers = #tpu.dot_dimension_numbers<[1], [0], [0], [1], [0, 0, 1, 1], [], []>} : vector<16x32xf32>, vector<32x32xf32>, vector<16x32xf32> -> vector<16x32xf32>
    %c0_35 = arith.constant 0 : index
    %c0_36 = arith.constant 0 : index
    %99 = vector.load %arg10[%c0_35, %c0_36] : memref<2x32xf32, #tpu.memory_space<vmem>>, vector<1x32xf32>
    %100 = vector.broadcast %99 : vector<1x32xf32> to vector<16x32xf32>
    %101 = arith.addf %98, %100 : vector<16x32xf32>
    %cst_37 = arith.constant 0.000000e+00 : f32
    %102 = vector.broadcast %cst_37 : f32 to vector<16x32xf32>
    %103 = arith.maximumf %101, %102 : vector<16x32xf32>
    %104 = arith.addf %38, %103 : vector<16x32xf32>
    %c1 = arith.constant 1 : index
    %c0_38 = arith.constant 0 : index
    %105 = vector.load %arg5[%c1, %c0_38] : memref<4x32xf32, #tpu.memory_space<vmem>>, vector<1x32xf32>
    %c1_39 = arith.constant 1 : index
    %c0_40 = arith.constant 0 : index
    %106 = vector.load %arg6[%c1_39, %c0_40] : memref<4x32xf32, #tpu.memory_space<vmem>>, vector<1x32xf32>
    %cst_41 = arith.constant dense<0.000000e+00> : vector<16xf32>
    %107 = vector.multi_reduction <add>, %104, %cst_41 [1] : vector<16x32xf32> to vector<16xf32>
    %108 = vector.shape_cast %107 : vector<16xf32> to vector<16x1xf32>
    %cst_42 = arith.constant 3.200000e+01 : f32
    %109 = vector.broadcast %cst_42 : f32 to vector<16x1xf32>
    %110 = arith.divf %108, %109 : vector<16x1xf32>
    %111 = vector.broadcast %110 : vector<16x1xf32> to vector<16x32xf32>
    %112 = arith.subf %104, %111 : vector<16x32xf32>
    %113 = arith.mulf %112, %112 : vector<16x32xf32>
    %cst_43 = arith.constant dense<0.000000e+00> : vector<16xf32>
    %114 = vector.multi_reduction <add>, %113, %cst_43 [1] : vector<16x32xf32> to vector<16xf32>
    %115 = vector.shape_cast %114 : vector<16xf32> to vector<16x1xf32>
    %cst_44 = arith.constant 3.200000e+01 : f32
    %116 = vector.broadcast %cst_44 : f32 to vector<16x1xf32>
    %117 = arith.divf %115, %116 : vector<16x1xf32>
    %118 = vector.broadcast %110 : vector<16x1xf32> to vector<16x32xf32>
    %119 = arith.subf %104, %118 : vector<16x32xf32>
    %cst_45 = arith.constant 9.99999974E-6 : f32
    %120 = vector.broadcast %cst_45 : f32 to vector<16x1xf32>
    %121 = arith.addf %117, %120 : vector<16x1xf32>
    %122 = math.rsqrt %121 : vector<16x1xf32>
    %123 = vector.broadcast %122 : vector<16x1xf32> to vector<16x32xf32>
    %124 = arith.mulf %119, %123 : vector<16x32xf32>
    %125 = vector.broadcast %105 : vector<1x32xf32> to vector<16x32xf32>
    %126 = arith.mulf %124, %125 : vector<16x32xf32>
    %127 = vector.broadcast %106 : vector<1x32xf32> to vector<16x32xf32>
    %128 = arith.addf %126, %127 : vector<16x32xf32>
    %129 = vector.broadcast %6 : vector<16x1xf32> to vector<16x32xf32>
    %130 = arith.mulf %128, %129 : vector<16x32xf32>
    %c1_46 = arith.constant 1 : index
    %c0_47 = arith.constant 0 : index
    %c0_48 = arith.constant 0 : index
    %131 = vector.load %arg7[%c1_46, %c0_47, %c0_48] : memref<2x5x32xf32, #tpu.memory_space<vmem>>, vector<1x5x32xf32>
    %132 = vector.shape_cast %131 : vector<1x5x32xf32> to vector<5x32xf32>
    %cst_49 = arith.constant 0.000000e+00 : f32
    %133 = vector.broadcast %cst_49 : f32 to vector<16x32xf32>
    %cst_50 = arith.constant dense<0.000000e+00> : vector<16x32xf32>
    %134 = tpu.matmul %17, %130, %cst_50 {dimension_numbers = #tpu.dot_dimension_numbers<[1], [0], [0], [1], [0, 0, 1, 1], [], []>} : vector<16x16xf32>, vector<16x32xf32>, vector<16x32xf32> -> vector<16x32xf32>
    %135 = vector.extract_strided_slice %132 {offsets = [0, 0], sizes = [1, 32], strides = [1, 1]} : vector<5x32xf32> to vector<1x32xf32>
    %136 = vector.broadcast %135 : vector<1x32xf32> to vector<16x32xf32>
    %137 = arith.mulf %134, %136 : vector<16x32xf32>
    %138 = arith.addf %133, %137 : vector<16x32xf32>
    %cst_51 = arith.constant dense<0.000000e+00> : vector<16x32xf32>
    %139 = tpu.matmul %22, %130, %cst_51 {dimension_numbers = #tpu.dot_dimension_numbers<[1], [0], [0], [1], [0, 0, 1, 1], [], []>} : vector<16x16xf32>, vector<16x32xf32>, vector<16x32xf32> -> vector<16x32xf32>
    %140 = vector.extract_strided_slice %132 {offsets = [1, 0], sizes = [1, 32], strides = [1, 1]} : vector<5x32xf32> to vector<1x32xf32>
    %141 = vector.broadcast %140 : vector<1x32xf32> to vector<16x32xf32>
    %142 = arith.mulf %139, %141 : vector<16x32xf32>
    %143 = arith.addf %138, %142 : vector<16x32xf32>
    %cst_52 = arith.constant dense<0.000000e+00> : vector<16x32xf32>
    %144 = tpu.matmul %27, %130, %cst_52 {dimension_numbers = #tpu.dot_dimension_numbers<[1], [0], [0], [1], [0, 0, 1, 1], [], []>} : vector<16x16xf32>, vector<16x32xf32>, vector<16x32xf32> -> vector<16x32xf32>
    %145 = vector.extract_strided_slice %132 {offsets = [2, 0], sizes = [1, 32], strides = [1, 1]} : vector<5x32xf32> to vector<1x32xf32>
    %146 = vector.broadcast %145 : vector<1x32xf32> to vector<16x32xf32>
    %147 = arith.mulf %144, %146 : vector<16x32xf32>
    %148 = arith.addf %143, %147 : vector<16x32xf32>
    %cst_53 = arith.constant dense<0.000000e+00> : vector<16x32xf32>
    %149 = tpu.matmul %32, %130, %cst_53 {dimension_numbers = #tpu.dot_dimension_numbers<[1], [0], [0], [1], [0, 0, 1, 1], [], []>} : vector<16x16xf32>, vector<16x32xf32>, vector<16x32xf32> -> vector<16x32xf32>
    %150 = vector.extract_strided_slice %132 {offsets = [3, 0], sizes = [1, 32], strides = [1, 1]} : vector<5x32xf32> to vector<1x32xf32>
    %151 = vector.broadcast %150 : vector<1x32xf32> to vector<16x32xf32>
    %152 = arith.mulf %149, %151 : vector<16x32xf32>
    %153 = arith.addf %148, %152 : vector<16x32xf32>
    %cst_54 = arith.constant dense<0.000000e+00> : vector<16x32xf32>
    %154 = tpu.matmul %37, %130, %cst_54 {dimension_numbers = #tpu.dot_dimension_numbers<[1], [0], [0], [1], [0, 0, 1, 1], [], []>} : vector<16x16xf32>, vector<16x32xf32>, vector<16x32xf32> -> vector<16x32xf32>
    %155 = vector.extract_strided_slice %132 {offsets = [4, 0], sizes = [1, 32], strides = [1, 1]} : vector<5x32xf32> to vector<1x32xf32>
    %156 = vector.broadcast %155 : vector<1x32xf32> to vector<16x32xf32>
    %157 = arith.mulf %154, %156 : vector<16x32xf32>
    %158 = arith.addf %153, %157 : vector<16x32xf32>
    %c1_55 = arith.constant 1 : index
    %c0_56 = arith.constant 0 : index
    %159 = vector.load %arg8[%c1_55, %c0_56] : memref<2x32xf32, #tpu.memory_space<vmem>>, vector<1x32xf32>
    %160 = vector.broadcast %159 : vector<1x32xf32> to vector<16x32xf32>
    %161 = arith.addf %158, %160 : vector<16x32xf32>
    %c1_57 = arith.constant 1 : index
    %c0_58 = arith.constant 0 : index
    %c0_59 = arith.constant 0 : index
    %162 = vector.load %arg9[%c1_57, %c0_58, %c0_59] : memref<2x32x32xf32, #tpu.memory_space<vmem>>, vector<1x32x32xf32>
    %163 = vector.shape_cast %162 : vector<1x32x32xf32> to vector<32x32xf32>
    %cst_60 = arith.constant dense<0.000000e+00> : vector<16x32xf32>
    %164 = tpu.matmul %161, %163, %cst_60 {dimension_numbers = #tpu.dot_dimension_numbers<[1], [0], [0], [1], [0, 0, 1, 1], [], []>} : vector<16x32xf32>, vector<32x32xf32>, vector<16x32xf32> -> vector<16x32xf32>
    %c1_61 = arith.constant 1 : index
    %c0_62 = arith.constant 0 : index
    %165 = vector.load %arg10[%c1_61, %c0_62] : memref<2x32xf32, #tpu.memory_space<vmem>>, vector<1x32xf32>
    %166 = vector.broadcast %165 : vector<1x32xf32> to vector<16x32xf32>
    %167 = arith.addf %164, %166 : vector<16x32xf32>
    %cst_63 = arith.constant 0.000000e+00 : f32
    %168 = vector.broadcast %cst_63 : f32 to vector<16x32xf32>
    %169 = arith.maximumf %167, %168 : vector<16x32xf32>
    %170 = arith.addf %104, %169 : vector<16x32xf32>
    %c2 = arith.constant 2 : index
    %c0_64 = arith.constant 0 : index
    %171 = vector.load %arg5[%c2, %c0_64] : memref<4x32xf32, #tpu.memory_space<vmem>>, vector<1x32xf32>
    %c2_65 = arith.constant 2 : index
    %c0_66 = arith.constant 0 : index
    %172 = vector.load %arg6[%c2_65, %c0_66] : memref<4x32xf32, #tpu.memory_space<vmem>>, vector<1x32xf32>
    %cst_67 = arith.constant dense<0.000000e+00> : vector<16xf32>
    %173 = vector.multi_reduction <add>, %170, %cst_67 [1] : vector<16x32xf32> to vector<16xf32>
    %174 = vector.shape_cast %173 : vector<16xf32> to vector<16x1xf32>
    %cst_68 = arith.constant 3.200000e+01 : f32
    %175 = vector.broadcast %cst_68 : f32 to vector<16x1xf32>
    %176 = arith.divf %174, %175 : vector<16x1xf32>
    %177 = vector.broadcast %176 : vector<16x1xf32> to vector<16x32xf32>
    %178 = arith.subf %170, %177 : vector<16x32xf32>
    %179 = arith.mulf %178, %178 : vector<16x32xf32>
    %cst_69 = arith.constant dense<0.000000e+00> : vector<16xf32>
    %180 = vector.multi_reduction <add>, %179, %cst_69 [1] : vector<16x32xf32> to vector<16xf32>
    %181 = vector.shape_cast %180 : vector<16xf32> to vector<16x1xf32>
    %cst_70 = arith.constant 3.200000e+01 : f32
    %182 = vector.broadcast %cst_70 : f32 to vector<16x1xf32>
    %183 = arith.divf %181, %182 : vector<16x1xf32>
    %184 = vector.broadcast %176 : vector<16x1xf32> to vector<16x32xf32>
    %185 = arith.subf %170, %184 : vector<16x32xf32>
    %cst_71 = arith.constant 9.99999974E-6 : f32
    %186 = vector.broadcast %cst_71 : f32 to vector<16x1xf32>
    %187 = arith.addf %183, %186 : vector<16x1xf32>
    %188 = math.rsqrt %187 : vector<16x1xf32>
    %189 = vector.broadcast %188 : vector<16x1xf32> to vector<16x32xf32>
    %190 = arith.mulf %185, %189 : vector<16x32xf32>
    %191 = vector.broadcast %171 : vector<1x32xf32> to vector<16x32xf32>
    %192 = arith.mulf %190, %191 : vector<16x32xf32>
    %193 = vector.broadcast %172 : vector<1x32xf32> to vector<16x32xf32>
    %194 = arith.addf %192, %193 : vector<16x32xf32>
    %c0_72 = arith.constant 0 : index
    %c0_73 = arith.constant 0 : index
    %c0_74 = arith.constant 0 : index
    %195 = vector.load %arg11[%c0_72, %c0_73, %c0_74] : memref<1x32x96xf32, #tpu.memory_space<vmem>>, vector<1x32x96xf32>
    %196 = vector.shape_cast %195 : vector<1x32x96xf32> to vector<32x96xf32>
    %cst_75 = arith.constant dense<0.000000e+00> : vector<16x96xf32>
    %197 = tpu.matmul %194, %196, %cst_75 {dimension_numbers = #tpu.dot_dimension_numbers<[1], [0], [0], [1], [0, 0, 1, 1], [], []>} : vector<16x32xf32>, vector<32x96xf32>, vector<16x96xf32> -> vector<16x96xf32>
    %c0_76 = arith.constant 0 : index
    %c0_77 = arith.constant 0 : index
    %198 = vector.load %arg12[%c0_76, %c0_77] : memref<1x96xf32, #tpu.memory_space<vmem>>, vector<1x96xf32>
    %199 = vector.broadcast %198 : vector<1x96xf32> to vector<16x96xf32>
    %200 = arith.addf %197, %199 : vector<16x96xf32>
    %c0_78 = arith.constant 0 : index
    %c0_79 = arith.constant 0 : index
    %c0_80 = arith.constant 0 : index
    %201 = vector.load %arg13[%c0_78, %c0_79, %c0_80] : memref<1x32x32xf32, #tpu.memory_space<vmem>>, vector<1x32x32xf32>
    %202 = vector.shape_cast %201 : vector<1x32x32xf32> to vector<32x32xf32>
    %cst_81 = arith.constant 0.000000e+00 : f32
    %203 = vector.broadcast %cst_81 : f32 to vector<16x32xf32>
    %204 = vector.extract_strided_slice %200 {offsets = [0, 0], sizes = [16, 8], strides = [1, 1]} : vector<16x96xf32> to vector<16x8xf32>
    %205 = vector.extract_strided_slice %200 {offsets = [0, 32], sizes = [16, 8], strides = [1, 1]} : vector<16x96xf32> to vector<16x8xf32>
    %206 = vector.extract_strided_slice %200 {offsets = [0, 64], sizes = [16, 8], strides = [1, 1]} : vector<16x96xf32> to vector<16x8xf32>
    %cst_82 = arith.constant dense<0.000000e+00> : vector<16x16xf32>
    %207 = tpu.matmul %204, %205, %cst_82 {dimension_numbers = #tpu.dot_dimension_numbers<[1], [1], [0], [0], [0, 0, 1, 0], [], []>} : vector<16x8xf32>, vector<16x8xf32>, vector<16x16xf32> -> vector<16x16xf32>
    %cst_83 = arith.constant 0.353553385 : f32
    %208 = vector.broadcast %cst_83 : f32 to vector<16x16xf32>
    %209 = arith.mulf %207, %208 : vector<16x16xf32>
    %210 = vector.broadcast %10 : vector<1x16xf32> to vector<16x16xf32>
    %211 = arith.addf %209, %210 : vector<16x16xf32>
    %cst_84 = arith.constant dense<0xFF800000> : vector<16xf32>
    %212 = vector.multi_reduction <maximumf>, %211, %cst_84 [1] : vector<16x16xf32> to vector<16xf32>
    %213 = vector.shape_cast %212 : vector<16xf32> to vector<16x1xf32>
    %214 = vector.broadcast %213 : vector<16x1xf32> to vector<16x16xf32>
    %215 = arith.subf %211, %214 : vector<16x16xf32>
    %216 = math.exp %215 : vector<16x16xf32>
    %cst_85 = arith.constant dense<0.000000e+00> : vector<16xf32>
    %217 = vector.multi_reduction <add>, %216, %cst_85 [1] : vector<16x16xf32> to vector<16xf32>
    %218 = vector.shape_cast %217 : vector<16xf32> to vector<16x1xf32>
    %219 = tpu.reciprocal %218 {approx = true} : vector<16x1xf32> -> vector<16x1xf32>
    %220 = vector.broadcast %219 : vector<16x1xf32> to vector<16x16xf32>
    %221 = arith.mulf %216, %220 : vector<16x16xf32>
    %cst_86 = arith.constant dense<0.000000e+00> : vector<16x8xf32>
    %222 = tpu.matmul %221, %206, %cst_86 {dimension_numbers = #tpu.dot_dimension_numbers<[1], [0], [0], [1], [0, 0, 1, 1], [], []>} : vector<16x16xf32>, vector<16x8xf32>, vector<16x8xf32> -> vector<16x8xf32>
    %223 = vector.extract_strided_slice %202 {offsets = [0, 0], sizes = [8, 32], strides = [1, 1]} : vector<32x32xf32> to vector<8x32xf32>
    %cst_87 = arith.constant dense<0.000000e+00> : vector<16x32xf32>
    %224 = tpu.matmul %222, %223, %cst_87 {dimension_numbers = #tpu.dot_dimension_numbers<[1], [0], [0], [1], [0, 0, 1, 1], [], []>} : vector<16x8xf32>, vector<8x32xf32>, vector<16x32xf32> -> vector<16x32xf32>
    %225 = arith.addf %203, %224 : vector<16x32xf32>
    %226 = vector.extract_strided_slice %200 {offsets = [0, 8], sizes = [16, 8], strides = [1, 1]} : vector<16x96xf32> to vector<16x8xf32>
    %227 = vector.extract_strided_slice %200 {offsets = [0, 40], sizes = [16, 8], strides = [1, 1]} : vector<16x96xf32> to vector<16x8xf32>
    %228 = vector.extract_strided_slice %200 {offsets = [0, 72], sizes = [16, 8], strides = [1, 1]} : vector<16x96xf32> to vector<16x8xf32>
    %cst_88 = arith.constant dense<0.000000e+00> : vector<16x16xf32>
    %229 = tpu.matmul %226, %227, %cst_88 {dimension_numbers = #tpu.dot_dimension_numbers<[1], [1], [0], [0], [0, 0, 1, 0], [], []>} : vector<16x8xf32>, vector<16x8xf32>, vector<16x16xf32> -> vector<16x16xf32>
    %cst_89 = arith.constant 0.353553385 : f32
    %230 = vector.broadcast %cst_89 : f32 to vector<16x16xf32>
    %231 = arith.mulf %229, %230 : vector<16x16xf32>
    %232 = vector.broadcast %10 : vector<1x16xf32> to vector<16x16xf32>
    %233 = arith.addf %231, %232 : vector<16x16xf32>
    %cst_90 = arith.constant dense<0xFF800000> : vector<16xf32>
    %234 = vector.multi_reduction <maximumf>, %233, %cst_90 [1] : vector<16x16xf32> to vector<16xf32>
    %235 = vector.shape_cast %234 : vector<16xf32> to vector<16x1xf32>
    %236 = vector.broadcast %235 : vector<16x1xf32> to vector<16x16xf32>
    %237 = arith.subf %233, %236 : vector<16x16xf32>
    %238 = math.exp %237 : vector<16x16xf32>
    %cst_91 = arith.constant dense<0.000000e+00> : vector<16xf32>
    %239 = vector.multi_reduction <add>, %238, %cst_91 [1] : vector<16x16xf32> to vector<16xf32>
    %240 = vector.shape_cast %239 : vector<16xf32> to vector<16x1xf32>
    %241 = tpu.reciprocal %240 {approx = true} : vector<16x1xf32> -> vector<16x1xf32>
    %242 = vector.broadcast %241 : vector<16x1xf32> to vector<16x16xf32>
    %243 = arith.mulf %238, %242 : vector<16x16xf32>
    %cst_92 = arith.constant dense<0.000000e+00> : vector<16x8xf32>
    %244 = tpu.matmul %243, %228, %cst_92 {dimension_numbers = #tpu.dot_dimension_numbers<[1], [0], [0], [1], [0, 0, 1, 1], [], []>} : vector<16x16xf32>, vector<16x8xf32>, vector<16x8xf32> -> vector<16x8xf32>
    %245 = vector.extract_strided_slice %202 {offsets = [8, 0], sizes = [8, 32], strides = [1, 1]} : vector<32x32xf32> to vector<8x32xf32>
    %cst_93 = arith.constant dense<0.000000e+00> : vector<16x32xf32>
    %246 = tpu.matmul %244, %245, %cst_93 {dimension_numbers = #tpu.dot_dimension_numbers<[1], [0], [0], [1], [0, 0, 1, 1], [], []>} : vector<16x8xf32>, vector<8x32xf32>, vector<16x32xf32> -> vector<16x32xf32>
    %247 = arith.addf %225, %246 : vector<16x32xf32>
    %248 = vector.extract_strided_slice %200 {offsets = [0, 16], sizes = [16, 8], strides = [1, 1]} : vector<16x96xf32> to vector<16x8xf32>
    %249 = vector.extract_strided_slice %200 {offsets = [0, 48], sizes = [16, 8], strides = [1, 1]} : vector<16x96xf32> to vector<16x8xf32>
    %250 = vector.extract_strided_slice %200 {offsets = [0, 80], sizes = [16, 8], strides = [1, 1]} : vector<16x96xf32> to vector<16x8xf32>
    %cst_94 = arith.constant dense<0.000000e+00> : vector<16x16xf32>
    %251 = tpu.matmul %248, %249, %cst_94 {dimension_numbers = #tpu.dot_dimension_numbers<[1], [1], [0], [0], [0, 0, 1, 0], [], []>} : vector<16x8xf32>, vector<16x8xf32>, vector<16x16xf32> -> vector<16x16xf32>
    %cst_95 = arith.constant 0.353553385 : f32
    %252 = vector.broadcast %cst_95 : f32 to vector<16x16xf32>
    %253 = arith.mulf %251, %252 : vector<16x16xf32>
    %254 = vector.broadcast %10 : vector<1x16xf32> to vector<16x16xf32>
    %255 = arith.addf %253, %254 : vector<16x16xf32>
    %cst_96 = arith.constant dense<0xFF800000> : vector<16xf32>
    %256 = vector.multi_reduction <maximumf>, %255, %cst_96 [1] : vector<16x16xf32> to vector<16xf32>
    %257 = vector.shape_cast %256 : vector<16xf32> to vector<16x1xf32>
    %258 = vector.broadcast %257 : vector<16x1xf32> to vector<16x16xf32>
    %259 = arith.subf %255, %258 : vector<16x16xf32>
    %260 = math.exp %259 : vector<16x16xf32>
    %cst_97 = arith.constant dense<0.000000e+00> : vector<16xf32>
    %261 = vector.multi_reduction <add>, %260, %cst_97 [1] : vector<16x16xf32> to vector<16xf32>
    %262 = vector.shape_cast %261 : vector<16xf32> to vector<16x1xf32>
    %263 = tpu.reciprocal %262 {approx = true} : vector<16x1xf32> -> vector<16x1xf32>
    %264 = vector.broadcast %263 : vector<16x1xf32> to vector<16x16xf32>
    %265 = arith.mulf %260, %264 : vector<16x16xf32>
    %cst_98 = arith.constant dense<0.000000e+00> : vector<16x8xf32>
    %266 = tpu.matmul %265, %250, %cst_98 {dimension_numbers = #tpu.dot_dimension_numbers<[1], [0], [0], [1], [0, 0, 1, 1], [], []>} : vector<16x16xf32>, vector<16x8xf32>, vector<16x8xf32> -> vector<16x8xf32>
    %267 = vector.extract_strided_slice %202 {offsets = [16, 0], sizes = [8, 32], strides = [1, 1]} : vector<32x32xf32> to vector<8x32xf32>
    %cst_99 = arith.constant dense<0.000000e+00> : vector<16x32xf32>
    %268 = tpu.matmul %266, %267, %cst_99 {dimension_numbers = #tpu.dot_dimension_numbers<[1], [0], [0], [1], [0, 0, 1, 1], [], []>} : vector<16x8xf32>, vector<8x32xf32>, vector<16x32xf32> -> vector<16x32xf32>
    %269 = arith.addf %247, %268 : vector<16x32xf32>
    %270 = vector.extract_strided_slice %200 {offsets = [0, 24], sizes = [16, 8], strides = [1, 1]} : vector<16x96xf32> to vector<16x8xf32>
    %271 = vector.extract_strided_slice %200 {offsets = [0, 56], sizes = [16, 8], strides = [1, 1]} : vector<16x96xf32> to vector<16x8xf32>
    %272 = vector.extract_strided_slice %200 {offsets = [0, 88], sizes = [16, 8], strides = [1, 1]} : vector<16x96xf32> to vector<16x8xf32>
    %cst_100 = arith.constant dense<0.000000e+00> : vector<16x16xf32>
    %273 = tpu.matmul %270, %271, %cst_100 {dimension_numbers = #tpu.dot_dimension_numbers<[1], [1], [0], [0], [0, 0, 1, 0], [], []>} : vector<16x8xf32>, vector<16x8xf32>, vector<16x16xf32> -> vector<16x16xf32>
    %cst_101 = arith.constant 0.353553385 : f32
    %274 = vector.broadcast %cst_101 : f32 to vector<16x16xf32>
    %275 = arith.mulf %273, %274 : vector<16x16xf32>
    %276 = vector.broadcast %10 : vector<1x16xf32> to vector<16x16xf32>
    %277 = arith.addf %275, %276 : vector<16x16xf32>
    %cst_102 = arith.constant dense<0xFF800000> : vector<16xf32>
    %278 = vector.multi_reduction <maximumf>, %277, %cst_102 [1] : vector<16x16xf32> to vector<16xf32>
    %279 = vector.shape_cast %278 : vector<16xf32> to vector<16x1xf32>
    %280 = vector.broadcast %279 : vector<16x1xf32> to vector<16x16xf32>
    %281 = arith.subf %277, %280 : vector<16x16xf32>
    %282 = math.exp %281 : vector<16x16xf32>
    %cst_103 = arith.constant dense<0.000000e+00> : vector<16xf32>
    %283 = vector.multi_reduction <add>, %282, %cst_103 [1] : vector<16x16xf32> to vector<16xf32>
    %284 = vector.shape_cast %283 : vector<16xf32> to vector<16x1xf32>
    %285 = tpu.reciprocal %284 {approx = true} : vector<16x1xf32> -> vector<16x1xf32>
    %286 = vector.broadcast %285 : vector<16x1xf32> to vector<16x16xf32>
    %287 = arith.mulf %282, %286 : vector<16x16xf32>
    %cst_104 = arith.constant dense<0.000000e+00> : vector<16x8xf32>
    %288 = tpu.matmul %287, %272, %cst_104 {dimension_numbers = #tpu.dot_dimension_numbers<[1], [0], [0], [1], [0, 0, 1, 1], [], []>} : vector<16x16xf32>, vector<16x8xf32>, vector<16x8xf32> -> vector<16x8xf32>
    %289 = vector.extract_strided_slice %202 {offsets = [24, 0], sizes = [8, 32], strides = [1, 1]} : vector<32x32xf32> to vector<8x32xf32>
    %cst_105 = arith.constant dense<0.000000e+00> : vector<16x32xf32>
    %290 = tpu.matmul %288, %289, %cst_105 {dimension_numbers = #tpu.dot_dimension_numbers<[1], [0], [0], [1], [0, 0, 1, 1], [], []>} : vector<16x8xf32>, vector<8x32xf32>, vector<16x32xf32> -> vector<16x32xf32>
    %291 = arith.addf %269, %290 : vector<16x32xf32>
    %292 = arith.addf %170, %291 : vector<16x32xf32>
    %c0_106 = arith.constant 0 : index
    %c0_107 = arith.constant 0 : index
    %293 = vector.load %arg14[%c0_106, %c0_107] : memref<1x32xf32, #tpu.memory_space<vmem>>, vector<1x32xf32>
    %294 = vector.broadcast %293 : vector<1x32xf32> to vector<16x32xf32>
    %295 = arith.addf %292, %294 : vector<16x32xf32>
    %c3 = arith.constant 3 : index
    %c0_108 = arith.constant 0 : index
    %296 = vector.load %arg5[%c3, %c0_108] : memref<4x32xf32, #tpu.memory_space<vmem>>, vector<1x32xf32>
    %c3_109 = arith.constant 3 : index
    %c0_110 = arith.constant 0 : index
    %297 = vector.load %arg6[%c3_109, %c0_110] : memref<4x32xf32, #tpu.memory_space<vmem>>, vector<1x32xf32>
    %cst_111 = arith.constant dense<0.000000e+00> : vector<16xf32>
    %298 = vector.multi_reduction <add>, %295, %cst_111 [1] : vector<16x32xf32> to vector<16xf32>
    %299 = vector.shape_cast %298 : vector<16xf32> to vector<16x1xf32>
    %cst_112 = arith.constant 3.200000e+01 : f32
    %300 = vector.broadcast %cst_112 : f32 to vector<16x1xf32>
    %301 = arith.divf %299, %300 : vector<16x1xf32>
    %302 = vector.broadcast %301 : vector<16x1xf32> to vector<16x32xf32>
    %303 = arith.subf %295, %302 : vector<16x32xf32>
    %304 = arith.mulf %303, %303 : vector<16x32xf32>
    %cst_113 = arith.constant dense<0.000000e+00> : vector<16xf32>
    %305 = vector.multi_reduction <add>, %304, %cst_113 [1] : vector<16x32xf32> to vector<16xf32>
    %306 = vector.shape_cast %305 : vector<16xf32> to vector<16x1xf32>
    %cst_114 = arith.constant 3.200000e+01 : f32
    %307 = vector.broadcast %cst_114 : f32 to vector<16x1xf32>
    %308 = arith.divf %306, %307 : vector<16x1xf32>
    %309 = vector.broadcast %301 : vector<16x1xf32> to vector<16x32xf32>
    %310 = arith.subf %295, %309 : vector<16x32xf32>
    %cst_115 = arith.constant 9.99999974E-6 : f32
    %311 = vector.broadcast %cst_115 : f32 to vector<16x1xf32>
    %312 = arith.addf %308, %311 : vector<16x1xf32>
    %313 = math.rsqrt %312 : vector<16x1xf32>
    %314 = vector.broadcast %313 : vector<16x1xf32> to vector<16x32xf32>
    %315 = arith.mulf %310, %314 : vector<16x32xf32>
    %316 = vector.broadcast %296 : vector<1x32xf32> to vector<16x32xf32>
    %317 = arith.mulf %315, %316 : vector<16x32xf32>
    %318 = vector.broadcast %297 : vector<1x32xf32> to vector<16x32xf32>
    %319 = arith.addf %317, %318 : vector<16x32xf32>
    %c0_116 = arith.constant 0 : index
    %c0_117 = arith.constant 0 : index
    %c0_118 = arith.constant 0 : index
    %320 = vector.load %arg15[%c0_116, %c0_117, %c0_118] : memref<1x32x32xf32, #tpu.memory_space<vmem>>, vector<1x32x32xf32>
    %321 = vector.shape_cast %320 : vector<1x32x32xf32> to vector<32x32xf32>
    %cst_119 = arith.constant dense<0.000000e+00> : vector<16x32xf32>
    %322 = tpu.matmul %319, %321, %cst_119 {dimension_numbers = #tpu.dot_dimension_numbers<[1], [0], [0], [1], [0, 0, 1, 1], [], []>} : vector<16x32xf32>, vector<32x32xf32>, vector<16x32xf32> -> vector<16x32xf32>
    %c0_120 = arith.constant 0 : index
    %c0_121 = arith.constant 0 : index
    %323 = vector.load %arg16[%c0_120, %c0_121] : memref<1x32xf32, #tpu.memory_space<vmem>>, vector<1x32xf32>
    %324 = vector.broadcast %323 : vector<1x32xf32> to vector<16x32xf32>
    %325 = arith.addf %322, %324 : vector<16x32xf32>
    %cst_122 = arith.constant 0.000000e+00 : f32
    %326 = vector.broadcast %cst_122 : f32 to vector<16x32xf32>
    %327 = arith.maximumf %325, %326 : vector<16x32xf32>
    %c0_123 = arith.constant 0 : index
    %c0_124 = arith.constant 0 : index
    %c0_125 = arith.constant 0 : index
    %328 = vector.load %arg17[%c0_123, %c0_124, %c0_125] : memref<1x32x32xf32, #tpu.memory_space<vmem>>, vector<1x32x32xf32>
    %329 = vector.shape_cast %328 : vector<1x32x32xf32> to vector<32x32xf32>
    %cst_126 = arith.constant dense<0.000000e+00> : vector<16x32xf32>
    %330 = tpu.matmul %327, %329, %cst_126 {dimension_numbers = #tpu.dot_dimension_numbers<[1], [0], [0], [1], [0, 0, 1, 1], [], []>} : vector<16x32xf32>, vector<32x32xf32>, vector<16x32xf32> -> vector<16x32xf32>
    %c0_127 = arith.constant 0 : index
    %c0_128 = arith.constant 0 : index
    %331 = vector.load %arg18[%c0_127, %c0_128] : memref<1x32xf32, #tpu.memory_space<vmem>>, vector<1x32xf32>
    %332 = vector.broadcast %331 : vector<1x32xf32> to vector<16x32xf32>
    %333 = arith.addf %330, %332 : vector<16x32xf32>
    %334 = arith.addf %295, %333 : vector<16x32xf32>
    %c0_129 = arith.constant 0 : index
    %c0_130 = arith.constant 0 : index
    %c0_131 = arith.constant 0 : index
    %335 = vector.load %arg19[%c0_129, %c0_130, %c0_131] : memref<1x16x32xf32, #tpu.memory_space<vmem>>, vector<1x16x32xf32>
    %336 = vector.shape_cast %335 : vector<1x16x32xf32> to vector<16x32xf32>
    %337 = vector.shape_cast %334 : vector<16x32xf32> to vector<1x16x32xf32>
    tpu.vector_store %arg19[%c0_129, %c0_130, %c0_131], %337 {strides = array<i32>} : memref<1x16x32xf32, #tpu.memory_space<vmem>>, vector<1x16x32xf32>,
    return
  }
  func.func @transform_0(%arg0: i32) -> (i32, i32, i32) {
    %c0_i32 = arith.constant 0 : i32
    %c0_i32_0 = arith.constant 0 : i32
    %c0_i32_1 = arith.constant 0 : i32
    return %arg0, %c0_i32, %c0_i32_0 : i32, i32, i32
  }
  func.func @transform_1(%arg0: i32) -> (i32, i32) {
    %c0_i32 = arith.constant 0 : i32
    %c0_i32_0 = arith.constant 0 : i32
    %c0_i32_1 = arith.constant 0 : i32
    return %c0_i32, %c0_i32_0 : i32, i32
  }
  func.func @transform_2(%arg0: i32) -> (i32, i32, i32) {
    %c0_i32 = arith.constant 0 : i32
    %c0_i32_0 = arith.constant 0 : i32
    %c0_i32_1 = arith.constant 0 : i32
    return %arg0, %c0_i32, %c0_i32_0 : i32, i32, i32
  }
  func.func @transform_3(%arg0: i32) -> (i32, i32, i32) {
    %c0_i32 = arith.constant 0 : i32
    %c0_i32_0 = arith.constant 0 : i32
    %c0_i32_1 = arith.constant 0 : i32
    return %arg0, %c0_i32, %c0_i32_0 : i32, i32, i32
  }
  func.func @transform_4(%arg0: i32) -> (i32, i32) {
    %c0_i32 = arith.constant 0 : i32
    %c0_i32_0 = arith.constant 0 : i32
    %c0_i32_1 = arith.constant 0 : i32
    return %c0_i32, %c0_i32_0 : i32, i32
  }
  func.func @transform_5(%arg0: i32) -> (i32, i32) {
    %c0_i32 = arith.constant 0 : i32
    %c0_i32_0 = arith.constant 0 : i32
    %c0_i32_1 = arith.constant 0 : i32
    return %c0_i32, %c0_i32_0 : i32, i32
  }
  func.func @transform_6(%arg0: i32) -> (i32, i32, i32) {
    %c0_i32 = arith.constant 0 : i32
    %c0_i32_0 = arith.constant 0 : i32
    %c0_i32_1 = arith.constant 0 : i32
    %c0_i32_2 = arith.constant 0 : i32
    return %c0_i32, %c0_i32_0, %c0_i32_1 : i32, i32, i32
  }
  func.func @transform_7(%arg0: i32) -> (i32, i32) {
    %c0_i32 = arith.constant 0 : i32
    %c0_i32_0 = arith.constant 0 : i32
    %c0_i32_1 = arith.constant 0 : i32
    return %c0_i32, %c0_i32_0 : i32, i32
  }
  func.func @transform_8(%arg0: i32) -> (i32, i32, i32) {
    %c0_i32 = arith.constant 0 : i32
    %c0_i32_0 = arith.constant 0 : i32
    %c0_i32_1 = arith.constant 0 : i32
    %c0_i32_2 = arith.constant 0 : i32
    return %c0_i32, %c0_i32_0, %c0_i32_1 : i32, i32, i32
  }
  func.func @transform_9(%arg0: i32) -> (i32, i32) {
    %c0_i32 = arith.constant 0 : i32
    %c0_i32_0 = arith.constant 0 : i32
    %c0_i32_1 = arith.constant 0 : i32
    return %c0_i32, %c0_i32_0 : i32, i32
  }
  func.func @transform_10(%arg0: i32) -> (i32, i32, i32) {
    %c0_i32 = arith.constant 0 : i32
    %c0_i32_0 = arith.constant 0 : i32
    %c0_i32_1 = arith.constant 0 : i32
    %c0_i32_2 = arith.constant 0 : i32
    return %c0_i32, %c0_i32_0, %c0_i32_1 : i32, i32, i32
  }
  func.func @transform_11(%arg0: i32) -> (i32, i32) {
    %c0_i32 = arith.constant 0 : i32
    %c0_i32_0 = arith.constant 0 : i32
    %c0_i32_1 = arith.constant 0 : i32
    return %c0_i32, %c0_i32_0 : i32, i32
  }
  func.func @transform_12(%arg0: i32) -> (i32, i32, i32) {
    %c0_i32 = arith.constant 0 : i32
    %c0_i32_0 = arith.constant 0 : i32
    %c0_i32_1 = arith.constant 0 : i32
    %c0_i32_2 = arith.constant 0 : i32
    return %c0_i32, %c0_i32_0, %c0_i32_1 : i32, i32, i32
  }
  func.func @transform_13(%arg0: i32) -> (i32, i32) {
    %c0_i32 = arith.constant 0 : i32
    %c0_i32_0 = arith.constant 0 : i32
    %c0_i32_1 = arith.constant 0 : i32
    return %c0_i32, %c0_i32_0 : i32, i32
  }
  func.func @transform_14(%arg0: i32) -> (i32, i32, i32) {
    %c0_i32 = arith.constant 0 : i32
    %c0_i32_0 = arith.constant 0 : i32
    %c0_i32_1 = arith.constant 0 : i32
    %c0_i32_2 = arith.constant 0 : i32
    return %c0_i32, %c0_i32_0, %c0_i32_1 : i32, i32, i32
  }
  func.func @transform_15(%arg0: i32) -> (i32, i32) {
    %c0_i32 = arith.constant 0 : i32
    %c0_i32_0 = arith.constant 0 : i32
    %c0_i32_1 = arith.constant 0 : i32
    return %c0_i32, %c0_i32_0 : i32, i32
  }
  func.func @transform_16(%arg0: i32) -> (i32, i32, i32) {
    %c0_i32 = arith.constant 0 : i32
    %c0_i32_0 = arith.constant 0 : i32
    %c0_i32_1 = arith.constant 0 : i32
    %c0_i32_2 = arith.constant 0 : i32
    return %c0_i32, %c0_i32_0, %c0_i32_1 : i32, i32, i32
  }
  func.func @transform_17(%arg0: i32) -> (i32, i32) {
    %c0_i32 = arith.constant 0 : i32
    %c0_i32_0 = arith.constant 0 : i32
    %c0_i32_1 = arith.constant 0 : i32
    return %c0_i32, %c0_i32_0 : i32, i32
  }
  func.func @transform_18(%arg0: i32) -> (i32, i32, i32) {
    %c0_i32 = arith.constant 0 : i32
    %c0_i32_0 = arith.constant 0 : i32
    %c0_i32_1 = arith.constant 0 : i32
    return %arg0, %c0_i32, %c0_i32_0 : i32, i32, i32
  }
}

module attributes {stable_mosaic.version = 11 : i64} {
  func.func @_bidaf_kernel(%arg0: i32, %arg1: memref<1x16x32xf32, #tpu.memory_space<vmem>>, %arg2: memref<1x8x32xf32, #tpu.memory_space<vmem>>, %arg3: memref<1x16x1xf32, #tpu.memory_space<vmem>>, %arg4: memref<1x1x8xf32, #tpu.memory_space<vmem>>, %arg5: memref<32x1xf32, #tpu.memory_space<vmem>>, %arg6: memref<32x1xf32, #tpu.memory_space<vmem>>, %arg7: memref<1x32xf32, #tpu.memory_space<vmem>>, %arg8: memref<1x1xf32, #tpu.memory_space<vmem>>, %arg9: memref<128x32xf32, #tpu.memory_space<vmem>>, %arg10: memref<1x32xf32, #tpu.memory_space<vmem>>, %arg11: memref<1x16x32xf32, #tpu.memory_space<vmem>>) attributes {dimension_semantics = [#tpu.dimension_semantics<parallel>], iteration_bounds = array<i64: 2>, scalar_prefetch = 0 : i64, scratch_operands = 0 : i64, tpu.core_type = #tpu.core_type<tc>, window_params = [{transform_indices = @transform_0, window_bounds = array<i64: 1, 16, 32>}, {transform_indices = @transform_1, window_bounds = array<i64: 1, 8, 32>}, {transform_indices = @transform_2, window_bounds = array<i64: 1, 16, 1>}, {transform_indices = @transform_3, window_bounds = array<i64: 1, 1, 8>}, {pipeline_mode = #tpu.pipeline_mode<synchronous>, transform_indices = @transform_4, window_bounds = array<i64: 32, 1>}, {pipeline_mode = #tpu.pipeline_mode<synchronous>, transform_indices = @transform_5, window_bounds = array<i64: 32, 1>}, {pipeline_mode = #tpu.pipeline_mode<synchronous>, transform_indices = @transform_6, window_bounds = array<i64: 1, 32>}, {pipeline_mode = #tpu.pipeline_mode<synchronous>, transform_indices = @transform_7, window_bounds = array<i64: 1, 1>}, {pipeline_mode = #tpu.pipeline_mode<synchronous>, transform_indices = @transform_8, window_bounds = array<i64: 128, 32>}, {pipeline_mode = #tpu.pipeline_mode<synchronous>, transform_indices = @transform_9, window_bounds = array<i64: 1, 32>}, {transform_indices = @transform_10, window_bounds = array<i64: 1, 16, 32>}]} {
    %c0 = arith.constant 0 : index
    %c0_0 = arith.constant 0 : index
    %c0_1 = arith.constant 0 : index
    %0 = vector.load %arg1[%c0, %c0_0, %c0_1] : memref<1x16x32xf32, #tpu.memory_space<vmem>>, vector<1x16x32xf32>
    %1 = vector.shape_cast %0 : vector<1x16x32xf32> to vector<16x32xf32>
    %c0_2 = arith.constant 0 : index
    %c0_3 = arith.constant 0 : index
    %c0_4 = arith.constant 0 : index
    %2 = vector.load %arg2[%c0_2, %c0_3, %c0_4] : memref<1x8x32xf32, #tpu.memory_space<vmem>>, vector<1x8x32xf32>
    %3 = vector.shape_cast %2 : vector<1x8x32xf32> to vector<8x32xf32>
    %c0_5 = arith.constant 0 : index
    %c0_6 = arith.constant 0 : index
    %c0_7 = arith.constant 0 : index
    %4 = vector.load %arg3[%c0_5, %c0_6, %c0_7] : memref<1x16x1xf32, #tpu.memory_space<vmem>>, vector<1x16x1xf32>
    %5 = vector.shape_cast %4 : vector<1x16x1xf32> to vector<16x1xf32>
    %c0_8 = arith.constant 0 : index
    %c0_9 = arith.constant 0 : index
    %c0_10 = arith.constant 0 : index
    %6 = vector.load %arg4[%c0_8, %c0_9, %c0_10] : memref<1x1x8xf32, #tpu.memory_space<vmem>>, vector<1x1x8xf32>
    %7 = vector.shape_cast %6 : vector<1x1x8xf32> to vector<1x8xf32>
    %c0_11 = arith.constant 0 : index
    %c0_12 = arith.constant 0 : index
    %8 = vector.load %arg5[%c0_11, %c0_12] : memref<32x1xf32, #tpu.memory_space<vmem>>, vector<32x1xf32>
    %cst = arith.constant dense<0.000000e+00> : vector<16x1xf32>
    %9 = tpu.matmul %1, %8, %cst {dimension_numbers = #tpu.dot_dimension_numbers<[1], [0], [0], [1], [0, 0, 1, 1], [], []>} : vector<16x32xf32>, vector<32x1xf32>, vector<16x1xf32> -> vector<16x1xf32>
    %c0_13 = arith.constant 0 : index
    %c0_14 = arith.constant 0 : index
    %10 = vector.load %arg6[%c0_13, %c0_14] : memref<32x1xf32, #tpu.memory_space<vmem>>, vector<32x1xf32>
    %cst_15 = arith.constant dense<0.000000e+00> : vector<1x8xf32>
    %11 = tpu.matmul %10, %3, %cst_15 {dimension_numbers = #tpu.dot_dimension_numbers<[0], [1], [1], [0], [0, 1, 1, 0], [], []>} : vector<32x1xf32>, vector<8x32xf32>, vector<1x8xf32> -> vector<1x8xf32>
    %c0_16 = arith.constant 0 : index
    %c0_17 = arith.constant 0 : index
    %12 = vector.load %arg7[%c0_16, %c0_17] : memref<1x32xf32, #tpu.memory_space<vmem>>, vector<1x32xf32>
    %13 = vector.broadcast %12 : vector<1x32xf32> to vector<16x32xf32>
    %14 = arith.mulf %1, %13 : vector<16x32xf32>
    %cst_18 = arith.constant dense<0.000000e+00> : vector<16x8xf32>
    %15 = tpu.matmul %14, %3, %cst_18 {dimension_numbers = #tpu.dot_dimension_numbers<[1], [1], [0], [0], [0, 0, 1, 0], [], []>} : vector<16x32xf32>, vector<8x32xf32>, vector<16x8xf32> -> vector<16x8xf32>
    %16 = vector.broadcast %9 : vector<16x1xf32> to vector<16x8xf32>
    %17 = vector.broadcast %11 : vector<1x8xf32> to vector<16x8xf32>
    %18 = arith.addf %16, %17 : vector<16x8xf32>
    %19 = arith.addf %18, %15 : vector<16x8xf32>
    %c0_19 = arith.constant 0 : index
    %c0_20 = arith.constant 0 : index
    %20 = vector.load %arg8[%c0_19, %c0_20] : memref<1x1xf32, #tpu.memory_space<vmem>>, vector<1x1xf32>
    %21 = vector.broadcast %20 : vector<1x1xf32> to vector<16x8xf32>
    %22 = arith.addf %19, %21 : vector<16x8xf32>
    %cst_21 = arith.constant 1.000000e+00 : f32
    %23 = vector.broadcast %cst_21 : f32 to vector<1x8xf32>
    %24 = arith.subf %7, %23 : vector<1x8xf32>
    %cst_22 = arith.constant 1.000000e+30 : f32
    %25 = vector.broadcast %cst_22 : f32 to vector<1x8xf32>
    %26 = arith.mulf %24, %25 : vector<1x8xf32>
    %27 = vector.broadcast %26 : vector<1x8xf32> to vector<16x8xf32>
    %28 = arith.addf %22, %27 : vector<16x8xf32>
    %cst_23 = arith.constant dense<0xFF800000> : vector<16xf32>
    %29 = vector.multi_reduction <maximumf>, %28, %cst_23 [1] : vector<16x8xf32> to vector<16xf32>
    %30 = vector.shape_cast %29 : vector<16xf32> to vector<16x1xf32>
    %31 = vector.broadcast %30 : vector<16x1xf32> to vector<16x8xf32>
    %32 = arith.subf %28, %31 : vector<16x8xf32>
    %33 = math.exp %32 : vector<16x8xf32>
    %cst_24 = arith.constant dense<0.000000e+00> : vector<16xf32>
    %34 = vector.multi_reduction <add>, %33, %cst_24 [1] : vector<16x8xf32> to vector<16xf32>
    %35 = vector.shape_cast %34 : vector<16xf32> to vector<16x1xf32>
    %36 = tpu.reciprocal %35 {approx = true} : vector<16x1xf32> -> vector<16x1xf32>
    %37 = vector.broadcast %36 : vector<16x1xf32> to vector<16x8xf32>
    %38 = arith.mulf %33, %37 : vector<16x8xf32>
    %cst_25 = arith.constant 1.000000e+00 : f32
    %39 = vector.broadcast %cst_25 : f32 to vector<16x1xf32>
    %40 = arith.subf %5, %39 : vector<16x1xf32>
    %cst_26 = arith.constant 1.000000e+30 : f32
    %41 = vector.broadcast %cst_26 : f32 to vector<16x1xf32>
    %42 = arith.mulf %40, %41 : vector<16x1xf32>
    %43 = vector.broadcast %42 : vector<16x1xf32> to vector<16x8xf32>
    %44 = arith.addf %22, %43 : vector<16x8xf32>
    %cst_27 = arith.constant dense<0xFF800000> : vector<8xf32>
    %45 = vector.multi_reduction <maximumf>, %44, %cst_27 [0] : vector<16x8xf32> to vector<8xf32>
    %46 = vector.shape_cast %45 : vector<8xf32> to vector<1x8xf32>
    %47 = vector.broadcast %46 : vector<1x8xf32> to vector<16x8xf32>
    %48 = arith.subf %44, %47 : vector<16x8xf32>
    %49 = math.exp %48 : vector<16x8xf32>
    %cst_28 = arith.constant dense<0.000000e+00> : vector<8xf32>
    %50 = vector.multi_reduction <add>, %49, %cst_28 [0] : vector<16x8xf32> to vector<8xf32>
    %51 = vector.shape_cast %50 : vector<8xf32> to vector<1x8xf32>
    %52 = tpu.reciprocal %51 {approx = true} : vector<1x8xf32> -> vector<1x8xf32>
    %53 = vector.broadcast %52 : vector<1x8xf32> to vector<16x8xf32>
    %54 = arith.mulf %49, %53 : vector<16x8xf32>
    %cst_29 = arith.constant dense<0.000000e+00> : vector<16x32xf32>
    %55 = tpu.matmul %38, %3, %cst_29 {dimension_numbers = #tpu.dot_dimension_numbers<[1], [0], [0], [1], [0, 0, 1, 1], [], []>} : vector<16x8xf32>, vector<8x32xf32>, vector<16x32xf32> -> vector<16x32xf32>
    %cst_30 = arith.constant dense<0.000000e+00> : vector<16x16xf32>
    %56 = tpu.matmul %38, %54, %cst_30 {dimension_numbers = #tpu.dot_dimension_numbers<[1], [1], [0], [0], [0, 0, 1, 0], [], []>} : vector<16x8xf32>, vector<16x8xf32>, vector<16x16xf32> -> vector<16x16xf32>
    %cst_31 = arith.constant dense<0.000000e+00> : vector<16x32xf32>
    %57 = tpu.matmul %56, %1, %cst_31 {dimension_numbers = #tpu.dot_dimension_numbers<[1], [0], [0], [1], [0, 0, 1, 1], [], []>} : vector<16x16xf32>, vector<16x32xf32>, vector<16x32xf32> -> vector<16x32xf32>
    %58 = arith.mulf %1, %55 : vector<16x32xf32>
    %59 = arith.mulf %1, %57 : vector<16x32xf32>
    %60 = tpu.concatenate %1, %55, %58, %59 in 1 : vector<16x32xf32>, vector<16x32xf32>, vector<16x32xf32>, vector<16x32xf32> -> vector<16x128xf32>
    %c0_32 = arith.constant 0 : index
    %c0_33 = arith.constant 0 : index
    %61 = vector.load %arg9[%c0_32, %c0_33] : memref<128x32xf32, #tpu.memory_space<vmem>>, vector<128x32xf32>
    %cst_34 = arith.constant dense<0.000000e+00> : vector<16x32xf32>
    %62 = tpu.matmul %60, %61, %cst_34 {dimension_numbers = #tpu.dot_dimension_numbers<[1], [0], [0], [1], [0, 0, 1, 1], [], []>} : vector<16x128xf32>, vector<128x32xf32>, vector<16x32xf32> -> vector<16x32xf32>
    %c0_35 = arith.constant 0 : index
    %c0_36 = arith.constant 0 : index
    %63 = vector.load %arg10[%c0_35, %c0_36] : memref<1x32xf32, #tpu.memory_space<vmem>>, vector<1x32xf32>
    %64 = vector.broadcast %63 : vector<1x32xf32> to vector<16x32xf32>
    %65 = arith.addf %62, %64 : vector<16x32xf32>
    %c0_37 = arith.constant 0 : index
    %c0_38 = arith.constant 0 : index
    %c0_39 = arith.constant 0 : index
    %66 = vector.load %arg11[%c0_37, %c0_38, %c0_39] : memref<1x16x32xf32, #tpu.memory_space<vmem>>, vector<1x16x32xf32>
    %67 = vector.shape_cast %66 : vector<1x16x32xf32> to vector<16x32xf32>
    %68 = vector.shape_cast %65 : vector<16x32xf32> to vector<1x16x32xf32>
    tpu.vector_store %arg11[%c0_37, %c0_38, %c0_39], %68 {strides = array<i32>} : memref<1x16x32xf32, #tpu.memory_space<vmem>>, vector<1x16x32xf32>,
    return
  }
  func.func @transform_0(%arg0: i32) -> (i32, i32, i32) {
    %c0_i32 = arith.constant 0 : i32
    %c0_i32_0 = arith.constant 0 : i32
    %c0_i32_1 = arith.constant 0 : i32
    return %arg0, %c0_i32, %c0_i32_0 : i32, i32, i32
  }
  func.func @transform_1(%arg0: i32) -> (i32, i32, i32) {
    %c0_i32 = arith.constant 0 : i32
    %c0_i32_0 = arith.constant 0 : i32
    %c0_i32_1 = arith.constant 0 : i32
    return %arg0, %c0_i32, %c0_i32_0 : i32, i32, i32
  }
  func.func @transform_2(%arg0: i32) -> (i32, i32, i32) {
    %c0_i32 = arith.constant 0 : i32
    %c0_i32_0 = arith.constant 0 : i32
    %c0_i32_1 = arith.constant 0 : i32
    return %arg0, %c0_i32, %c0_i32_0 : i32, i32, i32
  }
  func.func @transform_3(%arg0: i32) -> (i32, i32, i32) {
    %c0_i32 = arith.constant 0 : i32
    %c0_i32_0 = arith.constant 0 : i32
    %c0_i32_1 = arith.constant 0 : i32
    return %arg0, %c0_i32, %c0_i32_0 : i32, i32, i32
  }
  func.func @transform_4(%arg0: i32) -> (i32, i32) {
    %c0_i32 = arith.constant 0 : i32
    %c0_i32_0 = arith.constant 0 : i32
    %c0_i32_1 = arith.constant 0 : i32
    return %c0_i32, %c0_i32_0 : i32, i32
  }
  func.func @transform_5(%arg0: i32) -> (i32, i32) {
    %c0_i32 = arith.constant 0 : i32
    %c0_i32_0 = arith.constant 0 : i32
    %c0_i32_1 = arith.constant 0 : i32
    return %c0_i32, %c0_i32_0 : i32, i32
  }
  func.func @transform_6(%arg0: i32) -> (i32, i32) {
    %c0_i32 = arith.constant 0 : i32
    %c0_i32_0 = arith.constant 0 : i32
    %c0_i32_1 = arith.constant 0 : i32
    return %c0_i32, %c0_i32_0 : i32, i32
  }
  func.func @transform_7(%arg0: i32) -> (i32, i32) {
    %c0_i32 = arith.constant 0 : i32
    %c0_i32_0 = arith.constant 0 : i32
    %c0_i32_1 = arith.constant 0 : i32
    return %c0_i32, %c0_i32_0 : i32, i32
  }
  func.func @transform_8(%arg0: i32) -> (i32, i32) {
    %c0_i32 = arith.constant 0 : i32
    %c0_i32_0 = arith.constant 0 : i32
    %c0_i32_1 = arith.constant 0 : i32
    return %c0_i32, %c0_i32_0 : i32, i32
  }
  func.func @transform_9(%arg0: i32) -> (i32, i32) {
    %c0_i32 = arith.constant 0 : i32
    %c0_i32_0 = arith.constant 0 : i32
    %c0_i32_1 = arith.constant 0 : i32
    return %c0_i32, %c0_i32_0 : i32, i32
  }
  func.func @transform_10(%arg0: i32) -> (i32, i32, i32) {
    %c0_i32 = arith.constant 0 : i32
    %c0_i32_0 = arith.constant 0 : i32
    %c0_i32_1 = arith.constant 0 : i32
    return %arg0, %c0_i32, %c0_i32_0 : i32, i32, i32
  }
}

module attributes {stable_mosaic.version = 11 : i64} {
  func.func @_output_kernel(%arg0: i32, %arg1: memref<2x16x32xf32, #tpu.memory_space<vmem>>, %arg2: memref<2x16x32xf32, #tpu.memory_space<vmem>>, %arg3: memref<2x16x32xf32, #tpu.memory_space<vmem>>, %arg4: memref<2x16xf32, #tpu.memory_space<vmem>>, %arg5: memref<2x32xf32, #tpu.memory_space<vmem>>, %arg6: memref<2x32xf32, #tpu.memory_space<vmem>>, %arg7: memref<1x2xf32, #tpu.memory_space<vmem>>, %arg8: memref<2x16xf32, #tpu.memory_space<vmem>>, %arg9: memref<2x16xf32, #tpu.memory_space<vmem>>) attributes {dimension_semantics = [#tpu.dimension_semantics<arbitrary>], iteration_bounds = array<i64: 1>, scalar_prefetch = 0 : i64, scratch_operands = 0 : i64, tpu.core_type = #tpu.core_type<tc>, window_params = [{pipeline_mode = #tpu.pipeline_mode<synchronous>, transform_indices = @transform_0, window_bounds = array<i64: 2, 16, 32>}, {pipeline_mode = #tpu.pipeline_mode<synchronous>, transform_indices = @transform_1, window_bounds = array<i64: 2, 16, 32>}, {pipeline_mode = #tpu.pipeline_mode<synchronous>, transform_indices = @transform_2, window_bounds = array<i64: 2, 16, 32>}, {pipeline_mode = #tpu.pipeline_mode<synchronous>, transform_indices = @transform_3, window_bounds = array<i64: 2, 16>}, {pipeline_mode = #tpu.pipeline_mode<synchronous>, transform_indices = @transform_4, window_bounds = array<i64: 2, 32>}, {pipeline_mode = #tpu.pipeline_mode<synchronous>, transform_indices = @transform_5, window_bounds = array<i64: 2, 32>}, {pipeline_mode = #tpu.pipeline_mode<synchronous>, transform_indices = @transform_6, window_bounds = array<i64: 1, 2>}, {pipeline_mode = #tpu.pipeline_mode<synchronous>, transform_indices = @transform_7, window_bounds = array<i64: 2, 16>}, {pipeline_mode = #tpu.pipeline_mode<synchronous>, transform_indices = @transform_8, window_bounds = array<i64: 2, 16>}]} {
    %c0 = arith.constant 0 : index
    %c0_0 = arith.constant 0 : index
    %c0_1 = arith.constant 0 : index
    %0 = vector.load %arg1[%c0, %c0_0, %c0_1] : memref<2x16x32xf32, #tpu.memory_space<vmem>>, vector<2x16x32xf32>
    %c0_2 = arith.constant 0 : index
    %c0_3 = arith.constant 0 : index
    %c0_4 = arith.constant 0 : index
    %1 = vector.load %arg2[%c0_2, %c0_3, %c0_4] : memref<2x16x32xf32, #tpu.memory_space<vmem>>, vector<2x16x32xf32>
    %c0_5 = arith.constant 0 : index
    %c0_6 = arith.constant 0 : index
    %c0_7 = arith.constant 0 : index
    %2 = vector.load %arg3[%c0_5, %c0_6, %c0_7] : memref<2x16x32xf32, #tpu.memory_space<vmem>>, vector<2x16x32xf32>
    %c0_8 = arith.constant 0 : index
    %c0_9 = arith.constant 0 : index
    %3 = vector.load %arg4[%c0_8, %c0_9] : memref<2x16xf32, #tpu.memory_space<vmem>>, vector<2x16xf32>
    %c0_10 = arith.constant 0 : index
    %c0_11 = arith.constant 0 : index
    %4 = vector.load %arg5[%c0_10, %c0_11] : memref<2x32xf32, #tpu.memory_space<vmem>>, vector<2x32xf32>
    %c0_12 = arith.constant 0 : index
    %c0_13 = arith.constant 0 : index
    %5 = vector.load %arg6[%c0_12, %c0_13] : memref<2x32xf32, #tpu.memory_space<vmem>>, vector<2x32xf32>
    %6 = vector.extract_strided_slice %4 {offsets = [0, 0], sizes = [1, 32], strides = [1, 1]} : vector<2x32xf32> to vector<1x32xf32>
    %7 = vector.shape_cast %6 : vector<1x32xf32> to vector<1x1x32xf32>
    %8 = vector.broadcast %7 : vector<1x1x32xf32> to vector<2x16x32xf32>
    %9 = arith.mulf %0, %8 : vector<2x16x32xf32>
    %10 = vector.extract_strided_slice %4 {offsets = [1, 0], sizes = [1, 32], strides = [1, 1]} : vector<2x32xf32> to vector<1x32xf32>
    %11 = vector.shape_cast %10 : vector<1x32xf32> to vector<1x1x32xf32>
    %12 = vector.broadcast %11 : vector<1x1x32xf32> to vector<2x16x32xf32>
    %13 = arith.mulf %1, %12 : vector<2x16x32xf32>
    %14 = arith.addf %9, %13 : vector<2x16x32xf32>
    %cst = arith.constant dense<0.000000e+00> : vector<2x16xf32>
    %15 = vector.multi_reduction <add>, %14, %cst [2] : vector<2x16x32xf32> to vector<2x16xf32>
    %c0_14 = arith.constant 0 : index
    %c0_15 = arith.constant 0 : index
    %16 = vector.load %arg7[%c0_14, %c0_15] : memref<1x2xf32, #tpu.memory_space<vmem>>, vector<1x1xf32>
    %17 = vector.broadcast %16 : vector<1x1xf32> to vector<2x16xf32>
    %18 = arith.addf %15, %17 : vector<2x16xf32>
    %19 = vector.extract_strided_slice %5 {offsets = [0, 0], sizes = [1, 32], strides = [1, 1]} : vector<2x32xf32> to vector<1x32xf32>
    %20 = vector.shape_cast %19 : vector<1x32xf32> to vector<1x1x32xf32>
    %21 = vector.broadcast %20 : vector<1x1x32xf32> to vector<2x16x32xf32>
    %22 = arith.mulf %0, %21 : vector<2x16x32xf32>
    %23 = vector.extract_strided_slice %5 {offsets = [1, 0], sizes = [1, 32], strides = [1, 1]} : vector<2x32xf32> to vector<1x32xf32>
    %24 = vector.shape_cast %23 : vector<1x32xf32> to vector<1x1x32xf32>
    %25 = vector.broadcast %24 : vector<1x1x32xf32> to vector<2x16x32xf32>
    %26 = arith.mulf %2, %25 : vector<2x16x32xf32>
    %27 = arith.addf %22, %26 : vector<2x16x32xf32>
    %cst_16 = arith.constant dense<0.000000e+00> : vector<2x16xf32>
    %28 = vector.multi_reduction <add>, %27, %cst_16 [2] : vector<2x16x32xf32> to vector<2x16xf32>
    %c0_17 = arith.constant 0 : index
    %c1 = arith.constant 1 : index
    %29 = vector.load %arg7[%c0_17, %c1] : memref<1x2xf32, #tpu.memory_space<vmem>>, vector<1x1xf32>
    %30 = vector.broadcast %29 : vector<1x1xf32> to vector<2x16xf32>
    %31 = arith.addf %28, %30 : vector<2x16xf32>
    %cst_18 = arith.constant 1.000000e+00 : f32
    %32 = vector.broadcast %cst_18 : f32 to vector<2x16xf32>
    %33 = arith.subf %3, %32 : vector<2x16xf32>
    %cst_19 = arith.constant 1.000000e+30 : f32
    %34 = vector.broadcast %cst_19 : f32 to vector<2x16xf32>
    %35 = arith.mulf %33, %34 : vector<2x16xf32>
    %36 = arith.addf %18, %35 : vector<2x16xf32>
    %cst_20 = arith.constant dense<0xFF800000> : vector<2xf32>
    %37 = vector.multi_reduction <maximumf>, %36, %cst_20 [1] : vector<2x16xf32> to vector<2xf32>
    %38 = vector.shape_cast %37 : vector<2xf32> to vector<2x1xf32>
    %39 = vector.broadcast %38 : vector<2x1xf32> to vector<2x16xf32>
    %40 = arith.subf %36, %39 : vector<2x16xf32>
    %41 = math.exp %40 : vector<2x16xf32>
    %cst_21 = arith.constant dense<0.000000e+00> : vector<2xf32>
    %42 = vector.multi_reduction <add>, %41, %cst_21 [1] : vector<2x16xf32> to vector<2xf32>
    %43 = vector.shape_cast %42 : vector<2xf32> to vector<2x1xf32>
    %44 = math.log %43 : vector<2x1xf32>
    %45 = vector.broadcast %44 : vector<2x1xf32> to vector<2x16xf32>
    %46 = arith.subf %40, %45 : vector<2x16xf32>
    %c0_22 = arith.constant 0 : index
    %c0_23 = arith.constant 0 : index
    %47 = vector.load %arg8[%c0_22, %c0_23] : memref<2x16xf32, #tpu.memory_space<vmem>>, vector<2x16xf32>
    tpu.vector_store %arg8[%c0_22, %c0_23], %46 {strides = array<i32>} : memref<2x16xf32, #tpu.memory_space<vmem>>, vector<2x16xf32>,
    %cst_24 = arith.constant 1.000000e+00 : f32
    %48 = vector.broadcast %cst_24 : f32 to vector<2x16xf32>
    %49 = arith.subf %3, %48 : vector<2x16xf32>
    %cst_25 = arith.constant 1.000000e+30 : f32
    %50 = vector.broadcast %cst_25 : f32 to vector<2x16xf32>
    %51 = arith.mulf %49, %50 : vector<2x16xf32>
    %52 = arith.addf %31, %51 : vector<2x16xf32>
    %cst_26 = arith.constant dense<0xFF800000> : vector<2xf32>
    %53 = vector.multi_reduction <maximumf>, %52, %cst_26 [1] : vector<2x16xf32> to vector<2xf32>
    %54 = vector.shape_cast %53 : vector<2xf32> to vector<2x1xf32>
    %55 = vector.broadcast %54 : vector<2x1xf32> to vector<2x16xf32>
    %56 = arith.subf %52, %55 : vector<2x16xf32>
    %57 = math.exp %56 : vector<2x16xf32>
    %cst_27 = arith.constant dense<0.000000e+00> : vector<2xf32>
    %58 = vector.multi_reduction <add>, %57, %cst_27 [1] : vector<2x16xf32> to vector<2xf32>
    %59 = vector.shape_cast %58 : vector<2xf32> to vector<2x1xf32>
    %60 = math.log %59 : vector<2x1xf32>
    %61 = vector.broadcast %60 : vector<2x1xf32> to vector<2x16xf32>
    %62 = arith.subf %56, %61 : vector<2x16xf32>
    %c0_28 = arith.constant 0 : index
    %c0_29 = arith.constant 0 : index
    %63 = vector.load %arg9[%c0_28, %c0_29] : memref<2x16xf32, #tpu.memory_space<vmem>>, vector<2x16xf32>
    tpu.vector_store %arg9[%c0_28, %c0_29], %62 {strides = array<i32>} : memref<2x16xf32, #tpu.memory_space<vmem>>, vector<2x16xf32>,
    return
  }
  func.func @transform_0(%arg0: i32) -> (i32, i32, i32) {
    %c0_i32 = arith.constant 0 : i32
    %c0_i32_0 = arith.constant 0 : i32
    %c0_i32_1 = arith.constant 0 : i32
    %c0_i32_2 = arith.constant 0 : i32
    return %c0_i32, %c0_i32_0, %c0_i32_1 : i32, i32, i32
  }
  func.func @transform_1(%arg0: i32) -> (i32, i32, i32) {
    %c0_i32 = arith.constant 0 : i32
    %c0_i32_0 = arith.constant 0 : i32
    %c0_i32_1 = arith.constant 0 : i32
    %c0_i32_2 = arith.constant 0 : i32
    return %c0_i32, %c0_i32_0, %c0_i32_1 : i32, i32, i32
  }
  func.func @transform_2(%arg0: i32) -> (i32, i32, i32) {
    %c0_i32 = arith.constant 0 : i32
    %c0_i32_0 = arith.constant 0 : i32
    %c0_i32_1 = arith.constant 0 : i32
    %c0_i32_2 = arith.constant 0 : i32
    return %c0_i32, %c0_i32_0, %c0_i32_1 : i32, i32, i32
  }
  func.func @transform_3(%arg0: i32) -> (i32, i32) {
    %c0_i32 = arith.constant 0 : i32
    %c0_i32_0 = arith.constant 0 : i32
    %c0_i32_1 = arith.constant 0 : i32
    return %c0_i32, %c0_i32_0 : i32, i32
  }
  func.func @transform_4(%arg0: i32) -> (i32, i32) {
    %c0_i32 = arith.constant 0 : i32
    %c0_i32_0 = arith.constant 0 : i32
    %c0_i32_1 = arith.constant 0 : i32
    return %c0_i32, %c0_i32_0 : i32, i32
  }
  func.func @transform_5(%arg0: i32) -> (i32, i32) {
    %c0_i32 = arith.constant 0 : i32
    %c0_i32_0 = arith.constant 0 : i32
    %c0_i32_1 = arith.constant 0 : i32
    return %c0_i32, %c0_i32_0 : i32, i32
  }
  func.func @transform_6(%arg0: i32) -> (i32, i32) {
    %c0_i32 = arith.constant 0 : i32
    %c0_i32_0 = arith.constant 0 : i32
    %c0_i32_1 = arith.constant 0 : i32
    return %c0_i32, %c0_i32_0 : i32, i32
  }
  func.func @transform_7(%arg0: i32) -> (i32, i32) {
    %c0_i32 = arith.constant 0 : i32
    %c0_i32_0 = arith.constant 0 : i32
    %c0_i32_1 = arith.constant 0 : i32
    return %c0_i32, %c0_i32_0 : i32, i32
  }
  func.func @transform_8(%arg0: i32) -> (i32, i32) {
    %c0_i32 = arith.constant 0 : i32
    %c0_i32_0 = arith.constant 0 : i32
    %c0_i32_1 = arith.constant 0 : i32
    return %c0_i32, %c0_i32_0 : i32, i32
  }
}

</mosaic_0001>

<bundles_post_ra>
// kernel: qanet_forward.9
= control target key start
LH: loop header
LB: loop body
LE: loop exit
PB: predicated region body
PF: predicated region fallthrough
CT: control target
= control target key end

     0   :  { %s1042_s15 = smov 0   ;;  %s1199_s0 = inlined_call_operand.vmem [shape: f32[2,16,32], index: 0, kind: input, shape index: {}]   ;;  %s1200_s1 = inlined_call_operand.vmem [shape: f32[2,8,32], index: 1, kind: input, shape index: {}]   ;;  %s1201_s2 = inlined_call_operand.vmem [shape: f32[2,16,1], index: 2, kind: input, shape index: {}]   ;;  %s1202_s3 = inlined_call_operand.vmem [shape: f32[2,1,8], index: 3, kind: input, shape index: {}]   ;;  %s1203_s4 = inlined_call_operand.vmem [shape: f32[32,1], index: 4, kind: input, shape index: {}]   ;;  %s1204_s5 = inlined_call_operand.vmem [shape: f32[32,1], index: 5, kind: input, shape index: {}]   ;;  %s1205_s6 = inlined_call_operand.vmem [shape: f32[1,32], index: 6, kind: input, shape index: {}]   ;;  %s1206_s7 = inlined_call_operand.<no memory space> [shape: f32[1,1], index: 7, kind: input, shape index: {}]   ;;  %s1207_s8 = inlined_call_operand.vmem [shape: f32[128,32], index: 8, kind: input, shape index: {}]   ;;  %s1208_s9 = inlined_call_operand.vmem [shape: f32[1,32], index: 9, kind: input, shape index: {}]   ;;  %s1209_s10 = inlined_call_operand.vmem [shape: f32[2,16,32], index: 10, kind: output, shape index: {}]  }
   0x1   :  { %v15_v0 = vstv %s1206_s7 }
   0x2   :  { %16 = vst [vmem:[#allocation2] sm:$0x1] %v15_v0 }
   0x3 LB: > { %s904_s16 = sadd.s32 4294967295, %s978_s15   ;;  %p908_p0 = scmp.ge.s32.totalorder %s978_s15, 1  ;;  %s978_s15 = sphi %s1042_s15, %s22_s15  }
   0x4   : > { %p341_p1 = scmp.lt.s32.totalorder %s978_s15, 3 }
   0x6   : > { %p342_p2 = pnand %p908_p0, %p341_p1 }
   0x7   : > { %p391_p3 = scmp.lt.s32.totalorder (!%p342_p2), %s904_s16, 1  ;;  %s982_s30 = smov (!%p342_p2), 64  }
   0x8   : > { %345 = sbr.rel (%p342_p2) target bundleno = 1088 (0x440), region = 60 }
   0xd   : > { %v453_v1 = vld [vmem:[%s1204_s5] sm:$0xff]  ;;  %v422_v2 = vld [vmem:[%s1203_s4 + $0x18] sm:$0xff]  ;;  %v421_v3 = vld [vmem:[%s1203_s4 + $0x10] sm:$0xff]  ;;  %v980_v4 = vmov 0   ;;  %s1211_s16 = smov (!%p391_p3, %s904_s16), 1  ;;  %vm423_vm0 = vcmask 261120  }
   0xe   : > { %457 = vxpose.xlu0.b32.start [1/4] (short) (narrow) %v453_v1, 8  ;;  %952 = vset.pattern.permute.xlu1 %v980_v4  ;;  %v420_v5 = vld [vmem:[%s1203_s4 + $0x8] sm:$0xff]  ;;  %s1065_s24 = sshll.u32 %s1211_s16, 4  ;;  %v419_v6 = vld [vmem:[%s1203_s4] sm:$0xff]  ;;  %v455_v9 = vld [vmem:[%s1204_s5 + $0x10] sm:$0xff]  ;;  %s911_s18 = sshll.u32 %s1211_s16, 3 }
   0xf   : > { %442 = vmatpush.msra.mxu0 %v422_v2  ;;  %953 = vset.pattern.permute.xlu2 %v980_v4  ;;  %s395_s29 = scalar_lea.vmem %s1199_s0, %s1065_s24  ;;  %v454_v7 = vld [vmem:[%s1204_s5 + $0x8] sm:$0xff]  ;;  %v456_v11 = vld [vmem:[%s1204_s5 + $0x18] sm:$0xff]  ;;  %s399_s20 = scalar_lea.vmem %s1200_s1, %s911_s18  ;;  %v956_v13 = vld [vmem:[%s1205_s6] ss:$0 sm:$0xff]  ;;  %vm581_vm1 = vcmask 64512   ;;  %vm705_vm2 = vcmask 130048  }
  0x10   : > { %v1077_v8 = vld [vmem:[%s395_s29] sm:$0xff]  ;;  %v1084_v10 = vld [vmem:[%s395_s29 + $0x8] sm:$0xff]  ;;  %s404_s26 = scalar_lea.vmem %s1201_s2, %s1065_s24  ;;  %s407_s29 = scalar_lea.vmem %s1202_s3, %s1211_s16  ;;  %vm765_vm3 = vcmask 523264   ;;  %vm768_vm4 = vcmask 785408  }
  0x11   : > { %443 = vmatpush.msra.mxu0 %v421_v3  ;;  %v415_v12 = vld [vmem:[%s399_s20] sm:$0xff]  ;;  %v519_v14 = vmul.f32 %v956_v13, %v1077_v8  ;;  %v520_v16 = vmul.f32 %v956_v13, %v1084_v10  ;;  %v417_v22 = vld [vmem:[%s404_s26 + $0x8] sm:$0xff]  ;;  %s981_s16 = smov 32   ;;  %s983_s20 = smov 96  }
  0x12   : > { %918 = vmatpush.xpose.msk.msra.mxu1 %vm423_vm0, %v415_v12  ;;  %668 = vmatpush.msra.mxu3 %v415_v12  ;;  %v955_v17 = vld [vmem:[#allocation2] ss:$0 sm:$0xff]  ;;  %v925_v23 = vadd.f32 -1.0, %v417_v22  ;;  %s412_s11 = scalar_lea.vmem %s1209_s10, %s1065_s24 }
  0x13   : > { %444 = vmatpush.msra.mxu0 %v420_v5  ;;  %v416_v18 = vld [vmem:[%s404_s26] sm:$0xff] }
  0x14   : > { %726 = vmatpush.msrb.mxu3 %v1084_v10  ;;  %v924_v20 = vadd.f32 -1.0, %v416_v18  ;;  %v607_v24 = vmul.f32 1e+30, %v925_v23  ;;  %v418_v29 = vld [vmem:[%s407_s29] sm:$0x1] }
  0x15   : > { %445 = vmatpush.msra.mxu0 %v419_v6  ;;  %v923_v30 = vadd.f32 -1.0, %v418_v29 }
  0x16   : > { %458 = vxpose.xlu0.b32.cont [2/4] (short) (narrow) %v454_v7, 8  ;;  %916 = vmatmul.msk.f32.vlgmr.msra.gmra.mxu0 %vm423_vm0, %v1077_v8  ;;  %v606_v21 = vmul.f32 1e+30, %v924_v20 }
  0x17   : > { %920 = vmatpush.xpose.msk.msrb.mxu0 %vm423_vm0, %v415_v12  ;;  %727 = vmatpush.msrb.mxu3 %v1077_v8  ;;  %v575_v35 = vmul.f32 1e+30, %v923_v30 }
  0x19   : > { %v577_v41 = vperm.slane %v575_v35, 0 }
  0x1e   : > { %459 = vxpose.xlu0.b32.cont [3/4] (short) (narrow) %v455_v9, 8  ;;  %917 = vmatmul.msk.f32.gmra.mxu0 %vm423_vm0, %v1084_v10 }
  0x26   : > { %460 = vxpose.xlu0.b32.end [4/4] (short) (narrow) %v456_v11, 8  ;;  %921 = vmatmul.msk.f32.vlgmr.msrb.gmra.mxu0 %vm423_vm0, %v519_v14 }
  0x2e   : > { %922 = vmatmul.msk.f32.gmra.mxu0 %vm423_vm0, %v520_v16 }
  0x8d   : > { %954 = vset.pattern.permute.xlu0 %v980_v4 }
  0x93   : > { %v447_v15 = vpop.f32.mrf.mxu0 }
  0x94   : > { %552 = vperm.xlu1 %952, %v447_v15  }
  0x9b   : > { %v450_v19 = vpop.f32.mrf.mxu0 }
  0x9c   : > { %569 = vperm.xlu1 %952, %v955_v17   ;;  %557 = vperm.xlu2 %953, %v450_v19  }
  0xa3   : > { %v544_v28 = vpop.f32.mrf.mxu0 }
  0xa4   : > { %610 = vperm.xlu1 %952, %v606_v21  }
  0xab   : > { %v547_v36 = vpop.f32.mrf.mxu0 }
  0xac   : > { %615 = vperm.xlu1 %952, %v607_v24  }
  0xb2   : > { %v473_v25 = vpop.trf.xlu0 }
  0xb3   : > { %919 = vmatmul.msk.f32.vlgmr.msra.gmra.mxu1 %vm423_vm0, %v473_v25 }
  0xf6   : > { %v558_v33 = vpop.permute.xlu2 %557 }
 0x106   : > { %v553_v26 = vpop.permute.xlu1 %552 }
 0x10e   : > { %v570_v27 = vpop.permute.xlu1 %569 }
 0x116   : > { %v611_v31 = vpop.permute.xlu1 %610 }
 0x11e   : > { %v616_v44 = vpop.permute.xlu1 %615 }
 0x130   : > { %v512_v32 = vpop.f32.mrf.mxu1 }
 0x131   : > { %v560_v34 = vperm.slane %v512_v32, 0 }
 0x133   : > { %v561_v37 = vadd.f32 %v560_v34, %v553_v26  ;;  %v562_v38 = vadd.f32 %v560_v34, %v558_v33 }
 0x135   : > { %v563_v39 = vadd.f32 %v561_v37, %v544_v28  ;;  %v564_v40 = vadd.f32 %v562_v38, %v547_v36  ;;  %v786_v37 = vld [vmem:[%s1207_s8 + $0x78] sm:$0xff]  ;;  %v785_v38 = vld [vmem:[%s1207_s8 + $0x70] sm:$0xff] }
 0x136   : > { %791 = vmatpush.msra.mxu2 %v786_v37 }
 0x137   : > { %v573_v42 = vadd.f32 %v570_v27, %v564_v40  ;;  %v572_v43 = vadd.f32 %v570_v27, %v563_v39  ;;  %v784_v39 = vld [vmem:[%s1207_s8 + $0x68] sm:$0xff]  ;;  %v783_v40 = vld [vmem:[%s1207_s8 + $0x60] sm:$0xff] }
 0x138   : > { %792 = vmatpush.msra.mxu2 %v785_v38 }
 0x139   : > { %v619_v45 = vadd.f32 %v616_v44, %v573_v42  ;;  %v579_v46 = vadd.f32 %v577_v41, %v572_v43  ;;  %v618_v47 = vadd.f32 %v611_v31, %v572_v43  ;;  %v580_v48 = vadd.f32 %v577_v41, %v573_v42  ;;  %v782_v41 = vld [vmem:[%s1207_s8 + $0x58] sm:$0xff]  ;;  %v781_v42 = vld [vmem:[%s1207_s8 + $0x50] sm:$0xff]  ;;  %v780_v43 = vld [vmem:[%s1207_s8 + $0x48] sm:$0xff] }
 0x13a   : > { %793 = vmatpush.msra.mxu2 %v784_v39  ;;  %v779_v44 = vld [vmem:[%s1207_s8 + $0x40] sm:$0xff] }
 0x13b   : > { %v621_v49 = vsel %vm581_vm1, %v619_v45, -inf  ;;  %v582_v50 = vsel %vm581_vm1, %v579_v46, -inf  ;;  %v620_v51 = vsel %vm581_vm1, %v618_v47, -inf  ;;  %v585_v52 = vsel %vm581_vm1, %v580_v48, -inf }
 0x13c   : > { %583 = vmax.xlane.f32.xlu2 %v582_v50  ;;  %v622_v53 = vmax.f32 %v620_v51, %v621_v49  ;;  %586 = vmax.xlane.f32.xlu0 %v585_v52  ;;  %v774_v51 = vld [vmem:[%s1207_s8 + $0x18] sm:$0xff]  ;;  %v773_v52 = vld [vmem:[%s1207_s8 + $0x10] sm:$0xff] }
 0x13d   : > { %794 = vmatpush.msra.mxu2 %v783_v40 }
 0x13e   : > { %v623_v54 = vrot.slane %v622_v53, 4 }
 0x13f   : > { %795 = vmatpush.msra.mxu2 %v782_v41 }
 0x140   : > { %v624_v55 = vmax.f32 %v622_v53, %v623_v54  ;;  %v772_v53 = vld [vmem:[%s1207_s8 + $0x8] sm:$0xff] }
 0x141   : > { %796 = vmatpush.msra.mxu2 %v781_v42 }
 0x142   : > { %v625_v56 = vrot.slane %v624_v55, 2 }
 0x143   : > { %797 = vmatpush.msra.mxu2 %v780_v43 }
 0x144   : > { %v626_v57 = vmax.f32 %v624_v55, %v625_v56 }
 0x145   : > { %798 = vmatpush.msra.mxu2 %v779_v44 }
 0x146   : > { %v627_v58 = vrot.slane %v626_v57, 1 }
 0x148   : > { %v628_v59 = vmax.f32 %v626_v57, %v627_v58  ;;  %v771_v57 = vld [vmem:[%s1207_s8] sm:$0xff] }
 0x14a   : > { %v629_v60 = vsub.f32 %v618_v47, %v628_v59  ;;  %v630_v61 = vsub.f32 %v619_v45, %v628_v59  ;;  %v778_v45 = vld [vmem:[%s1207_s8 + $0x38] sm:$0xff]  ;;  %v776_v47 = vld [vmem:[%s1207_s8 + $0x28] sm:$0xff] }
 0x14b   : > { %799 = vmatpush.msra.mxu2 %v778_v45 }
 0x14c   : > { %v631_v62 = vmul.f32 1.442695, %v629_v60  ;;  %v633_v63 = vmul.f32 1.442695, %v630_v61 }
 0x14e   : > { %958 = vpow2.f32 %v631_v62 }
 0x14f   : > { %960 = vpow2.f32 %v633_v63 }
 0x154   : > { %v959_v0 = vpop.eup %958 }
 0x155   : > { %v961_v1 = vpop.eup %960  ;;  %v635_v2 = vsel %vm581_vm1, %v959_v0, 0.0 }
 0x156   : > { %v636_v3 = vsel %vm581_vm1, %v961_v1, 0.0 }
 0x157   : > { %v637_v4 = vadd.f32 %v636_v3, %v635_v2 }
 0x159   : > { %v638_v5 = vrot.slane %v637_v4, 4 }
 0x15b   : > { %v639_v6 = vadd.f32 %v638_v5, %v637_v4 }
 0x15d   : > { %v640_v7 = vrot.slane %v639_v6, 2 }
 0x15f   : > { %v641_v9 = vadd.f32 %v640_v7, %v639_v6  ;;  %v957_v6 = vld [vmem:[%s1208_s9] ss:$0 sm:$0xff] }
 0x161   : > { %v642_v11 = vrot.slane %v641_v9, 1 }
 0x163   : > { %v643_v12 = vadd.f32 %v642_v11, %v641_v9 }
 0x165   : > { %962 = vrcp.f32 %v643_v12 }
 0x16b   : > { %v963_v13 = vpop.eup %962 }
 0x16c   : > { %v646_v14 = vmul.f32 %v963_v13, %v961_v1  ;;  %v645_v15 = vmul.f32 %v963_v13, %v959_v0 }
 0x16e   : > { %928 = vmatpush.xpose.msk.msrb.mxu1 %vm581_vm1, %v646_v14 }
 0x172   : > { %929 = vmatpush.xpose.msk.msrb.mxu1 %vm581_vm1, %v645_v15 }
 0x1af   : > { %v584_v16 = vpop.xlane.xlu2 %583  ;;  %v587_v17 = vpop.xlane.xlu0 %586 }
 0x1b0   : > { %v588_v18 = vsub.f32 %v579_v46, %v584_v16  ;;  %v589_v19 = vsub.f32 %v580_v48, %v587_v17  ;;  %v777_v46 = vld [vmem:[%s1207_s8 + $0x30] sm:$0xff]  ;;  %v775_v48 = vld [vmem:[%s1207_s8 + $0x20] sm:$0xff] }
 0x1b1   : > { %800 = vmatpush.msra.mxu2 %v777_v46 }
 0x1b2   : > { %v590_v20 = vmul.f32 1.442695, %v588_v18  ;;  %v592_v21 = vmul.f32 1.442695, %v589_v19 }
 0x1b3   : > { %801 = vmatpush.msra.mxu2 %v776_v47 }
 0x1b4   : > { %964 = vpow2.f32 %v590_v20 }
 0x1b5   : > { %966 = vpow2.f32 %v592_v21  ;;  %802 = vmatpush.msra.mxu2 %v775_v48 }
 0x1b7   : > { %803 = vmatpush.msra.mxu2 %v774_v51 }
 0x1b9   : > { %804 = vmatpush.msra.mxu2 %v773_v52 }
 0x1ba   : > { %v965_v22 = vpop.eup %964 }
 0x1bb   : > { %v967_v23 = vpop.eup %966  ;;  %v594_v24 = vsel %vm581_vm1, %v965_v22, 0.0  ;;  %805 = vmatpush.msra.mxu2 %v772_v53 }
 0x1bc   : > { %595 = vadd.xlane.f32.xlu1 %v594_v24  ;;  %v597_v25 = vsel %vm581_vm1, %v967_v23, 0.0 }
 0x1bd   : > { %598 = vadd.xlane.f32.xlu2 %v597_v25  ;;  %806 = vmatpush.msra.mxu2 %v771_v57 }
 0x22f   : > { %v596_v26 = vpop.xlane.xlu1 %595 }
 0x230   : > { %968 = vrcp.f32 %v596_v26  ;;  %v599_v27 = vpop.xlane.xlu2 %598 }
 0x231   : > { %970 = vrcp.f32 %v599_v27 }
 0x236   : > { %v969_v28 = vpop.eup %968 }
 0x237   : > { %v602_v29 = vmul.f32 %v969_v28, %v965_v22  ;;  %v971_v30 = vpop.eup %970 }
 0x238   : > { %v603_v31 = vmul.f32 %v971_v30, %v967_v23 }
 0x239   : > { %926 = vmatmul.msk.f32.vlgmr.msra.gmra.mxu3 %vm581_vm1, %v602_v29  ;;  %930 = vmatmul.msk.f32.vlgmr.msrb.gmra.mxu1 %vm581_vm1, %v602_v29 }
 0x241   : > { %927 = vmatmul.msk.f32.gmra.mxu3 %vm581_vm1, %v603_v31  ;;  %931 = vmatmul.msk.f32.gmra.mxu1 %vm581_vm1, %v603_v31 }
 0x2b6   : > { %v699_v32 = vpop.f32.mrf.mxu1 }
 0x2b7   : > { %932 = vmatmul.msk.f32.vlgmr.msrb.gmra.mxu3 %vm705_vm2, %v699_v32 }
 0x2bc   : > { %v670_v33 = vpop.f32.mrf.mxu3 }
 0x2bd   : > { %v735_v34 = vmul.f32 %v670_v33, %v1077_v8  ;;  %741 = vrot.lane.b32.xlu2 %v670_v33, %s981_s16 }
 0x2be   : > { %v702_v35 = vpop.f32.mrf.mxu1 }
 0x2bf   : > { %749 = vrot.lane.b32.xlu1 %v735_v34, %s982_s30  ;;  %933 = vmatmul.msk.f32.gmra.mxu3 %vm705_vm2, %v702_v35 }
 0x2c4   : > { %v673_v36 = vpop.f32.mrf.mxu3 }
 0x2c5   : > { %743 = vrot.lane.b32.xlu2 %v673_v36, %s981_s16  ;;  %v736_v55 = vmul.f32 %v673_v36, %v1084_v10 }
 0x317   : > { %v742_v58 = vpop.permute.xlu2 %741 }
 0x318   : > { %v763_v61 = vsel %vm423_vm0, %v1077_v8, %v742_v58 }
 0x31f   : > { %v744_v59 = vpop.permute.xlu2 %743 }
 0x320   : > { %v764_v2 = vsel %vm423_vm0, %v1084_v10, %v744_v59 }
 0x331   : > { %v750_v60 = vpop.permute.xlu1 %749 }
 0x332   : > { %v766_v62 = vsel %vm765_vm3, %v763_v61, %v750_v60 }
 0x33a   : > { %v729_v49 = vpop.f32.mrf.mxu3 }
 0x33b   : > { %v737_v50 = vmul.f32 %v729_v49, %v1077_v8 }
 0x33d   : > { %757 = vrot.lane.b32.xlu2 %v737_v50, %s983_s20 }
 0x342   : > { %v732_v54 = vpop.f32.mrf.mxu3 }
 0x343   : > { %v738_v56 = vmul.f32 %v732_v54, %v1084_v10 }
 0x345   : > { %751 = vrot.lane.b32.xlu2 %v736_v55, %s982_s30  ;;  %759 = vrot.lane.b32.xlu1 %v738_v56, %s983_s20 }
 0x397   : > { %v758_v63 = vpop.permute.xlu2 %757 }
 0x398   : > { %v769_v0 = vsel %vm768_vm4, %v766_v62, %v758_v63 }
 0x399   : > { %807 = vmatmul.f32.vlgmr.msra.gmra.mxu2 %v769_v0 }
 0x39f   : > { %v752_v1 = vpop.permute.xlu2 %751 }
 0x3a0   : > { %v767_v3 = vsel %vm765_vm3, %v764_v2, %v752_v1 }
 0x3b7   : > { %v760_v4 = vpop.permute.xlu1 %759 }
 0x3b8   : > { %v770_v5 = vsel %vm768_vm4, %v767_v3, %v760_v4 }
 0x3b9   : > { %810 = vmatmul.f32.gmra.mxu2 %v770_v5 }
 0x41c   : > { %v808_v8 = vpop.f32.mrf.mxu2 }
 0x41d   : > { %v809_v7 = vadd.f32 %v957_v6, %v808_v8 }
 0x41f   : > { %814 = vst.msk [vmem:[%s412_s11] sm:$0xff] %vm423_vm0, %v809_v7 }
 0x43c   : > { %v811_v9 = vpop.f32.mrf.mxu2 }
 0x43d   : > { %v812_v11 = vadd.f32 %v957_v6, %v811_v9 }
 0x43f   : > { %815 = vst.msk [vmem:[%s412_s11 + $0x8] sm:$0xff] %vm423_vm0, %v812_v11 }
 0x440 PF: > { %s22_s15 = sadd.s32 1, %s978_s15  }
 0x441   : > { %p19_p4 = scmp.ge.s32.totalorder %s22_s15, 4  }
 0x443   :  { %21 = sbr.rel (!%p19_p4) target bundleno = 3 (0x3), region = 99 }

// kernel: qanet_forward.7
= control target key start
LH: loop header
LB: loop body
LE: loop exit
PB: predicated region body
PF: predicated region fallthrough
CT: control target
= control target key end

     0   :  { %vm103_vm0 = vcmask 392192   ;;  %s1527_s9 = smov 32   ;;  %vm665_vm1 = vcmask 261120   ;;  %s2375_s1 = inlined_call_operand.vmem [shape: f32[48,16], index: 1, kind: input, shape index: {}]   ;;  %s2376_s2 = inlined_call_operand.vmem [shape: f32[1,16], index: 2, kind: input, shape index: {}]   ;;  %s2377_s0 = inlined_call_operand.vmem [shape: f32[512,48], index: 0, kind: input, shape index: {}]   ;;  %s2378_s4 = inlined_call_operand.vmem [shape: f32[48,32], index: 4, kind: input, shape index: {}]   ;;  %s2379_s5 = inlined_call_operand.vmem [shape: f32[1,32], index: 5, kind: input, shape index: {}]   ;;  %s2380_s6 = inlined_call_operand.vmem [shape: f32[64,64], index: 6, kind: input, shape index: {}]   ;;  %s2381_s3 = inlined_call_operand.vmem [shape: f32[64,32], index: 3, kind: input, shape index: {}]   ;;  %s2382_s7 = inlined_call_operand.vmem [shape: f32[2,64], index: 7, kind: input, shape index: {}]   ;;  %s2383_s8 = inlined_call_operand.vmem [shape: f32[64,32], index: 8, kind: output, shape index: {}]  }
   0x1   :  { %v98_v0 = vld [vmem:[%s2375_s1 + $0x28] sm:$0xff]  ;;  %v97_v1 = vld [vmem:[%s2375_s1 + $0x20] sm:$0xff]  ;;  %v96_v2 = vld [vmem:[%s2375_s1 + $0x18] sm:$0xff] }
   0x2   :  { %306 = vmatpush.msra.mxu0 %v98_v0  ;;  %1441 = vmatpush.msra.mxu3 %v98_v0  ;;  %v95_v3 = vld [vmem:[%s2375_s1 + $0x10] sm:$0xff]  ;;  %v94_v4 = vld [vmem:[%s2375_s1 + $0x8] sm:$0xff]  ;;  %v93_v5 = vld [vmem:[%s2375_s1] sm:$0xff]  ;;  %s1528_s1 = smov 96  }
   0x3   :  { %1440 = vmatpush.msra.mxu2 %v98_v0  ;;  %1439 = vmatpush.msra.mxu1 %v98_v0  ;;  %v29_v6 = vld [vmem:[%s2377_s0] sm:$0xff]  ;;  %v79_v7 = vld [vmem:[%s2377_s0 + $0x190] sm:$0xff]  ;;  %v30_v9 = vld [vmem:[%s2377_s0 + $0x8] sm:$0xff] }
   0x4   :  { %307 = vmatpush.msra.mxu0 %v97_v1  ;;  %1444 = vmatpush.msra.mxu3 %v97_v1  ;;  %v65_v8 = vld [vmem:[%s2377_s0 + $0x120] sm:$0xff]  ;;  %v80_v10 = vld [vmem:[%s2377_s0 + $0x198] sm:$0xff]  ;;  %v66_v11 = vld [vmem:[%s2377_s0 + $0x128] sm:$0xff] }
   0x5   :  { %1443 = vmatpush.msra.mxu2 %v97_v1  ;;  %1442 = vmatpush.msra.mxu1 %v97_v1  ;;  %v31_v12 = vld [vmem:[%s2377_s0 + $0x10] sm:$0xff]  ;;  %v81_v13 = vld [vmem:[%s2377_s0 + $0x1a0] sm:$0xff]  ;;  %v32_v16 = vld [vmem:[%s2377_s0 + $0x18] sm:$0xff] }
   0x6   :  { %308 = vmatpush.msra.mxu0 %v96_v2  ;;  %1447 = vmatpush.msra.mxu3 %v96_v2  ;;  %v67_v14 = vld [vmem:[%s2377_s0 + $0x130] sm:$0xff]  ;;  %v82_v17 = vld [vmem:[%s2377_s0 + $0x1a8] sm:$0xff]  ;;  %v68_v18 = vld [vmem:[%s2377_s0 + $0x138] sm:$0xff] }
   0x7   :  { %1446 = vmatpush.msra.mxu2 %v96_v2  ;;  %1445 = vmatpush.msra.mxu1 %v96_v2  ;;  %v51_v15 = vld [vmem:[%s2377_s0 + $0xb0] sm:$0xff]  ;;  %v52_v19 = vld [vmem:[%s2377_s0 + $0xb8] sm:$0xff]  ;;  %v33_v20 = vld [vmem:[%s2377_s0 + $0x20] sm:$0xff] }
   0x8   :  { %309 = vmatpush.msra.mxu0 %v95_v3  ;;  %1450 = vmatpush.msra.mxu3 %v95_v3  ;;  %v83_v21 = vld [vmem:[%s2377_s0 + $0x1b0] sm:$0xff]  ;;  %v69_v22 = vld [vmem:[%s2377_s0 + $0x140] sm:$0xff]  ;;  %v34_v24 = vld [vmem:[%s2377_s0 + $0x28] sm:$0xff] }
   0x9   :  { %1449 = vmatpush.msra.mxu2 %v95_v3  ;;  %1448 = vmatpush.msra.mxu1 %v95_v3  ;;  %v53_v23 = vld [vmem:[%s2377_s0 + $0xc0] sm:$0xff]  ;;  %v84_v25 = vld [vmem:[%s2377_s0 + $0x1b8] sm:$0xff]  ;;  %v70_v26 = vld [vmem:[%s2377_s0 + $0x148] sm:$0xff] }
   0xa   :  { %310 = vmatpush.msra.mxu0 %v94_v4  ;;  %1453 = vmatpush.msra.mxu3 %v94_v4  ;;  %v54_v27 = vld [vmem:[%s2377_s0 + $0xc8] sm:$0xff]  ;;  %v35_v28 = vld [vmem:[%s2377_s0 + $0x30] sm:$0xff]  ;;  %v85_v29 = vld [vmem:[%s2377_s0 + $0x1c0] sm:$0xff] }
   0xb   :  { %1452 = vmatpush.msra.mxu2 %v94_v4  ;;  %1451 = vmatpush.msra.mxu1 %v94_v4  ;;  %v71_v30 = vld [vmem:[%s2377_s0 + $0x150] sm:$0xff]  ;;  %v36_v32 = vld [vmem:[%s2377_s0 + $0x38] sm:$0xff]  ;;  %v86_v33 = vld [vmem:[%s2377_s0 + $0x1c8] sm:$0xff] }
   0xc   :  { %311 = vmatpush.msra.mxu0 %v93_v5  ;;  %1456 = vmatpush.msra.mxu3 %v93_v5  ;;  %v55_v31 = vld [vmem:[%s2377_s0 + $0xd0] sm:$0xff]  ;;  %v72_v34 = vld [vmem:[%s2377_s0 + $0x158] sm:$0xff]  ;;  %v37_v36 = vld [vmem:[%s2377_s0 + $0x40] sm:$0xff] }
   0xd   :  { %1351 = vmatmul.msk.f32.vlgmr.msra.gmra.mxu0 %vm103_vm0, %v29_v6  ;;  %1401 = vmatmul.msk.f32.vlgmr.msra.gmra.mxu3 %vm103_vm0, %v79_v7  ;;  %v56_v35 = vld [vmem:[%s2377_s0 + $0xd8] sm:$0xff]  ;;  %v87_v37 = vld [vmem:[%s2377_s0 + $0x1d0] sm:$0xff]  ;;  %v73_v38 = vld [vmem:[%s2377_s0 + $0x160] sm:$0xff] }
   0xe   :  { %1455 = vmatpush.msra.mxu2 %v93_v5  ;;  %1454 = vmatpush.msra.mxu1 %v93_v5  ;;  %v57_v39 = vld [vmem:[%s2377_s0 + $0xe0] sm:$0xff]  ;;  %v38_v40 = vld [vmem:[%s2377_s0 + $0x48] sm:$0xff]  ;;  %v88_v41 = vld [vmem:[%s2377_s0 + $0x1d8] sm:$0xff] }
   0xf   :  { %1387 = vmatmul.msk.f32.vlgmr.msra.gmra.mxu2 %vm103_vm0, %v65_v8  ;;  %1373 = vmatmul.msk.f32.vlgmr.msra.gmra.mxu1 %vm103_vm0, %v51_v15  ;;  %v74_v42 = vld [vmem:[%s2377_s0 + $0x168] sm:$0xff]  ;;  %v39_v44 = vld [vmem:[%s2377_s0 + $0x50] sm:$0xff]  ;;  %v89_v45 = vld [vmem:[%s2377_s0 + $0x1e0] sm:$0xff] }
  0x10   :  { %v58_v43 = vld [vmem:[%s2377_s0 + $0xe8] sm:$0xff]  ;;  %v75_v46 = vld [vmem:[%s2377_s0 + $0x170] sm:$0xff]  ;;  %v40_v48 = vld [vmem:[%s2377_s0 + $0x58] sm:$0xff] }
  0x11   :  { %v59_v47 = vld [vmem:[%s2377_s0 + $0xf0] sm:$0xff]  ;;  %v90_v49 = vld [vmem:[%s2377_s0 + $0x1e8] sm:$0xff]  ;;  %v76_v50 = vld [vmem:[%s2377_s0 + $0x178] sm:$0xff] }
  0x12   :  { %v60_v51 = vld [vmem:[%s2377_s0 + $0xf8] sm:$0xff]  ;;  %v41_v52 = vld [vmem:[%s2377_s0 + $0x60] sm:$0xff]  ;;  %v91_v53 = vld [vmem:[%s2377_s0 + $0x1f0] sm:$0xff] }
  0x13   :  { %v77_v54 = vld [vmem:[%s2377_s0 + $0x180] sm:$0xff]  ;;  %v42_v56 = vld [vmem:[%s2377_s0 + $0x68] sm:$0xff]  ;;  %v92_v57 = vld [vmem:[%s2377_s0 + $0x1f8] sm:$0xff] }
  0x14   :  { %v61_v55 = vld [vmem:[%s2377_s0 + $0x100] sm:$0xff]  ;;  %v78_v58 = vld [vmem:[%s2377_s0 + $0x188] sm:$0xff]  ;;  %v43_v60 = vld [vmem:[%s2377_s0 + $0x70] sm:$0xff] }
  0x15   :  { %1352 = vmatmul.msk.f32.gmra.mxu0 %vm103_vm0, %v30_v9  ;;  %1402 = vmatmul.msk.f32.gmra.mxu3 %vm103_vm0, %v80_v10  ;;  %v62_v59 = vld [vmem:[%s2377_s0 + $0x108] sm:$0xff]  ;;  %v63_v61 = vld [vmem:[%s2377_s0 + $0x110] sm:$0xff]  ;;  %v44_v62 = vld [vmem:[%s2377_s0 + $0x78] sm:$0xff] }
  0x16   :  { %v64_v63 = vld [vmem:[%s2377_s0 + $0x118] sm:$0xff]  ;;  %v45_v1 = vld [vmem:[%s2377_s0 + $0x80] sm:$0xff]  ;;  %v46_v3 = vld [vmem:[%s2377_s0 + $0x88] sm:$0xff] }
  0x17   :  { %1388 = vmatmul.msk.f32.gmra.mxu2 %vm103_vm0, %v66_v11  ;;  %1374 = vmatmul.msk.f32.gmra.mxu1 %vm103_vm0, %v52_v19  ;;  %v47_v6 = vld [vmem:[%s2377_s0 + $0x90] sm:$0xff]  ;;  %v48_v10 = vld [vmem:[%s2377_s0 + $0x98] sm:$0xff]  ;;  %v49_v15 = vld [vmem:[%s2377_s0 + $0xa0] sm:$0xff] }
  0x18   :  { %v50_v19 = vld [vmem:[%s2377_s0 + $0xa8] sm:$0xff] }
  0x1d   :  { %1353 = vmatmul.msk.f32.gmra.mxu0 %vm103_vm0, %v31_v12  ;;  %1403 = vmatmul.msk.f32.gmra.mxu3 %vm103_vm0, %v81_v13 }
  0x1f   :  { %1389 = vmatmul.msk.f32.gmra.mxu2 %vm103_vm0, %v67_v14  ;;  %1375 = vmatmul.msk.f32.gmra.mxu1 %vm103_vm0, %v53_v23 }
  0x25   :  { %1354 = vmatmul.msk.f32.gmra.mxu0 %vm103_vm0, %v32_v16  ;;  %1404 = vmatmul.msk.f32.gmra.mxu3 %vm103_vm0, %v82_v17 }
  0x27   :  { %1390 = vmatmul.msk.f32.gmra.mxu2 %vm103_vm0, %v68_v18  ;;  %1376 = vmatmul.msk.f32.gmra.mxu1 %vm103_vm0, %v54_v27 }
  0x2d   :  { %1355 = vmatmul.msk.f32.gmra.mxu0 %vm103_vm0, %v33_v20  ;;  %1405 = vmatmul.msk.f32.gmra.mxu3 %vm103_vm0, %v83_v21 }
  0x2f   :  { %1391 = vmatmul.msk.f32.gmra.mxu2 %vm103_vm0, %v69_v22  ;;  %1377 = vmatmul.msk.f32.gmra.mxu1 %vm103_vm0, %v55_v31 }
  0x35   :  { %1356 = vmatmul.msk.f32.gmra.mxu0 %vm103_vm0, %v34_v24  ;;  %1406 = vmatmul.msk.f32.gmra.mxu3 %vm103_vm0, %v84_v25 }
  0x37   :  { %1392 = vmatmul.msk.f32.gmra.mxu2 %vm103_vm0, %v70_v26  ;;  %1378 = vmatmul.msk.f32.gmra.mxu1 %vm103_vm0, %v56_v35 }
  0x3d   :  { %1357 = vmatmul.msk.f32.gmra.mxu0 %vm103_vm0, %v35_v28  ;;  %1407 = vmatmul.msk.f32.gmra.mxu3 %vm103_vm0, %v85_v29 }
  0x3f   :  { %1393 = vmatmul.msk.f32.gmra.mxu2 %vm103_vm0, %v71_v30  ;;  %1379 = vmatmul.msk.f32.gmra.mxu1 %vm103_vm0, %v57_v39 }
  0x45   :  { %1358 = vmatmul.msk.f32.gmra.mxu0 %vm103_vm0, %v36_v32  ;;  %1408 = vmatmul.msk.f32.gmra.mxu3 %vm103_vm0, %v86_v33 }
  0x47   :  { %1394 = vmatmul.msk.f32.gmra.mxu2 %vm103_vm0, %v72_v34  ;;  %1380 = vmatmul.msk.f32.gmra.mxu1 %vm103_vm0, %v58_v43 }
  0x4d   :  { %1359 = vmatmul.msk.f32.gmra.mxu0 %vm103_vm0, %v37_v36  ;;  %1409 = vmatmul.msk.f32.gmra.mxu3 %vm103_vm0, %v87_v37 }
  0x4f   :  { %1395 = vmatmul.msk.f32.gmra.mxu2 %vm103_vm0, %v73_v38  ;;  %1381 = vmatmul.msk.f32.gmra.mxu1 %vm103_vm0, %v59_v47 }
  0x55   :  { %1360 = vmatmul.msk.f32.gmra.mxu0 %vm103_vm0, %v38_v40  ;;  %1410 = vmatmul.msk.f32.gmra.mxu3 %vm103_vm0, %v88_v41 }
  0x57   :  { %1396 = vmatmul.msk.f32.gmra.mxu2 %vm103_vm0, %v74_v42  ;;  %1382 = vmatmul.msk.f32.gmra.mxu1 %vm103_vm0, %v60_v51 }
  0x5d   :  { %1361 = vmatmul.msk.f32.gmra.mxu0 %vm103_vm0, %v39_v44  ;;  %1411 = vmatmul.msk.f32.gmra.mxu3 %vm103_vm0, %v89_v45 }
  0x5f   :  { %1397 = vmatmul.msk.f32.gmra.mxu2 %vm103_vm0, %v75_v46  ;;  %1383 = vmatmul.msk.f32.gmra.mxu1 %vm103_vm0, %v61_v55 }
  0x65   :  { %1362 = vmatmul.msk.f32.gmra.mxu0 %vm103_vm0, %v40_v48  ;;  %1412 = vmatmul.msk.f32.gmra.mxu3 %vm103_vm0, %v90_v49  ;;  %v1921_v49 = vld [vmem:[%s2376_s2] ss:$0 sm:$0xff] }
  0x67   :  { %1398 = vmatmul.msk.f32.gmra.mxu2 %vm103_vm0, %v76_v50  ;;  %1384 = vmatmul.msk.f32.gmra.mxu1 %vm103_vm0, %v62_v59 }
  0x6d   :  { %1363 = vmatmul.msk.f32.gmra.mxu0 %vm103_vm0, %v41_v52  ;;  %1413 = vmatmul.msk.f32.gmra.mxu3 %vm103_vm0, %v91_v53 }
  0x6f   :  { %1399 = vmatmul.msk.f32.gmra.mxu2 %vm103_vm0, %v77_v54  ;;  %1385 = vmatmul.msk.f32.gmra.mxu1 %vm103_vm0, %v63_v61 }
  0x75   :  { %1364 = vmatmul.msk.f32.gmra.mxu0 %vm103_vm0, %v42_v56  ;;  %1414 = vmatmul.msk.f32.gmra.mxu3 %vm103_vm0, %v92_v57 }
  0x77   :  { %1400 = vmatmul.msk.f32.gmra.mxu2 %vm103_vm0, %v78_v58  ;;  %1386 = vmatmul.msk.f32.gmra.mxu1 %vm103_vm0, %v64_v63 }
  0x7d   :  { %1365 = vmatmul.msk.f32.gmra.mxu0 %vm103_vm0, %v43_v60 }
  0x85   :  { %1366 = vmatmul.msk.f32.gmra.mxu0 %vm103_vm0, %v44_v62 }
  0x8a   :  { %v1824_v0 = vpop.f32.mrf.mxu0 }
  0x8c   :  { %v379_v8 = vpop.f32.mrf.mxu1 }
  0x8d   :  { %1367 = vmatmul.msk.f32.gmra.mxu0 %vm103_vm0, %v45_v1  ;;  %v380_v53 = vadd.f32 %v1921_v49, %v379_v8 }
  0x8f   :  { %v527_v59 = vmax.f32 %v380_v53, 0.0 }
  0x90   :  { %v1852_v11 = vpop.f32.mrf.mxu3 }
  0x92   :  { %v1830_v2 = vpop.f32.mrf.mxu0  ;;  %v1835_v4 = vpop.f32.mrf.mxu2 }
  0x94   :  { %v382_v13 = vpop.f32.mrf.mxu1 }
  0x95   :  { %1368 = vmatmul.msk.f32.gmra.mxu0 %vm103_vm0, %v46_v3 }
  0x98   :  { %v1860_v16 = vpop.f32.mrf.mxu3 }
  0x9a   :  { %v1838_v5 = vpop.f32.mrf.mxu0  ;;  %v1843_v7 = vpop.f32.mrf.mxu2 }
  0x9c   :  { %v1869_v20 = vpop.f32.mrf.mxu1 }
  0x9d   :  { %1369 = vmatmul.msk.f32.gmra.mxu0 %vm103_vm0, %v47_v6 }
  0xa0   :  { %v1872_v21 = vpop.f32.mrf.mxu3 }
  0xa2   :  { %v1846_v9 = vpop.f32.mrf.mxu0  ;;  %v427_v12 = vpop.f32.mrf.mxu2 }
  0xa3   :  { %v428_v58 = vadd.f32 %v1921_v49, %v427_v12 }
  0xa4   :  { %v1876_v24 = vpop.f32.mrf.mxu1 }
  0xa5   :  { %1370 = vmatmul.msk.f32.gmra.mxu0 %vm103_vm0, %v48_v10  ;;  %v543_v6 = vmax.f32 %v428_v58, 0.0 }
  0xa8   :  { %v1878_v26 = vpop.f32.mrf.mxu3 }
  0xaa   :  { %v1854_v14 = vpop.f32.mrf.mxu0  ;;  %v1862_v17 = vpop.f32.mrf.mxu2 }
  0xac   :  { %v1882_v28 = vpop.f32.mrf.mxu1 }
  0xad   :  { %1371 = vmatmul.msk.f32.gmra.mxu0 %vm103_vm0, %v49_v15  ;;  %v383_v15 = vadd.f32 %v1921_v49, %v382_v13  ;;  %v431_v13 = vadd.f32 %v1921_v49, %v1862_v17 }
  0xb0   :  { %v1884_v30 = vpop.f32.mrf.mxu3 }
  0xb2   :  { %v1864_v18 = vpop.f32.mrf.mxu0  ;;  %v1874_v23 = vpop.f32.mrf.mxu2 }
  0xb4   :  { %v1888_v32 = vpop.f32.mrf.mxu1 }
  0xb5   :  { %1372 = vmatmul.msk.f32.gmra.mxu0 %vm103_vm0, %v50_v19 }
  0xb8   :  { %v478_v34 = vpop.f32.mrf.mxu3 }
  0xba   :  { %v331_v22 = vpop.f32.mrf.mxu0  ;;  %v1880_v27 = vpop.f32.mrf.mxu2 }
  0xbb   :  { %v332_v51 = vadd.f32 %v1921_v49, %v331_v22 }
  0xbc   :  { %v1896_v37 = vpop.f32.mrf.mxu1 }
  0xbd   :  { %v511_v56 = vmax.f32 %v332_v51, 0.0 }
  0xc0   :  { %v1898_v38 = vpop.f32.mrf.mxu3 }
  0xc2   :  { %v334_v25 = vpop.f32.mrf.mxu0  ;;  %v1886_v31 = vpop.f32.mrf.mxu2 }
  0xc3   :  { %v335_v1 = vadd.f32 %v1921_v49, %v334_v25  ;;  %v679_v25 = vld [vmem:[%s2378_s4 + $0x28] sm:$0xff] }
  0xc4   :  { %v1904_v41 = vpop.f32.mrf.mxu1  ;;  %718 = vmatpush.msrb.mxu1 %v679_v25  ;;  %v434_v25 = vadd.f32 %v1921_v49, %v1874_v23 }
  0xc5   :  { %v512_v12 = vmax.f32 %v335_v1, 0.0  ;;  %v544_v1 = vmax.f32 %v431_v13, 0.0 }
  0xc8   :  { %v1908_v43 = vpop.f32.mrf.mxu3 }
  0xca   :  { %v337_v29 = vpop.f32.mrf.mxu0  ;;  %v1892_v35 = vpop.f32.mrf.mxu2 }
  0xcb   :  { %v338_v51 = vadd.f32 %v1921_v49, %v337_v29  ;;  %v479_v29 = vadd.f32 %v1921_v49, %v478_v34 }
  0xcc   :  { %v403_v45 = vpop.f32.mrf.mxu1 }
  0xcd   :  { %v404_v55 = vadd.f32 %v1921_v49, %v403_v45  ;;  %v513_v58 = vmax.f32 %v338_v51, 0.0 }
  0xcf   :  { %v535_v62 = vmax.f32 %v404_v55, 0.0  ;;  %v528_v55 = vmax.f32 %v383_v15, 0.0 }
  0xd0   :  { %v1914_v47 = vpop.f32.mrf.mxu3 }
  0xd2   :  { %v1890_v33 = vpop.f32.mrf.mxu0  ;;  %v1902_v40 = vpop.f32.mrf.mxu2 }
  0xd4   :  { %v406_v50 = vpop.f32.mrf.mxu1 }
  0xd5   :  { %v407_v45 = vadd.f32 %v1921_v49, %v406_v50 }
  0xd7   :  { %v536_v50 = vmax.f32 %v407_v45, 0.0  ;;  %v341_v45 = vadd.f32 %v1921_v49, %v1890_v33 }
  0xd8   :  { %v1928_v60 = vpop.f32.mrf.mxu3 }
  0xda   :  { %v1894_v36 = vpop.f32.mrf.mxu0  ;;  %v1910_v44 = vpop.f32.mrf.mxu2 }
  0xdc   :  { %v409_v8 = vpop.f32.mrf.mxu1 }
  0xe2   :  { %v1900_v39 = vpop.f32.mrf.mxu0  ;;  %v1916_v48 = vpop.f32.mrf.mxu2 }
  0xea   :  { %v1906_v42 = vpop.f32.mrf.mxu0  ;;  %v454_v63 = vpop.f32.mrf.mxu2 }
  0xf2   :  { %v1912_v46 = vpop.f32.mrf.mxu0 }
  0xfa   :  { %v355_v52 = vpop.f32.mrf.mxu0 }
  0xfb   :  { %v356_v54 = vadd.f32 %v1921_v49, %v355_v52 }
  0xfd   :  { %v519_v57 = vmax.f32 %v356_v54, 0.0  ;;  %v314_v54 = vadd.f32 %v1921_v49, %v1824_v0  ;;  %v386_v0 = vadd.f32 %v1921_v49, %v1869_v20 }
  0xff   :  { %v575_v61 = vmax.f32 %v511_v56, %v519_v57  ;;  %v455_v57 = vadd.f32 %v1921_v49, %v454_v63  ;;  %v560_v63 = vmax.f32 %v479_v29, 0.0  ;;  %v529_v20 = vmax.f32 %v386_v0, 0.0 }
 0x101   :  { %v583_v3 = vmax.f32 %v575_v61, %v527_v59  ;;  %v1946_v59 = vpop.f32.mrf.mxu3  ;;  %v552_v15 = vmax.f32 %v455_v57, 0.0 }
 0x102   :  { %v358_v10 = vpop.f32.mrf.mxu0 }
 0x103   :  { %v591_v19 = vmax.f32 %v583_v3, %v535_v62  ;;  %v359_v22 = vadd.f32 %v1921_v49, %v358_v10  ;;  %v505_v62 = vmax.f32 %v314_v54, 0.0 }
 0x105   :  { %v520_v52 = vmax.f32 %v359_v22, 0.0  ;;  %v1935_v53 = vmax.f32 %v591_v19, %v543_v6  ;;  %v457_v6 = vpop.f32.mrf.mxu2  ;;  %v410_v19 = vadd.f32 %v1921_v49, %v409_v8  ;;  %v412_v22 = vpop.f32.mrf.mxu1  ;;  %v569_v34 = vmax.f32 %v505_v62, %v513_v58 }
 0x106   :  { %v458_v8 = vadd.f32 %v1921_v49, %v457_v6  ;;  %v545_v58 = vmax.f32 %v434_v25, 0.0  ;;  %v413_v0 = vadd.f32 %v1921_v49, %v412_v22 }
 0x107   :  { %v576_v56 = vmax.f32 %v512_v12, %v520_v52  ;;  %v317_v52 = vadd.f32 %v1921_v49, %v1830_v2  ;;  %v389_v2 = vadd.f32 %v1921_v49, %v1876_v24  ;;  %v320_v24 = vadd.f32 %v1921_v49, %v1838_v5 }
 0x109   :  { %v584_v61 = vmax.f32 %v576_v56, %v528_v55  ;;  %v537_v55 = vmax.f32 %v410_v19, 0.0  ;;  %v482_v56 = vadd.f32 %v1921_v49, %v1898_v38  ;;  %v506_v29 = vmax.f32 %v317_v52, 0.0  ;;  %v1967_v6 = vpop.f32.mrf.mxu3 }
 0x10a   :  { %v361_v3 = vpop.f32.mrf.mxu0  ;;  %v507_v5 = vmax.f32 %v320_v24, 0.0  ;;  %v488_v24 = vadd.f32 %v1921_v49, %v1914_v47 }
 0x10b   :  { %v592_v17 = vmax.f32 %v584_v61, %v536_v50  ;;  %v362_v10 = vadd.f32 %v1921_v49, %v361_v3  ;;  %v514_v50 = vmax.f32 %v341_v45, 0.0  ;;  %v561_v3 = vmax.f32 %v482_v56, 0.0 }
 0x10d   :  { %v521_v12 = vmax.f32 %v362_v10, 0.0  ;;  %v600_v51 = vmax.f32 %v592_v17, %v544_v1  ;;  %v553_v1 = vmax.f32 %v458_v8, 0.0  ;;  %v460_v38 = vpop.f32.mrf.mxu2  ;;  %v570_v17 = vmax.f32 %v506_v29, %v514_v50  ;;  %v415_v45 = vpop.f32.mrf.mxu1 }
 0x10e   :  { %v344_v10 = vadd.f32 %v1921_v49, %v1894_v36  ;;  %v461_v52 = vadd.f32 %v1921_v49, %v460_v38  ;;  %v452_v36 = vadd.f32 %v1921_v49, %v1916_v48  ;;  %v678_v48 = vld [vmem:[%s2378_s4 + $0x20] sm:$0xff]  ;;  %v476_v29 = vadd.f32 %v1921_v49, %v1884_v30 }
 0x10f   :  { %v577_v54 = vmax.f32 %v569_v34, %v521_v12  ;;  %v608_v13 = vmax.f32 %v600_v51, %v552_v15  ;;  %v437_v34 = vadd.f32 %v1921_v49, %v1880_v27  ;;  %v538_v51 = vmax.f32 %v413_v0, 0.0  ;;  %719 = vmatpush.msrb.mxu1 %v678_v48 }
 0x110   :  { %v515_v25 = vmax.f32 %v344_v10, 0.0  ;;  %v392_v27 = vadd.f32 %v1921_v49, %v1882_v28  ;;  %v347_v28 = vadd.f32 %v1921_v49, %v1900_v39  ;;  %v440_v38 = vadd.f32 %v1921_v49, %v1886_v31 }
 0x111   :  { %v585_v57 = vmax.f32 %v577_v54, %v529_v20  ;;  %v1961_v33 = vmax.f32 %v608_v13, %v560_v63  ;;  %v530_v63 = vmax.f32 %v389_v2, 0.0  ;;  %v485_v20 = vadd.f32 %v1921_v49, %v1908_v43 }
 0x112   :  { %v364_v61 = vpop.f32.mrf.mxu0  ;;  %v416_v43 = vadd.f32 %v1921_v49, %v415_v45  ;;  %v571_v2 = vmax.f32 %v507_v5, %v515_v25  ;;  %v531_v0 = vmax.f32 %v392_v27, 0.0  ;;  %v559_v39 = vmax.f32 %v476_v29, 0.0  ;;  %v676_v25 = vld [vmem:[%s2378_s4 + $0x10] sm:$0xff] }
 0x113   :  { %v593_v62 = vmax.f32 %v585_v57, %v537_v55  ;;  %v365_v23 = vadd.f32 %v1921_v49, %v364_v61  ;;  %v546_v55 = vmax.f32 %v437_v34, 0.0  ;;  %v554_v57 = vmax.f32 %v461_v52, 0.0 }
 0x114   :  { %v551_v61 = vmax.f32 %v452_v36, 0.0  ;;  %v539_v30 = vmax.f32 %v416_v43, 0.0  ;;  %v395_v31 = vadd.f32 %v1921_v49, %v1888_v32  ;;  %v547_v52 = vmax.f32 %v440_v38, 0.0 }
 0x115   :  { %v522_v15 = vmax.f32 %v365_v23, 0.0  ;;  %v601_v19 = vmax.f32 %v593_v62, %v545_v58  ;;  %v562_v58 = vmax.f32 %v485_v20, 0.0  ;;  %v563_v32 = vmax.f32 %v488_v24, 0.0 }
 0x116   :  { %v607_v34 = vmax.f32 %v1935_v53, %v551_v61  ;;  %v677_v53 = vld [vmem:[%s2378_s4 + $0x18] sm:$0xff]  ;;  %v443_v43 = vadd.f32 %v1921_v49, %v1892_v35 }
 0x117   :  { %v578_v12 = vmax.f32 %v570_v17, %v522_v15  ;;  %v609_v22 = vmax.f32 %v601_v19, %v553_v1  ;;  %v323_v1 = vadd.f32 %v1921_v49, %v1846_v9  ;;  %v464_v15 = vadd.f32 %v1921_v49, %v1852_v11  ;;  %720 = vmatpush.msrb.mxu1 %v677_v53 }
 0x118   :  { %v516_v19 = vmax.f32 %v347_v28, 0.0  ;;  %v467_v28 = vadd.f32 %v1921_v49, %v1860_v16 }
 0x119   :  { %v586_v54 = vmax.f32 %v578_v12, %v530_v63  ;;  %v617_v13 = vmax.f32 %v609_v22, %v561_v3  ;;  %v499_v3 = vpop.f32.mrf.mxu3  ;;  %v418_v63 = vpop.f32.mrf.mxu1  ;;  %v508_v22 = vmax.f32 %v323_v1, 0.0  ;;  %v555_v36 = vmax.f32 %v464_v15, 0.0  ;;  %721 = vmatpush.msrb.mxu1 %v676_v25 }
 0x11a   :  { %v367_v8 = vpop.f32.mrf.mxu0  ;;  %v500_v9 = vadd.f32 %v1921_v49, %v499_v3  ;;  %v419_v47 = vadd.f32 %v1921_v49, %v418_v63  ;;  %v398_v3 = vadd.f32 %v1921_v49, %v1896_v37  ;;  %v556_v16 = vmax.f32 %v467_v28, 0.0 }
 0x11b   :  { %v594_v56 = vmax.f32 %v586_v54, %v538_v51  ;;  %v368_v50 = vadd.f32 %v1921_v49, %v367_v8  ;;  %641 = vrot.lane.b32.xlu0 %v617_v13, %s1527_s9  ;;  %v572_v54 = vmax.f32 %v508_v22, %v516_v19  ;;  %v350_v13 = vadd.f32 %v1921_v49, %v1906_v42 }
 0x11c   :  { %v567_v5 = vmax.f32 %v500_v9, 0.0  ;;  %v540_v29 = vmax.f32 %v419_v47, 0.0  ;;  %v353_v15 = vadd.f32 %v1921_v49, %v1912_v46  ;;  %v329_v37 = vadd.f32 %v1921_v49, %v1864_v18 }
 0x11d   :  { %v523_v62 = vmax.f32 %v368_v50, 0.0  ;;  %v602_v23 = vmax.f32 %v594_v56, %v546_v55  ;;  %v615_v55 = vmax.f32 %v607_v34, %v559_v39  ;;  %v675_v56 = vld [vmem:[%s2378_s4 + $0x8] sm:$0xff]  ;;  %v326_v50 = vadd.f32 %v1921_v49, %v1854_v14 }
 0x11e   :  { %722 = vmatpush.msrb.mxu1 %v675_v56  ;;  %v517_v14 = vmax.f32 %v350_v13, 0.0  ;;  %v533_v63 = vmax.f32 %v398_v3, 0.0  ;;  %v446_v34 = vadd.f32 %v1921_v49, %v1902_v40  ;;  %v494_v22 = vadd.f32 %v1921_v49, %v1946_v59  ;;  %v628_v3 = vld [vmem:[%s2381_s3 + $0x18] sm:$0xff] }
 0x11f   :  { %v579_v17 = vmax.f32 %v571_v2, %v523_v62  ;;  %v610_v10 = vmax.f32 %v602_v23, %v554_v57  ;;  %v532_v57 = vmax.f32 %v395_v31, 0.0  ;;  %v491_v2 = vadd.f32 %v1921_v49, %v1928_v60 }
 0x120   :  { %v623_v61 = vmax.f32 %v615_v55, %v567_v5  ;;  %v509_v1 = vmax.f32 %v326_v50, 0.0  ;;  %v422_v60 = vadd.f32 %v1921_v49, %v1835_v4  ;;  %v470_v4 = vadd.f32 %v1921_v49, %v1872_v21 }
 0x121   :  { %v587_v45 = vmax.f32 %v579_v17, %v531_v0  ;;  %v618_v12 = vmax.f32 %v610_v10, %v562_v58  ;;  %v674_v58 = vld [vmem:[%s2378_s4] sm:$0xff]  ;;  %v548_v0 = vmax.f32 %v443_v43, 0.0  ;;  %v564_v10 = vmax.f32 %v491_v2, 0.0  ;;  %v502_v24 = vpop.f32.mrf.mxu3 }
 0x122   :  { %v370_v51 = vpop.f32.mrf.mxu0  ;;  %723 = vmatpush.msrb.mxu1 %v674_v58  ;;  %v518_v46 = vmax.f32 %v353_v15, 0.0  ;;  %v503_v31 = vadd.f32 %v1921_v49, %v502_v24  ;;  %v510_v18 = vmax.f32 %v329_v37, 0.0  ;;  %v401_v40 = vadd.f32 %v1921_v49, %v1904_v41 }
 0x123   :  { %v595_v20 = vmax.f32 %v587_v45, %v539_v30  ;;  %v371_v11 = vadd.f32 %v1921_v49, %v370_v51  ;;  %643 = vrot.lane.b32.xlu0 %v618_v12, %s1527_s9  ;;  %v573_v30 = vmax.f32 %v509_v1, %v517_v14  ;;  %v541_v12 = vmax.f32 %v422_v60, 0.0  ;;  %v626_v14 = vld [vmem:[%s2381_s3 + $0x8] sm:$0xff]  ;;  %v627_v1 = vld [vmem:[%s2381_s3 + $0x10] sm:$0xff]  ;;  %v749_v60 = vld [vmem:[%s2380_s6] sm:$0xff] }
 0x124   :  { %v557_v21 = vmax.f32 %v470_v4, 0.0  ;;  %v425_v59 = vadd.f32 %v1921_v49, %v1843_v7  ;;  %v565_v25 = vmax.f32 %v494_v22, 0.0  ;;  %v534_v5 = vmax.f32 %v401_v40, 0.0  ;;  %v1460_v4 = vld [vmem:[%s2379_s5] ss:$0 sm:$0xff] }
 0x125   :  { %v603_v27 = vmax.f32 %v595_v20, %v547_v52  ;;  %v524_v8 = vmax.f32 %v371_v11, 0.0  ;;  %v549_v11 = vmax.f32 %v446_v34, 0.0  ;;  %v449_v55 = vadd.f32 %v1921_v49, %v1910_v44 }
 0x126   :  { %v473_v56 = vadd.f32 %v1921_v49, %v1878_v26  ;;  %v497_v50 = vadd.f32 %v1921_v49, %v1967_v6  ;;  %v752_v26 = vld [vmem:[%s2380_s6 + $0x18] sm:$0xff] }
 0x127   :  { %v580_v48 = vmax.f32 %v572_v54, %v524_v8  ;;  %v611_v42 = vmax.f32 %v603_v27, %v555_v36  ;;  %v574_v36 = vmax.f32 %v510_v18, %v518_v46  ;;  %v568_v54 = vmax.f32 %v503_v31, 0.0  ;;  %791 = vmatpush.msrb.mxu2 %v752_v26 }
 0x128   :  { %v542_v8 = vmax.f32 %v425_v59, 0.0  ;;  %v558_v44 = vmax.f32 %v473_v56, 0.0 }
 0x129   :  { %v588_v62 = vmax.f32 %v580_v48, %v532_v57  ;;  %v619_v23 = vmax.f32 %v611_v42, %v563_v32  ;;  %v624_v7 = vmax.f32 %v1961_v33, %v568_v54  ;;  %v550_v48 = vmax.f32 %v449_v55, 0.0 }
 0x12a   :  { %v373_v35 = vpop.f32.mrf.mxu0  ;;  %v566_v42 = vmax.f32 %v497_v50, 0.0 }
 0x12b   :  { %v596_v38 = vmax.f32 %v588_v62, %v540_v29  ;;  %v374_v17 = vadd.f32 %v1921_v49, %v373_v35  ;;  %645 = vrot.lane.b32.xlu1 %v619_v23, %s1527_s9  ;;  %653 = vrot.lane.b32.xlu0 %v623_v61, %s1527_s9  ;;  %v751_v23 = vld [vmem:[%s2380_s6 + $0x10] sm:$0xff] }
 0x12c   :  { %792 = vmatpush.msrb.mxu2 %v751_v23 }
 0x12d   :  { %v604_v39 = vmax.f32 %v596_v38, %v548_v0  ;;  %v525_v19 = vmax.f32 %v374_v17, 0.0 }
 0x12f   :  { %v581_v9 = vmax.f32 %v573_v30, %v525_v19  ;;  %v612_v45 = vmax.f32 %v604_v39, %v556_v16  ;;  %v750_v16 = vld [vmem:[%s2380_s6 + $0x8] sm:$0xff]  ;;  %v629_v30 = vld [vmem:[%s2381_s3 + $0x20] sm:$0xff] }
 0x130   :  { %793 = vmatpush.msrb.mxu2 %v750_v16  ;;  %v630_v19 = vld [vmem:[%s2381_s3 + $0x28] sm:$0xff] }
 0x131   :  { %v589_v51 = vmax.f32 %v581_v9, %v533_v63  ;;  %v620_v52 = vmax.f32 %v612_v45, %v564_v10  ;;  %v631_v63 = vld [vmem:[%s2381_s3 + $0x30] sm:$0xff]  ;;  %v632_v45 = vld [vmem:[%s2381_s3 + $0x38] sm:$0xff] }
 0x132   :  { %v376_v20 = vpop.f32.mrf.mxu0  ;;  %794 = vmatpush.msrb.mxu2 %v749_v60 }
 0x133   :  { %v597_v47 = vmax.f32 %v589_v51, %v541_v12  ;;  %v377_v53 = vadd.f32 %v1921_v49, %v376_v20  ;;  %647 = vrot.lane.b32.xlu1 %v620_v52, %s1527_s9  ;;  %v625_v49 = vld [vmem:[%s2381_s3] sm:$0xff] }
 0x135   :  { %v526_v32 = vmax.f32 %v377_v53, 0.0  ;;  %v605_v13 = vmax.f32 %v597_v47, %v549_v11 }
 0x137   :  { %v582_v27 = vmax.f32 %v574_v36, %v526_v32  ;;  %v613_v41 = vmax.f32 %v605_v13, %v557_v21  ;;  %v1047_v32 = vld [vmem:[%s2380_s6 + $0x38] sm:$0xff]  ;;  %v1461_v13 = vld [vmem:[%s2382_s7] ss:$0 sm:$0xff] }
 0x138   :  { %1086 = vmatpush.msrb.mxu3 %v1047_v32 }
 0x139   :  { %v590_v57 = vmax.f32 %v582_v27, %v534_v5  ;;  %v621_v43 = vmax.f32 %v613_v41, %v565_v25 }
 0x13b   :  { %v598_v29 = vmax.f32 %v590_v57, %v542_v8  ;;  %649 = vrot.lane.b32.xlu2 %v621_v43, %s1527_s9  ;;  %655 = vrot.lane.b32.xlu1 %v624_v7, %s1527_s9 }
 0x13d   :  { %v606_v58 = vmax.f32 %v598_v29, %v550_v48  ;;  %v1046_v48 = vld [vmem:[%s2380_s6 + $0x30] sm:$0xff] }
 0x13e   :  { %1087 = vmatpush.msrb.mxu3 %v1046_v48 }
 0x13f   :  { %v614_v28 = vmax.f32 %v606_v58, %v558_v44 }
 0x141   :  { %v622_v2 = vmax.f32 %v614_v28, %v566_v42 }
 0x143   :  { %651 = vrot.lane.b32.xlu2 %v622_v2, %s1527_s9 }
 0x18d   :  { %v642_v33 = vpop.permute.xlu0 %641 }
 0x18e   :  { %v666_v6 = vsel %vm665_vm1, %v625_v49, %v642_v33  ;;  %v1045_v49 = vld [vmem:[%s2380_s6 + $0x28] sm:$0xff] }
 0x18f   :  { %1415 = vmatmul.msk.f32.vlgmr.msrb.gmra.mxu1 %vm103_vm0, %v666_v6  ;;  %1088 = vmatpush.msrb.mxu3 %v1045_v49 }
 0x195   :  { %v644_v61 = vpop.permute.xlu0 %643  ;;  %v650_v10 = vpop.permute.xlu2 %649 }
 0x196   :  { %v667_v62 = vsel %vm665_vm1, %v626_v14, %v644_v61  ;;  %v670_v15 = vsel %vm665_vm1, %v629_v30, %v650_v10 }
 0x197   :  { %1416 = vmatmul.msk.f32.gmra.mxu1 %vm103_vm0, %v667_v62 }
 0x19d   :  { %v646_v35 = vpop.permute.xlu1 %645  ;;  %v652_v39 = vpop.permute.xlu2 %651 }
 0x19e   :  { %v668_v0 = vsel %vm665_vm1, %v627_v1, %v646_v35  ;;  %v671_v37 = vsel %vm665_vm1, %v630_v19, %v652_v39  ;;  %v654_v24 = vpop.permute.xlu0 %653 }
 0x19f   :  { %1417 = vmatmul.msk.f32.gmra.mxu1 %vm103_vm0, %v668_v0  ;;  %v672_v34 = vsel %vm665_vm1, %v631_v63, %v654_v24 }
 0x1a5   :  { %v648_v38 = vpop.permute.xlu1 %647 }
 0x1a6   :  { %v669_v17 = vsel %vm665_vm1, %v628_v3, %v648_v38 }
 0x1a7   :  { %1418 = vmatmul.msk.f32.gmra.mxu1 %vm103_vm0, %v669_v17  ;;  %v1044_v17 = vld [vmem:[%s2380_s6 + $0x20] sm:$0xff] }
 0x1a8   :  { %1089 = vmatpush.msrb.mxu3 %v1044_v17 }
 0x1ad   :  { %v656_v9 = vpop.permute.xlu1 %655 }
 0x1ae   :  { %v673_v12 = vsel %vm665_vm1, %v632_v45, %v656_v9 }
 0x1af   :  { %1419 = vmatmul.msk.f32.gmra.mxu1 %vm103_vm0, %v670_v15 }
 0x1b7   :  { %1420 = vmatmul.msk.f32.gmra.mxu1 %vm103_vm0, %v671_v37 }
 0x1bf   :  { %1421 = vmatmul.msk.f32.gmra.mxu1 %vm103_vm0, %v672_v34 }
 0x1c7   :  { %1422 = vmatmul.msk.f32.gmra.mxu1 %vm103_vm0, %v673_v12 }
 0x20c   :  { %v725_v22 = vpop.f32.mrf.mxu1 }
 0x20d   :  { %v2118_v46 = vadd.f32 %v1460_v4, %v725_v22 }
 0x20f   :  { %1423 = vmatmul.msk.f32.vlgmr.msrb.gmra.mxu2 %vm665_vm1, %v2118_v46 }
 0x214   :  { %v728_v31 = vpop.f32.mrf.mxu1 }
 0x215   :  { %v2122_v51 = vadd.f32 %v1460_v4, %v728_v31 }
 0x217   :  { %1424 = vmatmul.msk.f32.gmra.mxu2 %vm665_vm1, %v2122_v51 }
 0x21c   :  { %v731_v52 = vpop.f32.mrf.mxu1 }
 0x21d   :  { %v2126_v18 = vadd.f32 %v1460_v4, %v731_v52 }
 0x21f   :  { %1425 = vmatmul.msk.f32.gmra.mxu2 %vm665_vm1, %v2126_v18 }
 0x224   :  { %v734_v20 = vpop.f32.mrf.mxu1 }
 0x225   :  { %v2130_v11 = vadd.f32 %v1460_v4, %v734_v20 }
 0x227   :  { %1426 = vmatmul.msk.f32.gmra.mxu2 %vm665_vm1, %v2130_v11 }
 0x22c   :  { %v737_v40 = vpop.f32.mrf.mxu1 }
 0x22d   :  { %v2134_v47 = vadd.f32 %v1460_v4, %v737_v40 }
 0x22f   :  { %1427 = vmatmul.msk.f32.gmra.mxu2 %vm665_vm1, %v2134_v47 }
 0x234   :  { %v740_v53 = vpop.f32.mrf.mxu1 }
 0x235   :  { %v2138_v21 = vadd.f32 %v1460_v4, %v740_v53 }
 0x237   :  { %1428 = vmatmul.msk.f32.gmra.mxu2 %vm665_vm1, %v2138_v21 }
 0x23c   :  { %v743_v59 = vpop.f32.mrf.mxu1 }
 0x23d   :  { %v2142_v25 = vadd.f32 %v1460_v4, %v743_v59 }
 0x23f   :  { %1429 = vmatmul.msk.f32.gmra.mxu2 %vm665_vm1, %v2142_v25 }
 0x244   :  { %v746_v36 = vpop.f32.mrf.mxu1 }
 0x245   :  { %v2146_v54 = vadd.f32 %v1460_v4, %v746_v36 }
 0x247   :  { %1430 = vmatmul.msk.f32.gmra.mxu2 %vm665_vm1, %v2146_v54 }
 0x292   :  { %v796_v5 = vpop.f32.mrf.mxu2 }
 0x293   :  { %v797_v55 = vadd.f32 %v1461_v13, %v796_v5 }
 0x295   :  { %v972_v27 = vmax.f32 %v797_v55, 0.0  ;;  %v820_v2 = vsub.f32 0.0, %v797_v55 }
 0x297   :  { %988 = vrot.lane.b32.xlu2 %v972_v27, %s1528_s1  ;;  %v828_v14 = vmul.f32 1.442695, %v820_v2 }
 0x299   :  { %1463 = vpow2.f32 %v828_v14 }
 0x29a   :  { %v799_v41 = vpop.f32.mrf.mxu2 }
 0x29b   :  { %v800_v8 = vadd.f32 %v1461_v13, %v799_v41 }
 0x29d   :  { %v973_v56 = vmax.f32 %v800_v8, 0.0  ;;  %v821_v10 = vsub.f32 0.0, %v800_v8 }
 0x29f   :  { %990 = vrot.lane.b32.xlu0 %v973_v56, %s1528_s1  ;;  %v1464_v1 = vpop.eup %1463  ;;  %v830_v15 = vmul.f32 1.442695, %v821_v10 }
 0x2a0   :  { %v844_v0 = vadd.f32 1.0, %v1464_v1 }
 0x2a2   :  { %v802_v50 = vpop.f32.mrf.mxu2  ;;  %1465 = vrcp.f32 %v844_v0  ;;  %v863_v24 = vand.u32 2147483648, %v844_v0  ;;  %vm857_vm3 = vweird.f32 %v844_v0  ;;  %v861_v34 = vand.u32 2147483647, %v844_v0 }
 0x2a3   :  { %v803_v7 = vadd.f32 %v1461_v13, %v802_v50  ;;  %1467 = vpow2.f32 %v830_v15 }
 0x2a4   :  { %v864_v12 = vor.u32 1.1754944e-38, %v863_v24  ;;  %vm862_vm5 = vcmp.eq.f32.partialorder %v861_v34, 8.507059e+37 }
 0x2a5   :  { %v974_v57 = vmax.f32 %v803_v7, 0.0  ;;  %v822_v19 = vsub.f32 0.0, %v803_v7 }
 0x2a7   :  { %992 = vrot.lane.b32.xlu1 %v974_v57, %s1528_s1  ;;  %v832_v63 = vmul.f32 1.442695, %v822_v19 }
 0x2a8   :  { %v1466_v16 = vpop.eup %1465 }
 0x2a9   :  { %v853_v60 = vmul.f32 %v1466_v16, %v844_v0  ;;  %vm858_vm2 = vweird.f32 %v1466_v16  ;;  %v1468_v9 = vpop.eup %1467  ;;  %1469 = vpow2.f32 %v832_v63 }
 0x2aa   :  { %v805_v43 = vpop.f32.mrf.mxu2  ;;  %vm859_vm4 = vmor %vm857_vm3, %vm858_vm2  ;;  %v845_v22 = vadd.f32 1.0, %v1468_v9 }
 0x2ab   :  { %v806_v29 = vadd.f32 %v1461_v13, %v805_v43  ;;  %v854_v30 = vsub.f32 1.0, %v853_v60 }
 0x2ac   :  { %1471 = vrcp.f32 %v845_v22  ;;  %vm872_vm7 = vweird.f32 %v845_v22 }
 0x2ad   :  { %v975_v44 = vmax.f32 %v806_v29, 0.0  ;;  %v855_v39 = vmul.f32 %v1466_v16, %v854_v30  ;;  %v823_v4 = vsub.f32 0.0, %v806_v29 }
 0x2af   :  { %994 = vrot.lane.b32.xlu2 %v975_v44, %s1528_s1  ;;  %v856_v37 = vadd.f32 %v1466_v16, %v855_v39  ;;  %v834_v52 = vmul.f32 1.442695, %v823_v4  ;;  %v1470_v40 = vpop.eup %1469 }
 0x2b1   :  { %v860_v45 = vsel %vm859_vm4, %v1466_v16, %v856_v37  ;;  %1473 = vpow2.f32 %v834_v52 }
 0x2b2   :  { %v808_v42 = vpop.f32.mrf.mxu2  ;;  %v865_v31 = vsel %vm862_vm5, %v864_v12, %v860_v45  ;;  %v1472_v55 = vpop.eup %1471 }
 0x2b3   :  { %v809_v58 = vadd.f32 %v1461_v13, %v808_v42  ;;  %v1020_v20 = vsub.f32 1.0, %v865_v31  ;;  %v868_v8 = vmul.f32 %v1472_v55, %v845_v22  ;;  %vm873_vm6 = vweird.f32 %v1472_v55 }
 0x2b4   :  { %vm874_vm8 = vmor %vm872_vm7, %vm873_vm6 }
 0x2b5   :  { %v976_v28 = vmax.f32 %v809_v58, 0.0  ;;  %v824_v59 = vsub.f32 0.0, %v809_v58  ;;  %v1028_v32 = vmul.f32 %v1020_v20, %v2118_v46  ;;  %v869_v7 = vsub.f32 1.0, %v868_v8 }
 0x2b7   :  { %996 = vrot.lane.b32.xlu0 %v976_v28, %s1528_s1  ;;  %v836_v27 = vmul.f32 1.442695, %v824_v59  ;;  %v1474_v41 = vpop.eup %1473  ;;  %v870_v48 = vmul.f32 %v1472_v55, %v869_v7 }
 0x2b8   :  { %v2188_v50 = vadd.f32 1.0, %v1474_v41 }
 0x2b9   :  { %v871_v58 = vadd.f32 %v1472_v55, %v870_v48 }
 0x2ba   :  { %v811_v26 = vpop.f32.mrf.mxu2  ;;  %v908_v20 = vand.u32 2147483648, %v2188_v50  ;;  %vm902_vm15 = vweird.f32 %v2188_v50 }
 0x2bb   :  { %v2167_v33 = vadd.f32 %v1461_v13, %v811_v26  ;;  %v878_v26 = vand.u32 2147483648, %v845_v22 }
 0x2bd   :  { %v977_v6 = vmax.f32 %v2167_v33, 0.0  ;;  %v825_v56 = vsub.f32 0.0, %v2167_v33  ;;  %v876_v33 = vand.u32 2147483647, %v845_v22 }
 0x2bf   :  { %998 = vrot.lane.b32.xlu1 %v977_v6, %s1528_s1  ;;  %v838_v43 = vmul.f32 1.442695, %v825_v56  ;;  %vm877_vm9 = vcmp.eq.f32.partialorder %v876_v33, 8.507059e+37 }
 0x2c2   :  { %v814_v61 = vpop.f32.mrf.mxu2 }
 0x2c3   :  { %v2171_v62 = vadd.f32 %v1461_v13, %v814_v61  ;;  %v875_v61 = vsel %vm874_vm8, %v1472_v55, %v871_v58 }
 0x2c5   :  { %v978_v23 = vmax.f32 %v2171_v62, 0.0  ;;  %v826_v44 = vsub.f32 0.0, %v2171_v62 }
 0x2c7   :  { %1000 = vrot.lane.b32.xlu2 %v978_v23, %s1528_s1  ;;  %v840_v49 = vmul.f32 1.442695, %v826_v44  ;;  %v879_v23 = vor.u32 1.1754944e-38, %v878_v26 }
 0x2c9   :  { %v880_v0 = vsel %vm877_vm9, %v879_v23, %v875_v61 }
 0x2ca   :  { %v817_v35 = vpop.f32.mrf.mxu2  ;;  %v1021_v30 = vsub.f32 1.0, %v880_v0 }
 0x2cb   :  { %v2175_v3 = vadd.f32 %v1461_v13, %v817_v35  ;;  %v846_v13 = vadd.f32 1.0, %v1470_v40  ;;  %v906_v40 = vand.u32 2147483647, %v2188_v50 }
 0x2cc   :  { %v1029_v34 = vmul.f32 %v1021_v30, %v2122_v51 }
 0x2cd   :  { %v979_v38 = vmax.f32 %v2175_v3, 0.0  ;;  %1475 = vrcp.f32 %v846_v13  ;;  %v827_v1 = vsub.f32 0.0, %v2175_v3  ;;  %v893_v60 = vand.u32 2147483648, %v846_v13 }
 0x2ce   :  { %1477 = vpow2.f32 %v836_v27  ;;  %vm887_vm11 = vweird.f32 %v846_v13  ;;  %v891_v15 = vand.u32 2147483647, %v846_v13  ;;  %vm907_vm2 = vcmp.eq.f32.partialorder %v906_v40, 8.507059e+37 }
 0x2cf   :  { %1002 = vrot.lane.b32.xlu0 %v979_v38, %s1528_s1  ;;  %1479 = vrcp.f32 %v2188_v50  ;;  %v842_v10 = vmul.f32 1.442695, %v827_v1  ;;  %v894_v63 = vor.u32 1.1754944e-38, %v893_v60 }
 0x2d0   :  { %1481 = vpow2.f32 %v838_v43  ;;  %vm892_vm13 = vcmp.eq.f32.partialorder %v891_v15, 8.507059e+37 }
 0x2d3   :  { %v1476_v57 = vpop.eup %1475 }
 0x2d4   :  { %v1478_v46 = vpop.eup %1477  ;;  %v883_v29 = vmul.f32 %v1476_v57, %v846_v13  ;;  %vm888_vm10 = vweird.f32 %v1476_v57  ;;  %v909_v13 = vor.u32 1.1754944e-38, %v908_v20 }
 0x2d5   :  { %v2192_v42 = vadd.f32 1.0, %v1478_v46  ;;  %v2194_v2 = vpop.eup %1479  ;;  %vm889_vm12 = vmor %vm887_vm11, %vm888_vm10 }
 0x2d6   :  { %v884_v28 = vsub.f32 1.0, %v883_v29  ;;  %v1482_v6 = vpop.eup %1481  ;;  %v898_v14 = vmul.f32 %v2194_v2, %v2188_v50  ;;  %vm903_vm14 = vweird.f32 %v2194_v2 }
 0x2d7   :  { %1483 = vrcp.f32 %v2192_v42  ;;  %v2200_v35 = vadd.f32 1.0, %v1482_v6  ;;  %vm904_vm0 = vmor %vm902_vm15, %vm903_vm14  ;;  %v923_v48 = vand.u32 2147483648, %v2192_v42  ;;  %vm917_vm4 = vweird.f32 %v2192_v42 }
 0x2d8   :  { %v885_v62 = vmul.f32 %v1476_v57, %v884_v28  ;;  %1485 = vpow2.f32 %v840_v49  ;;  %v899_v38 = vsub.f32 1.0, %v898_v14 }
 0x2d9   :  { %1487 = vrcp.f32 %v2200_v35  ;;  %v924_v26 = vor.u32 1.1754944e-38, %v923_v48  ;;  %vm932_vm8 = vweird.f32 %v2200_v35  ;;  %v936_v1 = vand.u32 2147483647, %v2200_v35 }
 0x2da   :  { %v886_v17 = vadd.f32 %v1476_v57, %v885_v62  ;;  %v900_v3 = vmul.f32 %v2194_v2, %v899_v38  ;;  %1489 = vpow2.f32 %v842_v10  ;;  %v938_v62 = vand.u32 2147483648, %v2200_v35 }
 0x2db   :  { %vm937_vm10 = vcmp.eq.f32.partialorder %v936_v1, 8.507059e+37 }
 0x2dc   :  { %v890_v19 = vsel %vm889_vm12, %v1476_v57, %v886_v17  ;;  %v901_v4 = vadd.f32 %v2194_v2, %v900_v3 }
 0x2dd   :  { %v2202_v16 = vpop.eup %1483  ;;  %v895_v12 = vsel %vm892_vm13, %v894_v63, %v890_v19 }
 0x2de   :  { %v1486_v39 = vpop.eup %1485  ;;  %v913_v37 = vmul.f32 %v2202_v16, %v2192_v42  ;;  %v1022_v51 = vsub.f32 1.0, %v895_v12  ;;  %v905_v59 = vsel %vm904_vm0, %v2194_v2, %v901_v4  ;;  %vm918_vm3 = vweird.f32 %v2202_v16 }
 0x2df   :  { %v2209_v45 = vadd.f32 1.0, %v1486_v39  ;;  %v1488_v52 = vpop.eup %1487  ;;  %v910_v56 = vsel %vm907_vm2, %v909_v13, %v905_v59  ;;  %vm919_vm5 = vmor %vm917_vm4, %vm918_vm3 }
 0x2e0   :  { %v1030_v41 = vmul.f32 %v1022_v51, %v2126_v18  ;;  %v1023_v29 = vsub.f32 1.0, %v910_v56  ;;  %v921_v18 = vand.u32 2147483647, %v2192_v42  ;;  %vm933_vm7 = vweird.f32 %v1488_v52 }
 0x2e1   :  { %1491 = vrcp.f32 %v2209_v45  ;;  %vm934_vm9 = vmor %vm932_vm8, %vm933_vm7  ;;  %v953_v19 = vand.u32 2147483648, %v2209_v45  ;;  %vm947_vm12 = vweird.f32 %v2209_v45 }
 0x2e2   :  { %v1031_v49 = vmul.f32 %v1023_v29, %v2130_v11  ;;  %vm922_vm6 = vcmp.eq.f32.partialorder %v921_v18, 8.507059e+37 }
 0x2e3   :  { %v954_v63 = vor.u32 1.1754944e-38, %v953_v19 }
 0x2f1   :  { %v989_v53 = vpop.permute.xlu2 %988 }
 0x2f2   :  { %v1012_v36 = vmul.f32 %v989_v53, %v865_v31  ;;  %v914_v31 = vsub.f32 1.0, %v913_v37  ;;  %v1490_v53 = vpop.eup %1489 }
 0x2f3   :  { %v2225_v8 = vadd.f32 1.0, %v1490_v53  ;;  %v1492_v43 = vpop.eup %1491 }
 0x2f4   :  { %v2183_v5 = vadd.f32 %v1028_v32, %v1012_v36  ;;  %v915_v36 = vmul.f32 %v2202_v16, %v914_v31  ;;  %v928_v32 = vmul.f32 %v1488_v52, %v2200_v35  ;;  %v943_v58 = vmul.f32 %v1492_v43, %v2209_v45 }
 0x2f5   :  { %1493 = vrcp.f32 %v2225_v8  ;;  %vm948_vm11 = vweird.f32 %v1492_v43  ;;  %v951_v35 = vand.u32 2147483647, %v2209_v45  ;;  %v968_v45 = vand.u32 2147483648, %v2225_v8 }
 0x2f6   :  { %1431 = vmatmul.msk.f32.vlgmr.msrb.gmra.mxu3 %vm665_vm1, %v2183_v5  ;;  %v916_v7 = vadd.f32 %v2202_v16, %v915_v36  ;;  %v929_v57 = vsub.f32 1.0, %v928_v32  ;;  %v944_v14 = vsub.f32 1.0, %v943_v58  ;;  %vm949_vm13 = vmor %vm947_vm12, %vm948_vm11  ;;  %vm962_vm0 = vweird.f32 %v2225_v8 }
 0x2f7   :  { %vm952_vm14 = vcmp.eq.f32.partialorder %v951_v35, 8.507059e+37  ;;  %v966_v51 = vand.u32 2147483647, %v2225_v8  ;;  %v969_v59 = vor.u32 1.1754944e-38, %v968_v45 }
 0x2f8   :  { %v920_v28 = vsel %vm919_vm5, %v2202_v16, %v916_v7  ;;  %v930_v2 = vmul.f32 %v1488_v52, %v929_v57  ;;  %v945_v11 = vmul.f32 %v1492_v43, %v944_v14  ;;  %v939_v16 = vor.u32 1.1754944e-38, %v938_v62 }
 0x2f9   :  { %v925_v33 = vsel %vm922_vm6, %v924_v26, %v920_v28  ;;  %vm967_vm3 = vcmp.eq.f32.partialorder %v966_v51, 8.507059e+37 }
 0x2fa   :  { %v931_v61 = vadd.f32 %v1488_v52, %v930_v2  ;;  %v1024_v23 = vsub.f32 1.0, %v925_v33  ;;  %v946_v15 = vadd.f32 %v1492_v43, %v945_v11 }
 0x2fb   :  { %v1494_v42 = vpop.eup %1493 }
 0x2fc   :  { %v958_v38 = vmul.f32 %v1494_v42, %v2225_v8  ;;  %v1032_v60 = vmul.f32 %v1024_v23, %v2134_v47  ;;  %v950_v47 = vsel %vm949_vm13, %v1492_v43, %v946_v15  ;;  %vm963_vm15 = vweird.f32 %v1494_v42 }
 0x2fd   :  { %v955_v4 = vsel %vm952_vm14, %v954_v63, %v950_v47  ;;  %vm964_vm2 = vmor %vm962_vm0, %vm963_vm15 }
 0x2fe   :  { %v959_v3 = vsub.f32 1.0, %v958_v38  ;;  %v1026_v40 = vsub.f32 1.0, %v955_v4 }
 0x300   :  { %v1034_v36 = vmul.f32 %v1026_v40, %v2142_v25  ;;  %v1462_v25 = vld [vmem:[%s2382_s7 + $0x1] ss:$0 sm:$0xff] }
 0x309   :  { %v995_v46 = vpop.permute.xlu2 %994 }
 0x30a   :  { %v1015_v44 = vmul.f32 %v995_v46, %v910_v56 }
 0x30c   :  { %v2240_v6 = vadd.f32 %v1031_v49, %v1015_v44 }
 0x311   :  { %v991_v24 = vpop.permute.xlu0 %990 }
 0x312   :  { %v1013_v9 = vmul.f32 %v991_v24, %v880_v0  ;;  %v935_v0 = vsel %vm934_vm9, %v1488_v52, %v931_v61  ;;  %v960_v24 = vmul.f32 %v1494_v42, %v959_v3 }
 0x313   :  { %v940_v30 = vsel %vm937_vm10, %v939_v16, %v935_v0 }
 0x314   :  { %v2213_v22 = vadd.f32 %v1029_v34, %v1013_v9  ;;  %v1025_v37 = vsub.f32 1.0, %v940_v30  ;;  %v961_v52 = vadd.f32 %v1494_v42, %v960_v24 }
 0x316   :  { %1432 = vmatmul.msk.f32.gmra.mxu3 %vm665_vm1, %v2213_v22  ;;  %v1033_v9 = vmul.f32 %v1025_v37, %v2138_v21  ;;  %v965_v21 = vsel %vm964_vm2, %v1494_v42, %v961_v52 }
 0x317   :  { %v970_v32 = vsel %vm967_vm3, %v969_v59, %v965_v21 }
 0x319   :  { %v993_v55 = vpop.permute.xlu1 %992 }
 0x31a   :  { %v1014_v27 = vmul.f32 %v993_v55, %v895_v12  ;;  %v1027_v55 = vsub.f32 1.0, %v970_v32 }
 0x31c   :  { %v2227_v50 = vadd.f32 %v1030_v41, %v1014_v27  ;;  %v1035_v41 = vmul.f32 %v1027_v55, %v2146_v54 }
 0x31e   :  { %1433 = vmatmul.msk.f32.gmra.mxu3 %vm665_vm1, %v2227_v50 }
 0x321   :  { %v1001_v20 = vpop.permute.xlu2 %1000 }
 0x322   :  { %v1018_v53 = vmul.f32 %v1001_v20, %v955_v4 }
 0x324   :  { %v2265_v13 = vadd.f32 %v1034_v36, %v1018_v53 }
 0x326   :  { %1434 = vmatmul.msk.f32.gmra.mxu3 %vm665_vm1, %v2240_v6 }
 0x329   :  { %v997_v17 = vpop.permute.xlu0 %996 }
 0x32a   :  { %v1016_v10 = vmul.f32 %v997_v17, %v925_v33 }
 0x32c   :  { %v2249_v39 = vadd.f32 %v1032_v60, %v1016_v10 }
 0x32e   :  { %1435 = vmatmul.msk.f32.gmra.mxu3 %vm665_vm1, %v2249_v39 }
 0x331   :  { %v999_v34 = vpop.permute.xlu1 %998 }
 0x332   :  { %v1017_v12 = vmul.f32 %v999_v34, %v940_v30 }
 0x334   :  { %v2257_v31 = vadd.f32 %v1033_v9, %v1017_v12 }
 0x336   :  { %1436 = vmatmul.msk.f32.gmra.mxu3 %vm665_vm1, %v2257_v31 }
 0x33e   :  { %1437 = vmatmul.msk.f32.gmra.mxu3 %vm665_vm1, %v2265_v13 }
 0x341   :  { %v1003_v27 = vpop.permute.xlu0 %1002 }
 0x342   :  { %v1019_v56 = vmul.f32 %v1003_v27, %v970_v32 }
 0x344   :  { %v2270_v7 = vadd.f32 %v1035_v41, %v1019_v56 }
 0x346   :  { %1438 = vmatmul.msk.f32.gmra.mxu3 %vm665_vm1, %v2270_v7 }
 0x379   :  { %v1091_v8 = vpop.f32.mrf.mxu3 }
 0x37a   :  { %v1092_v57 = vadd.f32 %v1462_v25, %v1091_v8 }
 0x37c   :  { %v1267_v43 = vmax.f32 %v1092_v57, 0.0  ;;  %v1115_v14 = vsub.f32 0.0, %v1092_v57 }
 0x37e   :  { %1283 = vrot.lane.b32.xlu1 %v1267_v43, %s1528_s1  ;;  %v1123_v62 = vmul.f32 1.442695, %v1115_v14 }
 0x380   :  { %1495 = vpow2.f32 %v1123_v62 }
 0x386   :  { %v1496_v16 = vpop.eup %1495 }
 0x387   :  { %v1139_v60 = vadd.f32 1.0, %v1496_v16 }
 0x389   :  { %v1158_v20 = vand.u32 2147483648, %v1139_v60  ;;  %vm1152_vm5 = vweird.f32 %v1139_v60  ;;  %v1156_v40 = vand.u32 2147483647, %v1139_v60 }
 0x38b   :  { %v1159_v59 = vor.u32 1.1754944e-38, %v1158_v20  ;;  %vm1157_vm7 = vcmp.eq.f32.partialorder %v1156_v40, 8.507059e+37 }
 0x399   :  { %v1094_v46 = vpop.f32.mrf.mxu3 }
 0x39a   :  { %v1095_v48 = vadd.f32 %v1462_v25, %v1094_v46 }
 0x39c   :  { %v1268_v29 = vmax.f32 %v1095_v48, 0.0  ;;  %v1116_v1 = vsub.f32 0.0, %v1095_v48 }
 0x39e   :  { %1285 = vrot.lane.b32.xlu2 %v1268_v29, %s1528_s1  ;;  %v1125_v17 = vmul.f32 1.442695, %v1116_v1 }
 0x3a0   :  { %1497 = vpow2.f32 %v1125_v17 }
 0x3a1   :  { %v1097_v54 = vpop.f32.mrf.mxu3  ;;  %1499 = vrcp.f32 %v1139_v60 }
 0x3a2   :  { %v1098_v18 = vadd.f32 %v1462_v25, %v1097_v54 }
 0x3a4   :  { %v1269_v44 = vmax.f32 %v1098_v18, 0.0  ;;  %v1117_v4 = vsub.f32 0.0, %v1098_v18 }
 0x3a6   :  { %1287 = vrot.lane.b32.xlu0 %v1269_v44, %s1528_s1  ;;  %v1498_v3 = vpop.eup %1497  ;;  %v1127_v51 = vmul.f32 1.442695, %v1117_v4 }
 0x3a7   :  { %v1140_v19 = vadd.f32 1.0, %v1498_v3  ;;  %v1500_v35 = vpop.eup %1499 }
 0x3a8   :  { %v1148_v37 = vmul.f32 %v1500_v35, %v1139_v60  ;;  %vm1153_vm4 = vweird.f32 %v1500_v35 }
 0x3a9   :  { %v1100_v58 = vpop.f32.mrf.mxu3  ;;  %1501 = vrcp.f32 %v1140_v19  ;;  %vm1154_vm6 = vmor %vm1152_vm5, %vm1153_vm4  ;;  %vm1167_vm9 = vweird.f32 %v1140_v19  ;;  %v1171_v57 = vand.u32 2147483647, %v1140_v19 }
 0x3aa   :  { %v1101_v28 = vadd.f32 %v1462_v25, %v1100_v58  ;;  %v1149_v24 = vsub.f32 1.0, %v1148_v37 }
 0x3ab   :  { %vm1172_vm11 = vcmp.eq.f32.partialorder %v1171_v57, 8.507059e+37 }
 0x3ac   :  { %v1270_v2 = vmax.f32 %v1101_v28, 0.0  ;;  %v1150_v9 = vmul.f32 %v1500_v35, %v1149_v24  ;;  %v1118_v32 = vsub.f32 0.0, %v1101_v28 }
 0x3ae   :  { %1289 = vrot.lane.b32.xlu1 %v1270_v2, %s1528_s1  ;;  %v1151_v52 = vadd.f32 %v1500_v35, %v1150_v9  ;;  %v1129_v8 = vmul.f32 1.442695, %v1118_v32 }
 0x3af   :  { %v1502_v63 = vpop.eup %1501 }
 0x3b0   :  { %v1163_v12 = vmul.f32 %v1502_v63, %v1140_v19  ;;  %v1155_v53 = vsel %vm1154_vm6, %v1500_v35, %v1151_v52  ;;  %vm1168_vm8 = vweird.f32 %v1502_v63 }
 0x3b1   :  { %v1103_v26 = vpop.f32.mrf.mxu3  ;;  %v1160_v55 = vsel %vm1157_vm7, %v1159_v59, %v1155_v53  ;;  %vm1169_vm10 = vmor %vm1167_vm9, %vm1168_vm8 }
 0x3b2   :  { %v1104_v49 = vadd.f32 %v1462_v25, %v1103_v26  ;;  %v1164_v45 = vsub.f32 1.0, %v1163_v12  ;;  %v1315_v56 = vsub.f32 1.0, %v1160_v55 }
 0x3b4   :  { %v1271_v33 = vmax.f32 %v1104_v49, 0.0  ;;  %v1119_v47 = vsub.f32 0.0, %v1104_v49  ;;  %v1165_v36 = vmul.f32 %v1502_v63, %v1164_v45  ;;  %v1323_v48 = vmul.f32 %v1315_v56, %v2183_v5 }
 0x3b6   :  { %1291 = vrot.lane.b32.xlu2 %v1271_v33, %s1528_s1  ;;  %v1131_v34 = vmul.f32 1.442695, %v1119_v47  ;;  %v1166_v41 = vadd.f32 %v1502_v63, %v1165_v36 }
 0x3b8   :  { %1503 = vpow2.f32 %v1131_v34  ;;  %v1170_v46 = vsel %vm1169_vm10, %v1502_v63, %v1166_v41 }
 0x3b9   :  { %v1106_v61 = vpop.f32.mrf.mxu3  ;;  %1505 = vpow2.f32 %v1127_v51 }
 0x3ba   :  { %v2282_v42 = vadd.f32 %v1462_v25, %v1106_v61 }
 0x3bc   :  { %v1272_v23 = vmax.f32 %v2282_v42, 0.0  ;;  %v1120_v62 = vsub.f32 0.0, %v2282_v42 }
 0x3be   :  { %1293 = vrot.lane.b32.xlu0 %v1272_v23, %s1528_s1  ;;  %v1504_v21 = vpop.eup %1503  ;;  %v1133_v60 = vmul.f32 1.442695, %v1120_v62 }
 0x3bf   :  { %v2291_v27 = vadd.f32 1.0, %v1504_v21  ;;  %v1506_v43 = vpop.eup %1505 }
 0x3c0   :  { %v2295_v58 = vadd.f32 1.0, %v1506_v43 }
 0x3c1   :  { %v1109_v11 = vpop.f32.mrf.mxu3  ;;  %1507 = vrcp.f32 %v2291_v27  ;;  %v1218_v37 = vand.u32 2147483648, %v2291_v27  ;;  %vm1212_vm13 = vweird.f32 %v2291_v27  ;;  %v1216_v24 = vand.u32 2147483647, %v2291_v27 }
 0x3c2   :  { %v2286_v0 = vadd.f32 %v1462_v25, %v1109_v11  ;;  %1509 = vpow2.f32 %v1129_v8  ;;  %v1188_v51 = vand.u32 2147483648, %v2295_v58  ;;  %vm1182_vm2 = vweird.f32 %v2295_v58 }
 0x3c3   :  { %1511 = vrcp.f32 %v2295_v58  ;;  %v1219_v12 = vor.u32 1.1754944e-38, %v1218_v37  ;;  %vm1217_vm15 = vcmp.eq.f32.partialorder %v1216_v24, 8.507059e+37  ;;  %v1186_v21 = vand.u32 2147483647, %v2295_v58 }
 0x3c4   :  { %v1273_v38 = vmax.f32 %v2286_v0, 0.0  ;;  %v1189_v41 = vor.u32 1.1754944e-38, %v1188_v51 }
 0x3c5   :  { %vm1187_vm4 = vcmp.eq.f32.partialorder %v1186_v21, 8.507059e+37 }
 0x3c6   :  { %1295 = vrot.lane.b32.xlu1 %v1273_v38, %s1528_s1 }
 0x3c7   :  { %v1508_v26 = vpop.eup %1507 }
 0x3c8   :  { %v1510_v5 = vpop.eup %1509  ;;  %v1208_v14 = vmul.f32 %v1508_v26, %v2291_v27  ;;  %vm1213_vm12 = vweird.f32 %v1508_v26 }
 0x3c9   :  { %v1112_v10 = vpop.f32.mrf.mxu3  ;;  %v2305_v11 = vadd.f32 1.0, %v1510_v5  ;;  %v1512_v16 = vpop.eup %1511  ;;  %vm1214_vm14 = vmor %vm1212_vm13, %vm1213_vm12 }
 0x3ca   :  { %v1113_v30 = vadd.f32 %v1462_v25, %v1112_v10  ;;  %v1173_v25 = vand.u32 2147483648, %v1140_v19  ;;  %v1209_v17 = vsub.f32 1.0, %v1208_v14  ;;  %v1178_v42 = vmul.f32 %v1512_v16, %v2295_v58 }
 0x3cb   :  { %vm1183_vm0 = vweird.f32 %v1512_v16  ;;  %vm1197_vm6 = vweird.f32 %v2305_v11 }
 0x3cc   :  { %v1274_v15 = vmax.f32 %v1113_v30, 0.0  ;;  %v1174_v54 = vor.u32 1.1754944e-38, %v1173_v25  ;;  %v1122_v18 = vsub.f32 0.0, %v1113_v30  ;;  %v1210_v30 = vmul.f32 %v1508_v26, %v1209_v17  ;;  %vm1184_vm3 = vmor %vm1182_vm2, %vm1183_vm0 }
 0x3cd   :  { %v1179_v19 = vsub.f32 1.0, %v1178_v42 }
 0x3ce   :  { %1297 = vrot.lane.b32.xlu2 %v1274_v15, %s1528_s1  ;;  %v1175_v28 = vsel %vm1172_vm11, %v1174_v54, %v1170_v46  ;;  %v1137_v49 = vmul.f32 1.442695, %v1122_v18  ;;  %v1211_v3 = vadd.f32 %v1508_v26, %v1210_v30  ;;  %v1203_v54 = vand.u32 2147483648, %v2305_v11 }
 0x3cf   :  { %v1316_v33 = vsub.f32 1.0, %v1175_v28  ;;  %v1180_v9 = vmul.f32 %v1512_v16, %v1179_v19 }
 0x3d0   :  { %1513 = vpow2.f32 %v1137_v49  ;;  %v1215_v34 = vsel %vm1214_vm14, %v1508_v26, %v1211_v3  ;;  %v1204_v26 = vor.u32 1.1754944e-38, %v1203_v54 }
 0x3d1   :  { %v1324_v1 = vmul.f32 %v1316_v33, %v2213_v22  ;;  %1515 = vrcp.f32 %v2305_v11  ;;  %v1121_v22 = vsub.f32 0.0, %v2286_v0  ;;  %v1220_v52 = vsel %vm1217_vm15, %v1219_v12, %v1215_v34 }
 0x3d2   :  { %1517 = vpow2.f32 %v1133_v60  ;;  %v1181_v20 = vadd.f32 %v1512_v16, %v1180_v9  ;;  %v1319_v53 = vsub.f32 1.0, %v1220_v52 }
 0x3d3   :  { %v1135_v47 = vmul.f32 1.442695, %v1121_v22 }
 0x3d4   :  { %v1185_v36 = vsel %vm1184_vm3, %v1512_v16, %v1181_v20  ;;  %v1327_v25 = vmul.f32 %v1319_v53, %v2249_v39  ;;  %v1201_v39 = vand.u32 2147483647, %v2305_v11 }
 0x3d5   :  { %v1190_v57 = vsel %vm1187_vm4, %v1189_v41, %v1185_v36 }
 0x3d6   :  { %v1514_v10 = vpop.eup %1513  ;;  %v1317_v18 = vsub.f32 1.0, %v1190_v57  ;;  %vm1202_vm8 = vcmp.eq.f32.partialorder %v1201_v39, 8.507059e+37 }
 0x3d7   :  { %v2314_v15 = vadd.f32 1.0, %v1514_v10  ;;  %v1516_v35 = vpop.eup %1515 }
 0x3d8   :  { %v1518_v63 = vpop.eup %1517  ;;  %v1193_v0 = vmul.f32 %v1516_v35, %v2305_v11  ;;  %vm1198_vm5 = vweird.f32 %v1516_v35  ;;  %v1325_v49 = vmul.f32 %v1317_v18, %v2227_v50 }
 0x3d9   :  { %1519 = vrcp.f32 %v2314_v15  ;;  %v2321_v4 = vadd.f32 1.0, %v1518_v63  ;;  %vm1199_vm7 = vmor %vm1197_vm6, %vm1198_vm5  ;;  %vm1257_vm10 = vweird.f32 %v2314_v15  ;;  %v1261_v50 = vand.u32 2147483647, %v2314_v15 }
 0x3da   :  { %1521 = vpow2.f32 %v1135_v47  ;;  %v1194_v45 = vsub.f32 1.0, %v1193_v0 }
 0x3db   :  { %1523 = vrcp.f32 %v2321_v4  ;;  %vm1262_vm12 = vcmp.eq.f32.partialorder %v1261_v50, 8.507059e+37  ;;  %v1233_v37 = vand.u32 2147483648, %v2321_v4  ;;  %vm1227_vm14 = vweird.f32 %v2321_v4 }
 0x3dc   :  { %v1195_v32 = vmul.f32 %v1516_v35, %v1194_v45  ;;  %v1231_v47 = vand.u32 2147483647, %v2321_v4 }
 0x3dd   :  { %v1234_v34 = vor.u32 1.1754944e-38, %v1233_v37 }
 0x3de   :  { %v1196_v46 = vadd.f32 %v1516_v35, %v1195_v32  ;;  %vm1232_vm0 = vcmp.eq.f32.partialorder %v1231_v47, 8.507059e+37 }
 0x3df   :  { %v1520_v40 = vpop.eup %1519 }
 0x3e0   :  { %v1522_v59 = vpop.eup %1521  ;;  %vm1258_vm9 = vweird.f32 %v1520_v40 }
 0x3e1   :  { %v2329_v8 = vadd.f32 1.0, %v1522_v59  ;;  %vm1259_vm11 = vmor %vm1257_vm10, %vm1258_vm9 }
 0x3e3   :  { %1525 = vrcp.f32 %v2329_v8  ;;  %v1248_v45 = vand.u32 2147483648, %v2329_v8  ;;  %vm1242_vm3 = vweird.f32 %v2329_v8 }
 0x3e5   :  { %v1249_v53 = vor.u32 1.1754944e-38, %v1248_v45 }
 0x3f0   :  { %v1284_v29 = vpop.permute.xlu1 %1283 }
 0x3f1   :  { %v1307_v44 = vmul.f32 %v1284_v29, %v1160_v55  ;;  %v1253_v55 = vmul.f32 %v1520_v40, %v2314_v15  ;;  %v1524_v29 = vpop.eup %1523 }
 0x3f2   :  { %vm1228_vm13 = vweird.f32 %v1524_v29 }
 0x3f3   :  { %v1331_v2 = vadd.f32 %v1323_v48, %v1307_v44  ;;  %v1254_v48 = vsub.f32 1.0, %v1253_v55  ;;  %v1200_v44 = vsel %vm1199_vm7, %v1516_v35, %v1196_v46  ;;  %vm1229_vm15 = vmor %vm1227_vm14, %vm1228_vm13 }
 0x3f4   :  { %v1205_v5 = vsel %vm1202_vm8, %v1204_v26, %v1200_v44 }
 0x3f5   :  { %1339 = vst.msk [vmem:[%s2383_s8] sm:$0xff] %vm665_vm1, %v1331_v2  ;;  %v1255_v58 = vmul.f32 %v1520_v40, %v1254_v48  ;;  %v1318_v11 = vsub.f32 1.0, %v1205_v5 }
 0x3f7   :  { %v1326_v42 = vmul.f32 %v1318_v11, %v2240_v6 }
 0x3f8   :  { %v1286_v61 = vpop.permute.xlu2 %1285 }
 0x3f9   :  { %v1308_v23 = vmul.f32 %v1286_v61, %v1175_v28  ;;  %v1223_v28 = vmul.f32 %v1524_v29, %v2321_v4  ;;  %v1256_v61 = vadd.f32 %v1520_v40, %v1255_v58 }
 0x3fb   :  { %v1332_v38 = vadd.f32 %v1324_v1, %v1308_v23  ;;  %v1224_v62 = vsub.f32 1.0, %v1223_v28  ;;  %v1526_v23 = vpop.eup %1525  ;;  %v1263_v1 = vand.u32 2147483648, %v2314_v15 }
 0x3fc   :  { %v1238_v16 = vmul.f32 %v1526_v23, %v2329_v8  ;;  %vm1243_vm2 = vweird.f32 %v1526_v23 }
 0x3fd   :  { %1340 = vst.msk [vmem:[%s2383_s8 + $0x8] sm:$0xff] %vm665_vm1, %v1332_v38  ;;  %v1260_v38 = vsel %vm1259_vm11, %v1520_v40, %v1256_v61  ;;  %v1225_v17 = vmul.f32 %v1524_v29, %v1224_v62  ;;  %v1264_v10 = vor.u32 1.1754944e-38, %v1263_v1  ;;  %v1246_v40 = vand.u32 2147483647, %v2329_v8  ;;  %vm1244_vm4 = vmor %vm1242_vm3, %vm1243_vm2 }
 0x3fe   :  { %v1239_v35 = vsub.f32 1.0, %v1238_v16 }
 0x3ff   :  { %v1265_v22 = vsel %vm1262_vm12, %v1264_v10, %v1260_v38  ;;  %v1226_v19 = vadd.f32 %v1524_v29, %v1225_v17  ;;  %vm1247_vm5 = vcmp.eq.f32.partialorder %v1246_v40, 8.507059e+37 }
 0x400   :  { %v1322_v15 = vsub.f32 1.0, %v1265_v22  ;;  %v1240_v24 = vmul.f32 %v1526_v23, %v1239_v35 }
 0x401   :  { %v1230_v6 = vsel %vm1229_vm15, %v1524_v29, %v1226_v19 }
 0x402   :  { %v1330_v0 = vmul.f32 %v1322_v15, %v2270_v7  ;;  %v1235_v12 = vsel %vm1232_vm0, %v1234_v34, %v1230_v6  ;;  %v1241_v20 = vadd.f32 %v1526_v23, %v1240_v24 }
 0x403   :  { %v1320_v4 = vsub.f32 1.0, %v1235_v12 }
 0x404   :  { %v1245_v51 = vsel %vm1244_vm4, %v1526_v23, %v1241_v20 }
 0x405   :  { %v1328_v21 = vmul.f32 %v1320_v4, %v2257_v31  ;;  %v1250_v36 = vsel %vm1247_vm5, %v1249_v53, %v1245_v51 }
 0x406   :  { %v1321_v55 = vsub.f32 1.0, %v1250_v36 }
 0x410   :  { %v1292_v27 = vpop.permute.xlu2 %1291 }
 0x411   :  { %v1311_v56 = vmul.f32 %v1292_v27, %v1220_v52 }
 0x413   :  { %v1335_v43 = vadd.f32 %v1327_v25, %v1311_v56  ;;  %v1329_v56 = vmul.f32 %v1321_v55, %v2265_v13 }
 0x415   :  { %1343 = vst.msk [vmem:[%s2383_s8 + $0x20] sm:$0xff] %vm665_vm1, %v1335_v43 }
 0x418   :  { %v1288_v2 = vpop.permute.xlu0 %1287 }
 0x419   :  { %v1309_v33 = vmul.f32 %v1288_v2, %v1190_v57 }
 0x41b   :  { %v1333_v14 = vadd.f32 %v1325_v49, %v1309_v33 }
 0x41d   :  { %1341 = vst.msk [vmem:[%s2383_s8 + $0x10] sm:$0xff] %vm665_vm1, %v1333_v14 }
 0x420   :  { %v1290_v60 = vpop.permute.xlu1 %1289 }
 0x421   :  { %v1310_v30 = vmul.f32 %v1290_v60, %v1205_v5 }
 0x423   :  { %v1334_v3 = vadd.f32 %v1326_v42, %v1310_v30 }
 0x425   :  { %1342 = vst.msk [vmem:[%s2383_s8 + $0x18] sm:$0xff] %vm665_vm1, %v1334_v3 }
 0x428   :  { %v1298_v63 = vpop.permute.xlu2 %1297 }
 0x429   :  { %v1314_v9 = vmul.f32 %v1298_v63, %v1265_v22 }
 0x42b   :  { %v1338_v52 = vadd.f32 %v1330_v0, %v1314_v9 }
 0x42d   :  { %1346 = vst.msk [vmem:[%s2383_s8 + $0x38] sm:$0xff] %vm665_vm1, %v1338_v52 }
 0x430   :  { %v1294_v7 = vpop.permute.xlu0 %1293 }
 0x431   :  { %v1312_v59 = vmul.f32 %v1294_v7, %v1235_v12 }
 0x433   :  { %v1336_v32 = vadd.f32 %v1328_v21, %v1312_v59 }
 0x435   :  { %1344 = vst.msk [vmem:[%s2383_s8 + $0x28] sm:$0xff] %vm665_vm1, %v1336_v32 }
 0x438   :  { %v1296_v27 = vpop.permute.xlu1 %1295 }
 0x439   :  { %v1313_v41 = vmul.f32 %v1296_v27, %v1250_v36 }
 0x43b   :  { %v1337_v25 = vadd.f32 %v1329_v56, %v1313_v41 }
 0x43d   :  { %1345 = vst.msk [vmem:[%s2383_s8 + $0x30] sm:$0xff] %vm665_vm1, %v1337_v25 }

// kernel: qanet_forward.10
= control target key start
LH: loop header
LB: loop body
LE: loop exit
PB: predicated region body
PF: predicated region fallthrough
CT: control target
= control target key end

     0   :  { %s2345_s27 = smov 0   ;;  %s2765_s0 = inlined_call_operand.vmem [shape: f32[2,16,32], index: 0, kind: input, shape index: {}]   ;;  %s2766_s1 = inlined_call_operand.vmem [shape: f32[16,32], index: 1, kind: input, shape index: {}]   ;;  %s2767_s2 = inlined_call_operand.vmem [shape: f32[2,1,16], index: 2, kind: input, shape index: {}]   ;;  %s2768_s3 = inlined_call_operand.vmem [shape: f32[2,16,1], index: 3, kind: input, shape index: {}]   ;;  %s2769_s4 = inlined_call_operand.vmem [shape: f32[4,32], index: 4, kind: input, shape index: {}]   ;;  %s2770_s5 = inlined_call_operand.vmem [shape: f32[4,32], index: 5, kind: input, shape index: {}]   ;;  %s2771_s6 = inlined_call_operand.vmem [shape: f32[2,5,32], index: 6, kind: input, shape index: {}]   ;;  %s2772_s7 = inlined_call_operand.vmem [shape: f32[2,32], index: 7, kind: input, shape index: {}]   ;;  %s2773_s8 = inlined_call_operand.vmem [shape: f32[2,32,32], index: 8, kind: input, shape index: {}]   ;;  %s2774_s9 = inlined_call_operand.vmem [shape: f32[2,32], index: 9, kind: input, shape index: {}]   ;;  %s2775_s10 = inlined_call_operand.vmem [shape: f32[1,32,96], index: 10, kind: input, shape index: {}]   ;;  %s2776_s11 = inlined_call_operand.vmem [shape: f32[1,96], index: 11, kind: input, shape index: {}]   ;;  %s2777_s12 = inlined_call_operand.vmem [shape: f32[1,32,32], index: 12, kind: input, shape index: {}]   ;;  %s2778_s13 = inlined_call_operand.vmem [shape: f32[1,32], index: 13, kind: input, shape index: {}]   ;;  %s2779_s14 = inlined_call_operand.vmem [shape: f32[1,32,32], index: 14, kind: input, shape index: {}]   ;;  %s2780_s15 = inlined_call_operand.vmem [shape: f32[1,32], index: 15, kind: input, shape index: {}]   ;;  %s2781_s16 = inlined_call_operand.vmem [shape: f32[1,32,32], index: 16, kind: input, shape index: {}]   ;;  %s2782_s17 = inlined_call_operand.vmem [shape: f32[1,32], index: 17, kind: input, shape index: {}]   ;;  %s2783_s18 = inlined_call_operand.vmem [shape: f32[2,16,32], index: 18, kind: output, shape index: {}]  }
   0x1   :  { %2785 = sst [smem:[#allocation2_spill]] %s2765_s0 }
   0x2   :  { %2786 = sst [smem:[#allocation3_spill]] %s2766_s1 }
   0x3   :  { %2787 = sst [smem:[#allocation4_spill]] %s2767_s2 }
   0x4 LB: > { %s2022_s28 = sadd.s32 4294967295, %s2234_s27   ;;  %p2026_p0 = scmp.ge.s32.totalorder %s2234_s27, 1  ;;  %s2234_s27 = sphi %s2345_s27, %s28_s27  }
   0x5   : > { %p530_p1 = scmp.lt.s32.totalorder %s2234_s27, 3 }
   0x7   : > { %p531_p2 = pnand %p2026_p0, %p530_p1 }
   0x8   : > { %p592_p3 = scmp.lt.s32.totalorder (!%p531_p2), %s2022_s28, 1  ;;  %s2788_s19 = sld [smem:[#allocation3_spill]] (!%p531_p2) }
   0x9   : > { %534 = sbr.rel (%p531_p2) target bundleno = 3413 (0xd55), region = 92  ;;  %s2789_s21 = sld [smem:[#allocation2_spill]] (!%p531_p2) }
   0xa   : > { %s2239_s2 = smov (!%p531_p2), 96   ;;  %s2240_s23 = smov (!%p531_p2), 64  }
   0xb   : > { %s2241_s24 = smov (!%p531_p2), 88   ;;  %s2242_s25 = smov (!%p531_p2), 120  }
   0xc   : > { %s2244_s30 = smov (!%p531_p2), 104   ;;  %s2245_s0 = smov (!%p531_p2), 112  }
   0xe   : > { %s2792_s28 = smov (!%p592_p3, %s2022_s28), 1  ;;  %v613_v0 = vld [vmem:[%s2788_s19 + $0x8] sm:$0xff]  ;;  %vm666_vm0 = vcmask 261120   ;;  %v612_v4 = vld [vmem:[%s2788_s19] sm:$0xff]  ;;  %v2236_v8 = vmov 32.0   ;;  %v2237_v12 = vmov 0   ;;  %v619_v40 = vlaneseq }
   0xf   : > { %s2356_s29 = sshll.u32 %s2792_s28, 4  ;;  %2178 = vrcp.f32 %v2236_v8  ;;  %2140 = vset.pattern.permute.xlu2 %v2237_v12  ;;  %2161 = vset.pattern.permute.xlu0 %v2237_v12  ;;  %v2162_v43 = vld [vmem:[%s2769_s4] ss:$0 sm:$0xff]  ;;  %vm737_vm11 = vcmask 130048  }
  0x10   : > { %s596_s22 = scalar_lea.vmem %s2789_s21, %s2356_s29  ;;  %s604_s26 = scalar_lea.vmem %s2768_s3, %s2356_s29  ;;  %v2163_v46 = vld [vmem:[%s2770_s5] ss:$0 sm:$0xff]  ;;  %v620_v48 = vshrl.u32 %v619_v40, 7  ;;  %v623_v59 = vand.u32 127, %v619_v40 }
  0x11   : > { %v611_v1 = vld [vmem:[%s596_s22 + $0x8] sm:$0xff]  ;;  %v610_v3 = vld [vmem:[%s596_s22] sm:$0xff]  ;;  %s2790_s21 = sld [smem:[#allocation4_spill]] }
  0x12   : > { %v2365_v2 = vadd.f32 %v613_v0, %v611_v1  ;;  %v2372_v6 = vadd.f32 %v612_v4, %v610_v3  ;;  %v616_v11 = vld [vmem:[%s604_s26 + $0x8] sm:$0xff]  ;;  %v615_v15 = vld [vmem:[%s604_s26] sm:$0xff]  ;;  %v621_v54 = vadd.s32 8, %v620_v48  ;;  %v632_v61 = vadd.s32 4294967295, %v620_v48  ;;  %s2243_s26 = smov 72  }
  0x13   : > { %731 = vperm.xlu2 %2140, %v616_v11   ;;  %v624_v63 = vadd.s32 4294967294, %v620_v48  ;;  %vm640_vm10 = vcmp.eq.s32.totalorder %v623_v59, %v620_v48  ;;  %v2238_v4 = vmov 0.0   ;;  %v654_v12 = vadd.s32 2, %v620_v48 }
  0x14   : > { %v670_v5 = vsel %vm666_vm0, %v2365_v2, 0.0  ;;  %v667_v7 = vsel %vm666_vm0, %v2372_v6, 0.0  ;;  %v625_v60 = vadd.s32 4294967294, %v621_v54  ;;  %vm634_vm9 = vcmp.eq.s32.totalorder %v623_v59, %v632_v61 }
  0x15   : > { %671 = vadd.xlane.f32.xlu0 %v670_v5  ;;  %v2179_v9 = vpop.eup %2178  ;;  %vm626_vm12 = vcmp.eq.s32.totalorder %v623_v59, %v624_v63  ;;  %v2406_v8 = vsel %vm640_vm10, 1.0, %v2238_v4  ;;  %vm641_vm15 = vcmp.eq.s32.totalorder %v623_v59, %v621_v54 }
  0x16   : > { %v674_v10 = vmul.f32 32.0, %v2179_v9  ;;  %vm678_vm1 = vweird.f32 %v2179_v9  ;;  %vm627_vm8 = vcmp.eq.s32.totalorder %v623_v59, %v625_v60  ;;  %v2412_v11 = vsel %vm626_vm12, 1.0, %v2238_v4 }
  0x17   : > { %v2402_v5 = vsel %vm627_vm8, 1.0, %v2238_v4  ;;  %s599_s22 = scalar_lea.vmem %s2790_s21, %s2792_s28  ;;  %s2246_s28 = smov 80  }
  0x18   : > { %v675_v13 = vsub.f32 1.0, %v674_v10  ;;  %v646_v10 = vadd.s32 1, %v620_v48 }
  0x1a   : > { %v676_v14 = vmul.f32 %v2179_v9, %v675_v13  ;;  %vm648_vm14 = vcmp.eq.s32.totalorder %v623_v59, %v646_v10 }
  0x1b   : > { %726 = vperm.xlu2 %2140, %v615_v15   ;;  %v2422_v15 = vsel %vm641_vm15, 1.0, %v2238_v4 }
  0x1c   : > { %v677_v16 = vadd.f32 %v2179_v9, %v676_v14  ;;  %v2420_v14 = vsel %vm648_vm14, 1.0, %v2238_v4 }
  0x1d   : > { %668 = vadd.xlane.f32.xlu0 %v667_v7  ;;  %v2404_v7 = vsel %vm634_vm9, 1.0, %v2238_v4 }
  0x1e   : > { %v2380_v17 = vsel %vm678_vm1, %v2179_v9, %v677_v16  ;;  %v633_v9 = vadd.s32 4294967295, %v621_v54  ;;  %vm656_vm1 = vcmp.eq.s32.totalorder %v623_v59, %v654_v12  ;;  %v647_v16 = vadd.s32 1, %v621_v54 }
  0x20   : > { %vm635_vm13 = vcmp.eq.s32.totalorder %v623_v59, %v633_v9 }
  0x21   : > { %v2418_v13 = vsel %vm635_vm13, 1.0, %v2238_v4 }
  0x6d   : > { %v2396_v52 = vpop.permute.xlu2 %731 }
  0x75   : > { %v2399_v1 = vpop.permute.xlu2 %726 }
  0x88   : > { %v672_v18 = vpop.xlane.xlu0 %671 }
  0x89   : > { %v681_v19 = vmul.f32 %v2380_v17, %v672_v18  ;;  %v2428_v18 = vsel %vm656_vm1, 1.0, %v2238_v4 }
  0x8b   : > { %v683_v20 = vsub.f32 %v2365_v2, %v681_v19  ;;  %v655_v19 = vadd.s32 2, %v621_v54 }
  0x8d   : > { %v685_v21 = vmul.f32 %v683_v20, %v683_v20 }
  0x8f   : > { %v689_v22 = vsel %vm666_vm0, %v685_v21, 0.0 }
  0x90   : > { %690 = vadd.xlane.f32.xlu1 %v689_v22  ;;  %v669_v23 = vpop.xlane.xlu0 %668  ;;  %v915_v22 = vld [vmem:[%s2773_s8 + $0x18] sm:$0xff] }
  0x91   : > { %v680_v24 = vmul.f32 %v2380_v17, %v669_v23  ;;  %v914_v23 = vld [vmem:[%s2773_s8 + $0x10] sm:$0xff] }
  0x93   : > { %v682_v25 = vsub.f32 %v2372_v6, %v680_v24  ;;  %v913_v24 = vld [vmem:[%s2773_s8 + $0x8] sm:$0xff] }
  0x95   : > { %v684_v26 = vmul.f32 %v682_v25, %v682_v25 }
  0x97   : > { %v686_v27 = vsel %vm666_vm0, %v684_v26, 0.0  ;;  %v736_v26 = vld [vmem:[%s2771_s6] sm:$0x1f] }
  0x98   : > { %687 = vadd.xlane.f32.xlu1 %v686_v27  ;;  %v801_v27 = vperm.slane %v736_v26, 1  ;;  %v903_v40 = vperm.slane %v736_v26, 4 }
 0x103   : > { %v691_v28 = vpop.xlane.xlu1 %690 }
 0x104   : > { %v693_v29 = vmul.f32 %v691_v28, %v2380_v17 }
 0x106   : > { %v695_v30 = vadd.f32 1e-05, %v693_v29 }
 0x108   : > { %2180 = vrsqrt.f32 %v695_v30  ;;  %vm712_vm3 = vweird.f32 %v695_v30 }
 0x10b   : > { %v688_v31 = vpop.xlane.xlu1 %687 }
 0x10c   : > { %v692_v32 = vmul.f32 %v688_v31, %v2380_v17 }
 0x10e   : > { %v2181_v33 = vpop.eup %2180  ;;  %v694_v34 = vadd.f32 1e-05, %v692_v32 }
 0x10f   : > { %v707_v35 = vmul.f32 %v2181_v33, %v695_v30  ;;  %vm713_vm2 = vweird.f32 %v2181_v33  ;;  %v767_v30 = vperm.slane %v736_v26, 0 }
 0x110   : > { %2182 = vrsqrt.f32 %v694_v34  ;;  %vm714_vm4 = vmor %vm712_vm3, %vm713_vm2  ;;  %vm702_vm6 = vweird.f32 %v694_v34  ;;  %vm649_vm2 = vcmp.eq.s32.totalorder %v623_v59, %v647_v16  ;;  %vm657_vm3 = vcmp.eq.s32.totalorder %v623_v59, %v655_v19 }
 0x111   : > { %v708_v36 = vmul.f32 %v2181_v33, %v707_v35  ;;  %v2438_v21 = vsel %vm657_vm3, 1.0, %v2238_v4 }
 0x113   : > { %v709_v37 = vmul.f32 0.5, %v708_v36 }
 0x115   : > { %v710_v38 = vsub.f32 1.5, %v709_v37 }
 0x116   : > { %v2183_v39 = vpop.eup %2182 }
 0x117   : > { %v711_v41 = vmul.f32 %v2181_v33, %v710_v38  ;;  %v697_v42 = vmul.f32 %v2183_v39, %v694_v34  ;;  %vm703_vm5 = vweird.f32 %v2183_v39  ;;  %v835_v34 = vperm.slane %v736_v26, 2 }
 0x118   : > { %vm704_vm7 = vmor %vm702_vm6, %vm703_vm5  ;;  %v869_v38 = vperm.slane %v736_v26, 3 }
 0x119   : > { %v698_v44 = vmul.f32 %v2183_v39, %v697_v42  ;;  %v715_v45 = vsel %vm714_vm4, %v2181_v33, %v711_v41 }
 0x11a   : > { %v717_v47 = vmul.f32 %v715_v45, %v683_v20  ;;  %v2434_v20 = vsel %vm649_vm2, 1.0, %v2238_v4  ;;  %vm1290_vm2 = vcmask 64512  }
 0x11b   : > { %v699_v49 = vmul.f32 0.5, %v698_v44 }
 0x11c   : > { %v720_v50 = vmul.f32 %v2162_v43, %v717_v47 }
 0x11d   : > { %v700_v51 = vsub.f32 1.5, %v699_v49  ;;  %v2164_v49 = vld [vmem:[%s2772_s7] ss:$0 sm:$0xff] }
 0x11e   : > { %v723_v53 = vadd.f32 %v2163_v46, %v720_v50 }
 0x11f   : > { %v701_v55 = vmul.f32 %v2183_v39, %v700_v51 }
 0x120   : > { %v735_v56 = vmul.f32 %v2396_v52, %v723_v53 }
 0x121   : > { %v705_v57 = vsel %vm704_vm7, %v2183_v39, %v701_v55 }
 0x122   : > { %v716_v58 = vmul.f32 %v705_v57, %v682_v25  ;;  %758 = vmatpush.msra.mxu0 %v735_v56  ;;  %2116 = vmatpush.msra.mxu3 %v735_v56  ;;  %v912_v25 = vld [vmem:[%s2773_s8] sm:$0xff] }
 0x123   : > { %792 = vmatpush.msra.mxu1 %v735_v56  ;;  %826 = vmatpush.msra.mxu2 %v735_v56 }
 0x124   : > { %v719_v62 = vmul.f32 %v2162_v43, %v716_v58 }
 0x126   : > { %v722_v0 = vadd.f32 %v2163_v46, %v719_v62 }
 0x128   : > { %v734_v3 = vmul.f32 %v2399_v1, %v722_v0  ;;  %v2165_v0 = vld [vmem:[%s2774_s9] ss:$0 sm:$0xff] }
 0x12a   : > { %759 = vmatpush.msra.mxu0 %v734_v3  ;;  %2117 = vmatpush.msra.mxu3 %v734_v3 }
 0x12b   : > { %793 = vmatpush.msra.mxu1 %v734_v3  ;;  %827 = vmatpush.msra.mxu2 %v734_v3 }
 0x12c   : > { %2045 = vmatmul.msk.f32.vlgmr.msra.gmra.mxu3 %vm737_vm11, %v2402_v5  ;;  %2046 = vmatmul.msk.f32.vlgmr.msra.gmra.mxu1 %vm737_vm11, %v2404_v7 }
 0x12d   : > { %2048 = vmatmul.msk.f32.vlgmr.msra.gmra.mxu2 %vm737_vm11, %v2406_v8  ;;  %860 = vmatpush.msrb.mxu3 %v735_v56 }
 0x12e   : > { %894 = vmatpush.msrb.mxu0 %v735_v56  ;;  %936 = vmatpush.msrb.mxu1 %v915_v22 }
 0x12f   : > { %861 = vmatpush.msrb.mxu3 %v734_v3  ;;  %2044 = vmatmul.msk.f32.vlgmr.msra.gmra.mxu0 %vm737_vm11, %v2412_v11 }
 0x130   : > { %895 = vmatpush.msrb.mxu0 %v734_v3  ;;  %937 = vmatpush.msrb.mxu1 %v914_v23 }
 0x132   : > { %938 = vmatpush.msrb.mxu1 %v913_v24 }
 0x134   : > { %2047 = vmatmul.msk.f32.gmra.mxu1 %vm737_vm11, %v2418_v13  ;;  %2050 = vmatmul.msk.f32.vlgmr.msrb.gmra.mxu3 %vm737_vm11, %v2420_v14 }
 0x135   : > { %2049 = vmatmul.msk.f32.gmra.mxu2 %vm737_vm11, %v2422_v15  ;;  %939 = vmatpush.msrb.mxu1 %v912_v25 }
 0x137   : > { %2052 = vmatmul.msk.f32.vlgmr.msrb.gmra.mxu0 %vm737_vm11, %v2428_v18 }
 0x13c   : > { %2051 = vmatmul.msk.f32.gmra.mxu3 %vm737_vm11, %v2434_v20 }
 0x13f   : > { %2053 = vmatmul.msk.f32.gmra.mxu0 %vm737_vm11, %v2438_v21 }
 0x1a9   : > { %v795_v29 = vpop.f32.mrf.mxu1 }
 0x1aa   : > { %v802_v32 = vmul.f32 %v801_v27, %v795_v29 }
 0x1ac   : > { %v761_v28 = vpop.f32.mrf.mxu0 }
 0x1ad   : > { %v768_v35 = vmul.f32 %v767_v30, %v761_v28 }
 0x1af   : > { %v764_v31 = vpop.f32.mrf.mxu3  ;;  %v804_v37 = vadd.f32 %v802_v32, %v768_v35 }
 0x1b0   : > { %v829_v33 = vpop.f32.mrf.mxu2  ;;  %v769_v50 = vmul.f32 %v767_v30, %v764_v31 }
 0x1b1   : > { %v836_v36 = vmul.f32 %v835_v34, %v829_v33  ;;  %v798_v41 = vpop.f32.mrf.mxu1 }
 0x1b2   : > { %v803_v47 = vmul.f32 %v801_v27, %v798_v41 }
 0x1b3   : > { %v838_v43 = vadd.f32 %v836_v36, %v804_v37 }
 0x1b4   : > { %v897_v39 = vpop.f32.mrf.mxu0  ;;  %v805_v55 = vadd.f32 %v803_v47, %v769_v50 }
 0x1b5   : > { %v904_v45 = vmul.f32 %v903_v40, %v897_v39 }
 0x1b7   : > { %v863_v42 = vpop.f32.mrf.mxu3 }
 0x1b8   : > { %v870_v44 = vmul.f32 %v869_v38, %v863_v42  ;;  %v832_v46 = vpop.f32.mrf.mxu2 }
 0x1b9   : > { %v837_v51 = vmul.f32 %v835_v34, %v832_v46 }
 0x1ba   : > { %v872_v48 = vadd.f32 %v870_v44, %v838_v43 }
 0x1bb   : > { %v839_v58 = vadd.f32 %v837_v51, %v805_v55  ;;  %v2166_v51 = vld [vmem:[%s2769_s4 + $0x1] ss:$0 sm:$0xff] }
 0x1bc   : > { %v906_v53 = vadd.f32 %v904_v45, %v872_v48  ;;  %v900_v54 = vpop.f32.mrf.mxu0 }
 0x1bd   : > { %v905_v60 = vmul.f32 %v903_v40, %v900_v54 }
 0x1be   : > { %v910_v56 = vadd.f32 %v2164_v49, %v906_v53 }
 0x1bf   : > { %v866_v57 = vpop.f32.mrf.mxu3 }
 0x1c0   : > { %v871_v59 = vmul.f32 %v869_v38, %v866_v57  ;;  %2054 = vmatmul.msk.f32.vlgmr.msrb.gmra.mxu1 %vm666_vm0, %v910_v56  ;;  %v2167_v56 = vld [vmem:[%s2770_s5 + $0x1] ss:$0 sm:$0xff] }
 0x1c2   : > { %v873_v61 = vadd.f32 %v871_v59, %v839_v58 }
 0x1c4   : > { %v907_v62 = vadd.f32 %v905_v60, %v873_v61 }
 0x1c6   : > { %v911_v63 = vadd.f32 %v2164_v49, %v907_v62 }
 0x1c8   : > { %2055 = vmatmul.msk.f32.gmra.mxu1 %vm666_vm0, %v911_v63 }
 0x23d   : > { %v941_v3 = vpop.f32.mrf.mxu1 }
 0x23e   : > { %v942_v4 = vadd.f32 %v2165_v0, %v941_v3 }
 0x240   : > { %v947_v9 = vmax.f32 %v942_v4, 0.0 }
 0x242   : > { %v2466_v10 = vadd.f32 %v947_v9, %v2372_v6 }
 0x244   : > { %v953_v12 = vsel %vm666_vm0, %v2466_v10, 0.0 }
 0x245   : > { %v944_v16 = vpop.f32.mrf.mxu1  ;;  %954 = vadd.xlane.f32.xlu1 %v953_v12 }
 0x246   : > { %v945_v19 = vadd.f32 %v2165_v0, %v944_v16 }
 0x248   : > { %v948_v22 = vmax.f32 %v945_v19, 0.0 }
 0x24a   : > { %v2471_v23 = vadd.f32 %v948_v22, %v2365_v2 }
 0x24c   : > { %v956_v24 = vsel %vm666_vm0, %v2471_v23, 0.0 }
 0x24d   : > { %957 = vadd.xlane.f32.xlu0 %v956_v24 }
 0x2b8   : > { %v955_v25 = vpop.xlane.xlu1 %954 }
 0x2b9   : > { %v959_v26 = vmul.f32 %v955_v25, %v2380_v17 }
 0x2bb   : > { %v961_v6 = vsub.f32 %v2466_v10, %v959_v26 }
 0x2bd   : > { %v963_v27 = vmul.f32 %v961_v6, %v961_v6 }
 0x2bf   : > { %v965_v28 = vsel %vm666_vm0, %v963_v27, 0.0 }
 0x2c0   : > { %v958_v29 = vpop.xlane.xlu0 %957  ;;  %966 = vadd.xlane.f32.xlu0 %v965_v28 }
 0x2c1   : > { %v960_v30 = vmul.f32 %v958_v29, %v2380_v17 }
 0x2c3   : > { %v962_v31 = vsub.f32 %v2471_v23, %v960_v30 }
 0x2c5   : > { %v964_v2 = vmul.f32 %v962_v31, %v962_v31 }
 0x2c7   : > { %v968_v32 = vsel %vm666_vm0, %v964_v2, 0.0 }
 0x2c8   : > { %969 = vadd.xlane.f32.xlu2 %v968_v32  ;;  %v2168_v32 = vld [vmem:[%s2772_s7 + $0x1] ss:$0 sm:$0xff] }
 0x333   : > { %v967_v33 = vpop.xlane.xlu0 %966 }
 0x334   : > { %v971_v34 = vmul.f32 %v967_v33, %v2380_v17 }
 0x336   : > { %v973_v35 = vadd.f32 1e-05, %v971_v34 }
 0x338   : > { %2184 = vrsqrt.f32 %v973_v35  ;;  %vm981_vm5 = vweird.f32 %v973_v35 }
 0x33b   : > { %v970_v36 = vpop.xlane.xlu2 %969 }
 0x33c   : > { %v972_v37 = vmul.f32 %v970_v36, %v2380_v17 }
 0x33e   : > { %v2185_v38 = vpop.eup %2184  ;;  %v974_v39 = vadd.f32 1e-05, %v972_v37 }
 0x33f   : > { %v976_v40 = vmul.f32 %v2185_v38, %v973_v35  ;;  %vm982_vm4 = vweird.f32 %v2185_v38 }
 0x340   : > { %2186 = vrsqrt.f32 %v974_v39  ;;  %vm983_vm6 = vmor %vm981_vm5, %vm982_vm4  ;;  %vm991_vm8 = vweird.f32 %v974_v39 }
 0x341   : > { %v977_v41 = vmul.f32 %v2185_v38, %v976_v40 }
 0x343   : > { %v978_v42 = vmul.f32 0.5, %v977_v41 }
 0x345   : > { %v979_v43 = vsub.f32 1.5, %v978_v42 }
 0x346   : > { %v2187_v44 = vpop.eup %2186 }
 0x347   : > { %v980_v45 = vmul.f32 %v2185_v38, %v979_v43  ;;  %v986_v46 = vmul.f32 %v2187_v44, %v974_v39  ;;  %vm992_vm7 = vweird.f32 %v2187_v44  ;;  %v2169_v43 = vld [vmem:[%s2774_s9 + $0x1] ss:$0 sm:$0xff] }
 0x348   : > { %vm993_vm9 = vmor %vm991_vm8, %vm992_vm7 }
 0x349   : > { %v987_v47 = vmul.f32 %v2187_v44, %v986_v46  ;;  %v984_v48 = vsel %vm983_vm6, %v2185_v38, %v980_v45 }
 0x34a   : > { %v995_v53 = vmul.f32 %v984_v48, %v961_v6 }
 0x34b   : > { %v988_v49 = vmul.f32 0.5, %v987_v47 }
 0x34c   : > { %v998_v57 = vmul.f32 %v2166_v51, %v995_v53 }
 0x34d   : > { %v989_v50 = vsub.f32 1.5, %v988_v49 }
 0x34e   : > { %v1001_v60 = vadd.f32 %v2167_v56, %v998_v57 }
 0x34f   : > { %v990_v54 = vmul.f32 %v2187_v44, %v989_v50 }
 0x350   : > { %v1003_v63 = vmul.f32 %v1001_v60, %v2399_v1  ;;  %v2069_v1 = vld [vmem:[%s2773_s8 + $0x30] sm:$0xff] }
 0x351   : > { %v994_v55 = vsel %vm993_vm9, %v2187_v44, %v990_v54 }
 0x352   : > { %v996_v58 = vmul.f32 %v994_v55, %v962_v31 }
 0x354   : > { %v999_v59 = vmul.f32 %v2166_v51, %v996_v58 }
 0x356   : > { %v1002_v61 = vadd.f32 %v2167_v56, %v999_v59 }
 0x358   : > { %v1004_v62 = vmul.f32 %v1002_v61, %v2396_v52  ;;  %v2070_v52 = vld [vmem:[%s2773_s8 + $0x38] sm:$0xff] }
 0x35a   : > { %1021 = vmatpush.msrb.mxu2 %v1004_v62  ;;  %1049 = vmatpush.msra.mxu3 %v1004_v62 }
 0x35b   : > { %1077 = vmatpush.msra.mxu0 %v1004_v62  ;;  %1105 = vmatpush.msra.mxu1 %v1004_v62 }
 0x35c   : > { %1022 = vmatpush.msrb.mxu2 %v1003_v63  ;;  %1050 = vmatpush.msra.mxu3 %v1003_v63 }
 0x35d   : > { %1078 = vmatpush.msra.mxu0 %v1003_v63  ;;  %1106 = vmatpush.msra.mxu1 %v1003_v63 }
 0x35e   : > { %2057 = vmatmul.msk.f32.vlgmr.msrb.gmra.mxu2 %vm737_vm11, %v2412_v11  ;;  %2059 = vmatmul.msk.f32.vlgmr.msra.gmra.mxu3 %vm737_vm11, %v2404_v7  ;;  %v2067_v7 = vld [vmem:[%s2773_s8 + $0x20] sm:$0xff] }
 0x35f   : > { %1133 = vmatpush.msra.mxu2 %v1004_v62  ;;  %2061 = vmatmul.msk.f32.vlgmr.msra.gmra.mxu0 %vm737_vm11, %v2406_v8  ;;  %v2056_v8 = vld [vmem:[%s2771_s6 + $0x8] sm:$0x1f] }
 0x360   : > { %2063 = vmatmul.msk.f32.vlgmr.msra.gmra.mxu1 %vm737_vm11, %v2420_v14  ;;  %1176 = vmatpush.msrb.mxu3 %v2070_v52  ;;  %v1030_v14 = vperm.slane %v2056_v8, 0  ;;  %v1086_v0 = vperm.slane %v2056_v8, 2  ;;  %v1114_v16 = vperm.slane %v2056_v8, 3  ;;  %v1142_v22 = vperm.slane %v2056_v8, 4  ;;  %v1245_v52 = vld [vmem:[%s2775_s10 + $0x10] sm:$0xff] }
 0x361   : > { %1134 = vmatpush.msra.mxu2 %v1003_v63  ;;  %v1246_v63 = vld [vmem:[%s2775_s10 + $0x18] sm:$0xff] }
 0x362   : > { %1177 = vmatpush.msrb.mxu3 %v2069_v1  ;;  %1269 = vmatpush.msrb.mxu0 %v1246_v63  ;;  %v1244_v1 = vld [vmem:[%s2775_s10 + $0x8] sm:$0xff] }
 0x364   : > { %1270 = vmatpush.msrb.mxu0 %v1245_v52 }
 0x366   : > { %2058 = vmatmul.msk.f32.gmra.mxu2 %vm737_vm11, %v2402_v5  ;;  %2060 = vmatmul.msk.f32.gmra.mxu3 %vm737_vm11, %v2418_v13  ;;  %v2068_v5 = vld [vmem:[%s2773_s8 + $0x28] sm:$0xff] }
 0x367   : > { %2062 = vmatmul.msk.f32.gmra.mxu0 %vm737_vm11, %v2422_v15  ;;  %1178 = vmatpush.msrb.mxu3 %v2068_v5  ;;  %v1058_v15 = vperm.slane %v2056_v8, 1  ;;  %v1243_v5 = vld [vmem:[%s2775_s10] sm:$0xff] }
 0x368   : > { %2064 = vmatmul.msk.f32.gmra.mxu1 %vm737_vm11, %v2434_v20  ;;  %1271 = vmatpush.msrb.mxu0 %v1244_v1 }
 0x369   : > { %1179 = vmatpush.msrb.mxu3 %v2067_v7 }
 0x36a   : > { %1272 = vmatpush.msrb.mxu0 %v1243_v5 }
 0x36e   : > { %2065 = vmatmul.msk.f32.vlgmr.msra.gmra.mxu2 %vm737_vm11, %v2428_v18 }
 0x376   : > { %2066 = vmatmul.msk.f32.gmra.mxu2 %vm737_vm11, %v2438_v21 }
 0x3dc   : > { %v1080_v18 = vpop.f32.mrf.mxu0 }
 0x3dd   : > { %v1108_v3 = vpop.f32.mrf.mxu1  ;;  %v1087_v12 = vmul.f32 %v1086_v0, %v1080_v18 }
 0x3de   : > { %v1115_v25 = vmul.f32 %v1114_v16, %v1108_v3 }
 0x3e1   : > { %v1024_v11 = vpop.f32.mrf.mxu2  ;;  %v1052_v13 = vpop.f32.mrf.mxu3 }
 0x3e2   : > { %v1031_v20 = vmul.f32 %v1030_v14, %v1024_v11  ;;  %v1059_v21 = vmul.f32 %v1058_v15, %v1052_v13 }
 0x3e4   : > { %v1061_v9 = vadd.f32 %v1059_v21, %v1031_v20  ;;  %v1083_v27 = vpop.f32.mrf.mxu0 }
 0x3e5   : > { %v1088_v31 = vmul.f32 %v1086_v0, %v1083_v27  ;;  %v1111_v33 = vpop.f32.mrf.mxu1 }
 0x3e6   : > { %v1089_v24 = vadd.f32 %v1087_v12, %v1061_v9  ;;  %v1116_v36 = vmul.f32 %v1114_v16, %v1111_v33  ;;  %v2170_v16 = vld [vmem:[%s2769_s4 + $0x2] ss:$0 sm:$0xff]  ;;  %v2172_v33 = vld [vmem:[%s2776_s11] ss:$0 sm:$0xff] }
 0x3e8   : > { %v1117_v29 = vadd.f32 %v1115_v25, %v1089_v24  ;;  %v2171_v25 = vld [vmem:[%s2770_s5 + $0x2] ss:$0 sm:$0xff] }
 0x3e9   : > { %v1027_v4 = vpop.f32.mrf.mxu2  ;;  %v1055_v19 = vpop.f32.mrf.mxu3 }
 0x3ea   : > { %v1032_v26 = vmul.f32 %v1030_v14, %v1027_v4  ;;  %v1060_v6 = vmul.f32 %v1058_v15, %v1055_v19 }
 0x3ec   : > { %v1062_v30 = vadd.f32 %v1060_v6, %v1032_v26 }
 0x3ee   : > { %v1090_v35 = vadd.f32 %v1088_v31, %v1062_v30 }
 0x3f0   : > { %v1118_v39 = vadd.f32 %v1116_v36, %v1090_v35 }
 0x3f1   : > { %v1136_v28 = vpop.f32.mrf.mxu2 }
 0x3f2   : > { %v1143_v2 = vmul.f32 %v1142_v22, %v1136_v28 }
 0x3f4   : > { %v1145_v34 = vadd.f32 %v1143_v2, %v1117_v29 }
 0x3f6   : > { %v1149_v37 = vadd.f32 %v2168_v32, %v1145_v34 }
 0x3f8   : > { %2071 = vmatmul.msk.f32.vlgmr.msrb.gmra.mxu3 %vm666_vm0, %v1149_v37 }
 0x3f9   : > { %v1139_v38 = vpop.f32.mrf.mxu2 }
 0x3fa   : > { %v1144_v40 = vmul.f32 %v1142_v22, %v1139_v38 }
 0x3fc   : > { %v1146_v41 = vadd.f32 %v1144_v40, %v1118_v39 }
 0x3fe   : > { %v1150_v42 = vadd.f32 %v2168_v32, %v1146_v41 }
 0x400   : > { %2072 = vmatmul.msk.f32.gmra.mxu3 %vm666_vm0, %v1150_v42 }
 0x47b   : > { %v1181_v44 = vpop.f32.mrf.mxu3 }
 0x47c   : > { %v1182_v45 = vadd.f32 %v2169_v43, %v1181_v44 }
 0x47e   : > { %v1187_v46 = vmax.f32 %v1182_v45, 0.0  ;;  %v614_v45 = vld [vmem:[%s599_s22] sm:$0x1] }
 0x480   : > { %v2535_v47 = vadd.f32 %v1187_v46, %v2466_v10  ;;  %v2033_v46 = vadd.f32 -1.0, %v614_v45 }
 0x482   : > { %v1193_v48 = vsel %vm666_vm0, %v2535_v47, 0.0 }
 0x483   : > { %1194 = vadd.xlane.f32.xlu1 %v1193_v48  ;;  %v1184_v49 = vpop.f32.mrf.mxu3  ;;  %v618_v48 = vmul.f32 1e+30, %v2033_v46 }
 0x484   : > { %v1185_v50 = vadd.f32 %v2169_v43, %v1184_v49 }
 0x485   : > { %v2607_v49 = vperm.slane %v618_v48, 0 }
 0x486   : > { %v1188_v51 = vmax.f32 %v1185_v50, 0.0 }
 0x488   : > { %v2540_v53 = vadd.f32 %v1188_v51, %v2471_v23 }
 0x48a   : > { %v1196_v54 = vsel %vm666_vm0, %v2540_v53, 0.0 }
 0x48b   : > { %1197 = vadd.xlane.f32.xlu0 %v1196_v54 }
 0x4f6   : > { %v1195_v55 = vpop.xlane.xlu1 %1194 }
 0x4f7   : > { %v1199_v56 = vmul.f32 %v1195_v55, %v2380_v17 }
 0x4f9   : > { %v1201_v10 = vsub.f32 %v2535_v47, %v1199_v56 }
 0x4fb   : > { %v1203_v57 = vmul.f32 %v1201_v10, %v1201_v10 }
 0x4fd   : > { %v1205_v58 = vsel %vm666_vm0, %v1203_v57, 0.0 }
 0x4fe   : > { %1206 = vadd.xlane.f32.xlu1 %v1205_v58  ;;  %v1198_v59 = vpop.xlane.xlu0 %1197 }
 0x4ff   : > { %v1200_v60 = vmul.f32 %v1198_v59, %v2380_v17 }
 0x501   : > { %v1202_v61 = vsub.f32 %v2540_v53, %v1200_v60 }
 0x503   : > { %v1204_v23 = vmul.f32 %v1202_v61, %v1202_v61 }
 0x505   : > { %v1208_v62 = vsel %vm666_vm0, %v1204_v23, 0.0 }
 0x506   : > { %1209 = vadd.xlane.f32.xlu0 %v1208_v62 }
 0x571   : > { %v1207_v7 = vpop.xlane.xlu1 %1206 }
 0x572   : > { %v1211_v8 = vmul.f32 %v1207_v7, %v2380_v17 }
 0x574   : > { %v1213_v11 = vadd.f32 1e-05, %v1211_v8  ;;  %v1280_v8 = vld [vmem:[%s2777_s12] sm:$0xff] }
 0x576   : > { %2188 = vrsqrt.f32 %v1213_v11  ;;  %vm1221_vm12 = vweird.f32 %v1213_v11 }
 0x579   : > { %v1210_v13 = vpop.xlane.xlu0 %1209 }
 0x57a   : > { %v1212_v14 = vmul.f32 %v1210_v13, %v2380_v17 }
 0x57c   : > { %v2189_v15 = vpop.eup %2188  ;;  %v1214_v18 = vadd.f32 1e-05, %v1212_v14 }
 0x57d   : > { %v1216_v20 = vmul.f32 %v2189_v15, %v1213_v11  ;;  %vm1222_vm10 = vweird.f32 %v2189_v15 }
 0x57e   : > { %2190 = vrsqrt.f32 %v1214_v18  ;;  %vm1223_vm13 = vmor %vm1221_vm12, %vm1222_vm10  ;;  %vm1231_vm15 = vweird.f32 %v1214_v18 }
 0x57f   : > { %v1217_v21 = vmul.f32 %v2189_v15, %v1216_v20 }
 0x581   : > { %v1218_v0 = vmul.f32 0.5, %v1217_v21 }
 0x583   : > { %v1219_v3 = vsub.f32 1.5, %v1218_v0 }
 0x584   : > { %v2191_v4 = vpop.eup %2190 }
 0x585   : > { %v1220_v9 = vmul.f32 %v2189_v15, %v1219_v3  ;;  %v1226_v12 = vmul.f32 %v2191_v4, %v1214_v18  ;;  %vm1232_vm14 = vweird.f32 %v2191_v4 }
 0x586   : > { %vm1233_vm1 = vmor %vm1231_vm15, %vm1232_vm14 }
 0x587   : > { %v1224_v19 = vsel %vm1223_vm13, %v2189_v15, %v1220_v9  ;;  %v1227_v22 = vmul.f32 %v2191_v4, %v1226_v12 }
 0x588   : > { %v1235_v24 = vmul.f32 %v1224_v19, %v1201_v10 }
 0x589   : > { %v1228_v26 = vmul.f32 0.5, %v1227_v22 }
 0x58a   : > { %v1238_v6 = vmul.f32 %v2170_v16, %v1235_v24 }
 0x58b   : > { %v1229_v27 = vsub.f32 1.5, %v1228_v26 }
 0x58c   : > { %v1241_v28 = vadd.f32 %v2171_v25, %v1238_v6 }
 0x58d   : > { %v1230_v29 = vmul.f32 %v2191_v4, %v1229_v27 }
 0x58e   : > { %2073 = vmatmul.msk.f32.vlgmr.msrb.gmra.mxu0 %vm666_vm0, %v1241_v28 }
 0x58f   : > { %v1234_v30 = vsel %vm1233_vm1, %v2191_v4, %v1230_v29 }
 0x590   : > { %v1236_v31 = vmul.f32 %v1234_v30, %v1202_v61 }
 0x592   : > { %v1239_v2 = vmul.f32 %v2170_v16, %v1236_v31 }
 0x594   : > { %v1242_v32 = vadd.f32 %v2171_v25, %v1239_v2 }
 0x596   : > { %2074 = vmatmul.msk.f32.gmra.mxu0 %vm666_vm0, %v1242_v32 }
 0x60b   : > { %v1274_v34 = vpop.f32.mrf.mxu0 }
 0x60c   : > { %v2575_v35 = vadd.f32 %v2172_v33, %v1274_v34 }
 0x60e   : > { %1286 = vrot.lane.b32.xlu0 %v2575_v35, %s2239_s2 }
 0x613   : > { %v1277_v36 = vpop.f32.mrf.mxu0 }
 0x614   : > { %v2578_v37 = vadd.f32 %v2172_v33, %v1277_v36 }
 0x616   : > { %1288 = vrot.lane.b32.xlu1 %v2578_v37, %s2239_s2  ;;  %v2583_v38 = vpack.i.bf16 %v2575_v35, %v2578_v37 }
 0x618   : > { %2142 = vrot.lane.b32.xlu0 %v2583_v38, %s2240_s23 }
 0x620   : > { %1392 = vrot.lane.b32.xlu0 %v2578_v37, %s2241_s24 }
 0x628   : > { %1386 = vrot.lane.b32.xlu0 %v2575_v35, %s2242_s25 }
 0x630   : > { %1681 = vrot.lane.b32.xlu0 %v2578_v37, %s2243_s26 }
 0x638   : > { %1388 = vrot.lane.b32.xlu0 %v2578_v37, %s2242_s25  ;;  %s2248_s25 = smov 48  }
 0x640   : > { %1675 = vrot.lane.b32.xlu0 %v2575_v35, %s2244_s30 }
 0x648   : > { %1544 = vrot.lane.b32.xlu0 %v2575_v35, %s2245_s0 }
 0x650   : > { %1546 = vrot.lane.b32.xlu0 %v2578_v37, %s2245_s0 }
 0x680   : > { %v1287_v39 = vpop.permute.xlu0 %1286 }
 0x688   : > { %v1289_v40 = vpop.permute.xlu1 %1288 }
 0x689   : > { %2075 = vmatpush.xpose.msk.msrb.mxu1 %vm1290_vm2, %v1289_v40 }
 0x68a   : > { %v2143_v41 = vpop.permute.xlu0 %2142 }
 0x68b   : > { %v2144_v42 = vunpack.i.l.bf16 %v2143_v41  ;;  %v2145_v43 = vunpack.i.h.bf16 %v2143_v41 }
 0x68d   : > { %2076 = vmatpush.xpose.msk.msrb.mxu1 %vm1290_vm2, %v1287_v39  ;;  %1377 = vmatpush.msrb.mxu2 %v2144_v42 }
 0x68f   : > { %1378 = vmatpush.msrb.mxu2 %v2145_v43 }
 0x690   : > { %2077 = vmatmul.msk.f32.vlgmr.msrb.gmra.mxu1 %vm1290_vm2, %v2575_v35 }
 0x691   : > { %1536 = vmatpush.msra.mxu2 %v1280_v8 }
 0x692   : > { %v1393_v44 = vpop.permute.xlu0 %1392 }
 0x693   : > { %2081 = vmatpush.xpose.msk.msra.mxu3 %vm1290_vm2, %v1393_v44 }
 0x698   : > { %2078 = vmatmul.msk.f32.gmra.mxu1 %vm1290_vm2, %v2578_v37 }
 0x69a   : > { %v1387_v11 = vpop.permute.xlu0 %1386 }
 0x6a2   : > { %v1682_v14 = vpop.permute.xlu0 %1681 }
 0x6aa   : > { %v1389_v21 = vpop.permute.xlu0 %1388 }
 0x6b2   : > { %v1676_v12 = vpop.permute.xlu0 %1675 }
 0x6ba   : > { %v1545_v22 = vpop.permute.xlu0 %1544 }
 0x6c2   : > { %v1547_v24 = vpop.permute.xlu0 %1546 }
 0x70d   : > { %v1316_v50 = vpop.f32.mrf.mxu1 }
 0x70e   : > { %v1322_v51 = vmul.f32 0.35355338, %v1316_v50 }
 0x710   : > { %v1327_v54 = vadd.f32 %v2607_v49, %v1322_v51 }
 0x712   : > { %v1329_v55 = vsel %vm737_vm11, %v1327_v54, -inf }
 0x713   : > { %1330 = vmax.xlane.f32.xlu2 %v1329_v55 }
 0x715   : > { %v1319_v56 = vpop.f32.mrf.mxu1 }
 0x716   : > { %v1323_v10 = vmul.f32 0.35355338, %v1319_v56 }
 0x718   : > { %v1328_v57 = vadd.f32 %v2607_v49, %v1323_v10 }
 0x71a   : > { %v1332_v58 = vsel %vm737_vm11, %v1328_v57, -inf }
 0x71b   : > { %1333 = vmax.xlane.f32.xlu1 %v1332_v58 }
 0x734   : > { %1679 = vrot.lane.b32.xlu1 %v2575_v35, %s2243_s26  ;;  %s2249_s26 = smov 40  }
 0x786   : > { %v1331_v59 = vpop.xlane.xlu2 %1330 }
 0x787   : > { %v1335_v60 = vsub.f32 %v1327_v54, %v1331_v59 }
 0x789   : > { %v1337_v61 = vmul.f32 1.442695, %v1335_v60 }
 0x78b   : > { %2192 = vpow2.f32 %v1337_v61 }
 0x78e   : > { %v1334_v23 = vpop.xlane.xlu1 %1333 }
 0x78f   : > { %v1336_v62 = vsub.f32 %v1328_v57, %v1334_v23 }
 0x791   : > { %v2193_v63 = vpop.eup %2192  ;;  %v1339_v52 = vmul.f32 1.442695, %v1336_v62 }
 0x792   : > { %v1341_v1 = vsel %vm737_vm11, %v2193_v63, 0.0 }
 0x793   : > { %2194 = vpow2.f32 %v1339_v52  ;;  %1342 = vadd.xlane.f32.xlu2 %v1341_v1 }
 0x799   : > { %v2195_v5 = vpop.eup %2194 }
 0x79a   : > { %v1344_v7 = vsel %vm737_vm11, %v2195_v5, 0.0 }
 0x79b   : > { %1345 = vadd.xlane.f32.xlu2 %v1344_v7 }
 0x7a6   : > { %v1680_v0 = vpop.permute.xlu1 %1679 }
 0x7b3   : > { %1390 = vrot.lane.b32.xlu2 %v2575_v35, %s2241_s24  ;;  %s2247_s24 = smov 56  }
 0x7bb   : > { %1550 = vrot.lane.b32.xlu2 %v2578_v37, %s2246_s28 }
 0x7c3   : > { %1548 = vrot.lane.b32.xlu2 %v2575_v35, %s2246_s28 }
 0x7cb   : > { %1677 = vrot.lane.b32.xlu2 %v2578_v37, %s2244_s30 }
 0x806   : > { %v1343_v13 = vpop.xlane.xlu2 %1342 }
 0x807   : > { %2196 = vrcp.f32 %v1343_v13 }
 0x80d   : > { %v2197_v15 = vpop.eup %2196 }
 0x80e   : > { %v1349_v18 = vmul.f32 %v2197_v15, %v2193_v63  ;;  %v1346_v20 = vpop.xlane.xlu2 %1345 }
 0x80f   : > { %2198 = vrcp.f32 %v1346_v20 }
 0x810   : > { %2079 = vmatmul.msk.f32.vlgmr.msrb.gmra.mxu2 %vm737_vm11, %v1349_v18 }
 0x811   : > { %2099 = vmatpush.xpose.msk.msrb.mxu2 %vm1290_vm2, %v1682_v14 }
 0x815   : > { %v2199_v3 = vpop.eup %2198  ;;  %2100 = vmatpush.xpose.msk.msrb.mxu2 %vm1290_vm2, %v1680_v0 }
 0x816   : > { %v1391_v4 = vpop.permute.xlu2 %1390  ;;  %v1350_v9 = vmul.f32 %v2199_v3, %v2195_v5 }
 0x817   : > { %2082 = vmatpush.xpose.msk.msra.mxu3 %vm1290_vm2, %v1391_v4 }
 0x818   : > { %2080 = vmatmul.msk.f32.gmra.mxu2 %vm737_vm11, %v1350_v9 }
 0x81a   : > { %2083 = vmatmul.msk.f32.vlgmr.msra.gmra.mxu3 %vm1290_vm2, %v1387_v11 }
 0x81e   : > { %v1551_v16 = vpop.permute.xlu2 %1550 }
 0x81f   : > { %2091 = vmatpush.xpose.msk.msrb.mxu3 %vm1290_vm2, %v1551_v16 }
 0x822   : > { %2084 = vmatmul.msk.f32.gmra.mxu3 %vm1290_vm2, %v1389_v21 }
 0x826   : > { %v1549_v19 = vpop.permute.xlu2 %1548 }
 0x827   : > { %2092 = vmatpush.xpose.msk.msrb.mxu3 %vm1290_vm2, %v1549_v19 }
 0x82a   : > { %2093 = vmatmul.msk.f32.vlgmr.msrb.gmra.mxu3 %vm1290_vm2, %v1545_v22 }
 0x82e   : > { %v1678_v33 = vpop.permute.xlu2 %1677 }
 0x832   : > { %2094 = vmatmul.msk.f32.gmra.mxu3 %vm1290_vm2, %v1547_v24 }
 0x893   : > { %v1380_v25 = vpop.f32.mrf.mxu2 }
 0x894   : > { %2089 = vmatmul.msk.f32.vlgmr.msra.gmra.mxu2 %vm1290_vm2, %v1380_v25 }
 0x89b   : > { %v1383_v26 = vpop.f32.mrf.mxu2 }
 0x89c   : > { %2090 = vmatmul.msk.f32.gmra.mxu2 %vm1290_vm2, %v1383_v26 }
 0x89d   : > { %v1419_v6 = vpop.f32.mrf.mxu3 }
 0x89e   : > { %v1425_v27 = vmul.f32 0.35355338, %v1419_v6 }
 0x8a0   : > { %v1427_v28 = vadd.f32 %v1425_v27, %v2607_v49 }
 0x8a2   : > { %v1429_v29 = vsel %vm737_vm11, %v1427_v28, -inf }
 0x8a3   : > { %1430 = vmax.xlane.f32.xlu2 %v1429_v29 }
 0x8a4   : > { %2101 = vmatmul.msk.f32.vlgmr.msrb.gmra.mxu2 %vm1290_vm2, %v1676_v12 }
 0x8a5   : > { %v1422_v30 = vpop.f32.mrf.mxu3 }
 0x8a6   : > { %v1426_v31 = vmul.f32 0.35355338, %v1422_v30 }
 0x8a8   : > { %v1428_v2 = vadd.f32 %v1426_v31, %v2607_v49 }
 0x8aa   : > { %v1432_v32 = vsel %vm737_vm11, %v1428_v2, -inf }
 0x8ab   : > { %1433 = vmax.xlane.f32.xlu0 %v1432_v32 }
 0x8ac   : > { %2102 = vmatmul.msk.f32.gmra.mxu2 %vm1290_vm2, %v1678_v33 }
 0x8ad   : > { %v1577_v34 = vpop.f32.mrf.mxu3 }
 0x8ae   : > { %v1583_v35 = vmul.f32 0.35355338, %v1577_v34 }
 0x8b0   : > { %v1585_v36 = vadd.f32 %v1583_v35, %v2607_v49 }
 0x8b2   : > { %v1587_v37 = vsel %vm737_vm11, %v1585_v36, -inf }
 0x8b3   : > { %1588 = vmax.xlane.f32.xlu2 %v1587_v37  ;;  %v1281_v37 = vld [vmem:[%s2777_s12 + $0x8] sm:$0xff] }
 0x8b4   : > { %1507 = vmatpush.msra.mxu1 %v1281_v37 }
 0x8b5   : > { %v1580_v51 = vpop.f32.mrf.mxu3 }
 0x8b6   : > { %v1584_v56 = vmul.f32 0.35355338, %v1580_v51 }
 0x8b8   : > { %v1586_v61 = vadd.f32 %v1584_v56, %v2607_v49 }
 0x8ba   : > { %v1590_v63 = vsel %vm737_vm11, %v1586_v61, -inf }
 0x916   : > { %v1431_v39 = vpop.xlane.xlu2 %1430 }
 0x917   : > { %v1435_v40 = vsub.f32 %v1427_v28, %v1431_v39  ;;  %v2647_v41 = vpop.f32.mrf.mxu2 }
 0x919   : > { %v1437_v42 = vmul.f32 1.442695, %v1435_v40 }
 0x91b   : > { %2200 = vpow2.f32 %v1437_v42 }
 0x91e   : > { %v1434_v48 = vpop.xlane.xlu0 %1433 }
 0x91f   : > { %v2649_v43 = vpop.f32.mrf.mxu2  ;;  %v1436_v55 = vsub.f32 %v1428_v2, %v1434_v48  ;;  %v1282_v48 = vld [vmem:[%s2777_s12 + $0x10] sm:$0xff] }
 0x920   : > { %1665 = vmatpush.msrb.mxu1 %v1282_v48 }
 0x921   : > { %v2651_v44 = vpop.eup %2200  ;;  %v1439_v57 = vmul.f32 1.442695, %v1436_v55 }
 0x922   : > { %v1441_v45 = vsel %vm737_vm11, %v2651_v44, 0.0 }
 0x923   : > { %1442 = vadd.xlane.f32.xlu2 %v1441_v45  ;;  %2202 = vpow2.f32 %v1439_v57 }
 0x926   : > { %v1589_v59 = vpop.xlane.xlu2 %1588 }
 0x927   : > { %v1708_v46 = vpop.f32.mrf.mxu2  ;;  %v1593_v62 = vsub.f32 %v1585_v36, %v1589_v59 }
 0x928   : > { %v1714_v50 = vmul.f32 0.35355338, %v1708_v46 }
 0x929   : > { %v1595_v1 = vmul.f32 1.442695, %v1593_v62  ;;  %v2203_v5 = vpop.eup %2202 }
 0x92a   : > { %v1716_v54 = vadd.f32 %v1714_v50, %v2607_v49  ;;  %v1444_v7 = vsel %vm737_vm11, %v2203_v5, 0.0  ;;  %v1283_v50 = vld [vmem:[%s2777_s12 + $0x18] sm:$0xff] }
 0x92b   : > { %2204 = vpow2.f32 %v1595_v1 }
 0x92c   : > { %v1718_v10 = vsel %vm737_vm11, %v1716_v54, -inf }
 0x92d   : > { %1719 = vmax.xlane.f32.xlu1 %v1718_v10 }
 0x92f   : > { %v1711_v58 = vpop.f32.mrf.mxu2 }
 0x930   : > { %v1715_v60 = vmul.f32 0.35355338, %v1711_v58 }
 0x931   : > { %v2205_v8 = vpop.eup %2204 }
 0x932   : > { %v1717_v23 = vadd.f32 %v1715_v60, %v2607_v49  ;;  %v1599_v11 = vsel %vm737_vm11, %v2205_v8, 0.0 }
 0x934   : > { %v1721_v52 = vsel %vm737_vm11, %v1717_v23, -inf }
 0x935   : > { %1591 = vmax.xlane.f32.xlu1 %v1590_v63  ;;  %1722 = vmax.xlane.f32.xlu0 %v1721_v52 }
 0x93d   : > { %1445 = vadd.xlane.f32.xlu1 %v1444_v7 }
 0x945   : > { %1600 = vadd.xlane.f32.xlu1 %v1599_v11  ;;  %v2173_v11 = vld [vmem:[%s2778_s13] ss:$0 sm:$0xff] }
 0x949   : > { %2147 = vrot.lane.b32.xlu0 %v2583_v38, %s2247_s24 }
 0x951   : > { %2157 = vrot.lane.b32.xlu0 %v2583_v38, %s2248_s25  ;;  %s609_s25 = scalar_lea.vmem %s2783_s18, %s2356_s29 }
 0x996   : > { %v1443_v12 = vpop.xlane.xlu2 %1442 }
 0x9a0   : > { %v1720_v49 = vpop.xlane.xlu1 %1719 }
 0x9a1   : > { %v1724_v13 = vsub.f32 %v1716_v54, %v1720_v49 }
 0x9a3   : > { %v1726_v14 = vmul.f32 1.442695, %v1724_v13 }
 0x9a5   : > { %2206 = vpow2.f32 %v1726_v14 }
 0x9a8   : > { %v1723_v15 = vpop.xlane.xlu0 %1722  ;;  %v1592_v18 = vpop.xlane.xlu1 %1591 }
 0x9a9   : > { %v1725_v20 = vsub.f32 %v1717_v23, %v1723_v15  ;;  %v1594_v3 = vsub.f32 %v1586_v61, %v1592_v18 }
 0x9ab   : > { %v2207_v21 = vpop.eup %2206  ;;  %v1728_v0 = vmul.f32 1.442695, %v1725_v20  ;;  %v1597_v9 = vmul.f32 1.442695, %v1594_v3 }
 0x9ac   : > { %v1730_v4 = vsel %vm737_vm11, %v2207_v21, 0.0 }
 0x9ad   : > { %1731 = vadd.xlane.f32.xlu2 %v1730_v4  ;;  %2208 = vpow2.f32 %v1728_v0 }
 0x9ae   : > { %2210 = vpow2.f32 %v1597_v9 }
 0x9af   : > { %2212 = vrcp.f32 %v1443_v12 }
 0x9b0   : > { %v1446_v22 = vpop.xlane.xlu1 %1445 }
 0x9b1   : > { %2214 = vrcp.f32 %v1446_v22 }
 0x9b3   : > { %v2209_v16 = vpop.eup %2208 }
 0x9b4   : > { %v1733_v19 = vsel %vm737_vm11, %v2209_v16, 0.0  ;;  %v2211_v24 = vpop.eup %2210 }
 0x9b5   : > { %1734 = vadd.xlane.f32.xlu1 %v1733_v19  ;;  %v2213_v26 = vpop.eup %2212  ;;  %v1602_v27 = vsel %vm737_vm11, %v2211_v24, 0.0 }
 0x9b6   : > { %v1449_v29 = vmul.f32 %v2213_v26, %v2651_v44  ;;  %v1869_v26 = vld [vmem:[%s2779_s14 + $0x18] sm:$0xff] }
 0x9b7   : > { %v2215_v2 = vpop.eup %2214 }
 0x9b8   : > { %v1601_v30 = vpop.xlane.xlu1 %1600  ;;  %v1450_v34 = vmul.f32 %v2215_v2, %v2203_v5  ;;  %v1908_v2 = vld [vmem:[%s2781_s16 + $0x18] sm:$0xff] }
 0x9b9   : > { %2216 = vrcp.f32 %v1601_v30  ;;  %1931 = vmatpush.msra.mxu2 %v1908_v2 }
 0x9bb   : > { %v2148_v25 = vpop.permute.xlu0 %2147 }
 0x9bc   : > { %v2149_v6 = vunpack.i.l.bf16 %v2148_v25  ;;  %v2150_v28 = vunpack.i.h.bf16 %v2148_v25 }
 0x9bd   : > { %1603 = vadd.xlane.f32.xlu1 %v1602_v27  ;;  %v1867_v27 = vld [vmem:[%s2779_s14 + $0x8] sm:$0xff] }
 0x9be   : > { %1477 = vmatpush.msra.mxu0 %v2149_v6  ;;  %v1868_v6 = vld [vmem:[%s2779_s14 + $0x10] sm:$0xff] }
 0x9bf   : > { %v2217_v35 = vpop.eup %2216 }
 0x9c0   : > { %1478 = vmatpush.msra.mxu0 %v2150_v28  ;;  %v1607_v36 = vmul.f32 %v2217_v35, %v2205_v8  ;;  %v1866_v28 = vld [vmem:[%s2779_s14] sm:$0xff] }
 0x9c1   : > { %2085 = vmatmul.msk.f32.vlgmr.msra.gmra.mxu0 %vm737_vm11, %v1449_v29 }
 0x9c3   : > { %v2158_v31 = vpop.permute.xlu0 %2157 }
 0x9c4   : > { %v2159_v32 = vunpack.i.l.bf16 %v2158_v31  ;;  %v2160_v33 = vunpack.i.h.bf16 %v2158_v31 }
 0x9c5   : > { %2152 = vrot.lane.b32.xlu2 %v2583_v38, %s2249_s26 }
 0x9c6   : > { %1635 = vmatpush.msrb.mxu0 %v2159_v32 }
 0x9c8   : > { %1636 = vmatpush.msrb.mxu0 %v2160_v33 }
 0x9c9   : > { %2086 = vmatmul.msk.f32.gmra.mxu0 %vm737_vm11, %v1450_v34 }
 0x9ca   : > { %1796 = vmatpush.msra.mxu0 %v1283_v50  ;;  %v2175_v50 = vld [vmem:[%s2770_s5 + $0x3] ss:$0 sm:$0xff] }
 0x9d1   : > { %2095 = vmatmul.msk.f32.vlgmr.msrb.gmra.mxu0 %vm737_vm11, %v1607_v36 }
 0xa20   : > { %v1732_v39 = vpop.xlane.xlu2 %1731 }
 0xa21   : > { %2218 = vrcp.f32 %v1732_v39 }
 0xa27   : > { %v2219_v38 = vpop.eup %2218 }
 0xa28   : > { %v2153_v40 = vpop.permute.xlu2 %2152  ;;  %v1735_v44 = vpop.xlane.xlu1 %1734  ;;  %v1738_v46 = vmul.f32 %v2219_v38, %v2207_v21 }
 0xa29   : > { %v2154_v42 = vunpack.i.l.bf16 %v2153_v40  ;;  %v2155_v45 = vunpack.i.h.bf16 %v2153_v40  ;;  %2220 = vrcp.f32 %v1735_v44  ;;  %v2174_v44 = vld [vmem:[%s2769_s4 + $0x3] ss:$0 sm:$0xff] }
 0xa2b   : > { %1766 = vmatpush.msra.mxu3 %v2154_v42 }
 0xa2d   : > { %1767 = vmatpush.msra.mxu3 %v2155_v45 }
 0xa2e   : > { %2103 = vmatmul.msk.f32.vlgmr.msra.gmra.mxu3 %vm737_vm11, %v1738_v46 }
 0xa2f   : > { %v2221_v51 = vpop.eup %2220 }
 0xa30   : > { %v1604_v54 = vpop.xlane.xlu1 %1603  ;;  %v1739_v55 = vmul.f32 %v2221_v51, %v2209_v16 }
 0xa31   : > { %2222 = vrcp.f32 %v1604_v54 }
 0xa36   : > { %2104 = vmatmul.msk.f32.gmra.mxu3 %vm737_vm11, %v1739_v55 }
 0xa37   : > { %v2223_v56 = vpop.eup %2222 }
 0xa38   : > { %v1608_v10 = vmul.f32 %v2223_v56, %v2211_v24 }
 0xa3a   : > { %2096 = vmatmul.msk.f32.gmra.mxu0 %vm737_vm11, %v1608_v10 }
 0xa3e   : > { %v1480_v57 = vpop.f32.mrf.mxu0 }
 0xa3f   : > { %2087 = vmatmul.msk.f32.vlgmr.msra.gmra.mxu1 %vm1290_vm2, %v1480_v57 }
 0xa40   : > { %1892 = vmatpush.msra.mxu1 %v1869_v26 }
 0xa42   : > { %1893 = vmatpush.msra.mxu1 %v1868_v6 }
 0xa44   : > { %1894 = vmatpush.msra.mxu1 %v1867_v27 }
 0xa46   : > { %v1483_v58 = vpop.f32.mrf.mxu0  ;;  %1895 = vmatpush.msra.mxu1 %v1866_v28 }
 0xa47   : > { %2088 = vmatmul.msk.f32.gmra.mxu1 %vm1290_vm2, %v1483_v58 }
 0xa4e   : > { %v1638_v59 = vpop.f32.mrf.mxu0 }
 0xa4f   : > { %2097 = vmatmul.msk.f32.vlgmr.msrb.gmra.mxu1 %vm1290_vm2, %v1638_v59 }
 0xab1   : > { %v1769_v60 = vpop.f32.mrf.mxu3 }
 0xab2   : > { %2105 = vmatmul.msk.f32.vlgmr.msra.gmra.mxu0 %vm1290_vm2, %v1769_v60 }
 0xab7   : > { %v1641_v61 = vpop.f32.mrf.mxu0 }
 0xab8   : > { %2098 = vmatmul.msk.f32.gmra.mxu1 %vm1290_vm2, %v1641_v61  ;;  %v1907_v61 = vld [vmem:[%s2781_s16 + $0x10] sm:$0xff] }
 0xab9   : > { %v1772_v23 = vpop.f32.mrf.mxu3  ;;  %1932 = vmatpush.msra.mxu2 %v1907_v61 }
 0xaba   : > { %2106 = vmatmul.msk.f32.gmra.mxu0 %vm1290_vm2, %v1772_v23  ;;  %v1906_v23 = vld [vmem:[%s2781_s16 + $0x8] sm:$0xff] }
 0xabb   : > { %1933 = vmatpush.msra.mxu2 %v1906_v23 }
 0xabc   : > { %v1509_v62 = vpop.f32.mrf.mxu1 }
 0xabd   : > { %v1539_v1 = vadd.f32 %v2647_v41, %v1509_v62  ;;  %v1905_v62 = vld [vmem:[%s2781_s16] sm:$0xff] }
 0xabe   : > { %1934 = vmatpush.msra.mxu2 %v1905_v62 }
 0xac4   : > { %v1512_v63 = vpop.f32.mrf.mxu1 }
 0xac5   : > { %v1542_v14 = vadd.f32 %v2649_v43, %v1512_v63  ;;  %v2176_v63 = vld [vmem:[%s2780_s15] ss:$0 sm:$0xff] }
 0xacc   : > { %v1667_v52 = vpop.f32.mrf.mxu1 }
 0xacd   : > { %v1673_v5 = vadd.f32 %v1667_v52, %v1539_v1 }
 0xb2f   : > { %v1798_v7 = vpop.f32.mrf.mxu0 }
 0xb30   : > { %v1804_v8 = vadd.f32 %v1798_v7, %v1673_v5 }
 0xb32   : > { %v1806_v49 = vadd.f32 %v1804_v8, %v2535_v47 }
 0xb34   : > { %v2696_v13 = vadd.f32 %v2173_v11, %v1806_v49  ;;  %v2177_v49 = vld [vmem:[%s2782_s17] ss:$0 sm:$0xff] }
 0xb35   : > { %v1670_v15 = vpop.f32.mrf.mxu1 }
 0xb36   : > { %v1816_v18 = vsel %vm666_vm0, %v2696_v13, 0.0  ;;  %v1674_v20 = vadd.f32 %v1670_v15, %v1542_v14 }
 0xb37   : > { %v1801_v21 = vpop.f32.mrf.mxu0  ;;  %1817 = vadd.xlane.f32.xlu0 %v1816_v18 }
 0xb38   : > { %v1805_v41 = vadd.f32 %v1801_v21, %v1674_v20 }
 0xb3a   : > { %v1807_v0 = vadd.f32 %v1805_v41, %v2540_v53 }
 0xb3c   : > { %v2702_v3 = vadd.f32 %v2173_v11, %v1807_v0 }
 0xb3e   : > { %v1819_v4 = vsel %vm666_vm0, %v2702_v3, 0.0 }
 0xb3f   : > { %1820 = vadd.xlane.f32.xlu1 %v1819_v4 }
 0xbaa   : > { %v1818_v47 = vpop.xlane.xlu0 %1817 }
 0xbab   : > { %v1822_v9 = vmul.f32 %v1818_v47, %v2380_v17 }
 0xbad   : > { %v1824_v43 = vsub.f32 %v2696_v13, %v1822_v9 }
 0xbaf   : > { %v1826_v12 = vmul.f32 %v1824_v43, %v1824_v43 }
 0xbb1   : > { %v1828_v16 = vsel %vm666_vm0, %v1826_v12, 0.0 }
 0xbb2   : > { %1829 = vadd.xlane.f32.xlu2 %v1828_v16  ;;  %v1821_v19 = vpop.xlane.xlu1 %1820 }
 0xbb3   : > { %v1823_v22 = vmul.f32 %v1821_v19, %v2380_v17 }
 0xbb5   : > { %v1825_v53 = vsub.f32 %v2702_v3, %v1823_v22 }
 0xbb7   : > { %v1827_v24 = vmul.f32 %v1825_v53, %v1825_v53 }
 0xbb9   : > { %v1831_v25 = vsel %vm666_vm0, %v1827_v24, 0.0 }
 0xbba   : > { %1832 = vadd.xlane.f32.xlu1 %v1831_v25 }
 0xc25   : > { %v1830_v29 = vpop.xlane.xlu2 %1829 }
 0xc26   : > { %v1834_v30 = vmul.f32 %v1830_v29, %v2380_v17 }
 0xc28   : > { %v1836_v31 = vadd.f32 1e-05, %v1834_v30 }
 0xc2a   : > { %2224 = vrsqrt.f32 %v1836_v31  ;;  %vm1844_vm3 = vweird.f32 %v1836_v31 }
 0xc2d   : > { %v1833_v32 = vpop.xlane.xlu1 %1832 }
 0xc2e   : > { %v1835_v33 = vmul.f32 %v1833_v32, %v2380_v17 }
 0xc30   : > { %v2225_v34 = vpop.eup %2224  ;;  %v1837_v36 = vadd.f32 1e-05, %v1835_v33 }
 0xc31   : > { %v1839_v35 = vmul.f32 %v2225_v34, %v1836_v31  ;;  %vm1845_vm11 = vweird.f32 %v2225_v34 }
 0xc32   : > { %2226 = vrsqrt.f32 %v1837_v36  ;;  %vm1846_vm4 = vmor %vm1844_vm3, %vm1845_vm11  ;;  %vm1854_vm6 = vweird.f32 %v1837_v36 }
 0xc33   : > { %v1840_v37 = vmul.f32 %v2225_v34, %v1839_v35 }
 0xc35   : > { %v1841_v39 = vmul.f32 0.5, %v1840_v37 }
 0xc37   : > { %v1842_v40 = vsub.f32 1.5, %v1841_v39 }
 0xc38   : > { %v2227_v38 = vpop.eup %2226 }
 0xc39   : > { %v1843_v42 = vmul.f32 %v2225_v34, %v1842_v40  ;;  %v1849_v45 = vmul.f32 %v2227_v38, %v1837_v36  ;;  %vm1855_vm5 = vweird.f32 %v2227_v38 }
 0xc3a   : > { %vm1856_vm7 = vmor %vm1854_vm6, %vm1855_vm5 }
 0xc3b   : > { %v1847_v46 = vsel %vm1846_vm4, %v2225_v34, %v1843_v42  ;;  %v1850_v17 = vmul.f32 %v2227_v38, %v1849_v45 }
 0xc3c   : > { %v1858_v48 = vmul.f32 %v1847_v46, %v1824_v43 }
 0xc3d   : > { %v1851_v54 = vmul.f32 0.5, %v1850_v17 }
 0xc3e   : > { %v1861_v51 = vmul.f32 %v2174_v44, %v1858_v48 }
 0xc3f   : > { %v1852_v55 = vsub.f32 1.5, %v1851_v54 }
 0xc40   : > { %v1864_v56 = vadd.f32 %v2175_v50, %v1861_v51 }
 0xc41   : > { %v1853_v10 = vmul.f32 %v2227_v38, %v1852_v55 }
 0xc42   : > { %2107 = vmatmul.msk.f32.vlgmr.msra.gmra.mxu1 %vm666_vm0, %v1864_v56 }
 0xc43   : > { %v1857_v57 = vsel %vm1856_vm7, %v2227_v38, %v1853_v10 }
 0xc44   : > { %v1859_v58 = vmul.f32 %v1857_v57, %v1825_v53 }
 0xc46   : > { %v1862_v59 = vmul.f32 %v2174_v44, %v1859_v58 }
 0xc48   : > { %v1865_v60 = vadd.f32 %v2175_v50, %v1862_v59 }
 0xc4a   : > { %2108 = vmatmul.msk.f32.gmra.mxu1 %vm666_vm0, %v1865_v60 }
 0xcbf   : > { %v1897_v52 = vpop.f32.mrf.mxu1 }
 0xcc0   : > { %v1898_v1 = vadd.f32 %v2176_v63, %v1897_v52 }
 0xcc2   : > { %v1903_v5 = vmax.f32 %v1898_v1, 0.0 }
 0xcc4   : > { %2109 = vmatmul.msk.f32.vlgmr.msra.gmra.mxu2 %vm666_vm0, %v1903_v5 }
 0xcc7   : > { %v1900_v7 = vpop.f32.mrf.mxu1 }
 0xcc8   : > { %v1901_v8 = vadd.f32 %v2176_v63, %v1900_v7 }
 0xcca   : > { %v1904_v11 = vmax.f32 %v1901_v8, 0.0 }
 0xccc   : > { %2110 = vmatmul.msk.f32.gmra.mxu2 %vm666_vm0, %v1904_v11 }
 0xd47   : > { %v1936_v14 = vpop.f32.mrf.mxu2 }
 0xd48   : > { %v1937_v15 = vadd.f32 %v2177_v49, %v1936_v14 }
 0xd4a   : > { %v1942_v18 = vadd.f32 %v1937_v15, %v2696_v13 }
 0xd4c   : > { %1944 = vst.msk [vmem:[%s609_s25] sm:$0xff] %vm666_vm0, %v1942_v18 }
 0xd4f   : > { %v1939_v20 = vpop.f32.mrf.mxu2 }
 0xd50   : > { %v1940_v21 = vadd.f32 %v2177_v49, %v1939_v20 }
 0xd52   : > { %v1943_v41 = vadd.f32 %v1940_v21, %v2702_v3 }
 0xd54   : > { %1945 = vst.msk [vmem:[%s609_s25 + $0x8] sm:$0xff] %vm666_vm0, %v1943_v41 }
 0xd55 PF: > { %s28_s27 = sadd.s32 1, %s2234_s27  }
 0xd56   : > { %p25_p4 = scmp.ge.s32.totalorder %s28_s27, 4  }
 0xd58   :  { %27 = sbr.rel (!%p25_p4) target bundleno = 4 (0x4), region = 130 }

// kernel: qanet_forward.8
= control target key start
LH: loop header
LB: loop body
LE: loop exit
PB: predicated region body
PF: predicated region fallthrough
CT: control target
= control target key end

     0   :  { %s2345_s27 = smov 0   ;;  %s2765_s0 = inlined_call_operand.vmem [shape: f32[4,16,32], index: 0, kind: input, shape index: {}]   ;;  %s2766_s1 = inlined_call_operand.vmem [shape: f32[16,32], index: 1, kind: input, shape index: {}]   ;;  %s2767_s2 = inlined_call_operand.vmem [shape: f32[4,1,16], index: 2, kind: input, shape index: {}]   ;;  %s2768_s3 = inlined_call_operand.vmem [shape: f32[4,16,1], index: 3, kind: input, shape index: {}]   ;;  %s2769_s4 = inlined_call_operand.vmem [shape: f32[4,32], index: 4, kind: input, shape index: {}]   ;;  %s2770_s5 = inlined_call_operand.vmem [shape: f32[4,32], index: 5, kind: input, shape index: {}]   ;;  %s2771_s6 = inlined_call_operand.vmem [shape: f32[2,5,32], index: 6, kind: input, shape index: {}]   ;;  %s2772_s7 = inlined_call_operand.vmem [shape: f32[2,32], index: 7, kind: input, shape index: {}]   ;;  %s2773_s8 = inlined_call_operand.vmem [shape: f32[2,32,32], index: 8, kind: input, shape index: {}]   ;;  %s2774_s9 = inlined_call_operand.vmem [shape: f32[2,32], index: 9, kind: input, shape index: {}]   ;;  %s2775_s10 = inlined_call_operand.vmem [shape: f32[1,32,96], index: 10, kind: input, shape index: {}]   ;;  %s2776_s11 = inlined_call_operand.vmem [shape: f32[1,96], index: 11, kind: input, shape index: {}]   ;;  %s2777_s12 = inlined_call_operand.vmem [shape: f32[1,32,32], index: 12, kind: input, shape index: {}]   ;;  %s2778_s13 = inlined_call_operand.vmem [shape: f32[1,32], index: 13, kind: input, shape index: {}]   ;;  %s2779_s14 = inlined_call_operand.vmem [shape: f32[1,32,32], index: 14, kind: input, shape index: {}]   ;;  %s2780_s15 = inlined_call_operand.vmem [shape: f32[1,32], index: 15, kind: input, shape index: {}]   ;;  %s2781_s16 = inlined_call_operand.vmem [shape: f32[1,32,32], index: 16, kind: input, shape index: {}]   ;;  %s2782_s17 = inlined_call_operand.vmem [shape: f32[1,32], index: 17, kind: input, shape index: {}]   ;;  %s2783_s18 = inlined_call_operand.vmem [shape: f32[4,16,32], index: 18, kind: output, shape index: {}]  }
   0x1   :  { %2785 = sst [smem:[#allocation2_spill]] %s2765_s0 }
   0x2   :  { %2786 = sst [smem:[#allocation3_spill]] %s2766_s1 }
   0x3   :  { %2787 = sst [smem:[#allocation4_spill]] %s2767_s2 }
   0x4 LB: > { %s2022_s28 = sadd.s32 4294967295, %s2234_s27   ;;  %p2026_p0 = scmp.ge.s32.totalorder %s2234_s27, 1  ;;  %s2234_s27 = sphi %s2345_s27, %s28_s27  }
   0x5   : > { %p530_p1 = scmp.lt.s32.totalorder %s2234_s27, 5 }
   0x7   : > { %p531_p2 = pnand %p2026_p0, %p530_p1 }
   0x8   : > { %p592_p3 = scmp.lt.s32.totalorder (!%p531_p2), %s2022_s28, 3  ;;  %s2788_s19 = sld [smem:[#allocation3_spill]] (!%p531_p2) }
   0x9   : > { %534 = sbr.rel (%p531_p2) target bundleno = 3413 (0xd55), region = 92  ;;  %s2789_s21 = sld [smem:[#allocation2_spill]] (!%p531_p2) }
   0xa   : > { %s2239_s2 = smov (!%p531_p2), 96   ;;  %s2240_s23 = smov (!%p531_p2), 64  }
   0xb   : > { %s2241_s24 = smov (!%p531_p2), 88   ;;  %s2242_s25 = smov (!%p531_p2), 120  }
   0xc   : > { %s2244_s30 = smov (!%p531_p2), 104   ;;  %s2245_s0 = smov (!%p531_p2), 112  }
   0xe   : > { %s2792_s28 = smov (!%p592_p3, %s2022_s28), 3  ;;  %v613_v0 = vld [vmem:[%s2788_s19 + $0x8] sm:$0xff]  ;;  %vm666_vm0 = vcmask 261120   ;;  %v612_v4 = vld [vmem:[%s2788_s19] sm:$0xff]  ;;  %v2236_v8 = vmov 32.0   ;;  %v2237_v12 = vmov 0   ;;  %v619_v40 = vlaneseq }
   0xf   : > { %s2356_s29 = sshll.u32 %s2792_s28, 4  ;;  %2178 = vrcp.f32 %v2236_v8  ;;  %2140 = vset.pattern.permute.xlu2 %v2237_v12  ;;  %2161 = vset.pattern.permute.xlu0 %v2237_v12  ;;  %v2162_v43 = vld [vmem:[%s2769_s4] ss:$0 sm:$0xff]  ;;  %vm737_vm11 = vcmask 130048  }
  0x10   : > { %s596_s22 = scalar_lea.vmem %s2789_s21, %s2356_s29  ;;  %s604_s26 = scalar_lea.vmem %s2768_s3, %s2356_s29  ;;  %v2163_v46 = vld [vmem:[%s2770_s5] ss:$0 sm:$0xff]  ;;  %v620_v48 = vshrl.u32 %v619_v40, 7  ;;  %v623_v59 = vand.u32 127, %v619_v40 }
  0x11   : > { %v611_v1 = vld [vmem:[%s596_s22 + $0x8] sm:$0xff]  ;;  %v610_v3 = vld [vmem:[%s596_s22] sm:$0xff]  ;;  %s2790_s21 = sld [smem:[#allocation4_spill]] }
  0x12   : > { %v2365_v2 = vadd.f32 %v613_v0, %v611_v1  ;;  %v2372_v6 = vadd.f32 %v612_v4, %v610_v3  ;;  %v616_v11 = vld [vmem:[%s604_s26 + $0x8] sm:$0xff]  ;;  %v615_v15 = vld [vmem:[%s604_s26] sm:$0xff]  ;;  %v621_v54 = vadd.s32 8, %v620_v48  ;;  %v632_v61 = vadd.s32 4294967295, %v620_v48  ;;  %s2243_s26 = smov 72  }
  0x13   : > { %731 = vperm.xlu2 %2140, %v616_v11   ;;  %v624_v63 = vadd.s32 4294967294, %v620_v48  ;;  %vm640_vm10 = vcmp.eq.s32.totalorder %v623_v59, %v620_v48  ;;  %v2238_v4 = vmov 0.0   ;;  %v654_v12 = vadd.s32 2, %v620_v48 }
  0x14   : > { %v670_v5 = vsel %vm666_vm0, %v2365_v2, 0.0  ;;  %v667_v7 = vsel %vm666_vm0, %v2372_v6, 0.0  ;;  %v625_v60 = vadd.s32 4294967294, %v621_v54  ;;  %vm634_vm9 = vcmp.eq.s32.totalorder %v623_v59, %v632_v61 }
  0x15   : > { %671 = vadd.xlane.f32.xlu0 %v670_v5  ;;  %v2179_v9 = vpop.eup %2178  ;;  %vm626_vm12 = vcmp.eq.s32.totalorder %v623_v59, %v624_v63  ;;  %v2406_v8 = vsel %vm640_vm10, 1.0, %v2238_v4  ;;  %vm641_vm15 = vcmp.eq.s32.totalorder %v623_v59, %v621_v54 }
  0x16   : > { %v674_v10 = vmul.f32 32.0, %v2179_v9  ;;  %vm678_vm1 = vweird.f32 %v2179_v9  ;;  %vm627_vm8 = vcmp.eq.s32.totalorder %v623_v59, %v625_v60  ;;  %v2412_v11 = vsel %vm626_vm12, 1.0, %v2238_v4 }
  0x17   : > { %v2402_v5 = vsel %vm627_vm8, 1.0, %v2238_v4  ;;  %s599_s22 = scalar_lea.vmem %s2790_s21, %s2792_s28  ;;  %s2246_s28 = smov 80  }
  0x18   : > { %v675_v13 = vsub.f32 1.0, %v674_v10  ;;  %v646_v10 = vadd.s32 1, %v620_v48 }
  0x1a   : > { %v676_v14 = vmul.f32 %v2179_v9, %v675_v13  ;;  %vm648_vm14 = vcmp.eq.s32.totalorder %v623_v59, %v646_v10 }
  0x1b   : > { %726 = vperm.xlu2 %2140, %v615_v15   ;;  %v2422_v15 = vsel %vm641_vm15, 1.0, %v2238_v4 }
  0x1c   : > { %v677_v16 = vadd.f32 %v2179_v9, %v676_v14  ;;  %v2420_v14 = vsel %vm648_vm14, 1.0, %v2238_v4 }
  0x1d   : > { %668 = vadd.xlane.f32.xlu0 %v667_v7  ;;  %v2404_v7 = vsel %vm634_vm9, 1.0, %v2238_v4 }
  0x1e   : > { %v2380_v17 = vsel %vm678_vm1, %v2179_v9, %v677_v16  ;;  %v633_v9 = vadd.s32 4294967295, %v621_v54  ;;  %vm656_vm1 = vcmp.eq.s32.totalorder %v623_v59, %v654_v12  ;;  %v647_v16 = vadd.s32 1, %v621_v54 }
  0x20   : > { %vm635_vm13 = vcmp.eq.s32.totalorder %v623_v59, %v633_v9 }
  0x21   : > { %v2418_v13 = vsel %vm635_vm13, 1.0, %v2238_v4 }
  0x6d   : > { %v2396_v52 = vpop.permute.xlu2 %731 }
  0x75   : > { %v2399_v1 = vpop.permute.xlu2 %726 }
  0x88   : > { %v672_v18 = vpop.xlane.xlu0 %671 }
  0x89   : > { %v681_v19 = vmul.f32 %v2380_v17, %v672_v18  ;;  %v2428_v18 = vsel %vm656_vm1, 1.0, %v2238_v4 }
  0x8b   : > { %v683_v20 = vsub.f32 %v2365_v2, %v681_v19  ;;  %v655_v19 = vadd.s32 2, %v621_v54 }
  0x8d   : > { %v685_v21 = vmul.f32 %v683_v20, %v683_v20 }
  0x8f   : > { %v689_v22 = vsel %vm666_vm0, %v685_v21, 0.0 }
  0x90   : > { %690 = vadd.xlane.f32.xlu1 %v689_v22  ;;  %v669_v23 = vpop.xlane.xlu0 %668  ;;  %v915_v22 = vld [vmem:[%s2773_s8 + $0x18] sm:$0xff] }
  0x91   : > { %v680_v24 = vmul.f32 %v2380_v17, %v669_v23  ;;  %v914_v23 = vld [vmem:[%s2773_s8 + $0x10] sm:$0xff] }
  0x93   : > { %v682_v25 = vsub.f32 %v2372_v6, %v680_v24  ;;  %v913_v24 = vld [vmem:[%s2773_s8 + $0x8] sm:$0xff] }
  0x95   : > { %v684_v26 = vmul.f32 %v682_v25, %v682_v25 }
  0x97   : > { %v686_v27 = vsel %vm666_vm0, %v684_v26, 0.0  ;;  %v736_v26 = vld [vmem:[%s2771_s6] sm:$0x1f] }
  0x98   : > { %687 = vadd.xlane.f32.xlu1 %v686_v27  ;;  %v801_v27 = vperm.slane %v736_v26, 1  ;;  %v903_v40 = vperm.slane %v736_v26, 4 }
 0x103   : > { %v691_v28 = vpop.xlane.xlu1 %690 }
 0x104   : > { %v693_v29 = vmul.f32 %v691_v28, %v2380_v17 }
 0x106   : > { %v695_v30 = vadd.f32 1e-05, %v693_v29 }
 0x108   : > { %2180 = vrsqrt.f32 %v695_v30  ;;  %vm712_vm3 = vweird.f32 %v695_v30 }
 0x10b   : > { %v688_v31 = vpop.xlane.xlu1 %687 }
 0x10c   : > { %v692_v32 = vmul.f32 %v688_v31, %v2380_v17 }
 0x10e   : > { %v2181_v33 = vpop.eup %2180  ;;  %v694_v34 = vadd.f32 1e-05, %v692_v32 }
 0x10f   : > { %v707_v35 = vmul.f32 %v2181_v33, %v695_v30  ;;  %vm713_vm2 = vweird.f32 %v2181_v33  ;;  %v767_v30 = vperm.slane %v736_v26, 0 }
 0x110   : > { %2182 = vrsqrt.f32 %v694_v34  ;;  %vm714_vm4 = vmor %vm712_vm3, %vm713_vm2  ;;  %vm702_vm6 = vweird.f32 %v694_v34  ;;  %vm649_vm2 = vcmp.eq.s32.totalorder %v623_v59, %v647_v16  ;;  %vm657_vm3 = vcmp.eq.s32.totalorder %v623_v59, %v655_v19 }
 0x111   : > { %v708_v36 = vmul.f32 %v2181_v33, %v707_v35  ;;  %v2438_v21 = vsel %vm657_vm3, 1.0, %v2238_v4 }
 0x113   : > { %v709_v37 = vmul.f32 0.5, %v708_v36 }
 0x115   : > { %v710_v38 = vsub.f32 1.5, %v709_v37 }
 0x116   : > { %v2183_v39 = vpop.eup %2182 }
 0x117   : > { %v711_v41 = vmul.f32 %v2181_v33, %v710_v38  ;;  %v697_v42 = vmul.f32 %v2183_v39, %v694_v34  ;;  %vm703_vm5 = vweird.f32 %v2183_v39  ;;  %v835_v34 = vperm.slane %v736_v26, 2 }
 0x118   : > { %vm704_vm7 = vmor %vm702_vm6, %vm703_vm5  ;;  %v869_v38 = vperm.slane %v736_v26, 3 }
 0x119   : > { %v698_v44 = vmul.f32 %v2183_v39, %v697_v42  ;;  %v715_v45 = vsel %vm714_vm4, %v2181_v33, %v711_v41 }
 0x11a   : > { %v717_v47 = vmul.f32 %v715_v45, %v683_v20  ;;  %v2434_v20 = vsel %vm649_vm2, 1.0, %v2238_v4  ;;  %vm1290_vm2 = vcmask 64512  }
 0x11b   : > { %v699_v49 = vmul.f32 0.5, %v698_v44 }
 0x11c   : > { %v720_v50 = vmul.f32 %v2162_v43, %v717_v47 }
 0x11d   : > { %v700_v51 = vsub.f32 1.5, %v699_v49  ;;  %v2164_v49 = vld [vmem:[%s2772_s7] ss:$0 sm:$0xff] }
 0x11e   : > { %v723_v53 = vadd.f32 %v2163_v46, %v720_v50 }
 0x11f   : > { %v701_v55 = vmul.f32 %v2183_v39, %v700_v51 }
 0x120   : > { %v735_v56 = vmul.f32 %v2396_v52, %v723_v53 }
 0x121   : > { %v705_v57 = vsel %vm704_vm7, %v2183_v39, %v701_v55 }
 0x122   : > { %v716_v58 = vmul.f32 %v705_v57, %v682_v25  ;;  %758 = vmatpush.msra.mxu0 %v735_v56  ;;  %2116 = vmatpush.msra.mxu3 %v735_v56  ;;  %v912_v25 = vld [vmem:[%s2773_s8] sm:$0xff] }
 0x123   : > { %792 = vmatpush.msra.mxu1 %v735_v56  ;;  %826 = vmatpush.msra.mxu2 %v735_v56 }
 0x124   : > { %v719_v62 = vmul.f32 %v2162_v43, %v716_v58 }
 0x126   : > { %v722_v0 = vadd.f32 %v2163_v46, %v719_v62 }
 0x128   : > { %v734_v3 = vmul.f32 %v2399_v1, %v722_v0  ;;  %v2165_v0 = vld [vmem:[%s2774_s9] ss:$0 sm:$0xff] }
 0x12a   : > { %759 = vmatpush.msra.mxu0 %v734_v3  ;;  %2117 = vmatpush.msra.mxu3 %v734_v3 }
 0x12b   : > { %793 = vmatpush.msra.mxu1 %v734_v3  ;;  %827 = vmatpush.msra.mxu2 %v734_v3 }
 0x12c   : > { %2045 = vmatmul.msk.f32.vlgmr.msra.gmra.mxu3 %vm737_vm11, %v2402_v5  ;;  %2046 = vmatmul.msk.f32.vlgmr.msra.gmra.mxu1 %vm737_vm11, %v2404_v7 }
 0x12d   : > { %2048 = vmatmul.msk.f32.vlgmr.msra.gmra.mxu2 %vm737_vm11, %v2406_v8  ;;  %860 = vmatpush.msrb.mxu3 %v735_v56 }
 0x12e   : > { %894 = vmatpush.msrb.mxu0 %v735_v56  ;;  %936 = vmatpush.msrb.mxu1 %v915_v22 }
 0x12f   : > { %861 = vmatpush.msrb.mxu3 %v734_v3  ;;  %2044 = vmatmul.msk.f32.vlgmr.msra.gmra.mxu0 %vm737_vm11, %v2412_v11 }
 0x130   : > { %895 = vmatpush.msrb.mxu0 %v734_v3  ;;  %937 = vmatpush.msrb.mxu1 %v914_v23 }
 0x132   : > { %938 = vmatpush.msrb.mxu1 %v913_v24 }
 0x134   : > { %2047 = vmatmul.msk.f32.gmra.mxu1 %vm737_vm11, %v2418_v13  ;;  %2050 = vmatmul.msk.f32.vlgmr.msrb.gmra.mxu3 %vm737_vm11, %v2420_v14 }
 0x135   : > { %2049 = vmatmul.msk.f32.gmra.mxu2 %vm737_vm11, %v2422_v15  ;;  %939 = vmatpush.msrb.mxu1 %v912_v25 }
 0x137   : > { %2052 = vmatmul.msk.f32.vlgmr.msrb.gmra.mxu0 %vm737_vm11, %v2428_v18 }
 0x13c   : > { %2051 = vmatmul.msk.f32.gmra.mxu3 %vm737_vm11, %v2434_v20 }
 0x13f   : > { %2053 = vmatmul.msk.f32.gmra.mxu0 %vm737_vm11, %v2438_v21 }
 0x1a9   : > { %v795_v29 = vpop.f32.mrf.mxu1 }
 0x1aa   : > { %v802_v32 = vmul.f32 %v801_v27, %v795_v29 }
 0x1ac   : > { %v761_v28 = vpop.f32.mrf.mxu0 }
 0x1ad   : > { %v768_v35 = vmul.f32 %v767_v30, %v761_v28 }
 0x1af   : > { %v764_v31 = vpop.f32.mrf.mxu3  ;;  %v804_v37 = vadd.f32 %v802_v32, %v768_v35 }
 0x1b0   : > { %v829_v33 = vpop.f32.mrf.mxu2  ;;  %v769_v50 = vmul.f32 %v767_v30, %v764_v31 }
 0x1b1   : > { %v836_v36 = vmul.f32 %v835_v34, %v829_v33  ;;  %v798_v41 = vpop.f32.mrf.mxu1 }
 0x1b2   : > { %v803_v47 = vmul.f32 %v801_v27, %v798_v41 }
 0x1b3   : > { %v838_v43 = vadd.f32 %v836_v36, %v804_v37 }
 0x1b4   : > { %v897_v39 = vpop.f32.mrf.mxu0  ;;  %v805_v55 = vadd.f32 %v803_v47, %v769_v50 }
 0x1b5   : > { %v904_v45 = vmul.f32 %v903_v40, %v897_v39 }
 0x1b7   : > { %v863_v42 = vpop.f32.mrf.mxu3 }
 0x1b8   : > { %v870_v44 = vmul.f32 %v869_v38, %v863_v42  ;;  %v832_v46 = vpop.f32.mrf.mxu2 }
 0x1b9   : > { %v837_v51 = vmul.f32 %v835_v34, %v832_v46 }
 0x1ba   : > { %v872_v48 = vadd.f32 %v870_v44, %v838_v43 }
 0x1bb   : > { %v839_v58 = vadd.f32 %v837_v51, %v805_v55  ;;  %v2166_v51 = vld [vmem:[%s2769_s4 + $0x1] ss:$0 sm:$0xff] }
 0x1bc   : > { %v906_v53 = vadd.f32 %v904_v45, %v872_v48  ;;  %v900_v54 = vpop.f32.mrf.mxu0 }
 0x1bd   : > { %v905_v60 = vmul.f32 %v903_v40, %v900_v54 }
 0x1be   : > { %v910_v56 = vadd.f32 %v2164_v49, %v906_v53 }
 0x1bf   : > { %v866_v57 = vpop.f32.mrf.mxu3 }
 0x1c0   : > { %v871_v59 = vmul.f32 %v869_v38, %v866_v57  ;;  %2054 = vmatmul.msk.f32.vlgmr.msrb.gmra.mxu1 %vm666_vm0, %v910_v56  ;;  %v2167_v56 = vld [vmem:[%s2770_s5 + $0x1] ss:$0 sm:$0xff] }
 0x1c2   : > { %v873_v61 = vadd.f32 %v871_v59, %v839_v58 }
 0x1c4   : > { %v907_v62 = vadd.f32 %v905_v60, %v873_v61 }
 0x1c6   : > { %v911_v63 = vadd.f32 %v2164_v49, %v907_v62 }
 0x1c8   : > { %2055 = vmatmul.msk.f32.gmra.mxu1 %vm666_vm0, %v911_v63 }
 0x23d   : > { %v941_v3 = vpop.f32.mrf.mxu1 }
 0x23e   : > { %v942_v4 = vadd.f32 %v2165_v0, %v941_v3 }
 0x240   : > { %v947_v9 = vmax.f32 %v942_v4, 0.0 }
 0x242   : > { %v2466_v10 = vadd.f32 %v947_v9, %v2372_v6 }
 0x244   : > { %v953_v12 = vsel %vm666_vm0, %v2466_v10, 0.0 }
 0x245   : > { %v944_v16 = vpop.f32.mrf.mxu1  ;;  %954 = vadd.xlane.f32.xlu1 %v953_v12 }
 0x246   : > { %v945_v19 = vadd.f32 %v2165_v0, %v944_v16 }
 0x248   : > { %v948_v22 = vmax.f32 %v945_v19, 0.0 }
 0x24a   : > { %v2471_v23 = vadd.f32 %v948_v22, %v2365_v2 }
 0x24c   : > { %v956_v24 = vsel %vm666_vm0, %v2471_v23, 0.0 }
 0x24d   : > { %957 = vadd.xlane.f32.xlu0 %v956_v24 }
 0x2b8   : > { %v955_v25 = vpop.xlane.xlu1 %954 }
 0x2b9   : > { %v959_v26 = vmul.f32 %v955_v25, %v2380_v17 }
 0x2bb   : > { %v961_v6 = vsub.f32 %v2466_v10, %v959_v26 }
 0x2bd   : > { %v963_v27 = vmul.f32 %v961_v6, %v961_v6 }
 0x2bf   : > { %v965_v28 = vsel %vm666_vm0, %v963_v27, 0.0 }
 0x2c0   : > { %v958_v29 = vpop.xlane.xlu0 %957  ;;  %966 = vadd.xlane.f32.xlu0 %v965_v28 }
 0x2c1   : > { %v960_v30 = vmul.f32 %v958_v29, %v2380_v17 }
 0x2c3   : > { %v962_v31 = vsub.f32 %v2471_v23, %v960_v30 }
 0x2c5   : > { %v964_v2 = vmul.f32 %v962_v31, %v962_v31 }
 0x2c7   : > { %v968_v32 = vsel %vm666_vm0, %v964_v2, 0.0 }
 0x2c8   : > { %969 = vadd.xlane.f32.xlu2 %v968_v32  ;;  %v2168_v32 = vld [vmem:[%s2772_s7 + $0x1] ss:$0 sm:$0xff] }
 0x333   : > { %v967_v33 = vpop.xlane.xlu0 %966 }
 0x334   : > { %v971_v34 = vmul.f32 %v967_v33, %v2380_v17 }
 0x336   : > { %v973_v35 = vadd.f32 1e-05, %v971_v34 }
 0x338   : > { %2184 = vrsqrt.f32 %v973_v35  ;;  %vm981_vm5 = vweird.f32 %v973_v35 }
 0x33b   : > { %v970_v36 = vpop.xlane.xlu2 %969 }
 0x33c   : > { %v972_v37 = vmul.f32 %v970_v36, %v2380_v17 }
 0x33e   : > { %v2185_v38 = vpop.eup %2184  ;;  %v974_v39 = vadd.f32 1e-05, %v972_v37 }
 0x33f   : > { %v976_v40 = vmul.f32 %v2185_v38, %v973_v35  ;;  %vm982_vm4 = vweird.f32 %v2185_v38 }
 0x340   : > { %2186 = vrsqrt.f32 %v974_v39  ;;  %vm983_vm6 = vmor %vm981_vm5, %vm982_vm4  ;;  %vm991_vm8 = vweird.f32 %v974_v39 }
 0x341   : > { %v977_v41 = vmul.f32 %v2185_v38, %v976_v40 }
 0x343   : > { %v978_v42 = vmul.f32 0.5, %v977_v41 }
 0x345   : > { %v979_v43 = vsub.f32 1.5, %v978_v42 }
 0x346   : > { %v2187_v44 = vpop.eup %2186 }
 0x347   : > { %v980_v45 = vmul.f32 %v2185_v38, %v979_v43  ;;  %v986_v46 = vmul.f32 %v2187_v44, %v974_v39  ;;  %vm992_vm7 = vweird.f32 %v2187_v44  ;;  %v2169_v43 = vld [vmem:[%s2774_s9 + $0x1] ss:$0 sm:$0xff] }
 0x348   : > { %vm993_vm9 = vmor %vm991_vm8, %vm992_vm7 }
 0x349   : > { %v987_v47 = vmul.f32 %v2187_v44, %v986_v46  ;;  %v984_v48 = vsel %vm983_vm6, %v2185_v38, %v980_v45 }
 0x34a   : > { %v995_v53 = vmul.f32 %v984_v48, %v961_v6 }
 0x34b   : > { %v988_v49 = vmul.f32 0.5, %v987_v47 }
 0x34c   : > { %v998_v57 = vmul.f32 %v2166_v51, %v995_v53 }
 0x34d   : > { %v989_v50 = vsub.f32 1.5, %v988_v49 }
 0x34e   : > { %v1001_v60 = vadd.f32 %v2167_v56, %v998_v57 }
 0x34f   : > { %v990_v54 = vmul.f32 %v2187_v44, %v989_v50 }
 0x350   : > { %v1003_v63 = vmul.f32 %v1001_v60, %v2399_v1  ;;  %v2069_v1 = vld [vmem:[%s2773_s8 + $0x30] sm:$0xff] }
 0x351   : > { %v994_v55 = vsel %vm993_vm9, %v2187_v44, %v990_v54 }
 0x352   : > { %v996_v58 = vmul.f32 %v994_v55, %v962_v31 }
 0x354   : > { %v999_v59 = vmul.f32 %v2166_v51, %v996_v58 }
 0x356   : > { %v1002_v61 = vadd.f32 %v2167_v56, %v999_v59 }
 0x358   : > { %v1004_v62 = vmul.f32 %v1002_v61, %v2396_v52  ;;  %v2070_v52 = vld [vmem:[%s2773_s8 + $0x38] sm:$0xff] }
 0x35a   : > { %1021 = vmatpush.msrb.mxu2 %v1004_v62  ;;  %1049 = vmatpush.msra.mxu3 %v1004_v62 }
 0x35b   : > { %1077 = vmatpush.msra.mxu0 %v1004_v62  ;;  %1105 = vmatpush.msra.mxu1 %v1004_v62 }
 0x35c   : > { %1022 = vmatpush.msrb.mxu2 %v1003_v63  ;;  %1050 = vmatpush.msra.mxu3 %v1003_v63 }
 0x35d   : > { %1078 = vmatpush.msra.mxu0 %v1003_v63  ;;  %1106 = vmatpush.msra.mxu1 %v1003_v63 }
 0x35e   : > { %2057 = vmatmul.msk.f32.vlgmr.msrb.gmra.mxu2 %vm737_vm11, %v2412_v11  ;;  %2059 = vmatmul.msk.f32.vlgmr.msra.gmra.mxu3 %vm737_vm11, %v2404_v7  ;;  %v2067_v7 = vld [vmem:[%s2773_s8 + $0x20] sm:$0xff] }
 0x35f   : > { %1133 = vmatpush.msra.mxu2 %v1004_v62  ;;  %2061 = vmatmul.msk.f32.vlgmr.msra.gmra.mxu0 %vm737_vm11, %v2406_v8  ;;  %v2056_v8 = vld [vmem:[%s2771_s6 + $0x8] sm:$0x1f] }
 0x360   : > { %2063 = vmatmul.msk.f32.vlgmr.msra.gmra.mxu1 %vm737_vm11, %v2420_v14  ;;  %1176 = vmatpush.msrb.mxu3 %v2070_v52  ;;  %v1030_v14 = vperm.slane %v2056_v8, 0  ;;  %v1086_v0 = vperm.slane %v2056_v8, 2  ;;  %v1114_v16 = vperm.slane %v2056_v8, 3  ;;  %v1142_v22 = vperm.slane %v2056_v8, 4  ;;  %v1245_v52 = vld [vmem:[%s2775_s10 + $0x10] sm:$0xff] }
 0x361   : > { %1134 = vmatpush.msra.mxu2 %v1003_v63  ;;  %v1246_v63 = vld [vmem:[%s2775_s10 + $0x18] sm:$0xff] }
 0x362   : > { %1177 = vmatpush.msrb.mxu3 %v2069_v1  ;;  %1269 = vmatpush.msrb.mxu0 %v1246_v63  ;;  %v1244_v1 = vld [vmem:[%s2775_s10 + $0x8] sm:$0xff] }
 0x364   : > { %1270 = vmatpush.msrb.mxu0 %v1245_v52 }
 0x366   : > { %2058 = vmatmul.msk.f32.gmra.mxu2 %vm737_vm11, %v2402_v5  ;;  %2060 = vmatmul.msk.f32.gmra.mxu3 %vm737_vm11, %v2418_v13  ;;  %v2068_v5 = vld [vmem:[%s2773_s8 + $0x28] sm:$0xff] }
 0x367   : > { %2062 = vmatmul.msk.f32.gmra.mxu0 %vm737_vm11, %v2422_v15  ;;  %1178 = vmatpush.msrb.mxu3 %v2068_v5  ;;  %v1058_v15 = vperm.slane %v2056_v8, 1  ;;  %v1243_v5 = vld [vmem:[%s2775_s10] sm:$0xff] }
 0x368   : > { %2064 = vmatmul.msk.f32.gmra.mxu1 %vm737_vm11, %v2434_v20  ;;  %1271 = vmatpush.msrb.mxu0 %v1244_v1 }
 0x369   : > { %1179 = vmatpush.msrb.mxu3 %v2067_v7 }
 0x36a   : > { %1272 = vmatpush.msrb.mxu0 %v1243_v5 }
 0x36e   : > { %2065 = vmatmul.msk.f32.vlgmr.msra.gmra.mxu2 %vm737_vm11, %v2428_v18 }
 0x376   : > { %2066 = vmatmul.msk.f32.gmra.mxu2 %vm737_vm11, %v2438_v21 }
 0x3dc   : > { %v1080_v18 = vpop.f32.mrf.mxu0 }
 0x3dd   : > { %v1108_v3 = vpop.f32.mrf.mxu1  ;;  %v1087_v12 = vmul.f32 %v1086_v0, %v1080_v18 }
 0x3de   : > { %v1115_v25 = vmul.f32 %v1114_v16, %v1108_v3 }
 0x3e1   : > { %v1024_v11 = vpop.f32.mrf.mxu2  ;;  %v1052_v13 = vpop.f32.mrf.mxu3 }
 0x3e2   : > { %v1031_v20 = vmul.f32 %v1030_v14, %v1024_v11  ;;  %v1059_v21 = vmul.f32 %v1058_v15, %v1052_v13 }
 0x3e4   : > { %v1061_v9 = vadd.f32 %v1059_v21, %v1031_v20  ;;  %v1083_v27 = vpop.f32.mrf.mxu0 }
 0x3e5   : > { %v1088_v31 = vmul.f32 %v1086_v0, %v1083_v27  ;;  %v1111_v33 = vpop.f32.mrf.mxu1 }
 0x3e6   : > { %v1089_v24 = vadd.f32 %v1087_v12, %v1061_v9  ;;  %v1116_v36 = vmul.f32 %v1114_v16, %v1111_v33  ;;  %v2170_v16 = vld [vmem:[%s2769_s4 + $0x2] ss:$0 sm:$0xff]  ;;  %v2172_v33 = vld [vmem:[%s2776_s11] ss:$0 sm:$0xff] }
 0x3e8   : > { %v1117_v29 = vadd.f32 %v1115_v25, %v1089_v24  ;;  %v2171_v25 = vld [vmem:[%s2770_s5 + $0x2] ss:$0 sm:$0xff] }
 0x3e9   : > { %v1027_v4 = vpop.f32.mrf.mxu2  ;;  %v1055_v19 = vpop.f32.mrf.mxu3 }
 0x3ea   : > { %v1032_v26 = vmul.f32 %v1030_v14, %v1027_v4  ;;  %v1060_v6 = vmul.f32 %v1058_v15, %v1055_v19 }
 0x3ec   : > { %v1062_v30 = vadd.f32 %v1060_v6, %v1032_v26 }
 0x3ee   : > { %v1090_v35 = vadd.f32 %v1088_v31, %v1062_v30 }
 0x3f0   : > { %v1118_v39 = vadd.f32 %v1116_v36, %v1090_v35 }
 0x3f1   : > { %v1136_v28 = vpop.f32.mrf.mxu2 }
 0x3f2   : > { %v1143_v2 = vmul.f32 %v1142_v22, %v1136_v28 }
 0x3f4   : > { %v1145_v34 = vadd.f32 %v1143_v2, %v1117_v29 }
 0x3f6   : > { %v1149_v37 = vadd.f32 %v2168_v32, %v1145_v34 }
 0x3f8   : > { %2071 = vmatmul.msk.f32.vlgmr.msrb.gmra.mxu3 %vm666_vm0, %v1149_v37 }
 0x3f9   : > { %v1139_v38 = vpop.f32.mrf.mxu2 }
 0x3fa   : > { %v1144_v40 = vmul.f32 %v1142_v22, %v1139_v38 }
 0x3fc   : > { %v1146_v41 = vadd.f32 %v1144_v40, %v1118_v39 }
 0x3fe   : > { %v1150_v42 = vadd.f32 %v2168_v32, %v1146_v41 }
 0x400   : > { %2072 = vmatmul.msk.f32.gmra.mxu3 %vm666_vm0, %v1150_v42 }
 0x47b   : > { %v1181_v44 = vpop.f32.mrf.mxu3 }
 0x47c   : > { %v1182_v45 = vadd.f32 %v2169_v43, %v1181_v44 }
 0x47e   : > { %v1187_v46 = vmax.f32 %v1182_v45, 0.0  ;;  %v614_v45 = vld [vmem:[%s599_s22] sm:$0x1] }
 0x480   : > { %v2535_v47 = vadd.f32 %v1187_v46, %v2466_v10  ;;  %v2033_v46 = vadd.f32 -1.0, %v614_v45 }
 0x482   : > { %v1193_v48 = vsel %vm666_vm0, %v2535_v47, 0.0 }
 0x483   : > { %1194 = vadd.xlane.f32.xlu1 %v1193_v48  ;;  %v1184_v49 = vpop.f32.mrf.mxu3  ;;  %v618_v48 = vmul.f32 1e+30, %v2033_v46 }
 0x484   : > { %v1185_v50 = vadd.f32 %v2169_v43, %v1184_v49 }
 0x485   : > { %v2607_v49 = vperm.slane %v618_v48, 0 }
 0x486   : > { %v1188_v51 = vmax.f32 %v1185_v50, 0.0 }
 0x488   : > { %v2540_v53 = vadd.f32 %v1188_v51, %v2471_v23 }
 0x48a   : > { %v1196_v54 = vsel %vm666_vm0, %v2540_v53, 0.0 }
 0x48b   : > { %1197 = vadd.xlane.f32.xlu0 %v1196_v54 }
 0x4f6   : > { %v1195_v55 = vpop.xlane.xlu1 %1194 }
 0x4f7   : > { %v1199_v56 = vmul.f32 %v1195_v55, %v2380_v17 }
 0x4f9   : > { %v1201_v10 = vsub.f32 %v2535_v47, %v1199_v56 }
 0x4fb   : > { %v1203_v57 = vmul.f32 %v1201_v10, %v1201_v10 }
 0x4fd   : > { %v1205_v58 = vsel %vm666_vm0, %v1203_v57, 0.0 }
 0x4fe   : > { %1206 = vadd.xlane.f32.xlu1 %v1205_v58  ;;  %v1198_v59 = vpop.xlane.xlu0 %1197 }
 0x4ff   : > { %v1200_v60 = vmul.f32 %v1198_v59, %v2380_v17 }
 0x501   : > { %v1202_v61 = vsub.f32 %v2540_v53, %v1200_v60 }
 0x503   : > { %v1204_v23 = vmul.f32 %v1202_v61, %v1202_v61 }
 0x505   : > { %v1208_v62 = vsel %vm666_vm0, %v1204_v23, 0.0 }
 0x506   : > { %1209 = vadd.xlane.f32.xlu0 %v1208_v62 }
 0x571   : > { %v1207_v7 = vpop.xlane.xlu1 %1206 }
 0x572   : > { %v1211_v8 = vmul.f32 %v1207_v7, %v2380_v17 }
 0x574   : > { %v1213_v11 = vadd.f32 1e-05, %v1211_v8  ;;  %v1280_v8 = vld [vmem:[%s2777_s12] sm:$0xff] }
 0x576   : > { %2188 = vrsqrt.f32 %v1213_v11  ;;  %vm1221_vm12 = vweird.f32 %v1213_v11 }
 0x579   : > { %v1210_v13 = vpop.xlane.xlu0 %1209 }
 0x57a   : > { %v1212_v14 = vmul.f32 %v1210_v13, %v2380_v17 }
 0x57c   : > { %v2189_v15 = vpop.eup %2188  ;;  %v1214_v18 = vadd.f32 1e-05, %v1212_v14 }
 0x57d   : > { %v1216_v20 = vmul.f32 %v2189_v15, %v1213_v11  ;;  %vm1222_vm10 = vweird.f32 %v2189_v15 }
 0x57e   : > { %2190 = vrsqrt.f32 %v1214_v18  ;;  %vm1223_vm13 = vmor %vm1221_vm12, %vm1222_vm10  ;;  %vm1231_vm15 = vweird.f32 %v1214_v18 }
 0x57f   : > { %v1217_v21 = vmul.f32 %v2189_v15, %v1216_v20 }
 0x581   : > { %v1218_v0 = vmul.f32 0.5, %v1217_v21 }
 0x583   : > { %v1219_v3 = vsub.f32 1.5, %v1218_v0 }
 0x584   : > { %v2191_v4 = vpop.eup %2190 }
 0x585   : > { %v1220_v9 = vmul.f32 %v2189_v15, %v1219_v3  ;;  %v1226_v12 = vmul.f32 %v2191_v4, %v1214_v18  ;;  %vm1232_vm14 = vweird.f32 %v2191_v4 }
 0x586   : > { %vm1233_vm1 = vmor %vm1231_vm15, %vm1232_vm14 }
 0x587   : > { %v1224_v19 = vsel %vm1223_vm13, %v2189_v15, %v1220_v9  ;;  %v1227_v22 = vmul.f32 %v2191_v4, %v1226_v12 }
 0x588   : > { %v1235_v24 = vmul.f32 %v1224_v19, %v1201_v10 }
 0x589   : > { %v1228_v26 = vmul.f32 0.5, %v1227_v22 }
 0x58a   : > { %v1238_v6 = vmul.f32 %v2170_v16, %v1235_v24 }
 0x58b   : > { %v1229_v27 = vsub.f32 1.5, %v1228_v26 }
 0x58c   : > { %v1241_v28 = vadd.f32 %v2171_v25, %v1238_v6 }
 0x58d   : > { %v1230_v29 = vmul.f32 %v2191_v4, %v1229_v27 }
 0x58e   : > { %2073 = vmatmul.msk.f32.vlgmr.msrb.gmra.mxu0 %vm666_vm0, %v1241_v28 }
 0x58f   : > { %v1234_v30 = vsel %vm1233_vm1, %v2191_v4, %v1230_v29 }
 0x590   : > { %v1236_v31 = vmul.f32 %v1234_v30, %v1202_v61 }
 0x592   : > { %v1239_v2 = vmul.f32 %v2170_v16, %v1236_v31 }
 0x594   : > { %v1242_v32 = vadd.f32 %v2171_v25, %v1239_v2 }
 0x596   : > { %2074 = vmatmul.msk.f32.gmra.mxu0 %vm666_vm0, %v1242_v32 }
 0x60b   : > { %v1274_v34 = vpop.f32.mrf.mxu0 }
 0x60c   : > { %v2575_v35 = vadd.f32 %v2172_v33, %v1274_v34 }
 0x60e   : > { %1286 = vrot.lane.b32.xlu0 %v2575_v35, %s2239_s2 }
 0x613   : > { %v1277_v36 = vpop.f32.mrf.mxu0 }
 0x614   : > { %v2578_v37 = vadd.f32 %v2172_v33, %v1277_v36 }
 0x616   : > { %1288 = vrot.lane.b32.xlu1 %v2578_v37, %s2239_s2  ;;  %v2583_v38 = vpack.i.bf16 %v2575_v35, %v2578_v37 }
 0x618   : > { %2142 = vrot.lane.b32.xlu0 %v2583_v38, %s2240_s23 }
 0x620   : > { %1392 = vrot.lane.b32.xlu0 %v2578_v37, %s2241_s24 }
 0x628   : > { %1386 = vrot.lane.b32.xlu0 %v2575_v35, %s2242_s25 }
 0x630   : > { %1681 = vrot.lane.b32.xlu0 %v2578_v37, %s2243_s26 }
 0x638   : > { %1388 = vrot.lane.b32.xlu0 %v2578_v37, %s2242_s25  ;;  %s2248_s25 = smov 48  }
 0x640   : > { %1675 = vrot.lane.b32.xlu0 %v2575_v35, %s2244_s30 }
 0x648   : > { %1544 = vrot.lane.b32.xlu0 %v2575_v35, %s2245_s0 }
 0x650   : > { %1546 = vrot.lane.b32.xlu0 %v2578_v37, %s2245_s0 }
 0x680   : > { %v1287_v39 = vpop.permute.xlu0 %1286 }
 0x688   : > { %v1289_v40 = vpop.permute.xlu1 %1288 }
 0x689   : > { %2075 = vmatpush.xpose.msk.msrb.mxu1 %vm1290_vm2, %v1289_v40 }
 0x68a   : > { %v2143_v41 = vpop.permute.xlu0 %2142 }
 0x68b   : > { %v2144_v42 = vunpack.i.l.bf16 %v2143_v41  ;;  %v2145_v43 = vunpack.i.h.bf16 %v2143_v41 }
 0x68d   : > { %2076 = vmatpush.xpose.msk.msrb.mxu1 %vm1290_vm2, %v1287_v39  ;;  %1377 = vmatpush.msrb.mxu2 %v2144_v42 }
 0x68f   : > { %1378 = vmatpush.msrb.mxu2 %v2145_v43 }
 0x690   : > { %2077 = vmatmul.msk.f32.vlgmr.msrb.gmra.mxu1 %vm1290_vm2, %v2575_v35 }
 0x691   : > { %1536 = vmatpush.msra.mxu2 %v1280_v8 }
 0x692   : > { %v1393_v44 = vpop.permute.xlu0 %1392 }
 0x693   : > { %2081 = vmatpush.xpose.msk.msra.mxu3 %vm1290_vm2, %v1393_v44 }
 0x698   : > { %2078 = vmatmul.msk.f32.gmra.mxu1 %vm1290_vm2, %v2578_v37 }
 0x69a   : > { %v1387_v11 = vpop.permute.xlu0 %1386 }
 0x6a2   : > { %v1682_v14 = vpop.permute.xlu0 %1681 }
 0x6aa   : > { %v1389_v21 = vpop.permute.xlu0 %1388 }
 0x6b2   : > { %v1676_v12 = vpop.permute.xlu0 %1675 }
 0x6ba   : > { %v1545_v22 = vpop.permute.xlu0 %1544 }
 0x6c2   : > { %v1547_v24 = vpop.permute.xlu0 %1546 }
 0x70d   : > { %v1316_v50 = vpop.f32.mrf.mxu1 }
 0x70e   : > { %v1322_v51 = vmul.f32 0.35355338, %v1316_v50 }
 0x710   : > { %v1327_v54 = vadd.f32 %v2607_v49, %v1322_v51 }
 0x712   : > { %v1329_v55 = vsel %vm737_vm11, %v1327_v54, -inf }
 0x713   : > { %1330 = vmax.xlane.f32.xlu2 %v1329_v55 }
 0x715   : > { %v1319_v56 = vpop.f32.mrf.mxu1 }
 0x716   : > { %v1323_v10 = vmul.f32 0.35355338, %v1319_v56 }
 0x718   : > { %v1328_v57 = vadd.f32 %v2607_v49, %v1323_v10 }
 0x71a   : > { %v1332_v58 = vsel %vm737_vm11, %v1328_v57, -inf }
 0x71b   : > { %1333 = vmax.xlane.f32.xlu1 %v1332_v58 }
 0x734   : > { %1679 = vrot.lane.b32.xlu1 %v2575_v35, %s2243_s26  ;;  %s2249_s26 = smov 40  }
 0x786   : > { %v1331_v59 = vpop.xlane.xlu2 %1330 }
 0x787   : > { %v1335_v60 = vsub.f32 %v1327_v54, %v1331_v59 }
 0x789   : > { %v1337_v61 = vmul.f32 1.442695, %v1335_v60 }
 0x78b   : > { %2192 = vpow2.f32 %v1337_v61 }
 0x78e   : > { %v1334_v23 = vpop.xlane.xlu1 %1333 }
 0x78f   : > { %v1336_v62 = vsub.f32 %v1328_v57, %v1334_v23 }
 0x791   : > { %v2193_v63 = vpop.eup %2192  ;;  %v1339_v52 = vmul.f32 1.442695, %v1336_v62 }
 0x792   : > { %v1341_v1 = vsel %vm737_vm11, %v2193_v63, 0.0 }
 0x793   : > { %2194 = vpow2.f32 %v1339_v52  ;;  %1342 = vadd.xlane.f32.xlu2 %v1341_v1 }
 0x799   : > { %v2195_v5 = vpop.eup %2194 }
 0x79a   : > { %v1344_v7 = vsel %vm737_vm11, %v2195_v5, 0.0 }
 0x79b   : > { %1345 = vadd.xlane.f32.xlu2 %v1344_v7 }
 0x7a6   : > { %v1680_v0 = vpop.permute.xlu1 %1679 }
 0x7b3   : > { %1390 = vrot.lane.b32.xlu2 %v2575_v35, %s2241_s24  ;;  %s2247_s24 = smov 56  }
 0x7bb   : > { %1550 = vrot.lane.b32.xlu2 %v2578_v37, %s2246_s28 }
 0x7c3   : > { %1548 = vrot.lane.b32.xlu2 %v2575_v35, %s2246_s28 }
 0x7cb   : > { %1677 = vrot.lane.b32.xlu2 %v2578_v37, %s2244_s30 }
 0x806   : > { %v1343_v13 = vpop.xlane.xlu2 %1342 }
 0x807   : > { %2196 = vrcp.f32 %v1343_v13 }
 0x80d   : > { %v2197_v15 = vpop.eup %2196 }
 0x80e   : > { %v1349_v18 = vmul.f32 %v2197_v15, %v2193_v63  ;;  %v1346_v20 = vpop.xlane.xlu2 %1345 }
 0x80f   : > { %2198 = vrcp.f32 %v1346_v20 }
 0x810   : > { %2079 = vmatmul.msk.f32.vlgmr.msrb.gmra.mxu2 %vm737_vm11, %v1349_v18 }
 0x811   : > { %2099 = vmatpush.xpose.msk.msrb.mxu2 %vm1290_vm2, %v1682_v14 }
 0x815   : > { %v2199_v3 = vpop.eup %2198  ;;  %2100 = vmatpush.xpose.msk.msrb.mxu2 %vm1290_vm2, %v1680_v0 }
 0x816   : > { %v1391_v4 = vpop.permute.xlu2 %1390  ;;  %v1350_v9 = vmul.f32 %v2199_v3, %v2195_v5 }
 0x817   : > { %2082 = vmatpush.xpose.msk.msra.mxu3 %vm1290_vm2, %v1391_v4 }
 0x818   : > { %2080 = vmatmul.msk.f32.gmra.mxu2 %vm737_vm11, %v1350_v9 }
 0x81a   : > { %2083 = vmatmul.msk.f32.vlgmr.msra.gmra.mxu3 %vm1290_vm2, %v1387_v11 }
 0x81e   : > { %v1551_v16 = vpop.permute.xlu2 %1550 }
 0x81f   : > { %2091 = vmatpush.xpose.msk.msrb.mxu3 %vm1290_vm2, %v1551_v16 }
 0x822   : > { %2084 = vmatmul.msk.f32.gmra.mxu3 %vm1290_vm2, %v1389_v21 }
 0x826   : > { %v1549_v19 = vpop.permute.xlu2 %1548 }
 0x827   : > { %2092 = vmatpush.xpose.msk.msrb.mxu3 %vm1290_vm2, %v1549_v19 }
 0x82a   : > { %2093 = vmatmul.msk.f32.vlgmr.msrb.gmra.mxu3 %vm1290_vm2, %v1545_v22 }
 0x82e   : > { %v1678_v33 = vpop.permute.xlu2 %1677 }
 0x832   : > { %2094 = vmatmul.msk.f32.gmra.mxu3 %vm1290_vm2, %v1547_v24 }
 0x893   : > { %v1380_v25 = vpop.f32.mrf.mxu2 }
 0x894   : > { %2089 = vmatmul.msk.f32.vlgmr.msra.gmra.mxu2 %vm1290_vm2, %v1380_v25 }
 0x89b   : > { %v1383_v26 = vpop.f32.mrf.mxu2 }
 0x89c   : > { %2090 = vmatmul.msk.f32.gmra.mxu2 %vm1290_vm2, %v1383_v26 }
 0x89d   : > { %v1419_v6 = vpop.f32.mrf.mxu3 }
 0x89e   : > { %v1425_v27 = vmul.f32 0.35355338, %v1419_v6 }
 0x8a0   : > { %v1427_v28 = vadd.f32 %v1425_v27, %v2607_v49 }
 0x8a2   : > { %v1429_v29 = vsel %vm737_vm11, %v1427_v28, -inf }
 0x8a3   : > { %1430 = vmax.xlane.f32.xlu2 %v1429_v29 }
 0x8a4   : > { %2101 = vmatmul.msk.f32.vlgmr.msrb.gmra.mxu2 %vm1290_vm2, %v1676_v12 }
 0x8a5   : > { %v1422_v30 = vpop.f32.mrf.mxu3 }
 0x8a6   : > { %v1426_v31 = vmul.f32 0.35355338, %v1422_v30 }
 0x8a8   : > { %v1428_v2 = vadd.f32 %v1426_v31, %v2607_v49 }
 0x8aa   : > { %v1432_v32 = vsel %vm737_vm11, %v1428_v2, -inf }
 0x8ab   : > { %1433 = vmax.xlane.f32.xlu0 %v1432_v32 }
 0x8ac   : > { %2102 = vmatmul.msk.f32.gmra.mxu2 %vm1290_vm2, %v1678_v33 }
 0x8ad   : > { %v1577_v34 = vpop.f32.mrf.mxu3 }
 0x8ae   : > { %v1583_v35 = vmul.f32 0.35355338, %v1577_v34 }
 0x8b0   : > { %v1585_v36 = vadd.f32 %v1583_v35, %v2607_v49 }
 0x8b2   : > { %v1587_v37 = vsel %vm737_vm11, %v1585_v36, -inf }
 0x8b3   : > { %1588 = vmax.xlane.f32.xlu2 %v1587_v37  ;;  %v1281_v37 = vld [vmem:[%s2777_s12 + $0x8] sm:$0xff] }
 0x8b4   : > { %1507 = vmatpush.msra.mxu1 %v1281_v37 }
 0x8b5   : > { %v1580_v51 = vpop.f32.mrf.mxu3 }
 0x8b6   : > { %v1584_v56 = vmul.f32 0.35355338, %v1580_v51 }
 0x8b8   : > { %v1586_v61 = vadd.f32 %v1584_v56, %v2607_v49 }
 0x8ba   : > { %v1590_v63 = vsel %vm737_vm11, %v1586_v61, -inf }
 0x916   : > { %v1431_v39 = vpop.xlane.xlu2 %1430 }
 0x917   : > { %v1435_v40 = vsub.f32 %v1427_v28, %v1431_v39  ;;  %v2647_v41 = vpop.f32.mrf.mxu2 }
 0x919   : > { %v1437_v42 = vmul.f32 1.442695, %v1435_v40 }
 0x91b   : > { %2200 = vpow2.f32 %v1437_v42 }
 0x91e   : > { %v1434_v48 = vpop.xlane.xlu0 %1433 }
 0x91f   : > { %v2649_v43 = vpop.f32.mrf.mxu2  ;;  %v1436_v55 = vsub.f32 %v1428_v2, %v1434_v48  ;;  %v1282_v48 = vld [vmem:[%s2777_s12 + $0x10] sm:$0xff] }
 0x920   : > { %1665 = vmatpush.msrb.mxu1 %v1282_v48 }
 0x921   : > { %v2651_v44 = vpop.eup %2200  ;;  %v1439_v57 = vmul.f32 1.442695, %v1436_v55 }
 0x922   : > { %v1441_v45 = vsel %vm737_vm11, %v2651_v44, 0.0 }
 0x923   : > { %1442 = vadd.xlane.f32.xlu2 %v1441_v45  ;;  %2202 = vpow2.f32 %v1439_v57 }
 0x926   : > { %v1589_v59 = vpop.xlane.xlu2 %1588 }
 0x927   : > { %v1708_v46 = vpop.f32.mrf.mxu2  ;;  %v1593_v62 = vsub.f32 %v1585_v36, %v1589_v59 }
 0x928   : > { %v1714_v50 = vmul.f32 0.35355338, %v1708_v46 }
 0x929   : > { %v1595_v1 = vmul.f32 1.442695, %v1593_v62  ;;  %v2203_v5 = vpop.eup %2202 }
 0x92a   : > { %v1716_v54 = vadd.f32 %v1714_v50, %v2607_v49  ;;  %v1444_v7 = vsel %vm737_vm11, %v2203_v5, 0.0  ;;  %v1283_v50 = vld [vmem:[%s2777_s12 + $0x18] sm:$0xff] }
 0x92b   : > { %2204 = vpow2.f32 %v1595_v1 }
 0x92c   : > { %v1718_v10 = vsel %vm737_vm11, %v1716_v54, -inf }
 0x92d   : > { %1719 = vmax.xlane.f32.xlu1 %v1718_v10 }
 0x92f   : > { %v1711_v58 = vpop.f32.mrf.mxu2 }
 0x930   : > { %v1715_v60 = vmul.f32 0.35355338, %v1711_v58 }
 0x931   : > { %v2205_v8 = vpop.eup %2204 }
 0x932   : > { %v1717_v23 = vadd.f32 %v1715_v60, %v2607_v49  ;;  %v1599_v11 = vsel %vm737_vm11, %v2205_v8, 0.0 }
 0x934   : > { %v1721_v52 = vsel %vm737_vm11, %v1717_v23, -inf }
 0x935   : > { %1591 = vmax.xlane.f32.xlu1 %v1590_v63  ;;  %1722 = vmax.xlane.f32.xlu0 %v1721_v52 }
 0x93d   : > { %1445 = vadd.xlane.f32.xlu1 %v1444_v7 }
 0x945   : > { %1600 = vadd.xlane.f32.xlu1 %v1599_v11  ;;  %v2173_v11 = vld [vmem:[%s2778_s13] ss:$0 sm:$0xff] }
 0x949   : > { %2147 = vrot.lane.b32.xlu0 %v2583_v38, %s2247_s24 }
 0x951   : > { %2157 = vrot.lane.b32.xlu0 %v2583_v38, %s2248_s25  ;;  %s609_s25 = scalar_lea.vmem %s2783_s18, %s2356_s29 }
 0x996   : > { %v1443_v12 = vpop.xlane.xlu2 %1442 }
 0x9a0   : > { %v1720_v49 = vpop.xlane.xlu1 %1719 }
 0x9a1   : > { %v1724_v13 = vsub.f32 %v1716_v54, %v1720_v49 }
 0x9a3   : > { %v1726_v14 = vmul.f32 1.442695, %v1724_v13 }
 0x9a5   : > { %2206 = vpow2.f32 %v1726_v14 }
 0x9a8   : > { %v1723_v15 = vpop.xlane.xlu0 %1722  ;;  %v1592_v18 = vpop.xlane.xlu1 %1591 }
 0x9a9   : > { %v1725_v20 = vsub.f32 %v1717_v23, %v1723_v15  ;;  %v1594_v3 = vsub.f32 %v1586_v61, %v1592_v18 }
 0x9ab   : > { %v2207_v21 = vpop.eup %2206  ;;  %v1728_v0 = vmul.f32 1.442695, %v1725_v20  ;;  %v1597_v9 = vmul.f32 1.442695, %v1594_v3 }
 0x9ac   : > { %v1730_v4 = vsel %vm737_vm11, %v2207_v21, 0.0 }
 0x9ad   : > { %1731 = vadd.xlane.f32.xlu2 %v1730_v4  ;;  %2208 = vpow2.f32 %v1728_v0 }
 0x9ae   : > { %2210 = vpow2.f32 %v1597_v9 }
 0x9af   : > { %2212 = vrcp.f32 %v1443_v12 }
 0x9b0   : > { %v1446_v22 = vpop.xlane.xlu1 %1445 }
 0x9b1   : > { %2214 = vrcp.f32 %v1446_v22 }
 0x9b3   : > { %v2209_v16 = vpop.eup %2208 }
 0x9b4   : > { %v1733_v19 = vsel %vm737_vm11, %v2209_v16, 0.0  ;;  %v2211_v24 = vpop.eup %2210 }
 0x9b5   : > { %1734 = vadd.xlane.f32.xlu1 %v1733_v19  ;;  %v2213_v26 = vpop.eup %2212  ;;  %v1602_v27 = vsel %vm737_vm11, %v2211_v24, 0.0 }
 0x9b6   : > { %v1449_v29 = vmul.f32 %v2213_v26, %v2651_v44  ;;  %v1869_v26 = vld [vmem:[%s2779_s14 + $0x18] sm:$0xff] }
 0x9b7   : > { %v2215_v2 = vpop.eup %2214 }
 0x9b8   : > { %v1601_v30 = vpop.xlane.xlu1 %1600  ;;  %v1450_v34 = vmul.f32 %v2215_v2, %v2203_v5  ;;  %v1908_v2 = vld [vmem:[%s2781_s16 + $0x18] sm:$0xff] }
 0x9b9   : > { %2216 = vrcp.f32 %v1601_v30  ;;  %1931 = vmatpush.msra.mxu2 %v1908_v2 }
 0x9bb   : > { %v2148_v25 = vpop.permute.xlu0 %2147 }
 0x9bc   : > { %v2149_v6 = vunpack.i.l.bf16 %v2148_v25  ;;  %v2150_v28 = vunpack.i.h.bf16 %v2148_v25 }
 0x9bd   : > { %1603 = vadd.xlane.f32.xlu1 %v1602_v27  ;;  %v1867_v27 = vld [vmem:[%s2779_s14 + $0x8] sm:$0xff] }
 0x9be   : > { %1477 = vmatpush.msra.mxu0 %v2149_v6  ;;  %v1868_v6 = vld [vmem:[%s2779_s14 + $0x10] sm:$0xff] }
 0x9bf   : > { %v2217_v35 = vpop.eup %2216 }
 0x9c0   : > { %1478 = vmatpush.msra.mxu0 %v2150_v28  ;;  %v1607_v36 = vmul.f32 %v2217_v35, %v2205_v8  ;;  %v1866_v28 = vld [vmem:[%s2779_s14] sm:$0xff] }
 0x9c1   : > { %2085 = vmatmul.msk.f32.vlgmr.msra.gmra.mxu0 %vm737_vm11, %v1449_v29 }
 0x9c3   : > { %v2158_v31 = vpop.permute.xlu0 %2157 }
 0x9c4   : > { %v2159_v32 = vunpack.i.l.bf16 %v2158_v31  ;;  %v2160_v33 = vunpack.i.h.bf16 %v2158_v31 }
 0x9c5   : > { %2152 = vrot.lane.b32.xlu2 %v2583_v38, %s2249_s26 }
 0x9c6   : > { %1635 = vmatpush.msrb.mxu0 %v2159_v32 }
 0x9c8   : > { %1636 = vmatpush.msrb.mxu0 %v2160_v33 }
 0x9c9   : > { %2086 = vmatmul.msk.f32.gmra.mxu0 %vm737_vm11, %v1450_v34 }
 0x9ca   : > { %1796 = vmatpush.msra.mxu0 %v1283_v50  ;;  %v2175_v50 = vld [vmem:[%s2770_s5 + $0x3] ss:$0 sm:$0xff] }
 0x9d1   : > { %2095 = vmatmul.msk.f32.vlgmr.msrb.gmra.mxu0 %vm737_vm11, %v1607_v36 }
 0xa20   : > { %v1732_v39 = vpop.xlane.xlu2 %1731 }
 0xa21   : > { %2218 = vrcp.f32 %v1732_v39 }
 0xa27   : > { %v2219_v38 = vpop.eup %2218 }
 0xa28   : > { %v2153_v40 = vpop.permute.xlu2 %2152  ;;  %v1735_v44 = vpop.xlane.xlu1 %1734  ;;  %v1738_v46 = vmul.f32 %v2219_v38, %v2207_v21 }
 0xa29   : > { %v2154_v42 = vunpack.i.l.bf16 %v2153_v40  ;;  %v2155_v45 = vunpack.i.h.bf16 %v2153_v40  ;;  %2220 = vrcp.f32 %v1735_v44  ;;  %v2174_v44 = vld [vmem:[%s2769_s4 + $0x3] ss:$0 sm:$0xff] }
 0xa2b   : > { %1766 = vmatpush.msra.mxu3 %v2154_v42 }
 0xa2d   : > { %1767 = vmatpush.msra.mxu3 %v2155_v45 }
 0xa2e   : > { %2103 = vmatmul.msk.f32.vlgmr.msra.gmra.mxu3 %vm737_vm11, %v1738_v46 }
 0xa2f   : > { %v2221_v51 = vpop.eup %2220 }
 0xa30   : > { %v1604_v54 = vpop.xlane.xlu1 %1603  ;;  %v1739_v55 = vmul.f32 %v2221_v51, %v2209_v16 }
 0xa31   : > { %2222 = vrcp.f32 %v1604_v54 }
 0xa36   : > { %2104 = vmatmul.msk.f32.gmra.mxu3 %vm737_vm11, %v1739_v55 }
 0xa37   : > { %v2223_v56 = vpop.eup %2222 }
 0xa38   : > { %v1608_v10 = vmul.f32 %v2223_v56, %v2211_v24 }
 0xa3a   : > { %2096 = vmatmul.msk.f32.gmra.mxu0 %vm737_vm11, %v1608_v10 }
 0xa3e   : > { %v1480_v57 = vpop.f32.mrf.mxu0 }
 0xa3f   : > { %2087 = vmatmul.msk.f32.vlgmr.msra.gmra.mxu1 %vm1290_vm2, %v1480_v57 }
 0xa40   : > { %1892 = vmatpush.msra.mxu1 %v1869_v26 }
 0xa42   : > { %1893 = vmatpush.msra.mxu1 %v1868_v6 }
 0xa44   : > { %1894 = vmatpush.msra.mxu1 %v1867_v27 }
 0xa46   : > { %v1483_v58 = vpop.f32.mrf.mxu0  ;;  %1895 = vmatpush.msra.mxu1 %v1866_v28 }
 0xa47   : > { %2088 = vmatmul.msk.f32.gmra.mxu1 %vm1290_vm2, %v1483_v58 }
 0xa4e   : > { %v1638_v59 = vpop.f32.mrf.mxu0 }
 0xa4f   : > { %2097 = vmatmul.msk.f32.vlgmr.msrb.gmra.mxu1 %vm1290_vm2, %v1638_v59 }
 0xab1   : > { %v1769_v60 = vpop.f32.mrf.mxu3 }
 0xab2   : > { %2105 = vmatmul.msk.f32.vlgmr.msra.gmra.mxu0 %vm1290_vm2, %v1769_v60 }
 0xab7   : > { %v1641_v61 = vpop.f32.mrf.mxu0 }
 0xab8   : > { %2098 = vmatmul.msk.f32.gmra.mxu1 %vm1290_vm2, %v1641_v61  ;;  %v1907_v61 = vld [vmem:[%s2781_s16 + $0x10] sm:$0xff] }
 0xab9   : > { %v1772_v23 = vpop.f32.mrf.mxu3  ;;  %1932 = vmatpush.msra.mxu2 %v1907_v61 }
 0xaba   : > { %2106 = vmatmul.msk.f32.gmra.mxu0 %vm1290_vm2, %v1772_v23  ;;  %v1906_v23 = vld [vmem:[%s2781_s16 + $0x8] sm:$0xff] }
 0xabb   : > { %1933 = vmatpush.msra.mxu2 %v1906_v23 }
 0xabc   : > { %v1509_v62 = vpop.f32.mrf.mxu1 }
 0xabd   : > { %v1539_v1 = vadd.f32 %v2647_v41, %v1509_v62  ;;  %v1905_v62 = vld [vmem:[%s2781_s16] sm:$0xff] }
 0xabe   : > { %1934 = vmatpush.msra.mxu2 %v1905_v62 }
 0xac4   : > { %v1512_v63 = vpop.f32.mrf.mxu1 }
 0xac5   : > { %v1542_v14 = vadd.f32 %v2649_v43, %v1512_v63  ;;  %v2176_v63 = vld [vmem:[%s2780_s15] ss:$0 sm:$0xff] }
 0xacc   : > { %v1667_v52 = vpop.f32.mrf.mxu1 }
 0xacd   : > { %v1673_v5 = vadd.f32 %v1667_v52, %v1539_v1 }
 0xb2f   : > { %v1798_v7 = vpop.f32.mrf.mxu0 }
 0xb30   : > { %v1804_v8 = vadd.f32 %v1798_v7, %v1673_v5 }
 0xb32   : > { %v1806_v49 = vadd.f32 %v1804_v8, %v2535_v47 }
 0xb34   : > { %v2696_v13 = vadd.f32 %v2173_v11, %v1806_v49  ;;  %v2177_v49 = vld [vmem:[%s2782_s17] ss:$0 sm:$0xff] }
 0xb35   : > { %v1670_v15 = vpop.f32.mrf.mxu1 }
 0xb36   : > { %v1816_v18 = vsel %vm666_vm0, %v2696_v13, 0.0  ;;  %v1674_v20 = vadd.f32 %v1670_v15, %v1542_v14 }
 0xb37   : > { %v1801_v21 = vpop.f32.mrf.mxu0  ;;  %1817 = vadd.xlane.f32.xlu0 %v1816_v18 }
 0xb38   : > { %v1805_v41 = vadd.f32 %v1801_v21, %v1674_v20 }
 0xb3a   : > { %v1807_v0 = vadd.f32 %v1805_v41, %v2540_v53 }
 0xb3c   : > { %v2702_v3 = vadd.f32 %v2173_v11, %v1807_v0 }
 0xb3e   : > { %v1819_v4 = vsel %vm666_vm0, %v2702_v3, 0.0 }
 0xb3f   : > { %1820 = vadd.xlane.f32.xlu1 %v1819_v4 }
 0xbaa   : > { %v1818_v47 = vpop.xlane.xlu0 %1817 }
 0xbab   : > { %v1822_v9 = vmul.f32 %v1818_v47, %v2380_v17 }
 0xbad   : > { %v1824_v43 = vsub.f32 %v2696_v13, %v1822_v9 }
 0xbaf   : > { %v1826_v12 = vmul.f32 %v1824_v43, %v1824_v43 }
 0xbb1   : > { %v1828_v16 = vsel %vm666_vm0, %v1826_v12, 0.0 }
 0xbb2   : > { %1829 = vadd.xlane.f32.xlu2 %v1828_v16  ;;  %v1821_v19 = vpop.xlane.xlu1 %1820 }
 0xbb3   : > { %v1823_v22 = vmul.f32 %v1821_v19, %v2380_v17 }
 0xbb5   : > { %v1825_v53 = vsub.f32 %v2702_v3, %v1823_v22 }
 0xbb7   : > { %v1827_v24 = vmul.f32 %v1825_v53, %v1825_v53 }
 0xbb9   : > { %v1831_v25 = vsel %vm666_vm0, %v1827_v24, 0.0 }
 0xbba   : > { %1832 = vadd.xlane.f32.xlu1 %v1831_v25 }
 0xc25   : > { %v1830_v29 = vpop.xlane.xlu2 %1829 }
 0xc26   : > { %v1834_v30 = vmul.f32 %v1830_v29, %v2380_v17 }
 0xc28   : > { %v1836_v31 = vadd.f32 1e-05, %v1834_v30 }
 0xc2a   : > { %2224 = vrsqrt.f32 %v1836_v31  ;;  %vm1844_vm3 = vweird.f32 %v1836_v31 }
 0xc2d   : > { %v1833_v32 = vpop.xlane.xlu1 %1832 }
 0xc2e   : > { %v1835_v33 = vmul.f32 %v1833_v32, %v2380_v17 }
 0xc30   : > { %v2225_v34 = vpop.eup %2224  ;;  %v1837_v36 = vadd.f32 1e-05, %v1835_v33 }
 0xc31   : > { %v1839_v35 = vmul.f32 %v2225_v34, %v1836_v31  ;;  %vm1845_vm11 = vweird.f32 %v2225_v34 }
 0xc32   : > { %2226 = vrsqrt.f32 %v1837_v36  ;;  %vm1846_vm4 = vmor %vm1844_vm3, %vm1845_vm11  ;;  %vm1854_vm6 = vweird.f32 %v1837_v36 }
 0xc33   : > { %v1840_v37 = vmul.f32 %v2225_v34, %v1839_v35 }
 0xc35   : > { %v1841_v39 = vmul.f32 0.5, %v1840_v37 }
 0xc37   : > { %v1842_v40 = vsub.f32 1.5, %v1841_v39 }
 0xc38   : > { %v2227_v38 = vpop.eup %2226 }
 0xc39   : > { %v1843_v42 = vmul.f32 %v2225_v34, %v1842_v40  ;;  %v1849_v45 = vmul.f32 %v2227_v38, %v1837_v36  ;;  %vm1855_vm5 = vweird.f32 %v2227_v38 }
 0xc3a   : > { %vm1856_vm7 = vmor %vm1854_vm6, %vm1855_vm5 }
 0xc3b   : > { %v1847_v46 = vsel %vm1846_vm4, %v2225_v34, %v1843_v42  ;;  %v1850_v17 = vmul.f32 %v2227_v38, %v1849_v45 }
 0xc3c   : > { %v1858_v48 = vmul.f32 %v1847_v46, %v1824_v43 }
 0xc3d   : > { %v1851_v54 = vmul.f32 0.5, %v1850_v17 }
 0xc3e   : > { %v1861_v51 = vmul.f32 %v2174_v44, %v1858_v48 }
 0xc3f   : > { %v1852_v55 = vsub.f32 1.5, %v1851_v54 }
 0xc40   : > { %v1864_v56 = vadd.f32 %v2175_v50, %v1861_v51 }
 0xc41   : > { %v1853_v10 = vmul.f32 %v2227_v38, %v1852_v55 }
 0xc42   : > { %2107 = vmatmul.msk.f32.vlgmr.msra.gmra.mxu1 %vm666_vm0, %v1864_v56 }
 0xc43   : > { %v1857_v57 = vsel %vm1856_vm7, %v2227_v38, %v1853_v10 }
 0xc44   : > { %v1859_v58 = vmul.f32 %v1857_v57, %v1825_v53 }
 0xc46   : > { %v1862_v59 = vmul.f32 %v2174_v44, %v1859_v58 }
 0xc48   : > { %v1865_v60 = vadd.f32 %v2175_v50, %v1862_v59 }
 0xc4a   : > { %2108 = vmatmul.msk.f32.gmra.mxu1 %vm666_vm0, %v1865_v60 }
 0xcbf   : > { %v1897_v52 = vpop.f32.mrf.mxu1 }
 0xcc0   : > { %v1898_v1 = vadd.f32 %v2176_v63, %v1897_v52 }
 0xcc2   : > { %v1903_v5 = vmax.f32 %v1898_v1, 0.0 }
 0xcc4   : > { %2109 = vmatmul.msk.f32.vlgmr.msra.gmra.mxu2 %vm666_vm0, %v1903_v5 }
 0xcc7   : > { %v1900_v7 = vpop.f32.mrf.mxu1 }
 0xcc8   : > { %v1901_v8 = vadd.f32 %v2176_v63, %v1900_v7 }
 0xcca   : > { %v1904_v11 = vmax.f32 %v1901_v8, 0.0 }
 0xccc   : > { %2110 = vmatmul.msk.f32.gmra.mxu2 %vm666_vm0, %v1904_v11 }
 0xd47   : > { %v1936_v14 = vpop.f32.mrf.mxu2 }
 0xd48   : > { %v1937_v15 = vadd.f32 %v2177_v49, %v1936_v14 }
 0xd4a   : > { %v1942_v18 = vadd.f32 %v1937_v15, %v2696_v13 }
 0xd4c   : > { %1944 = vst.msk [vmem:[%s609_s25] sm:$0xff] %vm666_vm0, %v1942_v18 }
 0xd4f   : > { %v1939_v20 = vpop.f32.mrf.mxu2 }
 0xd50   : > { %v1940_v21 = vadd.f32 %v2177_v49, %v1939_v20 }
 0xd52   : > { %v1943_v41 = vadd.f32 %v1940_v21, %v2702_v3 }
 0xd54   : > { %1945 = vst.msk [vmem:[%s609_s25 + $0x8] sm:$0xff] %vm666_vm0, %v1943_v41 }
 0xd55 PF: > { %s28_s27 = sadd.s32 1, %s2234_s27  }
 0xd56   : > { %p25_p4 = scmp.ge.s32.totalorder %s28_s27, 6  }
 0xd58   :  { %27 = sbr.rel (!%p25_p4) target bundleno = 4 (0x4), region = 130 }

// kernel: qanet_forward.13
= control target key start
LH: loop header
LB: loop body
LE: loop exit
PB: predicated region body
PF: predicated region fallthrough
CT: control target
= control target key end

     0   :  { %14 = vsyncpa [#allocation3], 0  ;;  %v496_v2 = vmov 0   ;;  %v121_v6 = vlaneseq  ;;  %vm59_vm0 = vcmask 261120   ;;  %s710_s0 = inlined_call_operand.vmem [shape: f32[2,16,32], index: 0, kind: input, shape index: {}]   ;;  %s711_s1 = inlined_call_operand.vmem [shape: f32[2,16,32], index: 1, kind: input, shape index: {}]   ;;  %s712_s2 = inlined_call_operand.vmem [shape: f32[2,16,32], index: 2, kind: input, shape index: {}]   ;;  %s713_s3 = inlined_call_operand.vmem [shape: f32[2,16], index: 3, kind: input, shape index: {}]   ;;  %s714_s4 = inlined_call_operand.vmem [shape: f32[2,32], index: 4, kind: input, shape index: {}]   ;;  %s715_s5 = inlined_call_operand.vmem [shape: f32[2,32], index: 5, kind: input, shape index: {}]   ;;  %s716_s6 = inlined_call_operand.vmem [shape: f32[1,2], index: 6, kind: input, shape index: {}]   ;;  %s717_s7 = inlined_call_operand.hbm [shape: f32[2,16], index: 7, kind: output, shape index: {0}]   ;;  %s718_s8 = inlined_call_operand.hbm [shape: f32[2,16], index: 8, kind: output, shape index: {1}]  }
   0x1   :  { %v548_v0 = vld [vmem:[%s716_s6] ss:$0 sm:$0xff]  ;;  %v32_v1 = vld [vmem:[%s710_s0 + $0x10] sm:$0xff]  ;;  %415 = vset.pattern.permute.xlu2 %v496_v2  ;;  %v33_v10 = vld [vmem:[%s710_s0 + $0x18] sm:$0xff] }
   0x2   :  { %v36_v3 = vld [vmem:[%s711_s1 + $0x10] sm:$0xff]  ;;  %v43_v4 = vld [vmem:[%s714_s4] sm:$0x3]  ;;  %76 = vperm.xlu2 %415, %v548_v0   ;;  %v37_v11 = vld [vmem:[%s711_s1 + $0x18] sm:$0xff]  ;;  %v122_v14 = vshrl.u32 %v121_v6, 7 }
   0x3   :  { %v30_v5 = vld [vmem:[%s710_s0] sm:$0xff]  ;;  %v45_v7 = vperm.slane %v43_v4, 0  ;;  %v50_v8 = vperm.slane %v43_v4, 1  ;;  %v31_v12 = vld [vmem:[%s710_s0 + $0x8] sm:$0xff] }
   0x4   :  { %v34_v9 = vld [vmem:[%s711_s1] sm:$0xff]  ;;  %v35_v13 = vld [vmem:[%s711_s1 + $0x8] sm:$0xff]  ;;  %417 = vset.pattern.permute.xlu0 %v122_v14 }
   0x5   :  { %v48_v15 = vmul.f32 %v45_v7, %v32_v1  ;;  %v53_v16 = vmul.f32 %v50_v8, %v36_v3  ;;  %v46_v17 = vmul.f32 %v45_v7, %v30_v5  ;;  %v51_v18 = vmul.f32 %v50_v8, %v34_v9 }
   0x6   :  { %v49_v19 = vmul.f32 %v45_v7, %v33_v10  ;;  %v54_v20 = vmul.f32 %v50_v8, %v37_v11 }
   0x7   :  { %15 = vsyncpa [#allocation5], 0  ;;  %v57_v21 = vadd.f32 %v53_v16, %v48_v15  ;;  %v55_v22 = vadd.f32 %v51_v18, %v46_v17  ;;  %v47_v23 = vmul.f32 %v45_v7, %v31_v12  ;;  %v52_v24 = vmul.f32 %v50_v8, %v35_v13  ;;  %v44_v25 = vld [vmem:[%s715_s5] sm:$0x3]  ;;  %v40_v32 = vld [vmem:[%s712_s2 + $0x10] sm:$0xff]  ;;  %s385_s12 = sshll.u32 %s717_s7, 4  ;;  %s386_s12 = int_to_ptr.hbm [resolvable:$true] %s385_s12 }
   0x8   :  { %v83_v28 = vperm.slane %v44_v25, 0  ;;  %v88_v29 = vperm.slane %v44_v25, 1  ;;  %v58_v30 = vadd.f32 %v54_v20, %v49_v19  ;;  %v39_v33 = vld [vmem:[%s712_s2 + $0x8] sm:$0xff]  ;;  %v497_v34 = vmov 1   ;;  %v41_v43 = vld [vmem:[%s712_s2 + $0x18] sm:$0xff]  ;;  %v38_v49 = vld [vmem:[%s712_s2] sm:$0xff] }
   0x9   :  { %v66_v26 = vsel %vm59_vm0, %v57_v21, 0.0  ;;  %v60_v27 = vsel %vm59_vm0, %v55_v22, 0.0  ;;  %v56_v31 = vadd.f32 %v52_v24, %v47_v23  ;;  %416 = vset.pattern.permute.xlu1 %v497_v34  ;;  %v42_v54 = vld [vmem:[%s713_s3] sm:$0x3]  ;;  %v129_v59 = vadd.s32 8, %v122_v14  ;;  %s498_s2 = smov [#allocation2]  }
   0xa   :  { %67 = vadd.xlane.f32.xlu1 %v66_v26  ;;  %61 = vadd.xlane.f32.xlu0 %v60_v27  ;;  %v86_v35 = vmul.f32 %v83_v28, %v32_v1  ;;  %v91_v36 = vmul.f32 %v88_v29, %v40_v32  ;;  %v69_v37 = vsel %vm59_vm0, %v58_v30, 0.0  ;;  %v85_v39 = vmul.f32 %v83_v28, %v31_v12  ;;  %s383_s3 = sshll.u32 %s498_s2, 4  ;;  %s499_s7 = smov [#allocation4]   ;;  %s384_s3 = int_to_ptr.vmem [resolvable:$true] %s383_s3 }
   0xb   :  { %419 = vset.pattern.permute.xlu2 %v122_v14  ;;  %v63_v38 = vsel %vm59_vm0, %v56_v31, 0.0  ;;  %v90_v40 = vmul.f32 %v88_v29, %v39_v33  ;;  %v87_v46 = vmul.f32 %v83_v28, %v33_v10  ;;  %v92_v47 = vmul.f32 %v88_v29, %v41_v43  ;;  %s394_s13 = sshll.u32 %s499_s7, 4  ;;  %s396_s15 = sshll.u32 %s718_s8, 4  ;;  %s395_s13 = int_to_ptr.vmem [resolvable:$true] %s394_s13  ;;  %s397_s15 = int_to_ptr.hbm [resolvable:$true] %s396_s15 }
   0xc   :  { %v95_v41 = vadd.f32 %v91_v36, %v86_v35  ;;  %v84_v51 = vmul.f32 %v83_v28, %v30_v5  ;;  %v89_v52 = vmul.f32 %v88_v29, %v38_v49  ;;  %v410_v56 = vadd.f32 -1.0, %v42_v54 }
   0xd   :  { %v94_v42 = vadd.f32 %v90_v40, %v85_v39  ;;  %v96_v48 = vadd.f32 %v92_v47, %v87_v46  ;;  %v623_v29 = vand.u32 127, %v121_v6  ;;  %vm175_vm1 = vcmask 130112  }
   0xe   :  { %v103_v44 = vsel %vm59_vm0, %v95_v41, 0.0  ;;  %v93_v53 = vadd.f32 %v89_v52, %v84_v51  ;;  %v118_v57 = vmul.f32 1e+30, %v410_v56  ;;  %vm180_vm2 = vcmask 1041409  }
   0xf   :  { %v100_v45 = vsel %vm59_vm0, %v94_v42, 0.0  ;;  %v106_v50 = vsel %vm59_vm0, %v96_v48, 0.0  ;;  %v626_v31 = vadd.s32 4294967288, %v623_v29  ;;  %vm183_vm3 = vcmask 123904  }
  0x10   :  { %v97_v55 = vsel %vm59_vm0, %v93_v53, 0.0  ;;  %v120_v58 = vperm.slane %v118_v57, 0  ;;  %v133_v60 = vperm.slane %v118_v57, 1 }
  0x12   :  { %70 = vadd.xlane.f32.xlu1 %v69_v37  ;;  %64 = vadd.xlane.f32.xlu0 %v63_v38 }
  0x1a   :  { %104 = vadd.xlane.f32.xlu1 %v103_v44  ;;  %101 = vadd.xlane.f32.xlu0 %v100_v45 }
  0x22   :  { %107 = vadd.xlane.f32.xlu0 %v106_v50 }
  0x2b   :  { %98 = vadd.xlane.f32.xlu2 %v97_v55 }
  0x33   :  { %110 = vperm.xlu1 %416, %v548_v0  }
  0x36   :  { %125 = vperm.xlu0 %417, %v120_v58  }
  0x3b   :  { %418 = vset.pattern.permute.xlu1 %v129_v59 }
  0x3e   :  { %421 = vset.pattern.permute.xlu0 %v496_v2 }
  0x43   :  { %131 = vperm.xlu1 %418, %v120_v58   ;;  %138 = vperm.xlu2 %419, %v133_v60  }
  0x4b   :  { %144 = vperm.xlu1 %418, %v133_v60   ;;  %422 = vset.pattern.permute.xlu2 %v496_v2 }
  0x53   :  { %420 = vset.pattern.permute.xlu1 %v496_v2 }
  0x5c   :  { %v77_v4 = vpop.permute.xlu2 %76 }
  0x7d   :  { %v62_v61 = vpop.xlane.xlu0 %61  ;;  %v68_v63 = vpop.xlane.xlu1 %67 }
  0x7e   :  { %v79_v8 = vadd.f32 %v77_v4, %v62_v61  ;;  %v81_v13 = vadd.f32 %v77_v4, %v68_v63 }
  0x85   :  { %v65_v62 = vpop.xlane.xlu0 %64  ;;  %v71_v3 = vpop.xlane.xlu1 %70 }
  0x86   :  { %v80_v2 = vadd.f32 %v77_v4, %v65_v62  ;;  %v82_v20 = vadd.f32 %v77_v4, %v71_v3 }
  0x8d   :  { %v102_v1 = vpop.xlane.xlu0 %101  ;;  %v105_v7 = vpop.xlane.xlu1 %104 }
  0x95   :  { %v108_v0 = vpop.xlane.xlu0 %107 }
  0x9e   :  { %v99_v5 = vpop.xlane.xlu2 %98 }
  0xa5   :  { %v111_v11 = vpop.permute.xlu1 %110 }
  0xa6   :  { %v139_v12 = vpop.permute.xlu2 %138  ;;  %v113_v15 = vadd.f32 %v111_v11, %v99_v5  ;;  %v115_v19 = vadd.f32 %v111_v11, %v105_v7  ;;  %v116_v24 = vadd.f32 %v111_v11, %v108_v0  ;;  %v114_v26 = vadd.f32 %v111_v11, %v102_v1 }
  0xa7   :  { %v610_v14 = vadd.f32 %v139_v12, %v81_v13 }
  0xa8   :  { %v126_v9 = vpop.permute.xlu0 %125  ;;  %v616_v22 = vadd.f32 %v139_v12, %v115_v19 }
  0xa9   :  { %v150_v10 = vadd.f32 %v126_v9, %v79_v8  ;;  %v613_v18 = vadd.f32 %v126_v9, %v113_v15 }
  0xab   :  { %159 = vperm.xlu1 %420, %v150_v10  }
  0xb3   :  { %165 = vperm.xlu1 %420, %v610_v14  }
  0xb5   :  { %v132_v16 = vpop.permute.xlu1 %131 }
  0xb6   :  { %v151_v17 = vadd.f32 %v132_v16, %v80_v2  ;;  %v268_v27 = vadd.f32 %v132_v16, %v114_v26 }
  0xb8   :  { %162 = vperm.xlu0 %421, %v151_v17  }
  0xbb   :  { %276 = vperm.xlu1 %420, %v613_v18  }
  0xbd   :  { %v145_v21 = vpop.permute.xlu1 %144 }
  0xbe   :  { %v618_v23 = vadd.f32 %v145_v21, %v82_v20  ;;  %v270_v25 = vadd.f32 %v145_v21, %v116_v24 }
  0xc0   :  { %168 = vperm.xlu2 %422, %v618_v23   ;;  %282 = vperm.xlu0 %421, %v616_v22  }
  0xc3   :  { %285 = vperm.xlu1 %420, %v270_v25  }
  0xc8   :  { %279 = vperm.xlu2 %422, %v268_v27  }
 0x11a   :  { %v169_v32 = vpop.permute.xlu2 %168 }
 0x11b   :  { %v178_v35 = vperm.slane %v169_v32, %v626_v31 }
 0x11d   :  { %v160_v28 = vpop.permute.xlu1 %159 }
 0x11e   :  { %v172_v36 = vperm.slane %v160_v28, %v623_v29 }
 0x122   :  { %v280_v42 = vpop.permute.xlu2 %279 }
 0x123   :  { %v288_v46 = vperm.slane %v280_v42, %v626_v31 }
 0x125   :  { %v166_v30 = vpop.permute.xlu1 %165 }
 0x126   :  { %v177_v33 = vperm.slane %v166_v30, %v623_v29 }
 0x128   :  { %v179_v39 = vsel %vm175_vm1, %v178_v35, %v177_v33 }
 0x12a   :  { %v163_v34 = vpop.permute.xlu0 %162 }
 0x12b   :  { %v174_v37 = vperm.slane %v163_v34, %v626_v31 }
 0x12d   :  { %v277_v38 = vpop.permute.xlu1 %276  ;;  %v176_v6 = vsel %vm175_vm1, %v174_v37, %v172_v36 }
 0x12e   :  { %v181_v40 = vsel %vm180_vm2, %v179_v39, %v176_v6  ;;  %v287_v44 = vperm.slane %v277_v38, %v623_v29 }
 0x12f   :  { %v184_v41 = vsel %vm183_vm3, %v181_v40, -inf }
 0x130   :  { %185 = vmax.xlane.f32.xlu2 %v184_v41  ;;  %v289_v49 = vsel %vm175_vm1, %v288_v46, %v287_v44 }
 0x132   :  { %v283_v43 = vpop.permute.xlu0 %282 }
 0x133   :  { %v290_v47 = vperm.slane %v283_v43, %v623_v29 }
 0x135   :  { %v286_v45 = vpop.permute.xlu1 %285 }
 0x136   :  { %v291_v48 = vperm.slane %v286_v45, %v626_v31 }
 0x138   :  { %v292_v50 = vsel %vm175_vm1, %v291_v48, %v290_v47 }
 0x139   :  { %v293_v51 = vsel %vm180_vm2, %v292_v50, %v289_v49 }
 0x13a   :  { %v295_v52 = vsel %vm183_vm3, %v293_v51, -inf }
 0x13b   :  { %296 = vmax.xlane.f32.xlu0 %v295_v52 }
 0x1a3   :  { %v186_v53 = vpop.xlane.xlu2 %185 }
 0x1a4   :  { %v188_v54 = vperm.slane %v186_v53, 0  ;;  %v189_v58 = vperm.slane %v186_v53, 1 }
 0x1a6   :  { %v644_v55 = vsub.f32 %v150_v10, %v188_v54  ;;  %v647_v57 = vsub.f32 %v151_v17, %v188_v54  ;;  %v655_v4 = vsub.f32 %v610_v14, %v189_v58  ;;  %v661_v9 = vsub.f32 %v618_v23, %v189_v58 }
 0x1a8   :  { %v196_v56 = vmul.f32 1.442695, %v644_v55  ;;  %v198_v59 = vmul.f32 1.442695, %v647_v57  ;;  %v200_v7 = vmul.f32 1.442695, %v655_v4 }
 0x1a9   :  { %v202_v12 = vmul.f32 1.442695, %v661_v9 }
 0x1aa   :  { %424 = vpow2.f32 %v196_v56 }
 0x1ab   :  { %426 = vpow2.f32 %v198_v59 }
 0x1ae   :  { %v297_v60 = vpop.xlane.xlu0 %296 }
 0x1af   :  { %v299_v61 = vperm.slane %v297_v60, 0  ;;  %v300_v62 = vperm.slane %v297_v60, 1 }
 0x1b0   :  { %v425_v63 = vpop.eup %424 }
 0x1b1   :  { %v650_v1 = vsub.f32 %v268_v27, %v299_v61  ;;  %v652_v3 = vsub.f32 %v270_v25, %v300_v62  ;;  %209 = vperm.xlu1 %420, %v425_v63   ;;  %v427_v8 = vpop.eup %426  ;;  %v303_v14 = vsub.f32 %v613_v18, %v299_v61  ;;  %v305_v16 = vsub.f32 %v616_v22, %v300_v62 }
 0x1b3   :  { %v309_v0 = vmul.f32 1.442695, %v650_v1  ;;  %v313_v5 = vmul.f32 1.442695, %v652_v3  ;;  %v307_v2 = vmul.f32 1.442695, %v303_v14 }
 0x1b4   :  { %v311_v17 = vmul.f32 1.442695, %v305_v16 }
 0x1b5   :  { %428 = vpow2.f32 %v309_v0 }
 0x1b6   :  { %430 = vpow2.f32 %v313_v5 }
 0x1b7   :  { %432 = vpow2.f32 %v200_v7 }
 0x1b8   :  { %434 = vpow2.f32 %v202_v12 }
 0x1b9   :  { %212 = vperm.xlu1 %420, %v427_v8   ;;  %436 = vpow2.f32 %v307_v2 }
 0x1ba   :  { %438 = vpow2.f32 %v311_v17 }
 0x1bb   :  { %v429_v10 = vpop.eup %428 }
 0x1bc   :  { %323 = vperm.xlu2 %422, %v429_v10   ;;  %v431_v11 = vpop.eup %430 }
 0x1bd   :  { %329 = vperm.xlu0 %421, %v431_v11   ;;  %v433_v13 = vpop.eup %432 }
 0x1be   :  { %v435_v15 = vpop.eup %434 }
 0x1bf   :  { %v437_v19 = vpop.eup %436 }
 0x1c0   :  { %v439_v20 = vpop.eup %438 }
 0x1c1   :  { %215 = vperm.xlu1 %420, %v433_v13  }
 0x1c9   :  { %218 = vperm.xlu1 %420, %v435_v15  }
 0x1d1   :  { %320 = vperm.xlu1 %420, %v437_v19  }
 0x1d9   :  { %326 = vperm.xlu1 %420, %v439_v20  }
 0x216   :  { %v324_v35 = vpop.permute.xlu2 %323 }
 0x217   :  { %v332_v6 = vperm.slane %v324_v35, %v626_v31 }
 0x223   :  { %v210_v21 = vpop.permute.xlu1 %209 }
 0x224   :  { %v220_v18 = vperm.slane %v210_v21, %v623_v29 }
 0x22b   :  { %v213_v23 = vpop.permute.xlu1 %212 }
 0x22c   :  { %v221_v25 = vperm.slane %v213_v23, %v626_v31 }
 0x22e   :  { %v222_v22 = vsel %vm175_vm1, %v221_v25, %v220_v18 }
 0x22f   :  { %v330_v36 = vpop.permute.xlu0 %329 }
 0x230   :  { %v335_v39 = vperm.slane %v330_v36, %v626_v31 }
 0x233   :  { %v216_v24 = vpop.permute.xlu1 %215 }
 0x234   :  { %v223_v27 = vperm.slane %v216_v24, %v623_v29 }
 0x23b   :  { %v219_v26 = vpop.permute.xlu1 %218 }
 0x23c   :  { %v224_v28 = vperm.slane %v219_v26, %v626_v31 }
 0x23e   :  { %v225_v30 = vsel %vm175_vm1, %v224_v28, %v223_v27 }
 0x23f   :  { %v226_v32 = vsel %vm180_vm2, %v225_v30, %v222_v22 }
 0x240   :  { %v228_v33 = vsel %vm183_vm3, %v226_v32, 0.0 }
 0x241   :  { %229 = vadd.xlane.f32.xlu1 %v228_v33 }
 0x243   :  { %v321_v34 = vpop.permute.xlu1 %320 }
 0x244   :  { %v331_v37 = vperm.slane %v321_v34, %v623_v29 }
 0x246   :  { %v333_v41 = vsel %vm175_vm1, %v332_v6, %v331_v37 }
 0x24b   :  { %v327_v38 = vpop.permute.xlu1 %326 }
 0x24c   :  { %v334_v40 = vperm.slane %v327_v38, %v623_v29 }
 0x24e   :  { %v336_v42 = vsel %vm175_vm1, %v335_v39, %v334_v40 }
 0x24f   :  { %v337_v43 = vsel %vm180_vm2, %v336_v42, %v333_v41 }
 0x250   :  { %v339_v44 = vsel %vm183_vm3, %v337_v43, 0.0 }
 0x251   :  { %340 = vadd.xlane.f32.xlu2 %v339_v44 }
 0x2b4   :  { %v230_v45 = vpop.xlane.xlu1 %229 }
 0x2b5   :  { %440 = vlog2.f32 %v230_v45 }
 0x2bb   :  { %v441_v46 = vpop.eup %440 }
 0x2bc   :  { %v232_v47 = vmul.f32 0.6931472, %v441_v46 }
 0x2be   :  { %v234_v48 = vperm.slane %v232_v47, 0  ;;  %v235_v54 = vperm.slane %v232_v47, 1 }
 0x2c0   :  { %v238_v49 = vsub.f32 %v644_v55, %v234_v48  ;;  %v239_v51 = vsub.f32 %v647_v57, %v234_v48  ;;  %v240_v61 = vsub.f32 %v655_v4, %v235_v54  ;;  %v241_v55 = vsub.f32 %v661_v9, %v235_v54 }
 0x2c2   :  { %247 = vperm.xlu0 %421, %v238_v49  }
 0x2c4   :  { %v341_v50 = vpop.xlane.xlu2 %340 }
 0x2c5   :  { %442 = vlog2.f32 %v341_v50 }
 0x2ca   :  { %250 = vperm.xlu0 %421, %v239_v51  }
 0x2cb   :  { %v443_v52 = vpop.eup %442 }
 0x2cc   :  { %v343_v53 = vmul.f32 0.6931472, %v443_v52 }
 0x2ce   :  { %v345_v56 = vperm.slane %v343_v53, 0  ;;  %v346_v58 = vperm.slane %v343_v53, 1 }
 0x2d0   :  { %v351_v59 = vsub.f32 %v305_v16, %v346_v58  ;;  %v349_v60 = vsub.f32 %v303_v14, %v345_v56  ;;  %v350_v62 = vsub.f32 %v650_v1, %v345_v56  ;;  %v352_v57 = vsub.f32 %v652_v3, %v346_v58 }
 0x2d2   :  { %364 = vperm.xlu2 %422, %v351_v59   ;;  %358 = vperm.xlu1 %420, %v349_v60  }
 0x2d3   :  { %253 = vperm.xlu0 %421, %v240_v61  }
 0x2db   :  { %256 = vperm.xlu0 %421, %v241_v55  }
 0x2e3   :  { %361 = vperm.xlu0 %421, %v350_v62  }
 0x2eb   :  { %367 = vperm.xlu0 %421, %v352_v57  }
 0x32c   :  { %v365_v13 = vpop.permute.xlu2 %364 }
 0x32d   :  { %v372_v16 = vperm.slane %v365_v13, %v623_v29 }
 0x334   :  { %v248_v63 = vpop.permute.xlu0 %247 }
 0x335   :  { %v258_v4 = vperm.slane %v248_v63, %v623_v29 }
 0x33c   :  { %v251_v0 = vpop.permute.xlu0 %250 }
 0x33d   :  { %v259_v7 = vperm.slane %v251_v0, %v626_v31 }
 0x33f   :  { %v260_v3 = vsel %vm175_vm1, %v259_v7, %v258_v4 }
 0x344   :  { %v359_v14 = vpop.permute.xlu1 %358 }
 0x345   :  { %v254_v5 = vpop.permute.xlu0 %253  ;;  %v369_v17 = vperm.slane %v359_v14, %v623_v29 }
 0x346   :  { %v261_v1 = vperm.slane %v254_v5, %v623_v29 }
 0x34d   :  { %v257_v8 = vpop.permute.xlu0 %256 }
 0x34e   :  { %v262_v9 = vperm.slane %v257_v8, %v626_v31 }
 0x350   :  { %v263_v10 = vsel %vm175_vm1, %v262_v9, %v261_v1 }
 0x351   :  { %v264_v11 = vsel %vm180_vm2, %v263_v10, %v260_v3 }
 0x352   :  { %266 = vst.msk [vmem:[#allocation2] sm:$0x3] %vm183_vm3, %v264_v11 }
 0x353   :  { %388 = dma.vmem_to_hbm [thread:$0]  %s384_s3, 32, %s386_s12, [#allocation3]  }
 0x355   :  { %v362_v12 = vpop.permute.xlu0 %361 }
 0x356   :  { %v370_v2 = vperm.slane %v362_v12, %v626_v31 }
 0x358   :  { %v371_v20 = vsel %vm175_vm1, %v370_v2, %v369_v17 }
 0x35d   :  { %v368_v15 = vpop.permute.xlu0 %367 }
 0x35e   :  { %v373_v19 = vperm.slane %v368_v15, %v626_v31 }
 0x360   :  { %v374_v21 = vsel %vm175_vm1, %v373_v19, %v372_v16 }
 0x361   :  { %v375_v23 = vsel %vm180_vm2, %v374_v21, %v371_v20 }
 0x362   :  { %377 = vst.msk [vmem:[#allocation4] sm:$0x3] %vm183_vm3, %v375_v23 }
 0x363   :  { %399 = dma.vmem_to_hbm [thread:$0]  %s395_s13, 32, %s397_s15, [#allocation5]  }
 0x364   :  { %492 = dma.done.wait [#allocation3], 32  }
 0x365   :  { %493 = vsyncadd [#allocation3], 4294967264 }
 0x366   :  { %494 = dma.done.wait [#allocation5], 32  }
 0x367   :  { %495 = vsyncadd [#allocation5], 4294967264 }
 0x368   :  { %408 = vsyncpa [#allocation3], 1 }
 0x369   :  { %409 = vsyncpa [#allocation5], 1 }

</bundles_post_ra>
